<compile_context>
chip_gen: v5e
topology: v5e:2x2
jax: 0.10.0
libtpu: 0.0.40
codegen_flags: <defaults>
</compile_context>

<pallas_src>
import jax
import jax.numpy as jnp
from jax.experimental import pallas as pl
from jax.experimental.pallas import tpu as pltpu


def _kv_policy_kernel(
    counter_ref,                                   # SMEM (1,) i32: first memory write slot
    x_ref, h0_ref, keys_ref, u_ref,                # (T,B,I) f32, (B,H) f32, (M,B,K) f32, (T,B,1) f32
    wih_ref, bih_ref,                              # (I,3H) bf16, (1,3H) f32
    wstep_ref, bstep_ref,                          # (H,3H+2K) bf16 = [W_hh|W_q|W_k]^T, (1,3H+2K) f32
    wv_ref, bv_ref,                                # (1,H) f32, (1,1) f32   (value head on VPU)
    slab_ref, hidden_ref, newkeys_ref,             # outputs: (T,B,128), (T,B,H), (M,B,K)
    gx_ref,                                        # VMEM scratch (T,B,3H): hoisted input projection
):
    T, B, I = x_ref.shape
    H = h0_ref.shape[1]
    M = keys_ref.shape[0]
    K = keys_ref.shape[2]
    G = 3 * H                                      # GRU gate width (r|z|n)

    # Memory state lives in the (aliased) output ref for the whole rollout.
    newkeys_ref[...] = keys_ref[...]

    # ---- Hoisted input projection: gx for ALL steps in one (T*B, I)@(I, 3H) matmul.
    x_all = x_ref[...].reshape(T * B, I).astype(jnp.bfloat16)
    gx_all = jnp.dot(x_all, wih_ref[...],
                     preferred_element_type=jnp.float32) + bih_ref[...]
    gx_ref[...] = gx_all.reshape(T, B, G)

    wstep = wstep_ref[...]
    bstep = bstep_ref[...]
    wv = wv_ref[...]
    bv = bv_ref[...]
    counter0 = counter_ref[0]

    # Constants hoisted out of the recurrence (JAX does not CSE broadcast_in_dim).
    slot_iota = jax.lax.broadcasted_iota(jnp.int32, (B, M), 1)
    col_iota = jax.lax.broadcasted_iota(jnp.int32, (B, 128), 1)

    # Prologue matmul: hh-gate preactivations for step 0 (its query/key part unused).
    h0 = h0_ref[...]
    fused0 = jnp.dot(h0.astype(jnp.bfloat16), wstep,
                     preferred_element_type=jnp.float32) + bstep

    def step(t, carry):
        h_prev, fused_prev = carry

        # ---- nn.GRUCell (PyTorch gate order r, z, n) ----
        gx = gx_ref[t]                              # (B, 3H), precomputed
        gh = fused_prev[:, 0:G]
        r = jax.nn.sigmoid(gx[:, 0:H] + gh[:, 0:H])
        z = jax.nn.sigmoid(gx[:, H:2 * H] + gh[:, H:2 * H])
        n = jnp.tanh(gx[:, 2 * H:3 * H] + r * gh[:, 2 * H:3 * H])
        h = (1.0 - z) * n + z * h_prev
        hidden_ref[t] = h

        # ---- ONE fused matmul per step: cols [0,3H)=hh gates for the NEXT step,
        #      cols [3H,3H+K)=fc_query(h), [3H+K,3H+2K)=fc_key(h). 512 cols exactly.
        fused = jnp.dot(h.astype(jnp.bfloat16), wstep,
                        preferred_element_type=jnp.float32) + bstep
        q = fused[:, G:G + K]
        key = fused[:, G + K:G + 2 * K]

        # ---- value head stays on VPU/XLU (one live column is not worth an MXU tile).
        value = jnp.sum(h * wv, axis=-1, keepdims=True) + bv

        # ---- read_memory: scores against the M memory slots, LSE softmax ----
        scores = sum(
            jnp.where(slot_iota == m,
                      jnp.sum(q * newkeys_ref[m], axis=-1, keepdims=True), 0.0)
            for m in range(M))                      # (B, M)
        smax = jnp.max(scores, axis=-1, keepdims=True)
        shifted = scores - smax
        e = jnp.exp(shifted)
        sum_e = jnp.sum(e, axis=-1, keepdims=True)
        logp = shifted - jnp.log(sum_e)             # always finite
        p = e / sum_e                               # attention weights / policy
        entropy = -jnp.sum(p * logp, axis=-1, keepdims=True)

        # ---- Categorical(probs=p).sample() via inverse CDF on one uniform per row.
        u = u_ref[t]                                # (B, 1) in [0, 1)
        if M > 1:
            cdf = p[:, 0:1]
            action_i = (u >= cdf).astype(jnp.int32)
            for j in range(1, M - 1):
                cdf = cdf + p[:, j:j + 1]
                action_i = action_i + (u >= cdf).astype(jnp.int32)
        else:
            action_i = jnp.zeros((B, 1), jnp.int32)
        sel = (slot_iota == action_i).astype(jnp.float32)
        log_prob = jnp.sum(sel * logp, axis=-1, keepdims=True)

        # ---- write_memory: single-slot RMW, masked to a no-op once counter >= M ----
        c = counter0 + t
        slot = jnp.minimum(c, M - 1)
        wmask = (c < M).astype(jnp.float32)
        newkeys_ref[slot] = newkeys_ref[slot] + wmask * key

        # ---- pack per-step results into one lane-dense (B, 128) slab row ----
        # col 0: action, 1: log_prob, 2: entropy, 3: value, 4..4+M: policy
        parts = [action_i.astype(jnp.float32), log_prob, entropy, value]
        parts += [p[:, j:j + 1] for j in range(M)]
        slab_ref[t] = sum(jnp.where(col_iota == idx, v, 0.0)
                          for idx, v in enumerate(parts))
        return h, fused

    if T <= 16:
        # Short fixed trip count: fully unrolled straight-line code (LLO visibility).
        carry = (h0, fused0)
        for t in range(T):
            carry = step(t, carry)
    else:
        jax.lax.fori_loop(0, T, step, (h0, fused0))


def init_params(rng, input_size, key_size=64, memory_size=3, hidden_size=128):
    ks = jax.random.split(rng, 10)
    bound = 1.0 / float(hidden_size) ** 0.5   # PyTorch GRUCell / Linear(fan_in=hidden)
    u = lambda k, shape: jax.random.uniform(k, shape, jnp.float32, -bound, bound)

    w_ih = u(ks[0], (3 * hidden_size, input_size))
    w_hh = u(ks[1], (3 * hidden_size, hidden_size))
    b_ih = u(ks[2], (3 * hidden_size,))
    b_hh = u(ks[3], (3 * hidden_size,))
    w_k = u(ks[4], (key_size, hidden_size)); b_k = u(ks[5], (key_size,))
    w_q = u(ks[6], (key_size, hidden_size)); b_q = u(ks[7], (key_size,))
    w_v = u(ks[8], (1, hidden_size));        b_v = u(ks[9], (1,))

    # Fused per-step weight [W_hh | W_query | W_key]^T: (H, 3H+2K) = (128, 512),
    # exactly 2x256 / 4x128 MXU column tiles -> zero padded columns.
    w_step = jnp.concatenate([w_hh.T, w_q.T, w_k.T], axis=1)
    b_step = jnp.concatenate([b_hh, b_q, b_k])[None, :]

    return {
        "input_size": input_size,
        "key_size": key_size,
        "memory_size": memory_size,
        "hidden_size": hidden_size,
        # bf16 matmul weights (MXU-native), f32 biases / value head.
        "w_ih_t": w_ih.T.astype(jnp.bfloat16),     # (I, 3H)
        "b_ih": b_ih[None, :],                     # (1, 3H)
        "w_step": w_step.astype(jnp.bfloat16),     # (H, 3H+2K)
        "b_step": b_step,                          # (1, 3H+2K)
        "w_v": w_v,                                # (1, H)  f32 (VPU value head)
        "b_v": b_v.reshape(1, 1),                  # (1, 1)  f32
    }


def kv_memory_actor_critic_forward(params, x, state=None, keys=None, counter=0,
                                   rng=None):
    """Runs the policy for a (T, B, input) rollout, or one (B, input) step.

    Returns (action, policy, log_prob, entropy, value, hidden, new_keys,
    new_counter).  For a 2-D `x` the leading time axis is squeezed so the
    signature matches the PyTorch module's single-step forward; for a 3-D `x`,
    hidden[-1] is the recurrent carry for the next call. `counter` is a Python int.
    """
    H = params["hidden_size"]; K = params["key_size"]; M = params["memory_size"]
    single_step = (x.ndim == 2)
    if single_step:
        x = x[None]
    T, B, I = x.shape
    assert 4 + M <= 128, "output slab packs [action|logp|ent|value|policy] into 128 lanes"

    if state is None:
        state = jnp.zeros((B, H), jnp.float32)
        keys = jnp.zeros((B, M, K), jnp.float32)
        counter = 0
    assert keys is not None, "pass `keys` whenever `state` is provided"
    if rng is None:
        rng = jax.random.PRNGKey(0)

    counter_arr = jnp.asarray([counter], jnp.int32)
    uniforms = jax.random.uniform(rng, (T, B, 1), jnp.float32)   # one sample per (t, row)
    keys_mbk = jnp.transpose(keys, (1, 0, 2))                    # slot-major for in-kernel slot writes

    # Split the batch over a "parallel" grid axis when it divides cleanly so both
    # v7x TensorCores get work; on 1-TC chips the extra grid step costs ~0.35 us.
    bb = B // 2 if (B >= 16 and B % 16 == 0) else B
    nb = B // bb
    G = 3 * H

    smem = pl.BlockSpec(memory_space=pltpu.MemorySpace.SMEM)
    in_specs = [
        smem,                                                   # counter
        pl.BlockSpec((T, bb, I), lambda b: (0, b, 0)),          # x
        pl.BlockSpec((bb, H), lambda b: (b, 0)),                # initial hidden
        pl.BlockSpec((M, bb, K), lambda b: (0, b, 0)),          # keys (slot-major)
        pl.BlockSpec((T, bb, 1), lambda b: (0, b, 0)),          # uniforms
        pl.BlockSpec((I, G), lambda b: (0, 0)),                 # W_ih^T (bf16)
        pl.BlockSpec((1, G), lambda b: (0, 0)),                 # b_ih
        pl.BlockSpec((H, G + 2 * K), lambda b: (0, 0)),         # [W_hh|W_q|W_k]^T (bf16)
        pl.BlockSpec((1, G + 2 * K), lambda b: (0, 0)),         # fused bias
        pl.BlockSpec((1, H), lambda b: (0, 0)),                 # w_v
        pl.BlockSpec((1, 1), lambda b: (0, 0)),                 # b_v
    ]
    out_specs = [
        pl.BlockSpec((T, bb, 128), lambda b: (0, b, 0)),        # packed slab
        pl.BlockSpec((T, bb, H), lambda b: (0, b, 0)),          # hidden sequence
        pl.BlockSpec((M, bb, K), lambda b: (0, b, 0)),          # updated keys
    ]
    out_shape = (
        jax.ShapeDtypeStruct((T, B, 128), jnp.float32),
        jax.ShapeDtypeStruct((T, B, H), jnp.float32),
        jax.ShapeDtypeStruct((M, B, K), jnp.float32),
    )

    slab, hidden, new_keys_mbk = pl.pallas_call(
        _kv_policy_kernel,
        out_shape=out_shape,
        grid=(nb,),
        in_specs=in_specs,
        out_specs=out_specs,
        scratch_shapes=[pltpu.VMEM((T, bb, G), jnp.float32)],
        input_output_aliases={3: 2},   # keys input -> updated keys output (in-place)
        compiler_params=pltpu.CompilerParams(dimension_semantics=("parallel",)),
    )(
        counter_arr,
        x, state, keys_mbk, uniforms,
        params["w_ih_t"], params["b_ih"],
        params["w_step"], params["b_step"],
        params["w_v"], params["b_v"],
    )

    new_keys = jnp.transpose(new_keys_mbk, (1, 0, 2))            # back to (B, M, K)
    new_counter = min(int(counter) + T, M)                       # module's self.counter

    action = slab[..., 0].astype(jnp.int32)     # (T, B)   (torch returns int64)
    log_prob = slab[..., 1]                     # (T, B)
    entropy = slab[..., 2]                      # (T, B)
    value = slab[..., 3:4]                      # (T, B, 1)
    policy = slab[..., 4:4 + M]                 # (T, B, M)

    if single_step:
        action, policy, log_prob, entropy, value, hidden = (
            a[0] for a in (action, policy, log_prob, entropy, value, hidden))
    return action, policy, log_prob, entropy, value, hidden, new_keys, new_counter


def _reference_forward(params, x_seq, state, keys, counter, uniforms):
    """Pure-JAX (no Pallas) step-by-step reference with the same dtype strategy."""
    H = params["hidden_size"]; K = params["key_size"]; M = params["memory_size"]
    G = 3 * H
    T = x_seq.shape[0]
    wih, bih = params["w_ih_t"], params["b_ih"]
    wstep, bstep = params["w_step"], params["b_step"]
    wv, bv = params["w_v"], params["b_v"]
    h, ks, c = state, keys, counter
    hs, ps, vs, es, lps, acts = [], [], [], [], [], []
    for t in range(T):
        gx = jnp.dot(x_seq[t].astype(jnp.bfloat16), wih,
                     preferred_element_type=jnp.float32) + bih
        gh = jnp.dot(h.astype(jnp.bfloat16), wstep,
                     preferred_element_type=jnp.float32)[:, :G] + bstep[:, :G]
        r = jax.nn.sigmoid(gx[:, :H] + gh[:, :H])
        z = jax.nn.sigmoid(gx[:, H:2 * H] + gh[:, H:2 * H])
        n = jnp.tanh(gx[:, 2 * H:] + r * gh[:, 2 * H:])
        h = (1.0 - z) * n + z * h
        fused = jnp.dot(h.astype(jnp.bfloat16), wstep,
                        preferred_element_type=jnp.float32) + bstep
        q, key = fused[:, G:G + K], fused[:, G + K:G + 2 * K]
        value = jnp.sum(h * wv, axis=-1, keepdims=True) + bv
        scores = jnp.einsum("bk,bmk->bm", q, ks)
        smax = jnp.max(scores, axis=-1, keepdims=True)
        e = jnp.exp(scores - smax)
        se = jnp.sum(e, axis=-1, keepdims=True)
        p = e / se
        logp = scores - smax - jnp.log(se)
        ent = -jnp.sum(p * logp, axis=-1)
        u = uniforms[t]
        cdf = jnp.cumsum(p, axis=-1)
        act = jnp.minimum(jnp.sum((u >= cdf[:, :M - 1]).astype(jnp.int32), axis=-1), M - 1)
        lp = jnp.take_along_axis(logp, act[:, None], axis=-1)[:, 0]
        if c < M:
            ks = ks.at[:, c, :].add(key)
            c += 1
        hs.append(h); ps.append(p); vs.append(value); es.append(ent)
        lps.append(lp); acts.append(act)
    return (jnp.stack(acts), jnp.stack(ps), jnp.stack(lps), jnp.stack(es),
            jnp.stack(vs), jnp.stack(hs), ks, c)


if __name__ == "__main__":
    root = jax.random.PRNGKey(0)
    pkey, xkey, skey = jax.random.split(root, 3)

    seq_len, batch, input_size = 8, 16, 32
    params = init_params(pkey, input_size, key_size=64, memory_size=3, hidden_size=128)
    M, H, K = params["memory_size"], params["hidden_size"], params["key_size"]

    x_seq = jax.random.normal(xkey, (seq_len, batch, input_size), jnp.float32)

    (action, policy, log_prob, entropy, value, hidden,
     new_keys, new_counter) = kv_memory_actor_critic_forward(params, x_seq, rng=skey)
    jax.block_until_ready((action, policy, log_prob, entropy, value, hidden, new_keys))

    # ---- shape / invariant checks ----
    assert action.shape == (seq_len, batch)
    assert policy.shape == (seq_len, batch, M)
    assert value.shape == (seq_len, batch, 1)
    assert hidden.shape == (seq_len, batch, H)
    assert new_keys.shape == (batch, M, K)
    assert new_counter == M
    assert bool(jnp.all(jnp.isfinite(policy)))
    assert bool(jnp.all(jnp.abs(jnp.sum(policy, axis=-1) - 1.0) < 1e-3))
    assert bool(jnp.all((action >= 0) & (action < M)))
    # step 0 starts from empty memory -> uniform attention over slots
    assert bool(jnp.all(jnp.abs(policy[0] - 1.0 / M) < 1e-5))
    # self-consistency of the sampled action's log-prob and of the entropy
    sel_logp = jnp.take_along_axis(jnp.log(policy), action[..., None], axis=-1)[..., 0]
    assert bool(jnp.all(jnp.abs(sel_logp - log_prob) < 1e-3))
    ent_chk = -jnp.sum(policy * jnp.log(policy), axis=-1)
    assert bool(jnp.all(jnp.abs(ent_chk - entropy) < 1e-3))

    # ---- compare against a pure-JAX step-by-step reference (same uniforms) ----
    uniforms = jax.random.uniform(skey, (seq_len, batch, 1), jnp.float32)
    (_, ref_p, _, ref_e, ref_v, ref_h, ref_keys, ref_c) = _reference_forward(
        params, x_seq, jnp.zeros((batch, H), jnp.float32),
        jnp.zeros((batch, M, K), jnp.float32), 0, uniforms)

    def close(a, b, tol=2e-2):
        return bool(jnp.max(jnp.abs(a - b)) <= tol)

    assert close(hidden, ref_h)
    assert close(policy, ref_p)
    assert close(value, ref_v)
    assert close(entropy, ref_e)
    assert close(new_keys, ref_keys)
    assert ref_c == new_counter

    # ---- single-step continuation (matches the PyTorch forward signature) ----
    a1, p1, lp1, e1, v1, h1, k1, c1 = kv_memory_actor_critic_forward(
        params, x_seq[0], state=hidden[-1], keys=new_keys, counter=new_counter,
        rng=skey)
    jax.block_until_ready((a1, p1, lp1, e1, v1, h1, k1))
    assert a1.shape == (batch,) and p1.shape == (batch, M)
    assert v1.shape == (batch, 1) and h1.shape == (batch, H)
    assert c1 == M          # memory already full -> no further writes

    print("KERNEL_OK")
</pallas_src>

<mosaic_0001>
module attributes {stable_mosaic.version = 11 : i64} {
  func.func @_kv_policy_kernel(%arg0: i32, %arg1: memref<1xi32, #tpu.memory_space<smem>>, %arg2: memref<8x8x32xf32, #tpu.memory_space<vmem>>, %arg3: memref<8x128xf32, #tpu.memory_space<vmem>>, %arg4: memref<3x8x64xf32, #tpu.memory_space<vmem>>, %arg5: memref<8x8x1xf32, #tpu.memory_space<vmem>>, %arg6: memref<32x384xbf16, #tpu.memory_space<vmem>>, %arg7: memref<1x384xf32, #tpu.memory_space<vmem>>, %arg8: memref<128x512xbf16, #tpu.memory_space<vmem>>, %arg9: memref<1x512xf32, #tpu.memory_space<vmem>>, %arg10: memref<1x128xf32, #tpu.memory_space<vmem>>, %arg11: memref<1x1xf32, #tpu.memory_space<vmem>>, %arg12: memref<8x8x128xf32, #tpu.memory_space<vmem>>, %arg13: memref<8x8x128xf32, #tpu.memory_space<vmem>>, %arg14: memref<3x8x64xf32, #tpu.memory_space<vmem>>, %arg15: memref<8x8x384xf32, #tpu.memory_space<vmem>>) attributes {dimension_semantics = [#tpu.dimension_semantics<parallel>], iteration_bounds = array<i64: 2>, scalar_prefetch = 0 : i64, scratch_operands = 1 : i64, tpu.core_type = #tpu.core_type<tc>, window_params = [{transform_indices = @transform_0, window_bounds = array<i64: 1>}, {transform_indices = @transform_1, window_bounds = array<i64: 8, 8, 32>}, {transform_indices = @transform_2, window_bounds = array<i64: 8, 128>}, {transform_indices = @transform_3, window_bounds = array<i64: 3, 8, 64>}, {transform_indices = @transform_4, window_bounds = array<i64: 8, 8, 1>}, {pipeline_mode = #tpu.pipeline_mode<synchronous>, transform_indices = @transform_5, window_bounds = array<i64: 32, 384>}, {pipeline_mode = #tpu.pipeline_mode<synchronous>, transform_indices = @transform_6, window_bounds = array<i64: 1, 384>}, {pipeline_mode = #tpu.pipeline_mode<synchronous>, transform_indices = @transform_7, window_bounds = array<i64: 128, 512>}, {pipeline_mode = #tpu.pipeline_mode<synchronous>, transform_indices = @transform_8, window_bounds = array<i64: 1, 512>}, {pipeline_mode = #tpu.pipeline_mode<synchronous>, transform_indices = @transform_9, window_bounds = array<i64: 1, 128>}, {pipeline_mode = #tpu.pipeline_mode<synchronous>, transform_indices = @transform_10, window_bounds = array<i64: 1, 1>}, {transform_indices = @transform_11, window_bounds = array<i64: 8, 8, 128>}, {transform_indices = @transform_12, window_bounds = array<i64: 8, 8, 128>}, {transform_indices = @transform_13, window_bounds = array<i64: 3, 8, 64>}]} {
    %c0 = arith.constant 0 : index
    %c0_0 = arith.constant 0 : index
    %c0_1 = arith.constant 0 : index
    %0 = vector.load %arg4[%c0, %c0_0, %c0_1] : memref<3x8x64xf32, #tpu.memory_space<vmem>>, vector<3x8x64xf32>
    %c0_2 = arith.constant 0 : index
    %c0_3 = arith.constant 0 : index
    %c0_4 = arith.constant 0 : index
    %1 = vector.load %arg14[%c0_2, %c0_3, %c0_4] : memref<3x8x64xf32, #tpu.memory_space<vmem>>, vector<3x8x64xf32>
    tpu.vector_store %arg14[%c0_2, %c0_3, %c0_4], %0 {strides = array<i32>} : memref<3x8x64xf32, #tpu.memory_space<vmem>>, vector<3x8x64xf32>,
    %c0_5 = arith.constant 0 : index
    %c0_6 = arith.constant 0 : index
    %c0_7 = arith.constant 0 : index
    %2 = vector.load %arg2[%c0_5, %c0_6, %c0_7] : memref<8x8x32xf32, #tpu.memory_space<vmem>>, vector<8x8x32xf32>
    %3 = vector.shape_cast %2 : vector<8x8x32xf32> to vector<64x32xf32>
    %4 = arith.truncf %3 : vector<64x32xf32> to vector<64x32xbf16>
    %c0_8 = arith.constant 0 : index
    %c0_9 = arith.constant 0 : index
    %5 = vector.load %arg6[%c0_8, %c0_9] : memref<32x384xbf16, #tpu.memory_space<vmem>>, vector<32x384xbf16>
    %cst = arith.constant dense<0.000000e+00> : vector<64x384xf32>
    %6 = tpu.matmul %4, %5, %cst {dimension_numbers = #tpu.dot_dimension_numbers<[1], [0], [0], [1], [0, 0, 1, 1], [], []>} : vector<64x32xbf16>, vector<32x384xbf16>, vector<64x384xf32> -> vector<64x384xf32>
    %c0_10 = arith.constant 0 : index
    %c0_11 = arith.constant 0 : index
    %7 = vector.load %arg7[%c0_10, %c0_11] : memref<1x384xf32, #tpu.memory_space<vmem>>, vector<1x384xf32>
    %8 = vector.broadcast %7 : vector<1x384xf32> to vector<64x384xf32>
    %9 = arith.addf %6, %8 : vector<64x384xf32>
    %10 = vector.shape_cast %9 : vector<64x384xf32> to vector<8x8x384xf32>
    %c0_12 = arith.constant 0 : index
    %c0_13 = arith.constant 0 : index
    %c0_14 = arith.constant 0 : index
    %11 = vector.load %arg15[%c0_12, %c0_13, %c0_14] : memref<8x8x384xf32, #tpu.memory_space<vmem>>, vector<8x8x384xf32>
    tpu.vector_store %arg15[%c0_12, %c0_13, %c0_14], %10 {strides = array<i32>} : memref<8x8x384xf32, #tpu.memory_space<vmem>>, vector<8x8x384xf32>,
    %c0_15 = arith.constant 0 : index
    %c0_16 = arith.constant 0 : index
    %12 = vector.load %arg8[%c0_15, %c0_16] : memref<128x512xbf16, #tpu.memory_space<vmem>>, vector<128x512xbf16>
    %c0_17 = arith.constant 0 : index
    %c0_18 = arith.constant 0 : index
    %13 = vector.load %arg9[%c0_17, %c0_18] : memref<1x512xf32, #tpu.memory_space<vmem>>, vector<1x512xf32>
    %c0_19 = arith.constant 0 : index
    %c0_20 = arith.constant 0 : index
    %14 = vector.load %arg10[%c0_19, %c0_20] : memref<1x128xf32, #tpu.memory_space<vmem>>, vector<1x128xf32>
    %c0_21 = arith.constant 0 : index
    %c0_22 = arith.constant 0 : index
    %15 = vector.load %arg11[%c0_21, %c0_22] : memref<1x1xf32, #tpu.memory_space<vmem>>, vector<1x1xf32>
    %c0_23 = arith.constant 0 : index
    %16 = memref.load %arg1[%c0_23] : memref<1xi32, #tpu.memory_space<smem>>
    %17 = tpu.iota {dimensions = array<i32: 1>} : vector<8x3xi32>
    %18 = tpu.iota {dimensions = array<i32: 1>} : vector<8x128xi32>
    %c0_24 = arith.constant 0 : index
    %c0_25 = arith.constant 0 : index
    %19 = vector.load %arg3[%c0_24, %c0_25] : memref<8x128xf32, #tpu.memory_space<vmem>>, vector<8x128xf32>
    %20 = arith.truncf %19 : vector<8x128xf32> to vector<8x128xbf16>
    %cst_26 = arith.constant dense<0.000000e+00> : vector<8x512xf32>
    %21 = tpu.matmul %20, %12, %cst_26 {dimension_numbers = #tpu.dot_dimension_numbers<[1], [0], [0], [1], [0, 0, 1, 1], [], []>} : vector<8x128xbf16>, vector<128x512xbf16>, vector<8x512xf32> -> vector<8x512xf32>
    %22 = vector.broadcast %13 : vector<1x512xf32> to vector<8x512xf32>
    %23 = arith.addf %21, %22 : vector<8x512xf32>
    %c0_27 = arith.constant 0 : index
    %c0_28 = arith.constant 0 : index
    %c0_29 = arith.constant 0 : index
    %24 = vector.load %arg15[%c0_27, %c0_28, %c0_29] : memref<8x8x384xf32, #tpu.memory_space<vmem>>, vector<1x8x384xf32>
    %25 = vector.shape_cast %24 : vector<1x8x384xf32> to vector<8x384xf32>
    %26 = vector.extract_strided_slice %23 {offsets = [0, 0], sizes = [8, 384], strides = [1, 1]} : vector<8x512xf32> to vector<8x384xf32>
    %27 = vector.extract_strided_slice %25 {offsets = [0, 0], sizes = [8, 128], strides = [1, 1]} : vector<8x384xf32> to vector<8x128xf32>
    %28 = vector.extract_strided_slice %26 {offsets = [0, 0], sizes = [8, 128], strides = [1, 1]} : vector<8x384xf32> to vector<8x128xf32>
    %29 = arith.addf %27, %28 : vector<8x128xf32>
    %30 = arith.negf %29 : vector<8x128xf32>
    %31 = math.exp %30 : vector<8x128xf32>
    %cst_30 = arith.constant 1.000000e+00 : f32
    %32 = vector.broadcast %cst_30 : f32 to vector<8x128xf32>
    %33 = arith.addf %32, %31 : vector<8x128xf32>
    %34 = arith.divf %32, %33 : vector<8x128xf32>
    %35 = vector.extract_strided_slice %25 {offsets = [0, 128], sizes = [8, 128], strides = [1, 1]} : vector<8x384xf32> to vector<8x128xf32>
    %36 = vector.extract_strided_slice %26 {offsets = [0, 128], sizes = [8, 128], strides = [1, 1]} : vector<8x384xf32> to vector<8x128xf32>
    %37 = arith.addf %35, %36 : vector<8x128xf32>
    %38 = arith.negf %37 : vector<8x128xf32>
    %39 = math.exp %38 : vector<8x128xf32>
    %cst_31 = arith.constant 1.000000e+00 : f32
    %40 = vector.broadcast %cst_31 : f32 to vector<8x128xf32>
    %41 = arith.addf %40, %39 : vector<8x128xf32>
    %42 = arith.divf %40, %41 : vector<8x128xf32>
    %43 = vector.extract_strided_slice %25 {offsets = [0, 256], sizes = [8, 128], strides = [1, 1]} : vector<8x384xf32> to vector<8x128xf32>
    %44 = vector.extract_strided_slice %26 {offsets = [0, 256], sizes = [8, 128], strides = [1, 1]} : vector<8x384xf32> to vector<8x128xf32>
    %45 = arith.mulf %34, %44 : vector<8x128xf32>
    %46 = arith.addf %43, %45 : vector<8x128xf32>
    %47 = math.tanh %46 : vector<8x128xf32>
    %cst_32 = arith.constant 1.000000e+00 : f32
    %48 = vector.broadcast %cst_32 : f32 to vector<8x128xf32>
    %49 = arith.subf %48, %42 : vector<8x128xf32>
    %50 = arith.mulf %49, %47 : vector<8x128xf32>
    %51 = arith.mulf %42, %19 : vector<8x128xf32>
    %52 = arith.addf %50, %51 : vector<8x128xf32>
    %c0_33 = arith.constant 0 : index
    %c0_34 = arith.constant 0 : index
    %c0_35 = arith.constant 0 : index
    %53 = vector.load %arg13[%c0_33, %c0_34, %c0_35] : memref<8x8x128xf32, #tpu.memory_space<vmem>>, vector<1x8x128xf32>
    %54 = vector.shape_cast %53 : vector<1x8x128xf32> to vector<8x128xf32>
    %55 = vector.shape_cast %52 : vector<8x128xf32> to vector<1x8x128xf32>
    tpu.vector_store %arg13[%c0_33, %c0_34, %c0_35], %55 {strides = array<i32>} : memref<8x8x128xf32, #tpu.memory_space<vmem>>, vector<1x8x128xf32>,
    %56 = arith.truncf %52 : vector<8x128xf32> to vector<8x128xbf16>
    %cst_36 = arith.constant dense<0.000000e+00> : vector<8x512xf32>
    %57 = tpu.matmul %56, %12, %cst_36 {dimension_numbers = #tpu.dot_dimension_numbers<[1], [0], [0], [1], [0, 0, 1, 1], [], []>} : vector<8x128xbf16>, vector<128x512xbf16>, vector<8x512xf32> -> vector<8x512xf32>
    %58 = vector.broadcast %13 : vector<1x512xf32> to vector<8x512xf32>
    %59 = arith.addf %57, %58 : vector<8x512xf32>
    %60 = vector.extract_strided_slice %59 {offsets = [0, 384], sizes = [8, 64], strides = [1, 1]} : vector<8x512xf32> to vector<8x64xf32>
    %61 = vector.extract_strided_slice %59 {offsets = [0, 448], sizes = [8, 64], strides = [1, 1]} : vector<8x512xf32> to vector<8x64xf32>
    %62 = vector.broadcast %14 : vector<1x128xf32> to vector<8x128xf32>
    %63 = arith.mulf %52, %62 : vector<8x128xf32>
    %cst_37 = arith.constant dense<0.000000e+00> : vector<8xf32>
    %64 = vector.multi_reduction <add>, %63, %cst_37 [1] : vector<8x128xf32> to vector<8xf32>
    %65 = vector.shape_cast %64 : vector<8xf32> to vector<8x1xf32>
    %66 = vector.broadcast %15 : vector<1x1xf32> to vector<8x1xf32>
    %67 = arith.addf %65, %66 : vector<8x1xf32>
    %c0_i32 = arith.constant 0 : i32
    %68 = vector.broadcast %c0_i32 : i32 to vector<8x3xi32>
    %69 = arith.cmpi eq, %17, %68 : vector<8x3xi32>
    %c0_38 = arith.constant 0 : index
    %c0_39 = arith.constant 0 : index
    %c0_40 = arith.constant 0 : index
    %70 = vector.load %arg14[%c0_38, %c0_39, %c0_40] : memref<3x8x64xf32, #tpu.memory_space<vmem>>, vector<1x8x64xf32>
    %71 = vector.shape_cast %70 : vector<1x8x64xf32> to vector<8x64xf32>
    %72 = arith.mulf %60, %71 : vector<8x64xf32>
    %cst_41 = arith.constant dense<0.000000e+00> : vector<8xf32>
    %73 = vector.multi_reduction <add>, %72, %cst_41 [1] : vector<8x64xf32> to vector<8xf32>
    %74 = vector.shape_cast %73 : vector<8xf32> to vector<8x1xf32>
    %cst_42 = arith.constant 0.000000e+00 : f32
    %75 = vector.shape_cast %74 : vector<8x1xf32> to vector<8x1xf32>
    %76 = vector.broadcast %75 : vector<8x1xf32> to vector<8x3xf32>
    %77 = vector.broadcast %cst_42 : f32 to vector<8x3xf32>
    %78 = arith.select %69, %76, %77 : vector<8x3xi1>, vector<8x3xf32>
    %cst_43 = arith.constant 0.000000e+00 : f32
    %79 = vector.broadcast %cst_43 : f32 to vector<8x3xf32>
    %80 = arith.addf %79, %78 : vector<8x3xf32>
    %c1_i32 = arith.constant 1 : i32
    %81 = vector.broadcast %c1_i32 : i32 to vector<8x3xi32>
    %82 = arith.cmpi eq, %17, %81 : vector<8x3xi32>
    %c1 = arith.constant 1 : index
    %c0_44 = arith.constant 0 : index
    %c0_45 = arith.constant 0 : index
    %83 = vector.load %arg14[%c1, %c0_44, %c0_45] : memref<3x8x64xf32, #tpu.memory_space<vmem>>, vector<1x8x64xf32>
    %84 = vector.shape_cast %83 : vector<1x8x64xf32> to vector<8x64xf32>
    %85 = arith.mulf %60, %84 : vector<8x64xf32>
    %cst_46 = arith.constant dense<0.000000e+00> : vector<8xf32>
    %86 = vector.multi_reduction <add>, %85, %cst_46 [1] : vector<8x64xf32> to vector<8xf32>
    %87 = vector.shape_cast %86 : vector<8xf32> to vector<8x1xf32>
    %cst_47 = arith.constant 0.000000e+00 : f32
    %88 = vector.shape_cast %87 : vector<8x1xf32> to vector<8x1xf32>
    %89 = vector.broadcast %88 : vector<8x1xf32> to vector<8x3xf32>
    %90 = vector.broadcast %cst_47 : f32 to vector<8x3xf32>
    %91 = arith.select %82, %89, %90 : vector<8x3xi1>, vector<8x3xf32>
    %92 = arith.addf %80, %91 : vector<8x3xf32>
    %c2_i32 = arith.constant 2 : i32
    %93 = vector.broadcast %c2_i32 : i32 to vector<8x3xi32>
    %94 = arith.cmpi eq, %17, %93 : vector<8x3xi32>
    %c2 = arith.constant 2 : index
    %c0_48 = arith.constant 0 : index
    %c0_49 = arith.constant 0 : index
    %95 = vector.load %arg14[%c2, %c0_48, %c0_49] : memref<3x8x64xf32, #tpu.memory_space<vmem>>, vector<1x8x64xf32>
    %96 = vector.shape_cast %95 : vector<1x8x64xf32> to vector<8x64xf32>
    %97 = arith.mulf %60, %96 : vector<8x64xf32>
    %cst_50 = arith.constant dense<0.000000e+00> : vector<8xf32>
    %98 = vector.multi_reduction <add>, %97, %cst_50 [1] : vector<8x64xf32> to vector<8xf32>
    %99 = vector.shape_cast %98 : vector<8xf32> to vector<8x1xf32>
    %cst_51 = arith.constant 0.000000e+00 : f32
    %100 = vector.shape_cast %99 : vector<8x1xf32> to vector<8x1xf32>
    %101 = vector.broadcast %100 : vector<8x1xf32> to vector<8x3xf32>
    %102 = vector.broadcast %cst_51 : f32 to vector<8x3xf32>
    %103 = arith.select %94, %101, %102 : vector<8x3xi1>, vector<8x3xf32>
    %104 = arith.addf %92, %103 : vector<8x3xf32>
    %cst_52 = arith.constant dense<0xFF800000> : vector<8xf32>
    %105 = vector.multi_reduction <maximumf>, %104, %cst_52 [1] : vector<8x3xf32> to vector<8xf32>
    %106 = vector.shape_cast %105 : vector<8xf32> to vector<8x1xf32>
    %107 = vector.broadcast %106 : vector<8x1xf32> to vector<8x3xf32>
    %108 = arith.subf %104, %107 : vector<8x3xf32>
    %109 = math.exp %108 : vector<8x3xf32>
    %cst_53 = arith.constant dense<0.000000e+00> : vector<8xf32>
    %110 = vector.multi_reduction <add>, %109, %cst_53 [1] : vector<8x3xf32> to vector<8xf32>
    %111 = vector.shape_cast %110 : vector<8xf32> to vector<8x1xf32>
    %112 = math.log %111 : vector<8x1xf32>
    %113 = vector.broadcast %112 : vector<8x1xf32> to vector<8x3xf32>
    %114 = arith.subf %108, %113 : vector<8x3xf32>
    %115 = vector.broadcast %111 : vector<8x1xf32> to vector<8x3xf32>
    %116 = arith.divf %109, %115 : vector<8x3xf32>
    %117 = arith.mulf %116, %114 : vector<8x3xf32>
    %cst_54 = arith.constant dense<0.000000e+00> : vector<8xf32>
    %118 = vector.multi_reduction <add>, %117, %cst_54 [1] : vector<8x3xf32> to vector<8xf32>
    %119 = vector.shape_cast %118 : vector<8xf32> to vector<8x1xf32>
    %cst_55 = arith.constant 0.000000e+00 : f32
    %120 = vector.broadcast %cst_55 : f32 to vector<8x1xf32>
    %121 = arith.subf %120, %119 : vector<8x1xf32>
    %c0_56 = arith.constant 0 : index
    %c0_57 = arith.constant 0 : index
    %c0_58 = arith.constant 0 : index
    %122 = vector.load %arg5[%c0_56, %c0_57, %c0_58] : memref<8x8x1xf32, #tpu.memory_space<vmem>>, vector<1x8x1xf32>
    %123 = vector.shape_cast %122 : vector<1x8x1xf32> to vector<8x1xf32>
    %124 = vector.extract_strided_slice %116 {offsets = [0, 0], sizes = [8, 1], strides = [1, 1]} : vector<8x3xf32> to vector<8x1xf32>
    %125 = arith.cmpf oge, %123, %124 : vector<8x1xf32>
    %126 = arith.extui %125 : vector<8x1xi1> to vector<8x1xi32>
    %127 = vector.extract_strided_slice %116 {offsets = [0, 1], sizes = [8, 1], strides = [1, 1]} : vector<8x3xf32> to vector<8x1xf32>
    %128 = arith.addf %124, %127 : vector<8x1xf32>
    %129 = arith.cmpf oge, %123, %128 : vector<8x1xf32>
    %130 = arith.extui %129 : vector<8x1xi1> to vector<8x1xi32>
    %131 = arith.addi %126, %130 : vector<8x1xi32>
    %132 = vector.broadcast %131 : vector<8x1xi32> to vector<8x3xi32>
    %133 = arith.cmpi eq, %17, %132 : vector<8x3xi32>
    %134 = arith.extui %133 : vector<8x3xi1> to vector<8x3xi32>
    %135 = arith.sitofp %134 : vector<8x3xi32> to vector<8x3xf32>
    %136 = arith.mulf %135, %114 : vector<8x3xf32>
    %cst_59 = arith.constant dense<0.000000e+00> : vector<8xf32>
    %137 = vector.multi_reduction <add>, %136, %cst_59 [1] : vector<8x3xf32> to vector<8xf32>
    %138 = vector.shape_cast %137 : vector<8xf32> to vector<8x1xf32>
    %c0_i32_60 = arith.constant 0 : i32
    %139 = arith.addi %16, %c0_i32_60 : i32
    %c2_i32_61 = arith.constant 2 : i32
    %140 = arith.minsi %139, %c2_i32_61 : i32
    %c3_i32 = arith.constant 3 : i32
    %141 = arith.cmpi slt, %139, %c3_i32 : i32
    %142 = arith.extui %141 : i1 to i32
    %143 = arith.sitofp %142 : i32 to f32
    %144 = arith.index_cast %140 : i32 to index
    %c0_62 = arith.constant 0 : index
    %c0_63 = arith.constant 0 : index
    %145 = vector.load %arg14[%144, %c0_62, %c0_63] : memref<3x8x64xf32, #tpu.memory_space<vmem>>, vector<1x8x64xf32>
    %146 = vector.shape_cast %145 : vector<1x8x64xf32> to vector<8x64xf32>
    %147 = vector.broadcast %143 : f32 to vector<8x64xf32>
    %148 = arith.mulf %147, %61 : vector<8x64xf32>
    %149 = arith.addf %146, %148 : vector<8x64xf32>
    %150 = arith.index_cast %140 : i32 to index
    %c0_64 = arith.constant 0 : index
    %c0_65 = arith.constant 0 : index
    %151 = vector.load %arg14[%150, %c0_64, %c0_65] : memref<3x8x64xf32, #tpu.memory_space<vmem>>, vector<1x8x64xf32>
    %152 = vector.shape_cast %151 : vector<1x8x64xf32> to vector<8x64xf32>
    %153 = vector.shape_cast %149 : vector<8x64xf32> to vector<1x8x64xf32>
    tpu.vector_store %arg14[%150, %c0_64, %c0_65], %153 {strides = array<i32>} : memref<3x8x64xf32, #tpu.memory_space<vmem>>, vector<1x8x64xf32>,
    %154 = arith.sitofp %131 : vector<8x1xi32> to vector<8x1xf32>
    %155 = vector.extract_strided_slice %116 {offsets = [0, 0], sizes = [8, 1], strides = [1, 1]} : vector<8x3xf32> to vector<8x1xf32>
    %156 = vector.extract_strided_slice %116 {offsets = [0, 1], sizes = [8, 1], strides = [1, 1]} : vector<8x3xf32> to vector<8x1xf32>
    %157 = vector.extract_strided_slice %116 {offsets = [0, 2], sizes = [8, 1], strides = [1, 1]} : vector<8x3xf32> to vector<8x1xf32>
    %c0_i32_66 = arith.constant 0 : i32
    %158 = vector.broadcast %c0_i32_66 : i32 to vector<8x128xi32>
    %159 = arith.cmpi eq, %18, %158 : vector<8x128xi32>
    %cst_67 = arith.constant 0.000000e+00 : f32
    %160 = vector.shape_cast %154 : vector<8x1xf32> to vector<8x1xf32>
    %161 = vector.broadcast %160 : vector<8x1xf32> to vector<8x128xf32>
    %162 = vector.broadcast %cst_67 : f32 to vector<8x128xf32>
    %163 = arith.select %159, %161, %162 : vector<8x128xi1>, vector<8x128xf32>
    %cst_68 = arith.constant 0.000000e+00 : f32
    %164 = vector.broadcast %cst_68 : f32 to vector<8x128xf32>
    %165 = arith.addf %164, %163 : vector<8x128xf32>
    %c1_i32_69 = arith.constant 1 : i32
    %166 = vector.broadcast %c1_i32_69 : i32 to vector<8x128xi32>
    %167 = arith.cmpi eq, %18, %166 : vector<8x128xi32>
    %cst_70 = arith.constant 0.000000e+00 : f32
    %168 = vector.shape_cast %138 : vector<8x1xf32> to vector<8x1xf32>
    %169 = vector.broadcast %168 : vector<8x1xf32> to vector<8x128xf32>
    %170 = vector.broadcast %cst_70 : f32 to vector<8x128xf32>
    %171 = arith.select %167, %169, %170 : vector<8x128xi1>, vector<8x128xf32>
    %172 = arith.addf %165, %171 : vector<8x128xf32>
    %c2_i32_71 = arith.constant 2 : i32
    %173 = vector.broadcast %c2_i32_71 : i32 to vector<8x128xi32>
    %174 = arith.cmpi eq, %18, %173 : vector<8x128xi32>
    %cst_72 = arith.constant 0.000000e+00 : f32
    %175 = vector.shape_cast %121 : vector<8x1xf32> to vector<8x1xf32>
    %176 = vector.broadcast %175 : vector<8x1xf32> to vector<8x128xf32>
    %177 = vector.broadcast %cst_72 : f32 to vector<8x128xf32>
    %178 = arith.select %174, %176, %177 : vector<8x128xi1>, vector<8x128xf32>
    %179 = arith.addf %172, %178 : vector<8x128xf32>
    %c3_i32_73 = arith.constant 3 : i32
    %180 = vector.broadcast %c3_i32_73 : i32 to vector<8x128xi32>
    %181 = arith.cmpi eq, %18, %180 : vector<8x128xi32>
    %cst_74 = arith.constant 0.000000e+00 : f32
    %182 = vector.shape_cast %67 : vector<8x1xf32> to vector<8x1xf32>
    %183 = vector.broadcast %182 : vector<8x1xf32> to vector<8x128xf32>
    %184 = vector.broadcast %cst_74 : f32 to vector<8x128xf32>
    %185 = arith.select %181, %183, %184 : vector<8x128xi1>, vector<8x128xf32>
    %186 = arith.addf %179, %185 : vector<8x128xf32>
    %c4_i32 = arith.constant 4 : i32
    %187 = vector.broadcast %c4_i32 : i32 to vector<8x128xi32>
    %188 = arith.cmpi eq, %18, %187 : vector<8x128xi32>
    %cst_75 = arith.constant 0.000000e+00 : f32
    %189 = vector.shape_cast %155 : vector<8x1xf32> to vector<8x1xf32>
    %190 = vector.broadcast %189 : vector<8x1xf32> to vector<8x128xf32>
    %191 = vector.broadcast %cst_75 : f32 to vector<8x128xf32>
    %192 = arith.select %188, %190, %191 : vector<8x128xi1>, vector<8x128xf32>
    %193 = arith.addf %186, %192 : vector<8x128xf32>
    %c5_i32 = arith.constant 5 : i32
    %194 = vector.broadcast %c5_i32 : i32 to vector<8x128xi32>
    %195 = arith.cmpi eq, %18, %194 : vector<8x128xi32>
    %cst_76 = arith.constant 0.000000e+00 : f32
    %196 = vector.shape_cast %156 : vector<8x1xf32> to vector<8x1xf32>
    %197 = vector.broadcast %196 : vector<8x1xf32> to vector<8x128xf32>
    %198 = vector.broadcast %cst_76 : f32 to vector<8x128xf32>
    %199 = arith.select %195, %197, %198 : vector<8x128xi1>, vector<8x128xf32>
    %200 = arith.addf %193, %199 : vector<8x128xf32>
    %c6_i32 = arith.constant 6 : i32
    %201 = vector.broadcast %c6_i32 : i32 to vector<8x128xi32>
    %202 = arith.cmpi eq, %18, %201 : vector<8x128xi32>
    %cst_77 = arith.constant 0.000000e+00 : f32
    %203 = vector.shape_cast %157 : vector<8x1xf32> to vector<8x1xf32>
    %204 = vector.broadcast %203 : vector<8x1xf32> to vector<8x128xf32>
    %205 = vector.broadcast %cst_77 : f32 to vector<8x128xf32>
    %206 = arith.select %202, %204, %205 : vector<8x128xi1>, vector<8x128xf32>
    %207 = arith.addf %200, %206 : vector<8x128xf32>
    %c0_78 = arith.constant 0 : index
    %c0_79 = arith.constant 0 : index
    %c0_80 = arith.constant 0 : index
    %208 = vector.load %arg12[%c0_78, %c0_79, %c0_80] : memref<8x8x128xf32, #tpu.memory_space<vmem>>, vector<1x8x128xf32>
    %209 = vector.shape_cast %208 : vector<1x8x128xf32> to vector<8x128xf32>
    %210 = vector.shape_cast %207 : vector<8x128xf32> to vector<1x8x128xf32>
    tpu.vector_store %arg12[%c0_78, %c0_79, %c0_80], %210 {strides = array<i32>} : memref<8x8x128xf32, #tpu.memory_space<vmem>>, vector<1x8x128xf32>,
    %c1_81 = arith.constant 1 : index
    %c0_82 = arith.constant 0 : index
    %c0_83 = arith.constant 0 : index
    %211 = vector.load %arg15[%c1_81, %c0_82, %c0_83] : memref<8x8x384xf32, #tpu.memory_space<vmem>>, vector<1x8x384xf32>
    %212 = vector.shape_cast %211 : vector<1x8x384xf32> to vector<8x384xf32>
    %213 = vector.extract_strided_slice %59 {offsets = [0, 0], sizes = [8, 384], strides = [1, 1]} : vector<8x512xf32> to vector<8x384xf32>
    %214 = vector.extract_strided_slice %212 {offsets = [0, 0], sizes = [8, 128], strides = [1, 1]} : vector<8x384xf32> to vector<8x128xf32>
    %215 = vector.extract_strided_slice %213 {offsets = [0, 0], sizes = [8, 128], strides = [1, 1]} : vector<8x384xf32> to vector<8x128xf32>
    %216 = arith.addf %214, %215 : vector<8x128xf32>
    %217 = arith.negf %216 : vector<8x128xf32>
    %218 = math.exp %217 : vector<8x128xf32>
    %cst_84 = arith.constant 1.000000e+00 : f32
    %219 = vector.broadcast %cst_84 : f32 to vector<8x128xf32>
    %220 = arith.addf %219, %218 : vector<8x128xf32>
    %221 = arith.divf %219, %220 : vector<8x128xf32>
    %222 = vector.extract_strided_slice %212 {offsets = [0, 128], sizes = [8, 128], strides = [1, 1]} : vector<8x384xf32> to vector<8x128xf32>
    %223 = vector.extract_strided_slice %213 {offsets = [0, 128], sizes = [8, 128], strides = [1, 1]} : vector<8x384xf32> to vector<8x128xf32>
    %224 = arith.addf %222, %223 : vector<8x128xf32>
    %225 = arith.negf %224 : vector<8x128xf32>
    %226 = math.exp %225 : vector<8x128xf32>
    %cst_85 = arith.constant 1.000000e+00 : f32
    %227 = vector.broadcast %cst_85 : f32 to vector<8x128xf32>
    %228 = arith.addf %227, %226 : vector<8x128xf32>
    %229 = arith.divf %227, %228 : vector<8x128xf32>
    %230 = vector.extract_strided_slice %212 {offsets = [0, 256], sizes = [8, 128], strides = [1, 1]} : vector<8x384xf32> to vector<8x128xf32>
    %231 = vector.extract_strided_slice %213 {offsets = [0, 256], sizes = [8, 128], strides = [1, 1]} : vector<8x384xf32> to vector<8x128xf32>
    %232 = arith.mulf %221, %231 : vector<8x128xf32>
    %233 = arith.addf %230, %232 : vector<8x128xf32>
    %234 = math.tanh %233 : vector<8x128xf32>
    %cst_86 = arith.constant 1.000000e+00 : f32
    %235 = vector.broadcast %cst_86 : f32 to vector<8x128xf32>
    %236 = arith.subf %235, %229 : vector<8x128xf32>
    %237 = arith.mulf %236, %234 : vector<8x128xf32>
    %238 = arith.mulf %229, %52 : vector<8x128xf32>
    %239 = arith.addf %237, %238 : vector<8x128xf32>
    %c1_87 = arith.constant 1 : index
    %c0_88 = arith.constant 0 : index
    %c0_89 = arith.constant 0 : index
    %240 = vector.load %arg13[%c1_87, %c0_88, %c0_89] : memref<8x8x128xf32, #tpu.memory_space<vmem>>, vector<1x8x128xf32>
    %241 = vector.shape_cast %240 : vector<1x8x128xf32> to vector<8x128xf32>
    %242 = vector.shape_cast %239 : vector<8x128xf32> to vector<1x8x128xf32>
    tpu.vector_store %arg13[%c1_87, %c0_88, %c0_89], %242 {strides = array<i32>} : memref<8x8x128xf32, #tpu.memory_space<vmem>>, vector<1x8x128xf32>,
    %243 = arith.truncf %239 : vector<8x128xf32> to vector<8x128xbf16>
    %cst_90 = arith.constant dense<0.000000e+00> : vector<8x512xf32>
    %244 = tpu.matmul %243, %12, %cst_90 {dimension_numbers = #tpu.dot_dimension_numbers<[1], [0], [0], [1], [0, 0, 1, 1], [], []>} : vector<8x128xbf16>, vector<128x512xbf16>, vector<8x512xf32> -> vector<8x512xf32>
    %245 = vector.broadcast %13 : vector<1x512xf32> to vector<8x512xf32>
    %246 = arith.addf %244, %245 : vector<8x512xf32>
    %247 = vector.extract_strided_slice %246 {offsets = [0, 384], sizes = [8, 64], strides = [1, 1]} : vector<8x512xf32> to vector<8x64xf32>
    %248 = vector.extract_strided_slice %246 {offsets = [0, 448], sizes = [8, 64], strides = [1, 1]} : vector<8x512xf32> to vector<8x64xf32>
    %249 = vector.broadcast %14 : vector<1x128xf32> to vector<8x128xf32>
    %250 = arith.mulf %239, %249 : vector<8x128xf32>
    %cst_91 = arith.constant dense<0.000000e+00> : vector<8xf32>
    %251 = vector.multi_reduction <add>, %250, %cst_91 [1] : vector<8x128xf32> to vector<8xf32>
    %252 = vector.shape_cast %251 : vector<8xf32> to vector<8x1xf32>
    %253 = vector.broadcast %15 : vector<1x1xf32> to vector<8x1xf32>
    %254 = arith.addf %252, %253 : vector<8x1xf32>
    %c0_i32_92 = arith.constant 0 : i32
    %255 = vector.broadcast %c0_i32_92 : i32 to vector<8x3xi32>
    %256 = arith.cmpi eq, %17, %255 : vector<8x3xi32>
    %c0_93 = arith.constant 0 : index
    %c0_94 = arith.constant 0 : index
    %c0_95 = arith.constant 0 : index
    %257 = vector.load %arg14[%c0_93, %c0_94, %c0_95] : memref<3x8x64xf32, #tpu.memory_space<vmem>>, vector<1x8x64xf32>
    %258 = vector.shape_cast %257 : vector<1x8x64xf32> to vector<8x64xf32>
    %259 = arith.mulf %247, %258 : vector<8x64xf32>
    %cst_96 = arith.constant dense<0.000000e+00> : vector<8xf32>
    %260 = vector.multi_reduction <add>, %259, %cst_96 [1] : vector<8x64xf32> to vector<8xf32>
    %261 = vector.shape_cast %260 : vector<8xf32> to vector<8x1xf32>
    %cst_97 = arith.constant 0.000000e+00 : f32
    %262 = vector.shape_cast %261 : vector<8x1xf32> to vector<8x1xf32>
    %263 = vector.broadcast %262 : vector<8x1xf32> to vector<8x3xf32>
    %264 = vector.broadcast %cst_97 : f32 to vector<8x3xf32>
    %265 = arith.select %256, %263, %264 : vector<8x3xi1>, vector<8x3xf32>
    %cst_98 = arith.constant 0.000000e+00 : f32
    %266 = vector.broadcast %cst_98 : f32 to vector<8x3xf32>
    %267 = arith.addf %266, %265 : vector<8x3xf32>
    %c1_i32_99 = arith.constant 1 : i32
    %268 = vector.broadcast %c1_i32_99 : i32 to vector<8x3xi32>
    %269 = arith.cmpi eq, %17, %268 : vector<8x3xi32>
    %c1_100 = arith.constant 1 : index
    %c0_101 = arith.constant 0 : index
    %c0_102 = arith.constant 0 : index
    %270 = vector.load %arg14[%c1_100, %c0_101, %c0_102] : memref<3x8x64xf32, #tpu.memory_space<vmem>>, vector<1x8x64xf32>
    %271 = vector.shape_cast %270 : vector<1x8x64xf32> to vector<8x64xf32>
    %272 = arith.mulf %247, %271 : vector<8x64xf32>
    %cst_103 = arith.constant dense<0.000000e+00> : vector<8xf32>
    %273 = vector.multi_reduction <add>, %272, %cst_103 [1] : vector<8x64xf32> to vector<8xf32>
    %274 = vector.shape_cast %273 : vector<8xf32> to vector<8x1xf32>
    %cst_104 = arith.constant 0.000000e+00 : f32
    %275 = vector.shape_cast %274 : vector<8x1xf32> to vector<8x1xf32>
    %276 = vector.broadcast %275 : vector<8x1xf32> to vector<8x3xf32>
    %277 = vector.broadcast %cst_104 : f32 to vector<8x3xf32>
    %278 = arith.select %269, %276, %277 : vector<8x3xi1>, vector<8x3xf32>
    %279 = arith.addf %267, %278 : vector<8x3xf32>
    %c2_i32_105 = arith.constant 2 : i32
    %280 = vector.broadcast %c2_i32_105 : i32 to vector<8x3xi32>
    %281 = arith.cmpi eq, %17, %280 : vector<8x3xi32>
    %c2_106 = arith.constant 2 : index
    %c0_107 = arith.constant 0 : index
    %c0_108 = arith.constant 0 : index
    %282 = vector.load %arg14[%c2_106, %c0_107, %c0_108] : memref<3x8x64xf32, #tpu.memory_space<vmem>>, vector<1x8x64xf32>
    %283 = vector.shape_cast %282 : vector<1x8x64xf32> to vector<8x64xf32>
    %284 = arith.mulf %247, %283 : vector<8x64xf32>
    %cst_109 = arith.constant dense<0.000000e+00> : vector<8xf32>
    %285 = vector.multi_reduction <add>, %284, %cst_109 [1] : vector<8x64xf32> to vector<8xf32>
    %286 = vector.shape_cast %285 : vector<8xf32> to vector<8x1xf32>
    %cst_110 = arith.constant 0.000000e+00 : f32
    %287 = vector.shape_cast %286 : vector<8x1xf32> to vector<8x1xf32>
    %288 = vector.broadcast %287 : vector<8x1xf32> to vector<8x3xf32>
    %289 = vector.broadcast %cst_110 : f32 to vector<8x3xf32>
    %290 = arith.select %281, %288, %289 : vector<8x3xi1>, vector<8x3xf32>
    %291 = arith.addf %279, %290 : vector<8x3xf32>
    %cst_111 = arith.constant dense<0xFF800000> : vector<8xf32>
    %292 = vector.multi_reduction <maximumf>, %291, %cst_111 [1] : vector<8x3xf32> to vector<8xf32>
    %293 = vector.shape_cast %292 : vector<8xf32> to vector<8x1xf32>
    %294 = vector.broadcast %293 : vector<8x1xf32> to vector<8x3xf32>
    %295 = arith.subf %291, %294 : vector<8x3xf32>
    %296 = math.exp %295 : vector<8x3xf32>
    %cst_112 = arith.constant dense<0.000000e+00> : vector<8xf32>
    %297 = vector.multi_reduction <add>, %296, %cst_112 [1] : vector<8x3xf32> to vector<8xf32>
    %298 = vector.shape_cast %297 : vector<8xf32> to vector<8x1xf32>
    %299 = math.log %298 : vector<8x1xf32>
    %300 = vector.broadcast %299 : vector<8x1xf32> to vector<8x3xf32>
    %301 = arith.subf %295, %300 : vector<8x3xf32>
    %302 = vector.broadcast %298 : vector<8x1xf32> to vector<8x3xf32>
    %303 = arith.divf %296, %302 : vector<8x3xf32>
    %304 = arith.mulf %303, %301 : vector<8x3xf32>
    %cst_113 = arith.constant dense<0.000000e+00> : vector<8xf32>
    %305 = vector.multi_reduction <add>, %304, %cst_113 [1] : vector<8x3xf32> to vector<8xf32>
    %306 = vector.shape_cast %305 : vector<8xf32> to vector<8x1xf32>
    %cst_114 = arith.constant 0.000000e+00 : f32
    %307 = vector.broadcast %cst_114 : f32 to vector<8x1xf32>
    %308 = arith.subf %307, %306 : vector<8x1xf32>
    %c1_115 = arith.constant 1 : index
    %c0_116 = arith.constant 0 : index
    %c0_117 = arith.constant 0 : index
    %309 = vector.load %arg5[%c1_115, %c0_116, %c0_117] : memref<8x8x1xf32, #tpu.memory_space<vmem>>, vector<1x8x1xf32>
    %310 = vector.shape_cast %309 : vector<1x8x1xf32> to vector<8x1xf32>
    %311 = vector.extract_strided_slice %303 {offsets = [0, 0], sizes = [8, 1], strides = [1, 1]} : vector<8x3xf32> to vector<8x1xf32>
    %312 = arith.cmpf oge, %310, %311 : vector<8x1xf32>
    %313 = arith.extui %312 : vector<8x1xi1> to vector<8x1xi32>
    %314 = vector.extract_strided_slice %303 {offsets = [0, 1], sizes = [8, 1], strides = [1, 1]} : vector<8x3xf32> to vector<8x1xf32>
    %315 = arith.addf %311, %314 : vector<8x1xf32>
    %316 = arith.cmpf oge, %310, %315 : vector<8x1xf32>
    %317 = arith.extui %316 : vector<8x1xi1> to vector<8x1xi32>
    %318 = arith.addi %313, %317 : vector<8x1xi32>
    %319 = vector.broadcast %318 : vector<8x1xi32> to vector<8x3xi32>
    %320 = arith.cmpi eq, %17, %319 : vector<8x3xi32>
    %321 = arith.extui %320 : vector<8x3xi1> to vector<8x3xi32>
    %322 = arith.sitofp %321 : vector<8x3xi32> to vector<8x3xf32>
    %323 = arith.mulf %322, %301 : vector<8x3xf32>
    %cst_118 = arith.constant dense<0.000000e+00> : vector<8xf32>
    %324 = vector.multi_reduction <add>, %323, %cst_118 [1] : vector<8x3xf32> to vector<8xf32>
    %325 = vector.shape_cast %324 : vector<8xf32> to vector<8x1xf32>
    %c1_i32_119 = arith.constant 1 : i32
    %326 = arith.addi %16, %c1_i32_119 : i32
    %c2_i32_120 = arith.constant 2 : i32
    %327 = arith.minsi %326, %c2_i32_120 : i32
    %c3_i32_121 = arith.constant 3 : i32
    %328 = arith.cmpi slt, %326, %c3_i32_121 : i32
    %329 = arith.extui %328 : i1 to i32
    %330 = arith.sitofp %329 : i32 to f32
    %331 = arith.index_cast %327 : i32 to index
    %c0_122 = arith.constant 0 : index
    %c0_123 = arith.constant 0 : index
    %332 = vector.load %arg14[%331, %c0_122, %c0_123] : memref<3x8x64xf32, #tpu.memory_space<vmem>>, vector<1x8x64xf32>
    %333 = vector.shape_cast %332 : vector<1x8x64xf32> to vector<8x64xf32>
    %334 = vector.broadcast %330 : f32 to vector<8x64xf32>
    %335 = arith.mulf %334, %248 : vector<8x64xf32>
    %336 = arith.addf %333, %335 : vector<8x64xf32>
    %337 = arith.index_cast %327 : i32 to index
    %c0_124 = arith.constant 0 : index
    %c0_125 = arith.constant 0 : index
    %338 = vector.load %arg14[%337, %c0_124, %c0_125] : memref<3x8x64xf32, #tpu.memory_space<vmem>>, vector<1x8x64xf32>
    %339 = vector.shape_cast %338 : vector<1x8x64xf32> to vector<8x64xf32>
    %340 = vector.shape_cast %336 : vector<8x64xf32> to vector<1x8x64xf32>
    tpu.vector_store %arg14[%337, %c0_124, %c0_125], %340 {strides = array<i32>} : memref<3x8x64xf32, #tpu.memory_space<vmem>>, vector<1x8x64xf32>,
    %341 = arith.sitofp %318 : vector<8x1xi32> to vector<8x1xf32>
    %342 = vector.extract_strided_slice %303 {offsets = [0, 0], sizes = [8, 1], strides = [1, 1]} : vector<8x3xf32> to vector<8x1xf32>
    %343 = vector.extract_strided_slice %303 {offsets = [0, 1], sizes = [8, 1], strides = [1, 1]} : vector<8x3xf32> to vector<8x1xf32>
    %344 = vector.extract_strided_slice %303 {offsets = [0, 2], sizes = [8, 1], strides = [1, 1]} : vector<8x3xf32> to vector<8x1xf32>
    %c0_i32_126 = arith.constant 0 : i32
    %345 = vector.broadcast %c0_i32_126 : i32 to vector<8x128xi32>
    %346 = arith.cmpi eq, %18, %345 : vector<8x128xi32>
    %cst_127 = arith.constant 0.000000e+00 : f32
    %347 = vector.shape_cast %341 : vector<8x1xf32> to vector<8x1xf32>
    %348 = vector.broadcast %347 : vector<8x1xf32> to vector<8x128xf32>
    %349 = vector.broadcast %cst_127 : f32 to vector<8x128xf32>
    %350 = arith.select %346, %348, %349 : vector<8x128xi1>, vector<8x128xf32>
    %cst_128 = arith.constant 0.000000e+00 : f32
    %351 = vector.broadcast %cst_128 : f32 to vector<8x128xf32>
    %352 = arith.addf %351, %350 : vector<8x128xf32>
    %c1_i32_129 = arith.constant 1 : i32
    %353 = vector.broadcast %c1_i32_129 : i32 to vector<8x128xi32>
    %354 = arith.cmpi eq, %18, %353 : vector<8x128xi32>
    %cst_130 = arith.constant 0.000000e+00 : f32
    %355 = vector.shape_cast %325 : vector<8x1xf32> to vector<8x1xf32>
    %356 = vector.broadcast %355 : vector<8x1xf32> to vector<8x128xf32>
    %357 = vector.broadcast %cst_130 : f32 to vector<8x128xf32>
    %358 = arith.select %354, %356, %357 : vector<8x128xi1>, vector<8x128xf32>
    %359 = arith.addf %352, %358 : vector<8x128xf32>
    %c2_i32_131 = arith.constant 2 : i32
    %360 = vector.broadcast %c2_i32_131 : i32 to vector<8x128xi32>
    %361 = arith.cmpi eq, %18, %360 : vector<8x128xi32>
    %cst_132 = arith.constant 0.000000e+00 : f32
    %362 = vector.shape_cast %308 : vector<8x1xf32> to vector<8x1xf32>
    %363 = vector.broadcast %362 : vector<8x1xf32> to vector<8x128xf32>
    %364 = vector.broadcast %cst_132 : f32 to vector<8x128xf32>
    %365 = arith.select %361, %363, %364 : vector<8x128xi1>, vector<8x128xf32>
    %366 = arith.addf %359, %365 : vector<8x128xf32>
    %c3_i32_133 = arith.constant 3 : i32
    %367 = vector.broadcast %c3_i32_133 : i32 to vector<8x128xi32>
    %368 = arith.cmpi eq, %18, %367 : vector<8x128xi32>
    %cst_134 = arith.constant 0.000000e+00 : f32
    %369 = vector.shape_cast %254 : vector<8x1xf32> to vector<8x1xf32>
    %370 = vector.broadcast %369 : vector<8x1xf32> to vector<8x128xf32>
    %371 = vector.broadcast %cst_134 : f32 to vector<8x128xf32>
    %372 = arith.select %368, %370, %371 : vector<8x128xi1>, vector<8x128xf32>
    %373 = arith.addf %366, %372 : vector<8x128xf32>
    %c4_i32_135 = arith.constant 4 : i32
    %374 = vector.broadcast %c4_i32_135 : i32 to vector<8x128xi32>
    %375 = arith.cmpi eq, %18, %374 : vector<8x128xi32>
    %cst_136 = arith.constant 0.000000e+00 : f32
    %376 = vector.shape_cast %342 : vector<8x1xf32> to vector<8x1xf32>
    %377 = vector.broadcast %376 : vector<8x1xf32> to vector<8x128xf32>
    %378 = vector.broadcast %cst_136 : f32 to vector<8x128xf32>
    %379 = arith.select %375, %377, %378 : vector<8x128xi1>, vector<8x128xf32>
    %380 = arith.addf %373, %379 : vector<8x128xf32>
    %c5_i32_137 = arith.constant 5 : i32
    %381 = vector.broadcast %c5_i32_137 : i32 to vector<8x128xi32>
    %382 = arith.cmpi eq, %18, %381 : vector<8x128xi32>
    %cst_138 = arith.constant 0.000000e+00 : f32
    %383 = vector.shape_cast %343 : vector<8x1xf32> to vector<8x1xf32>
    %384 = vector.broadcast %383 : vector<8x1xf32> to vector<8x128xf32>
    %385 = vector.broadcast %cst_138 : f32 to vector<8x128xf32>
    %386 = arith.select %382, %384, %385 : vector<8x128xi1>, vector<8x128xf32>
    %387 = arith.addf %380, %386 : vector<8x128xf32>
    %c6_i32_139 = arith.constant 6 : i32
    %388 = vector.broadcast %c6_i32_139 : i32 to vector<8x128xi32>
    %389 = arith.cmpi eq, %18, %388 : vector<8x128xi32>
    %cst_140 = arith.constant 0.000000e+00 : f32
    %390 = vector.shape_cast %344 : vector<8x1xf32> to vector<8x1xf32>
    %391 = vector.broadcast %390 : vector<8x1xf32> to vector<8x128xf32>
    %392 = vector.broadcast %cst_140 : f32 to vector<8x128xf32>
    %393 = arith.select %389, %391, %392 : vector<8x128xi1>, vector<8x128xf32>
    %394 = arith.addf %387, %393 : vector<8x128xf32>
    %c1_141 = arith.constant 1 : index
    %c0_142 = arith.constant 0 : index
    %c0_143 = arith.constant 0 : index
    %395 = vector.load %arg12[%c1_141, %c0_142, %c0_143] : memref<8x8x128xf32, #tpu.memory_space<vmem>>, vector<1x8x128xf32>
    %396 = vector.shape_cast %395 : vector<1x8x128xf32> to vector<8x128xf32>
    %397 = vector.shape_cast %394 : vector<8x128xf32> to vector<1x8x128xf32>
    tpu.vector_store %arg12[%c1_141, %c0_142, %c0_143], %397 {strides = array<i32>} : memref<8x8x128xf32, #tpu.memory_space<vmem>>, vector<1x8x128xf32>,
    %c2_144 = arith.constant 2 : index
    %c0_145 = arith.constant 0 : index
    %c0_146 = arith.constant 0 : index
    %398 = vector.load %arg15[%c2_144, %c0_145, %c0_146] : memref<8x8x384xf32, #tpu.memory_space<vmem>>, vector<1x8x384xf32>
    %399 = vector.shape_cast %398 : vector<1x8x384xf32> to vector<8x384xf32>
    %400 = vector.extract_strided_slice %246 {offsets = [0, 0], sizes = [8, 384], strides = [1, 1]} : vector<8x512xf32> to vector<8x384xf32>
    %401 = vector.extract_strided_slice %399 {offsets = [0, 0], sizes = [8, 128], strides = [1, 1]} : vector<8x384xf32> to vector<8x128xf32>
    %402 = vector.extract_strided_slice %400 {offsets = [0, 0], sizes = [8, 128], strides = [1, 1]} : vector<8x384xf32> to vector<8x128xf32>
    %403 = arith.addf %401, %402 : vector<8x128xf32>
    %404 = arith.negf %403 : vector<8x128xf32>
    %405 = math.exp %404 : vector<8x128xf32>
    %cst_147 = arith.constant 1.000000e+00 : f32
    %406 = vector.broadcast %cst_147 : f32 to vector<8x128xf32>
    %407 = arith.addf %406, %405 : vector<8x128xf32>
    %408 = arith.divf %406, %407 : vector<8x128xf32>
    %409 = vector.extract_strided_slice %399 {offsets = [0, 128], sizes = [8, 128], strides = [1, 1]} : vector<8x384xf32> to vector<8x128xf32>
    %410 = vector.extract_strided_slice %400 {offsets = [0, 128], sizes = [8, 128], strides = [1, 1]} : vector<8x384xf32> to vector<8x128xf32>
    %411 = arith.addf %409, %410 : vector<8x128xf32>
    %412 = arith.negf %411 : vector<8x128xf32>
    %413 = math.exp %412 : vector<8x128xf32>
    %cst_148 = arith.constant 1.000000e+00 : f32
    %414 = vector.broadcast %cst_148 : f32 to vector<8x128xf32>
    %415 = arith.addf %414, %413 : vector<8x128xf32>
    %416 = arith.divf %414, %415 : vector<8x128xf32>
    %417 = vector.extract_strided_slice %399 {offsets = [0, 256], sizes = [8, 128], strides = [1, 1]} : vector<8x384xf32> to vector<8x128xf32>
    %418 = vector.extract_strided_slice %400 {offsets = [0, 256], sizes = [8, 128], strides = [1, 1]} : vector<8x384xf32> to vector<8x128xf32>
    %419 = arith.mulf %408, %418 : vector<8x128xf32>
    %420 = arith.addf %417, %419 : vector<8x128xf32>
    %421 = math.tanh %420 : vector<8x128xf32>
    %cst_149 = arith.constant 1.000000e+00 : f32
    %422 = vector.broadcast %cst_149 : f32 to vector<8x128xf32>
    %423 = arith.subf %422, %416 : vector<8x128xf32>
    %424 = arith.mulf %423, %421 : vector<8x128xf32>
    %425 = arith.mulf %416, %239 : vector<8x128xf32>
    %426 = arith.addf %424, %425 : vector<8x128xf32>
    %c2_150 = arith.constant 2 : index
    %c0_151 = arith.constant 0 : index
    %c0_152 = arith.constant 0 : index
    %427 = vector.load %arg13[%c2_150, %c0_151, %c0_152] : memref<8x8x128xf32, #tpu.memory_space<vmem>>, vector<1x8x128xf32>
    %428 = vector.shape_cast %427 : vector<1x8x128xf32> to vector<8x128xf32>
    %429 = vector.shape_cast %426 : vector<8x128xf32> to vector<1x8x128xf32>
    tpu.vector_store %arg13[%c2_150, %c0_151, %c0_152], %429 {strides = array<i32>} : memref<8x8x128xf32, #tpu.memory_space<vmem>>, vector<1x8x128xf32>,
    %430 = arith.truncf %426 : vector<8x128xf32> to vector<8x128xbf16>
    %cst_153 = arith.constant dense<0.000000e+00> : vector<8x512xf32>
    %431 = tpu.matmul %430, %12, %cst_153 {dimension_numbers = #tpu.dot_dimension_numbers<[1], [0], [0], [1], [0, 0, 1, 1], [], []>} : vector<8x128xbf16>, vector<128x512xbf16>, vector<8x512xf32> -> vector<8x512xf32>
    %432 = vector.broadcast %13 : vector<1x512xf32> to vector<8x512xf32>
    %433 = arith.addf %431, %432 : vector<8x512xf32>
    %434 = vector.extract_strided_slice %433 {offsets = [0, 384], sizes = [8, 64], strides = [1, 1]} : vector<8x512xf32> to vector<8x64xf32>
    %435 = vector.extract_strided_slice %433 {offsets = [0, 448], sizes = [8, 64], strides = [1, 1]} : vector<8x512xf32> to vector<8x64xf32>
    %436 = vector.broadcast %14 : vector<1x128xf32> to vector<8x128xf32>
    %437 = arith.mulf %426, %436 : vector<8x128xf32>
    %cst_154 = arith.constant dense<0.000000e+00> : vector<8xf32>
    %438 = vector.multi_reduction <add>, %437, %cst_154 [1] : vector<8x128xf32> to vector<8xf32>
    %439 = vector.shape_cast %438 : vector<8xf32> to vector<8x1xf32>
    %440 = vector.broadcast %15 : vector<1x1xf32> to vector<8x1xf32>
    %441 = arith.addf %439, %440 : vector<8x1xf32>
    %c0_i32_155 = arith.constant 0 : i32
    %442 = vector.broadcast %c0_i32_155 : i32 to vector<8x3xi32>
    %443 = arith.cmpi eq, %17, %442 : vector<8x3xi32>
    %c0_156 = arith.constant 0 : index
    %c0_157 = arith.constant 0 : index
    %c0_158 = arith.constant 0 : index
    %444 = vector.load %arg14[%c0_156, %c0_157, %c0_158] : memref<3x8x64xf32, #tpu.memory_space<vmem>>, vector<1x8x64xf32>
    %445 = vector.shape_cast %444 : vector<1x8x64xf32> to vector<8x64xf32>
    %446 = arith.mulf %434, %445 : vector<8x64xf32>
    %cst_159 = arith.constant dense<0.000000e+00> : vector<8xf32>
    %447 = vector.multi_reduction <add>, %446, %cst_159 [1] : vector<8x64xf32> to vector<8xf32>
    %448 = vector.shape_cast %447 : vector<8xf32> to vector<8x1xf32>
    %cst_160 = arith.constant 0.000000e+00 : f32
    %449 = vector.shape_cast %448 : vector<8x1xf32> to vector<8x1xf32>
    %450 = vector.broadcast %449 : vector<8x1xf32> to vector<8x3xf32>
    %451 = vector.broadcast %cst_160 : f32 to vector<8x3xf32>
    %452 = arith.select %443, %450, %451 : vector<8x3xi1>, vector<8x3xf32>
    %cst_161 = arith.constant 0.000000e+00 : f32
    %453 = vector.broadcast %cst_161 : f32 to vector<8x3xf32>
    %454 = arith.addf %453, %452 : vector<8x3xf32>
    %c1_i32_162 = arith.constant 1 : i32
    %455 = vector.broadcast %c1_i32_162 : i32 to vector<8x3xi32>
    %456 = arith.cmpi eq, %17, %455 : vector<8x3xi32>
    %c1_163 = arith.constant 1 : index
    %c0_164 = arith.constant 0 : index
    %c0_165 = arith.constant 0 : index
    %457 = vector.load %arg14[%c1_163, %c0_164, %c0_165] : memref<3x8x64xf32, #tpu.memory_space<vmem>>, vector<1x8x64xf32>
    %458 = vector.shape_cast %457 : vector<1x8x64xf32> to vector<8x64xf32>
    %459 = arith.mulf %434, %458 : vector<8x64xf32>
    %cst_166 = arith.constant dense<0.000000e+00> : vector<8xf32>
    %460 = vector.multi_reduction <add>, %459, %cst_166 [1] : vector<8x64xf32> to vector<8xf32>
    %461 = vector.shape_cast %460 : vector<8xf32> to vector<8x1xf32>
    %cst_167 = arith.constant 0.000000e+00 : f32
    %462 = vector.shape_cast %461 : vector<8x1xf32> to vector<8x1xf32>
    %463 = vector.broadcast %462 : vector<8x1xf32> to vector<8x3xf32>
    %464 = vector.broadcast %cst_167 : f32 to vector<8x3xf32>
    %465 = arith.select %456, %463, %464 : vector<8x3xi1>, vector<8x3xf32>
    %466 = arith.addf %454, %465 : vector<8x3xf32>
    %c2_i32_168 = arith.constant 2 : i32
    %467 = vector.broadcast %c2_i32_168 : i32 to vector<8x3xi32>
    %468 = arith.cmpi eq, %17, %467 : vector<8x3xi32>
    %c2_169 = arith.constant 2 : index
    %c0_170 = arith.constant 0 : index
    %c0_171 = arith.constant 0 : index
    %469 = vector.load %arg14[%c2_169, %c0_170, %c0_171] : memref<3x8x64xf32, #tpu.memory_space<vmem>>, vector<1x8x64xf32>
    %470 = vector.shape_cast %469 : vector<1x8x64xf32> to vector<8x64xf32>
    %471 = arith.mulf %434, %470 : vector<8x64xf32>
    %cst_172 = arith.constant dense<0.000000e+00> : vector<8xf32>
    %472 = vector.multi_reduction <add>, %471, %cst_172 [1] : vector<8x64xf32> to vector<8xf32>
    %473 = vector.shape_cast %472 : vector<8xf32> to vector<8x1xf32>
    %cst_173 = arith.constant 0.000000e+00 : f32
    %474 = vector.shape_cast %473 : vector<8x1xf32> to vector<8x1xf32>
    %475 = vector.broadcast %474 : vector<8x1xf32> to vector<8x3xf32>
    %476 = vector.broadcast %cst_173 : f32 to vector<8x3xf32>
    %477 = arith.select %468, %475, %476 : vector<8x3xi1>, vector<8x3xf32>
    %478 = arith.addf %466, %477 : vector<8x3xf32>
    %cst_174 = arith.constant dense<0xFF800000> : vector<8xf32>
    %479 = vector.multi_reduction <maximumf>, %478, %cst_174 [1] : vector<8x3xf32> to vector<8xf32>
    %480 = vector.shape_cast %479 : vector<8xf32> to vector<8x1xf32>
    %481 = vector.broadcast %480 : vector<8x1xf32> to vector<8x3xf32>
    %482 = arith.subf %478, %481 : vector<8x3xf32>
    %483 = math.exp %482 : vector<8x3xf32>
    %cst_175 = arith.constant dense<0.000000e+00> : vector<8xf32>
    %484 = vector.multi_reduction <add>, %483, %cst_175 [1] : vector<8x3xf32> to vector<8xf32>
    %485 = vector.shape_cast %484 : vector<8xf32> to vector<8x1xf32>
    %486 = math.log %485 : vector<8x1xf32>
    %487 = vector.broadcast %486 : vector<8x1xf32> to vector<8x3xf32>
    %488 = arith.subf %482, %487 : vector<8x3xf32>
    %489 = vector.broadcast %485 : vector<8x1xf32> to vector<8x3xf32>
    %490 = arith.divf %483, %489 : vector<8x3xf32>
    %491 = arith.mulf %490, %488 : vector<8x3xf32>
    %cst_176 = arith.constant dense<0.000000e+00> : vector<8xf32>
    %492 = vector.multi_reduction <add>, %491, %cst_176 [1] : vector<8x3xf32> to vector<8xf32>
    %493 = vector.shape_cast %492 : vector<8xf32> to vector<8x1xf32>
    %cst_177 = arith.constant 0.000000e+00 : f32
    %494 = vector.broadcast %cst_177 : f32 to vector<8x1xf32>
    %495 = arith.subf %494, %493 : vector<8x1xf32>
    %c2_178 = arith.constant 2 : index
    %c0_179 = arith.constant 0 : index
    %c0_180 = arith.constant 0 : index
    %496 = vector.load %arg5[%c2_178, %c0_179, %c0_180] : memref<8x8x1xf32, #tpu.memory_space<vmem>>, vector<1x8x1xf32>
    %497 = vector.shape_cast %496 : vector<1x8x1xf32> to vector<8x1xf32>
    %498 = vector.extract_strided_slice %490 {offsets = [0, 0], sizes = [8, 1], strides = [1, 1]} : vector<8x3xf32> to vector<8x1xf32>
    %499 = arith.cmpf oge, %497, %498 : vector<8x1xf32>
    %500 = arith.extui %499 : vector<8x1xi1> to vector<8x1xi32>
    %501 = vector.extract_strided_slice %490 {offsets = [0, 1], sizes = [8, 1], strides = [1, 1]} : vector<8x3xf32> to vector<8x1xf32>
    %502 = arith.addf %498, %501 : vector<8x1xf32>
    %503 = arith.cmpf oge, %497, %502 : vector<8x1xf32>
    %504 = arith.extui %503 : vector<8x1xi1> to vector<8x1xi32>
    %505 = arith.addi %500, %504 : vector<8x1xi32>
    %506 = vector.broadcast %505 : vector<8x1xi32> to vector<8x3xi32>
    %507 = arith.cmpi eq, %17, %506 : vector<8x3xi32>
    %508 = arith.extui %507 : vector<8x3xi1> to vector<8x3xi32>
    %509 = arith.sitofp %508 : vector<8x3xi32> to vector<8x3xf32>
    %510 = arith.mulf %509, %488 : vector<8x3xf32>
    %cst_181 = arith.constant dense<0.000000e+00> : vector<8xf32>
    %511 = vector.multi_reduction <add>, %510, %cst_181 [1] : vector<8x3xf32> to vector<8xf32>
    %512 = vector.shape_cast %511 : vector<8xf32> to vector<8x1xf32>
    %c2_i32_182 = arith.constant 2 : i32
    %513 = arith.addi %16, %c2_i32_182 : i32
    %c2_i32_183 = arith.constant 2 : i32
    %514 = arith.minsi %513, %c2_i32_183 : i32
    %c3_i32_184 = arith.constant 3 : i32
    %515 = arith.cmpi slt, %513, %c3_i32_184 : i32
    %516 = arith.extui %515 : i1 to i32
    %517 = arith.sitofp %516 : i32 to f32
    %518 = arith.index_cast %514 : i32 to index
    %c0_185 = arith.constant 0 : index
    %c0_186 = arith.constant 0 : index
    %519 = vector.load %arg14[%518, %c0_185, %c0_186] : memref<3x8x64xf32, #tpu.memory_space<vmem>>, vector<1x8x64xf32>
    %520 = vector.shape_cast %519 : vector<1x8x64xf32> to vector<8x64xf32>
    %521 = vector.broadcast %517 : f32 to vector<8x64xf32>
    %522 = arith.mulf %521, %435 : vector<8x64xf32>
    %523 = arith.addf %520, %522 : vector<8x64xf32>
    %524 = arith.index_cast %514 : i32 to index
    %c0_187 = arith.constant 0 : index
    %c0_188 = arith.constant 0 : index
    %525 = vector.load %arg14[%524, %c0_187, %c0_188] : memref<3x8x64xf32, #tpu.memory_space<vmem>>, vector<1x8x64xf32>
    %526 = vector.shape_cast %525 : vector<1x8x64xf32> to vector<8x64xf32>
    %527 = vector.shape_cast %523 : vector<8x64xf32> to vector<1x8x64xf32>
    tpu.vector_store %arg14[%524, %c0_187, %c0_188], %527 {strides = array<i32>} : memref<3x8x64xf32, #tpu.memory_space<vmem>>, vector<1x8x64xf32>,
    %528 = arith.sitofp %505 : vector<8x1xi32> to vector<8x1xf32>
    %529 = vector.extract_strided_slice %490 {offsets = [0, 0], sizes = [8, 1], strides = [1, 1]} : vector<8x3xf32> to vector<8x1xf32>
    %530 = vector.extract_strided_slice %490 {offsets = [0, 1], sizes = [8, 1], strides = [1, 1]} : vector<8x3xf32> to vector<8x1xf32>
    %531 = vector.extract_strided_slice %490 {offsets = [0, 2], sizes = [8, 1], strides = [1, 1]} : vector<8x3xf32> to vector<8x1xf32>
    %c0_i32_189 = arith.constant 0 : i32
    %532 = vector.broadcast %c0_i32_189 : i32 to vector<8x128xi32>
    %533 = arith.cmpi eq, %18, %532 : vector<8x128xi32>
    %cst_190 = arith.constant 0.000000e+00 : f32
    %534 = vector.shape_cast %528 : vector<8x1xf32> to vector<8x1xf32>
    %535 = vector.broadcast %534 : vector<8x1xf32> to vector<8x128xf32>
    %536 = vector.broadcast %cst_190 : f32 to vector<8x128xf32>
    %537 = arith.select %533, %535, %536 : vector<8x128xi1>, vector<8x128xf32>
    %cst_191 = arith.constant 0.000000e+00 : f32
    %538 = vector.broadcast %cst_191 : f32 to vector<8x128xf32>
    %539 = arith.addf %538, %537 : vector<8x128xf32>
    %c1_i32_192 = arith.constant 1 : i32
    %540 = vector.broadcast %c1_i32_192 : i32 to vector<8x128xi32>
    %541 = arith.cmpi eq, %18, %540 : vector<8x128xi32>
    %cst_193 = arith.constant 0.000000e+00 : f32
    %542 = vector.shape_cast %512 : vector<8x1xf32> to vector<8x1xf32>
    %543 = vector.broadcast %542 : vector<8x1xf32> to vector<8x128xf32>
    %544 = vector.broadcast %cst_193 : f32 to vector<8x128xf32>
    %545 = arith.select %541, %543, %544 : vector<8x128xi1>, vector<8x128xf32>
    %546 = arith.addf %539, %545 : vector<8x128xf32>
    %c2_i32_194 = arith.constant 2 : i32
    %547 = vector.broadcast %c2_i32_194 : i32 to vector<8x128xi32>
    %548 = arith.cmpi eq, %18, %547 : vector<8x128xi32>
    %cst_195 = arith.constant 0.000000e+00 : f32
    %549 = vector.shape_cast %495 : vector<8x1xf32> to vector<8x1xf32>
    %550 = vector.broadcast %549 : vector<8x1xf32> to vector<8x128xf32>
    %551 = vector.broadcast %cst_195 : f32 to vector<8x128xf32>
    %552 = arith.select %548, %550, %551 : vector<8x128xi1>, vector<8x128xf32>
    %553 = arith.addf %546, %552 : vector<8x128xf32>
    %c3_i32_196 = arith.constant 3 : i32
    %554 = vector.broadcast %c3_i32_196 : i32 to vector<8x128xi32>
    %555 = arith.cmpi eq, %18, %554 : vector<8x128xi32>
    %cst_197 = arith.constant 0.000000e+00 : f32
    %556 = vector.shape_cast %441 : vector<8x1xf32> to vector<8x1xf32>
    %557 = vector.broadcast %556 : vector<8x1xf32> to vector<8x128xf32>
    %558 = vector.broadcast %cst_197 : f32 to vector<8x128xf32>
    %559 = arith.select %555, %557, %558 : vector<8x128xi1>, vector<8x128xf32>
    %560 = arith.addf %553, %559 : vector<8x128xf32>
    %c4_i32_198 = arith.constant 4 : i32
    %561 = vector.broadcast %c4_i32_198 : i32 to vector<8x128xi32>
    %562 = arith.cmpi eq, %18, %561 : vector<8x128xi32>
    %cst_199 = arith.constant 0.000000e+00 : f32
    %563 = vector.shape_cast %529 : vector<8x1xf32> to vector<8x1xf32>
    %564 = vector.broadcast %563 : vector<8x1xf32> to vector<8x128xf32>
    %565 = vector.broadcast %cst_199 : f32 to vector<8x128xf32>
    %566 = arith.select %562, %564, %565 : vector<8x128xi1>, vector<8x128xf32>
    %567 = arith.addf %560, %566 : vector<8x128xf32>
    %c5_i32_200 = arith.constant 5 : i32
    %568 = vector.broadcast %c5_i32_200 : i32 to vector<8x128xi32>
    %569 = arith.cmpi eq, %18, %568 : vector<8x128xi32>
    %cst_201 = arith.constant 0.000000e+00 : f32
    %570 = vector.shape_cast %530 : vector<8x1xf32> to vector<8x1xf32>
    %571 = vector.broadcast %570 : vector<8x1xf32> to vector<8x128xf32>
    %572 = vector.broadcast %cst_201 : f32 to vector<8x128xf32>
    %573 = arith.select %569, %571, %572 : vector<8x128xi1>, vector<8x128xf32>
    %574 = arith.addf %567, %573 : vector<8x128xf32>
    %c6_i32_202 = arith.constant 6 : i32
    %575 = vector.broadcast %c6_i32_202 : i32 to vector<8x128xi32>
    %576 = arith.cmpi eq, %18, %575 : vector<8x128xi32>
    %cst_203 = arith.constant 0.000000e+00 : f32
    %577 = vector.shape_cast %531 : vector<8x1xf32> to vector<8x1xf32>
    %578 = vector.broadcast %577 : vector<8x1xf32> to vector<8x128xf32>
    %579 = vector.broadcast %cst_203 : f32 to vector<8x128xf32>
    %580 = arith.select %576, %578, %579 : vector<8x128xi1>, vector<8x128xf32>
    %581 = arith.addf %574, %580 : vector<8x128xf32>
    %c2_204 = arith.constant 2 : index
    %c0_205 = arith.constant 0 : index
    %c0_206 = arith.constant 0 : index
    %582 = vector.load %arg12[%c2_204, %c0_205, %c0_206] : memref<8x8x128xf32, #tpu.memory_space<vmem>>, vector<1x8x128xf32>
    %583 = vector.shape_cast %582 : vector<1x8x128xf32> to vector<8x128xf32>
    %584 = vector.shape_cast %581 : vector<8x128xf32> to vector<1x8x128xf32>
    tpu.vector_store %arg12[%c2_204, %c0_205, %c0_206], %584 {strides = array<i32>} : memref<8x8x128xf32, #tpu.memory_space<vmem>>, vector<1x8x128xf32>,
    %c3 = arith.constant 3 : index
    %c0_207 = arith.constant 0 : index
    %c0_208 = arith.constant 0 : index
    %585 = vector.load %arg15[%c3, %c0_207, %c0_208] : memref<8x8x384xf32, #tpu.memory_space<vmem>>, vector<1x8x384xf32>
    %586 = vector.shape_cast %585 : vector<1x8x384xf32> to vector<8x384xf32>
    %587 = vector.extract_strided_slice %433 {offsets = [0, 0], sizes = [8, 384], strides = [1, 1]} : vector<8x512xf32> to vector<8x384xf32>
    %588 = vector.extract_strided_slice %586 {offsets = [0, 0], sizes = [8, 128], strides = [1, 1]} : vector<8x384xf32> to vector<8x128xf32>
    %589 = vector.extract_strided_slice %587 {offsets = [0, 0], sizes = [8, 128], strides = [1, 1]} : vector<8x384xf32> to vector<8x128xf32>
    %590 = arith.addf %588, %589 : vector<8x128xf32>
    %591 = arith.negf %590 : vector<8x128xf32>
    %592 = math.exp %591 : vector<8x128xf32>
    %cst_209 = arith.constant 1.000000e+00 : f32
    %593 = vector.broadcast %cst_209 : f32 to vector<8x128xf32>
    %594 = arith.addf %593, %592 : vector<8x128xf32>
    %595 = arith.divf %593, %594 : vector<8x128xf32>
    %596 = vector.extract_strided_slice %586 {offsets = [0, 128], sizes = [8, 128], strides = [1, 1]} : vector<8x384xf32> to vector<8x128xf32>
    %597 = vector.extract_strided_slice %587 {offsets = [0, 128], sizes = [8, 128], strides = [1, 1]} : vector<8x384xf32> to vector<8x128xf32>
    %598 = arith.addf %596, %597 : vector<8x128xf32>
    %599 = arith.negf %598 : vector<8x128xf32>
    %600 = math.exp %599 : vector<8x128xf32>
    %cst_210 = arith.constant 1.000000e+00 : f32
    %601 = vector.broadcast %cst_210 : f32 to vector<8x128xf32>
    %602 = arith.addf %601, %600 : vector<8x128xf32>
    %603 = arith.divf %601, %602 : vector<8x128xf32>
    %604 = vector.extract_strided_slice %586 {offsets = [0, 256], sizes = [8, 128], strides = [1, 1]} : vector<8x384xf32> to vector<8x128xf32>
    %605 = vector.extract_strided_slice %587 {offsets = [0, 256], sizes = [8, 128], strides = [1, 1]} : vector<8x384xf32> to vector<8x128xf32>
    %606 = arith.mulf %595, %605 : vector<8x128xf32>
    %607 = arith.addf %604, %606 : vector<8x128xf32>
    %608 = math.tanh %607 : vector<8x128xf32>
    %cst_211 = arith.constant 1.000000e+00 : f32
    %609 = vector.broadcast %cst_211 : f32 to vector<8x128xf32>
    %610 = arith.subf %609, %603 : vector<8x128xf32>
    %611 = arith.mulf %610, %608 : vector<8x128xf32>
    %612 = arith.mulf %603, %426 : vector<8x128xf32>
    %613 = arith.addf %611, %612 : vector<8x128xf32>
    %c3_212 = arith.constant 3 : index
    %c0_213 = arith.constant 0 : index
    %c0_214 = arith.constant 0 : index
    %614 = vector.load %arg13[%c3_212, %c0_213, %c0_214] : memref<8x8x128xf32, #tpu.memory_space<vmem>>, vector<1x8x128xf32>
    %615 = vector.shape_cast %614 : vector<1x8x128xf32> to vector<8x128xf32>
    %616 = vector.shape_cast %613 : vector<8x128xf32> to vector<1x8x128xf32>
    tpu.vector_store %arg13[%c3_212, %c0_213, %c0_214], %616 {strides = array<i32>} : memref<8x8x128xf32, #tpu.memory_space<vmem>>, vector<1x8x128xf32>,
    %617 = arith.truncf %613 : vector<8x128xf32> to vector<8x128xbf16>
    %cst_215 = arith.constant dense<0.000000e+00> : vector<8x512xf32>
    %618 = tpu.matmul %617, %12, %cst_215 {dimension_numbers = #tpu.dot_dimension_numbers<[1], [0], [0], [1], [0, 0, 1, 1], [], []>} : vector<8x128xbf16>, vector<128x512xbf16>, vector<8x512xf32> -> vector<8x512xf32>
    %619 = vector.broadcast %13 : vector<1x512xf32> to vector<8x512xf32>
    %620 = arith.addf %618, %619 : vector<8x512xf32>
    %621 = vector.extract_strided_slice %620 {offsets = [0, 384], sizes = [8, 64], strides = [1, 1]} : vector<8x512xf32> to vector<8x64xf32>
    %622 = vector.extract_strided_slice %620 {offsets = [0, 448], sizes = [8, 64], strides = [1, 1]} : vector<8x512xf32> to vector<8x64xf32>
    %623 = vector.broadcast %14 : vector<1x128xf32> to vector<8x128xf32>
    %624 = arith.mulf %613, %623 : vector<8x128xf32>
    %cst_216 = arith.constant dense<0.000000e+00> : vector<8xf32>
    %625 = vector.multi_reduction <add>, %624, %cst_216 [1] : vector<8x128xf32> to vector<8xf32>
    %626 = vector.shape_cast %625 : vector<8xf32> to vector<8x1xf32>
    %627 = vector.broadcast %15 : vector<1x1xf32> to vector<8x1xf32>
    %628 = arith.addf %626, %627 : vector<8x1xf32>
    %c0_i32_217 = arith.constant 0 : i32
    %629 = vector.broadcast %c0_i32_217 : i32 to vector<8x3xi32>
    %630 = arith.cmpi eq, %17, %629 : vector<8x3xi32>
    %c0_218 = arith.constant 0 : index
    %c0_219 = arith.constant 0 : index
    %c0_220 = arith.constant 0 : index
    %631 = vector.load %arg14[%c0_218, %c0_219, %c0_220] : memref<3x8x64xf32, #tpu.memory_space<vmem>>, vector<1x8x64xf32>
    %632 = vector.shape_cast %631 : vector<1x8x64xf32> to vector<8x64xf32>
    %633 = arith.mulf %621, %632 : vector<8x64xf32>
    %cst_221 = arith.constant dense<0.000000e+00> : vector<8xf32>
    %634 = vector.multi_reduction <add>, %633, %cst_221 [1] : vector<8x64xf32> to vector<8xf32>
    %635 = vector.shape_cast %634 : vector<8xf32> to vector<8x1xf32>
    %cst_222 = arith.constant 0.000000e+00 : f32
    %636 = vector.shape_cast %635 : vector<8x1xf32> to vector<8x1xf32>
    %637 = vector.broadcast %636 : vector<8x1xf32> to vector<8x3xf32>
    %638 = vector.broadcast %cst_222 : f32 to vector<8x3xf32>
    %639 = arith.select %630, %637, %638 : vector<8x3xi1>, vector<8x3xf32>
    %cst_223 = arith.constant 0.000000e+00 : f32
    %640 = vector.broadcast %cst_223 : f32 to vector<8x3xf32>
    %641 = arith.addf %640, %639 : vector<8x3xf32>
    %c1_i32_224 = arith.constant 1 : i32
    %642 = vector.broadcast %c1_i32_224 : i32 to vector<8x3xi32>
    %643 = arith.cmpi eq, %17, %642 : vector<8x3xi32>
    %c1_225 = arith.constant 1 : index
    %c0_226 = arith.constant 0 : index
    %c0_227 = arith.constant 0 : index
    %644 = vector.load %arg14[%c1_225, %c0_226, %c0_227] : memref<3x8x64xf32, #tpu.memory_space<vmem>>, vector<1x8x64xf32>
    %645 = vector.shape_cast %644 : vector<1x8x64xf32> to vector<8x64xf32>
    %646 = arith.mulf %621, %645 : vector<8x64xf32>
    %cst_228 = arith.constant dense<0.000000e+00> : vector<8xf32>
    %647 = vector.multi_reduction <add>, %646, %cst_228 [1] : vector<8x64xf32> to vector<8xf32>
    %648 = vector.shape_cast %647 : vector<8xf32> to vector<8x1xf32>
    %cst_229 = arith.constant 0.000000e+00 : f32
    %649 = vector.shape_cast %648 : vector<8x1xf32> to vector<8x1xf32>
    %650 = vector.broadcast %649 : vector<8x1xf32> to vector<8x3xf32>
    %651 = vector.broadcast %cst_229 : f32 to vector<8x3xf32>
    %652 = arith.select %643, %650, %651 : vector<8x3xi1>, vector<8x3xf32>
    %653 = arith.addf %641, %652 : vector<8x3xf32>
    %c2_i32_230 = arith.constant 2 : i32
    %654 = vector.broadcast %c2_i32_230 : i32 to vector<8x3xi32>
    %655 = arith.cmpi eq, %17, %654 : vector<8x3xi32>
    %c2_231 = arith.constant 2 : index
    %c0_232 = arith.constant 0 : index
    %c0_233 = arith.constant 0 : index
    %656 = vector.load %arg14[%c2_231, %c0_232, %c0_233] : memref<3x8x64xf32, #tpu.memory_space<vmem>>, vector<1x8x64xf32>
    %657 = vector.shape_cast %656 : vector<1x8x64xf32> to vector<8x64xf32>
    %658 = arith.mulf %621, %657 : vector<8x64xf32>
    %cst_234 = arith.constant dense<0.000000e+00> : vector<8xf32>
    %659 = vector.multi_reduction <add>, %658, %cst_234 [1] : vector<8x64xf32> to vector<8xf32>
    %660 = vector.shape_cast %659 : vector<8xf32> to vector<8x1xf32>
    %cst_235 = arith.constant 0.000000e+00 : f32
    %661 = vector.shape_cast %660 : vector<8x1xf32> to vector<8x1xf32>
    %662 = vector.broadcast %661 : vector<8x1xf32> to vector<8x3xf32>
    %663 = vector.broadcast %cst_235 : f32 to vector<8x3xf32>
    %664 = arith.select %655, %662, %663 : vector<8x3xi1>, vector<8x3xf32>
    %665 = arith.addf %653, %664 : vector<8x3xf32>
    %cst_236 = arith.constant dense<0xFF800000> : vector<8xf32>
    %666 = vector.multi_reduction <maximumf>, %665, %cst_236 [1] : vector<8x3xf32> to vector<8xf32>
    %667 = vector.shape_cast %666 : vector<8xf32> to vector<8x1xf32>
    %668 = vector.broadcast %667 : vector<8x1xf32> to vector<8x3xf32>
    %669 = arith.subf %665, %668 : vector<8x3xf32>
    %670 = math.exp %669 : vector<8x3xf32>
    %cst_237 = arith.constant dense<0.000000e+00> : vector<8xf32>
    %671 = vector.multi_reduction <add>, %670, %cst_237 [1] : vector<8x3xf32> to vector<8xf32>
    %672 = vector.shape_cast %671 : vector<8xf32> to vector<8x1xf32>
    %673 = math.log %672 : vector<8x1xf32>
    %674 = vector.broadcast %673 : vector<8x1xf32> to vector<8x3xf32>
    %675 = arith.subf %669, %674 : vector<8x3xf32>
    %676 = vector.broadcast %672 : vector<8x1xf32> to vector<8x3xf32>
    %677 = arith.divf %670, %676 : vector<8x3xf32>
    %678 = arith.mulf %677, %675 : vector<8x3xf32>
    %cst_238 = arith.constant dense<0.000000e+00> : vector<8xf32>
    %679 = vector.multi_reduction <add>, %678, %cst_238 [1] : vector<8x3xf32> to vector<8xf32>
    %680 = vector.shape_cast %679 : vector<8xf32> to vector<8x1xf32>
    %cst_239 = arith.constant 0.000000e+00 : f32
    %681 = vector.broadcast %cst_239 : f32 to vector<8x1xf32>
    %682 = arith.subf %681, %680 : vector<8x1xf32>
    %c3_240 = arith.constant 3 : index
    %c0_241 = arith.constant 0 : index
    %c0_242 = arith.constant 0 : index
    %683 = vector.load %arg5[%c3_240, %c0_241, %c0_242] : memref<8x8x1xf32, #tpu.memory_space<vmem>>, vector<1x8x1xf32>
    %684 = vector.shape_cast %683 : vector<1x8x1xf32> to vector<8x1xf32>
    %685 = vector.extract_strided_slice %677 {offsets = [0, 0], sizes = [8, 1], strides = [1, 1]} : vector<8x3xf32> to vector<8x1xf32>
    %686 = arith.cmpf oge, %684, %685 : vector<8x1xf32>
    %687 = arith.extui %686 : vector<8x1xi1> to vector<8x1xi32>
    %688 = vector.extract_strided_slice %677 {offsets = [0, 1], sizes = [8, 1], strides = [1, 1]} : vector<8x3xf32> to vector<8x1xf32>
    %689 = arith.addf %685, %688 : vector<8x1xf32>
    %690 = arith.cmpf oge, %684, %689 : vector<8x1xf32>
    %691 = arith.extui %690 : vector<8x1xi1> to vector<8x1xi32>
    %692 = arith.addi %687, %691 : vector<8x1xi32>
    %693 = vector.broadcast %692 : vector<8x1xi32> to vector<8x3xi32>
    %694 = arith.cmpi eq, %17, %693 : vector<8x3xi32>
    %695 = arith.extui %694 : vector<8x3xi1> to vector<8x3xi32>
    %696 = arith.sitofp %695 : vector<8x3xi32> to vector<8x3xf32>
    %697 = arith.mulf %696, %675 : vector<8x3xf32>
    %cst_243 = arith.constant dense<0.000000e+00> : vector<8xf32>
    %698 = vector.multi_reduction <add>, %697, %cst_243 [1] : vector<8x3xf32> to vector<8xf32>
    %699 = vector.shape_cast %698 : vector<8xf32> to vector<8x1xf32>
    %c3_i32_244 = arith.constant 3 : i32
    %700 = arith.addi %16, %c3_i32_244 : i32
    %c2_i32_245 = arith.constant 2 : i32
    %701 = arith.minsi %700, %c2_i32_245 : i32
    %c3_i32_246 = arith.constant 3 : i32
    %702 = arith.cmpi slt, %700, %c3_i32_246 : i32
    %703 = arith.extui %702 : i1 to i32
    %704 = arith.sitofp %703 : i32 to f32
    %705 = arith.index_cast %701 : i32 to index
    %c0_247 = arith.constant 0 : index
    %c0_248 = arith.constant 0 : index
    %706 = vector.load %arg14[%705, %c0_247, %c0_248] : memref<3x8x64xf32, #tpu.memory_space<vmem>>, vector<1x8x64xf32>
    %707 = vector.shape_cast %706 : vector<1x8x64xf32> to vector<8x64xf32>
    %708 = vector.broadcast %704 : f32 to vector<8x64xf32>
    %709 = arith.mulf %708, %622 : vector<8x64xf32>
    %710 = arith.addf %707, %709 : vector<8x64xf32>
    %711 = arith.index_cast %701 : i32 to index
    %c0_249 = arith.constant 0 : index
    %c0_250 = arith.constant 0 : index
    %712 = vector.load %arg14[%711, %c0_249, %c0_250] : memref<3x8x64xf32, #tpu.memory_space<vmem>>, vector<1x8x64xf32>
    %713 = vector.shape_cast %712 : vector<1x8x64xf32> to vector<8x64xf32>
    %714 = vector.shape_cast %710 : vector<8x64xf32> to vector<1x8x64xf32>
    tpu.vector_store %arg14[%711, %c0_249, %c0_250], %714 {strides = array<i32>} : memref<3x8x64xf32, #tpu.memory_space<vmem>>, vector<1x8x64xf32>,
    %715 = arith.sitofp %692 : vector<8x1xi32> to vector<8x1xf32>
    %716 = vector.extract_strided_slice %677 {offsets = [0, 0], sizes = [8, 1], strides = [1, 1]} : vector<8x3xf32> to vector<8x1xf32>
    %717 = vector.extract_strided_slice %677 {offsets = [0, 1], sizes = [8, 1], strides = [1, 1]} : vector<8x3xf32> to vector<8x1xf32>
    %718 = vector.extract_strided_slice %677 {offsets = [0, 2], sizes = [8, 1], strides = [1, 1]} : vector<8x3xf32> to vector<8x1xf32>
    %c0_i32_251 = arith.constant 0 : i32
    %719 = vector.broadcast %c0_i32_251 : i32 to vector<8x128xi32>
    %720 = arith.cmpi eq, %18, %719 : vector<8x128xi32>
    %cst_252 = arith.constant 0.000000e+00 : f32
    %721 = vector.shape_cast %715 : vector<8x1xf32> to vector<8x1xf32>
    %722 = vector.broadcast %721 : vector<8x1xf32> to vector<8x128xf32>
    %723 = vector.broadcast %cst_252 : f32 to vector<8x128xf32>
    %724 = arith.select %720, %722, %723 : vector<8x128xi1>, vector<8x128xf32>
    %cst_253 = arith.constant 0.000000e+00 : f32
    %725 = vector.broadcast %cst_253 : f32 to vector<8x128xf32>
    %726 = arith.addf %725, %724 : vector<8x128xf32>
    %c1_i32_254 = arith.constant 1 : i32
    %727 = vector.broadcast %c1_i32_254 : i32 to vector<8x128xi32>
    %728 = arith.cmpi eq, %18, %727 : vector<8x128xi32>
    %cst_255 = arith.constant 0.000000e+00 : f32
    %729 = vector.shape_cast %699 : vector<8x1xf32> to vector<8x1xf32>
    %730 = vector.broadcast %729 : vector<8x1xf32> to vector<8x128xf32>
    %731 = vector.broadcast %cst_255 : f32 to vector<8x128xf32>
    %732 = arith.select %728, %730, %731 : vector<8x128xi1>, vector<8x128xf32>
    %733 = arith.addf %726, %732 : vector<8x128xf32>
    %c2_i32_256 = arith.constant 2 : i32
    %734 = vector.broadcast %c2_i32_256 : i32 to vector<8x128xi32>
    %735 = arith.cmpi eq, %18, %734 : vector<8x128xi32>
    %cst_257 = arith.constant 0.000000e+00 : f32
    %736 = vector.shape_cast %682 : vector<8x1xf32> to vector<8x1xf32>
    %737 = vector.broadcast %736 : vector<8x1xf32> to vector<8x128xf32>
    %738 = vector.broadcast %cst_257 : f32 to vector<8x128xf32>
    %739 = arith.select %735, %737, %738 : vector<8x128xi1>, vector<8x128xf32>
    %740 = arith.addf %733, %739 : vector<8x128xf32>
    %c3_i32_258 = arith.constant 3 : i32
    %741 = vector.broadcast %c3_i32_258 : i32 to vector<8x128xi32>
    %742 = arith.cmpi eq, %18, %741 : vector<8x128xi32>
    %cst_259 = arith.constant 0.000000e+00 : f32
    %743 = vector.shape_cast %628 : vector<8x1xf32> to vector<8x1xf32>
    %744 = vector.broadcast %743 : vector<8x1xf32> to vector<8x128xf32>
    %745 = vector.broadcast %cst_259 : f32 to vector<8x128xf32>
    %746 = arith.select %742, %744, %745 : vector<8x128xi1>, vector<8x128xf32>
    %747 = arith.addf %740, %746 : vector<8x128xf32>
    %c4_i32_260 = arith.constant 4 : i32
    %748 = vector.broadcast %c4_i32_260 : i32 to vector<8x128xi32>
    %749 = arith.cmpi eq, %18, %748 : vector<8x128xi32>
    %cst_261 = arith.constant 0.000000e+00 : f32
    %750 = vector.shape_cast %716 : vector<8x1xf32> to vector<8x1xf32>
    %751 = vector.broadcast %750 : vector<8x1xf32> to vector<8x128xf32>
    %752 = vector.broadcast %cst_261 : f32 to vector<8x128xf32>
    %753 = arith.select %749, %751, %752 : vector<8x128xi1>, vector<8x128xf32>
    %754 = arith.addf %747, %753 : vector<8x128xf32>
    %c5_i32_262 = arith.constant 5 : i32
    %755 = vector.broadcast %c5_i32_262 : i32 to vector<8x128xi32>
    %756 = arith.cmpi eq, %18, %755 : vector<8x128xi32>
    %cst_263 = arith.constant 0.000000e+00 : f32
    %757 = vector.shape_cast %717 : vector<8x1xf32> to vector<8x1xf32>
    %758 = vector.broadcast %757 : vector<8x1xf32> to vector<8x128xf32>
    %759 = vector.broadcast %cst_263 : f32 to vector<8x128xf32>
    %760 = arith.select %756, %758, %759 : vector<8x128xi1>, vector<8x128xf32>
    %761 = arith.addf %754, %760 : vector<8x128xf32>
    %c6_i32_264 = arith.constant 6 : i32
    %762 = vector.broadcast %c6_i32_264 : i32 to vector<8x128xi32>
    %763 = arith.cmpi eq, %18, %762 : vector<8x128xi32>
    %cst_265 = arith.constant 0.000000e+00 : f32
    %764 = vector.shape_cast %718 : vector<8x1xf32> to vector<8x1xf32>
    %765 = vector.broadcast %764 : vector<8x1xf32> to vector<8x128xf32>
    %766 = vector.broadcast %cst_265 : f32 to vector<8x128xf32>
    %767 = arith.select %763, %765, %766 : vector<8x128xi1>, vector<8x128xf32>
    %768 = arith.addf %761, %767 : vector<8x128xf32>
    %c3_266 = arith.constant 3 : index
    %c0_267 = arith.constant 0 : index
    %c0_268 = arith.constant 0 : index
    %769 = vector.load %arg12[%c3_266, %c0_267, %c0_268] : memref<8x8x128xf32, #tpu.memory_space<vmem>>, vector<1x8x128xf32>
    %770 = vector.shape_cast %769 : vector<1x8x128xf32> to vector<8x128xf32>
    %771 = vector.shape_cast %768 : vector<8x128xf32> to vector<1x8x128xf32>
    tpu.vector_store %arg12[%c3_266, %c0_267, %c0_268], %771 {strides = array<i32>} : memref<8x8x128xf32, #tpu.memory_space<vmem>>, vector<1x8x128xf32>,
    %c4 = arith.constant 4 : index
    %c0_269 = arith.constant 0 : index
    %c0_270 = arith.constant 0 : index
    %772 = vector.load %arg15[%c4, %c0_269, %c0_270] : memref<8x8x384xf32, #tpu.memory_space<vmem>>, vector<1x8x384xf32>
    %773 = vector.shape_cast %772 : vector<1x8x384xf32> to vector<8x384xf32>
    %774 = vector.extract_strided_slice %620 {offsets = [0, 0], sizes = [8, 384], strides = [1, 1]} : vector<8x512xf32> to vector<8x384xf32>
    %775 = vector.extract_strided_slice %773 {offsets = [0, 0], sizes = [8, 128], strides = [1, 1]} : vector<8x384xf32> to vector<8x128xf32>
    %776 = vector.extract_strided_slice %774 {offsets = [0, 0], sizes = [8, 128], strides = [1, 1]} : vector<8x384xf32> to vector<8x128xf32>
    %777 = arith.addf %775, %776 : vector<8x128xf32>
    %778 = arith.negf %777 : vector<8x128xf32>
    %779 = math.exp %778 : vector<8x128xf32>
    %cst_271 = arith.constant 1.000000e+00 : f32
    %780 = vector.broadcast %cst_271 : f32 to vector<8x128xf32>
    %781 = arith.addf %780, %779 : vector<8x128xf32>
    %782 = arith.divf %780, %781 : vector<8x128xf32>
    %783 = vector.extract_strided_slice %773 {offsets = [0, 128], sizes = [8, 128], strides = [1, 1]} : vector<8x384xf32> to vector<8x128xf32>
    %784 = vector.extract_strided_slice %774 {offsets = [0, 128], sizes = [8, 128], strides = [1, 1]} : vector<8x384xf32> to vector<8x128xf32>
    %785 = arith.addf %783, %784 : vector<8x128xf32>
    %786 = arith.negf %785 : vector<8x128xf32>
    %787 = math.exp %786 : vector<8x128xf32>
    %cst_272 = arith.constant 1.000000e+00 : f32
    %788 = vector.broadcast %cst_272 : f32 to vector<8x128xf32>
    %789 = arith.addf %788, %787 : vector<8x128xf32>
    %790 = arith.divf %788, %789 : vector<8x128xf32>
    %791 = vector.extract_strided_slice %773 {offsets = [0, 256], sizes = [8, 128], strides = [1, 1]} : vector<8x384xf32> to vector<8x128xf32>
    %792 = vector.extract_strided_slice %774 {offsets = [0, 256], sizes = [8, 128], strides = [1, 1]} : vector<8x384xf32> to vector<8x128xf32>
    %793 = arith.mulf %782, %792 : vector<8x128xf32>
    %794 = arith.addf %791, %793 : vector<8x128xf32>
    %795 = math.tanh %794 : vector<8x128xf32>
    %cst_273 = arith.constant 1.000000e+00 : f32
    %796 = vector.broadcast %cst_273 : f32 to vector<8x128xf32>
    %797 = arith.subf %796, %790 : vector<8x128xf32>
    %798 = arith.mulf %797, %795 : vector<8x128xf32>
    %799 = arith.mulf %790, %613 : vector<8x128xf32>
    %800 = arith.addf %798, %799 : vector<8x128xf32>
    %c4_274 = arith.constant 4 : index
    %c0_275 = arith.constant 0 : index
    %c0_276 = arith.constant 0 : index
    %801 = vector.load %arg13[%c4_274, %c0_275, %c0_276] : memref<8x8x128xf32, #tpu.memory_space<vmem>>, vector<1x8x128xf32>
    %802 = vector.shape_cast %801 : vector<1x8x128xf32> to vector<8x128xf32>
    %803 = vector.shape_cast %800 : vector<8x128xf32> to vector<1x8x128xf32>
    tpu.vector_store %arg13[%c4_274, %c0_275, %c0_276], %803 {strides = array<i32>} : memref<8x8x128xf32, #tpu.memory_space<vmem>>, vector<1x8x128xf32>,
    %804 = arith.truncf %800 : vector<8x128xf32> to vector<8x128xbf16>
    %cst_277 = arith.constant dense<0.000000e+00> : vector<8x512xf32>
    %805 = tpu.matmul %804, %12, %cst_277 {dimension_numbers = #tpu.dot_dimension_numbers<[1], [0], [0], [1], [0, 0, 1, 1], [], []>} : vector<8x128xbf16>, vector<128x512xbf16>, vector<8x512xf32> -> vector<8x512xf32>
    %806 = vector.broadcast %13 : vector<1x512xf32> to vector<8x512xf32>
    %807 = arith.addf %805, %806 : vector<8x512xf32>
    %808 = vector.extract_strided_slice %807 {offsets = [0, 384], sizes = [8, 64], strides = [1, 1]} : vector<8x512xf32> to vector<8x64xf32>
    %809 = vector.extract_strided_slice %807 {offsets = [0, 448], sizes = [8, 64], strides = [1, 1]} : vector<8x512xf32> to vector<8x64xf32>
    %810 = vector.broadcast %14 : vector<1x128xf32> to vector<8x128xf32>
    %811 = arith.mulf %800, %810 : vector<8x128xf32>
    %cst_278 = arith.constant dense<0.000000e+00> : vector<8xf32>
    %812 = vector.multi_reduction <add>, %811, %cst_278 [1] : vector<8x128xf32> to vector<8xf32>
    %813 = vector.shape_cast %812 : vector<8xf32> to vector<8x1xf32>
    %814 = vector.broadcast %15 : vector<1x1xf32> to vector<8x1xf32>
    %815 = arith.addf %813, %814 : vector<8x1xf32>
    %c0_i32_279 = arith.constant 0 : i32
    %816 = vector.broadcast %c0_i32_279 : i32 to vector<8x3xi32>
    %817 = arith.cmpi eq, %17, %816 : vector<8x3xi32>
    %c0_280 = arith.constant 0 : index
    %c0_281 = arith.constant 0 : index
    %c0_282 = arith.constant 0 : index
    %818 = vector.load %arg14[%c0_280, %c0_281, %c0_282] : memref<3x8x64xf32, #tpu.memory_space<vmem>>, vector<1x8x64xf32>
    %819 = vector.shape_cast %818 : vector<1x8x64xf32> to vector<8x64xf32>
    %820 = arith.mulf %808, %819 : vector<8x64xf32>
    %cst_283 = arith.constant dense<0.000000e+00> : vector<8xf32>
    %821 = vector.multi_reduction <add>, %820, %cst_283 [1] : vector<8x64xf32> to vector<8xf32>
    %822 = vector.shape_cast %821 : vector<8xf32> to vector<8x1xf32>
    %cst_284 = arith.constant 0.000000e+00 : f32
    %823 = vector.shape_cast %822 : vector<8x1xf32> to vector<8x1xf32>
    %824 = vector.broadcast %823 : vector<8x1xf32> to vector<8x3xf32>
    %825 = vector.broadcast %cst_284 : f32 to vector<8x3xf32>
    %826 = arith.select %817, %824, %825 : vector<8x3xi1>, vector<8x3xf32>
    %cst_285 = arith.constant 0.000000e+00 : f32
    %827 = vector.broadcast %cst_285 : f32 to vector<8x3xf32>
    %828 = arith.addf %827, %826 : vector<8x3xf32>
    %c1_i32_286 = arith.constant 1 : i32
    %829 = vector.broadcast %c1_i32_286 : i32 to vector<8x3xi32>
    %830 = arith.cmpi eq, %17, %829 : vector<8x3xi32>
    %c1_287 = arith.constant 1 : index
    %c0_288 = arith.constant 0 : index
    %c0_289 = arith.constant 0 : index
    %831 = vector.load %arg14[%c1_287, %c0_288, %c0_289] : memref<3x8x64xf32, #tpu.memory_space<vmem>>, vector<1x8x64xf32>
    %832 = vector.shape_cast %831 : vector<1x8x64xf32> to vector<8x64xf32>
    %833 = arith.mulf %808, %832 : vector<8x64xf32>
    %cst_290 = arith.constant dense<0.000000e+00> : vector<8xf32>
    %834 = vector.multi_reduction <add>, %833, %cst_290 [1] : vector<8x64xf32> to vector<8xf32>
    %835 = vector.shape_cast %834 : vector<8xf32> to vector<8x1xf32>
    %cst_291 = arith.constant 0.000000e+00 : f32
    %836 = vector.shape_cast %835 : vector<8x1xf32> to vector<8x1xf32>
    %837 = vector.broadcast %836 : vector<8x1xf32> to vector<8x3xf32>
    %838 = vector.broadcast %cst_291 : f32 to vector<8x3xf32>
    %839 = arith.select %830, %837, %838 : vector<8x3xi1>, vector<8x3xf32>
    %840 = arith.addf %828, %839 : vector<8x3xf32>
    %c2_i32_292 = arith.constant 2 : i32
    %841 = vector.broadcast %c2_i32_292 : i32 to vector<8x3xi32>
    %842 = arith.cmpi eq, %17, %841 : vector<8x3xi32>
    %c2_293 = arith.constant 2 : index
    %c0_294 = arith.constant 0 : index
    %c0_295 = arith.constant 0 : index
    %843 = vector.load %arg14[%c2_293, %c0_294, %c0_295] : memref<3x8x64xf32, #tpu.memory_space<vmem>>, vector<1x8x64xf32>
    %844 = vector.shape_cast %843 : vector<1x8x64xf32> to vector<8x64xf32>
    %845 = arith.mulf %808, %844 : vector<8x64xf32>
    %cst_296 = arith.constant dense<0.000000e+00> : vector<8xf32>
    %846 = vector.multi_reduction <add>, %845, %cst_296 [1] : vector<8x64xf32> to vector<8xf32>
    %847 = vector.shape_cast %846 : vector<8xf32> to vector<8x1xf32>
    %cst_297 = arith.constant 0.000000e+00 : f32
    %848 = vector.shape_cast %847 : vector<8x1xf32> to vector<8x1xf32>
    %849 = vector.broadcast %848 : vector<8x1xf32> to vector<8x3xf32>
    %850 = vector.broadcast %cst_297 : f32 to vector<8x3xf32>
    %851 = arith.select %842, %849, %850 : vector<8x3xi1>, vector<8x3xf32>
    %852 = arith.addf %840, %851 : vector<8x3xf32>
    %cst_298 = arith.constant dense<0xFF800000> : vector<8xf32>
    %853 = vector.multi_reduction <maximumf>, %852, %cst_298 [1] : vector<8x3xf32> to vector<8xf32>
    %854 = vector.shape_cast %853 : vector<8xf32> to vector<8x1xf32>
    %855 = vector.broadcast %854 : vector<8x1xf32> to vector<8x3xf32>
    %856 = arith.subf %852, %855 : vector<8x3xf32>
    %857 = math.exp %856 : vector<8x3xf32>
    %cst_299 = arith.constant dense<0.000000e+00> : vector<8xf32>
    %858 = vector.multi_reduction <add>, %857, %cst_299 [1] : vector<8x3xf32> to vector<8xf32>
    %859 = vector.shape_cast %858 : vector<8xf32> to vector<8x1xf32>
    %860 = math.log %859 : vector<8x1xf32>
    %861 = vector.broadcast %860 : vector<8x1xf32> to vector<8x3xf32>
    %862 = arith.subf %856, %861 : vector<8x3xf32>
    %863 = vector.broadcast %859 : vector<8x1xf32> to vector<8x3xf32>
    %864 = arith.divf %857, %863 : vector<8x3xf32>
    %865 = arith.mulf %864, %862 : vector<8x3xf32>
    %cst_300 = arith.constant dense<0.000000e+00> : vector<8xf32>
    %866 = vector.multi_reduction <add>, %865, %cst_300 [1] : vector<8x3xf32> to vector<8xf32>
    %867 = vector.shape_cast %866 : vector<8xf32> to vector<8x1xf32>
    %cst_301 = arith.constant 0.000000e+00 : f32
    %868 = vector.broadcast %cst_301 : f32 to vector<8x1xf32>
    %869 = arith.subf %868, %867 : vector<8x1xf32>
    %c4_302 = arith.constant 4 : index
    %c0_303 = arith.constant 0 : index
    %c0_304 = arith.constant 0 : index
    %870 = vector.load %arg5[%c4_302, %c0_303, %c0_304] : memref<8x8x1xf32, #tpu.memory_space<vmem>>, vector<1x8x1xf32>
    %871 = vector.shape_cast %870 : vector<1x8x1xf32> to vector<8x1xf32>
    %872 = vector.extract_strided_slice %864 {offsets = [0, 0], sizes = [8, 1], strides = [1, 1]} : vector<8x3xf32> to vector<8x1xf32>
    %873 = arith.cmpf oge, %871, %872 : vector<8x1xf32>
    %874 = arith.extui %873 : vector<8x1xi1> to vector<8x1xi32>
    %875 = vector.extract_strided_slice %864 {offsets = [0, 1], sizes = [8, 1], strides = [1, 1]} : vector<8x3xf32> to vector<8x1xf32>
    %876 = arith.addf %872, %875 : vector<8x1xf32>
    %877 = arith.cmpf oge, %871, %876 : vector<8x1xf32>
    %878 = arith.extui %877 : vector<8x1xi1> to vector<8x1xi32>
    %879 = arith.addi %874, %878 : vector<8x1xi32>
    %880 = vector.broadcast %879 : vector<8x1xi32> to vector<8x3xi32>
    %881 = arith.cmpi eq, %17, %880 : vector<8x3xi32>
    %882 = arith.extui %881 : vector<8x3xi1> to vector<8x3xi32>
    %883 = arith.sitofp %882 : vector<8x3xi32> to vector<8x3xf32>
    %884 = arith.mulf %883, %862 : vector<8x3xf32>
    %cst_305 = arith.constant dense<0.000000e+00> : vector<8xf32>
    %885 = vector.multi_reduction <add>, %884, %cst_305 [1] : vector<8x3xf32> to vector<8xf32>
    %886 = vector.shape_cast %885 : vector<8xf32> to vector<8x1xf32>
    %c4_i32_306 = arith.constant 4 : i32
    %887 = arith.addi %16, %c4_i32_306 : i32
    %c2_i32_307 = arith.constant 2 : i32
    %888 = arith.minsi %887, %c2_i32_307 : i32
    %c3_i32_308 = arith.constant 3 : i32
    %889 = arith.cmpi slt, %887, %c3_i32_308 : i32
    %890 = arith.extui %889 : i1 to i32
    %891 = arith.sitofp %890 : i32 to f32
    %892 = arith.index_cast %888 : i32 to index
    %c0_309 = arith.constant 0 : index
    %c0_310 = arith.constant 0 : index
    %893 = vector.load %arg14[%892, %c0_309, %c0_310] : memref<3x8x64xf32, #tpu.memory_space<vmem>>, vector<1x8x64xf32>
    %894 = vector.shape_cast %893 : vector<1x8x64xf32> to vector<8x64xf32>
    %895 = vector.broadcast %891 : f32 to vector<8x64xf32>
    %896 = arith.mulf %895, %809 : vector<8x64xf32>
    %897 = arith.addf %894, %896 : vector<8x64xf32>
    %898 = arith.index_cast %888 : i32 to index
    %c0_311 = arith.constant 0 : index
    %c0_312 = arith.constant 0 : index
    %899 = vector.load %arg14[%898, %c0_311, %c0_312] : memref<3x8x64xf32, #tpu.memory_space<vmem>>, vector<1x8x64xf32>
    %900 = vector.shape_cast %899 : vector<1x8x64xf32> to vector<8x64xf32>
    %901 = vector.shape_cast %897 : vector<8x64xf32> to vector<1x8x64xf32>
    tpu.vector_store %arg14[%898, %c0_311, %c0_312], %901 {strides = array<i32>} : memref<3x8x64xf32, #tpu.memory_space<vmem>>, vector<1x8x64xf32>,
    %902 = arith.sitofp %879 : vector<8x1xi32> to vector<8x1xf32>
    %903 = vector.extract_strided_slice %864 {offsets = [0, 0], sizes = [8, 1], strides = [1, 1]} : vector<8x3xf32> to vector<8x1xf32>
    %904 = vector.extract_strided_slice %864 {offsets = [0, 1], sizes = [8, 1], strides = [1, 1]} : vector<8x3xf32> to vector<8x1xf32>
    %905 = vector.extract_strided_slice %864 {offsets = [0, 2], sizes = [8, 1], strides = [1, 1]} : vector<8x3xf32> to vector<8x1xf32>
    %c0_i32_313 = arith.constant 0 : i32
    %906 = vector.broadcast %c0_i32_313 : i32 to vector<8x128xi32>
    %907 = arith.cmpi eq, %18, %906 : vector<8x128xi32>
    %cst_314 = arith.constant 0.000000e+00 : f32
    %908 = vector.shape_cast %902 : vector<8x1xf32> to vector<8x1xf32>
    %909 = vector.broadcast %908 : vector<8x1xf32> to vector<8x128xf32>
    %910 = vector.broadcast %cst_314 : f32 to vector<8x128xf32>
    %911 = arith.select %907, %909, %910 : vector<8x128xi1>, vector<8x128xf32>
    %cst_315 = arith.constant 0.000000e+00 : f32
    %912 = vector.broadcast %cst_315 : f32 to vector<8x128xf32>
    %913 = arith.addf %912, %911 : vector<8x128xf32>
    %c1_i32_316 = arith.constant 1 : i32
    %914 = vector.broadcast %c1_i32_316 : i32 to vector<8x128xi32>
    %915 = arith.cmpi eq, %18, %914 : vector<8x128xi32>
    %cst_317 = arith.constant 0.000000e+00 : f32
    %916 = vector.shape_cast %886 : vector<8x1xf32> to vector<8x1xf32>
    %917 = vector.broadcast %916 : vector<8x1xf32> to vector<8x128xf32>
    %918 = vector.broadcast %cst_317 : f32 to vector<8x128xf32>
    %919 = arith.select %915, %917, %918 : vector<8x128xi1>, vector<8x128xf32>
    %920 = arith.addf %913, %919 : vector<8x128xf32>
    %c2_i32_318 = arith.constant 2 : i32
    %921 = vector.broadcast %c2_i32_318 : i32 to vector<8x128xi32>
    %922 = arith.cmpi eq, %18, %921 : vector<8x128xi32>
    %cst_319 = arith.constant 0.000000e+00 : f32
    %923 = vector.shape_cast %869 : vector<8x1xf32> to vector<8x1xf32>
    %924 = vector.broadcast %923 : vector<8x1xf32> to vector<8x128xf32>
    %925 = vector.broadcast %cst_319 : f32 to vector<8x128xf32>
    %926 = arith.select %922, %924, %925 : vector<8x128xi1>, vector<8x128xf32>
    %927 = arith.addf %920, %926 : vector<8x128xf32>
    %c3_i32_320 = arith.constant 3 : i32
    %928 = vector.broadcast %c3_i32_320 : i32 to vector<8x128xi32>
    %929 = arith.cmpi eq, %18, %928 : vector<8x128xi32>
    %cst_321 = arith.constant 0.000000e+00 : f32
    %930 = vector.shape_cast %815 : vector<8x1xf32> to vector<8x1xf32>
    %931 = vector.broadcast %930 : vector<8x1xf32> to vector<8x128xf32>
    %932 = vector.broadcast %cst_321 : f32 to vector<8x128xf32>
    %933 = arith.select %929, %931, %932 : vector<8x128xi1>, vector<8x128xf32>
    %934 = arith.addf %927, %933 : vector<8x128xf32>
    %c4_i32_322 = arith.constant 4 : i32
    %935 = vector.broadcast %c4_i32_322 : i32 to vector<8x128xi32>
    %936 = arith.cmpi eq, %18, %935 : vector<8x128xi32>
    %cst_323 = arith.constant 0.000000e+00 : f32
    %937 = vector.shape_cast %903 : vector<8x1xf32> to vector<8x1xf32>
    %938 = vector.broadcast %937 : vector<8x1xf32> to vector<8x128xf32>
    %939 = vector.broadcast %cst_323 : f32 to vector<8x128xf32>
    %940 = arith.select %936, %938, %939 : vector<8x128xi1>, vector<8x128xf32>
    %941 = arith.addf %934, %940 : vector<8x128xf32>
    %c5_i32_324 = arith.constant 5 : i32
    %942 = vector.broadcast %c5_i32_324 : i32 to vector<8x128xi32>
    %943 = arith.cmpi eq, %18, %942 : vector<8x128xi32>
    %cst_325 = arith.constant 0.000000e+00 : f32
    %944 = vector.shape_cast %904 : vector<8x1xf32> to vector<8x1xf32>
    %945 = vector.broadcast %944 : vector<8x1xf32> to vector<8x128xf32>
    %946 = vector.broadcast %cst_325 : f32 to vector<8x128xf32>
    %947 = arith.select %943, %945, %946 : vector<8x128xi1>, vector<8x128xf32>
    %948 = arith.addf %941, %947 : vector<8x128xf32>
    %c6_i32_326 = arith.constant 6 : i32
    %949 = vector.broadcast %c6_i32_326 : i32 to vector<8x128xi32>
    %950 = arith.cmpi eq, %18, %949 : vector<8x128xi32>
    %cst_327 = arith.constant 0.000000e+00 : f32
    %951 = vector.shape_cast %905 : vector<8x1xf32> to vector<8x1xf32>
    %952 = vector.broadcast %951 : vector<8x1xf32> to vector<8x128xf32>
    %953 = vector.broadcast %cst_327 : f32 to vector<8x128xf32>
    %954 = arith.select %950, %952, %953 : vector<8x128xi1>, vector<8x128xf32>
    %955 = arith.addf %948, %954 : vector<8x128xf32>
    %c4_328 = arith.constant 4 : index
    %c0_329 = arith.constant 0 : index
    %c0_330 = arith.constant 0 : index
    %956 = vector.load %arg12[%c4_328, %c0_329, %c0_330] : memref<8x8x128xf32, #tpu.memory_space<vmem>>, vector<1x8x128xf32>
    %957 = vector.shape_cast %956 : vector<1x8x128xf32> to vector<8x128xf32>
    %958 = vector.shape_cast %955 : vector<8x128xf32> to vector<1x8x128xf32>
    tpu.vector_store %arg12[%c4_328, %c0_329, %c0_330], %958 {strides = array<i32>} : memref<8x8x128xf32, #tpu.memory_space<vmem>>, vector<1x8x128xf32>,
    %c5 = arith.constant 5 : index
    %c0_331 = arith.constant 0 : index
    %c0_332 = arith.constant 0 : index
    %959 = vector.load %arg15[%c5, %c0_331, %c0_332] : memref<8x8x384xf32, #tpu.memory_space<vmem>>, vector<1x8x384xf32>
    %960 = vector.shape_cast %959 : vector<1x8x384xf32> to vector<8x384xf32>
    %961 = vector.extract_strided_slice %807 {offsets = [0, 0], sizes = [8, 384], strides = [1, 1]} : vector<8x512xf32> to vector<8x384xf32>
    %962 = vector.extract_strided_slice %960 {offsets = [0, 0], sizes = [8, 128], strides = [1, 1]} : vector<8x384xf32> to vector<8x128xf32>
    %963 = vector.extract_strided_slice %961 {offsets = [0, 0], sizes = [8, 128], strides = [1, 1]} : vector<8x384xf32> to vector<8x128xf32>
    %964 = arith.addf %962, %963 : vector<8x128xf32>
    %965 = arith.negf %964 : vector<8x128xf32>
    %966 = math.exp %965 : vector<8x128xf32>
    %cst_333 = arith.constant 1.000000e+00 : f32
    %967 = vector.broadcast %cst_333 : f32 to vector<8x128xf32>
    %968 = arith.addf %967, %966 : vector<8x128xf32>
    %969 = arith.divf %967, %968 : vector<8x128xf32>
    %970 = vector.extract_strided_slice %960 {offsets = [0, 128], sizes = [8, 128], strides = [1, 1]} : vector<8x384xf32> to vector<8x128xf32>
    %971 = vector.extract_strided_slice %961 {offsets = [0, 128], sizes = [8, 128], strides = [1, 1]} : vector<8x384xf32> to vector<8x128xf32>
    %972 = arith.addf %970, %971 : vector<8x128xf32>
    %973 = arith.negf %972 : vector<8x128xf32>
    %974 = math.exp %973 : vector<8x128xf32>
    %cst_334 = arith.constant 1.000000e+00 : f32
    %975 = vector.broadcast %cst_334 : f32 to vector<8x128xf32>
    %976 = arith.addf %975, %974 : vector<8x128xf32>
    %977 = arith.divf %975, %976 : vector<8x128xf32>
    %978 = vector.extract_strided_slice %960 {offsets = [0, 256], sizes = [8, 128], strides = [1, 1]} : vector<8x384xf32> to vector<8x128xf32>
    %979 = vector.extract_strided_slice %961 {offsets = [0, 256], sizes = [8, 128], strides = [1, 1]} : vector<8x384xf32> to vector<8x128xf32>
    %980 = arith.mulf %969, %979 : vector<8x128xf32>
    %981 = arith.addf %978, %980 : vector<8x128xf32>
    %982 = math.tanh %981 : vector<8x128xf32>
    %cst_335 = arith.constant 1.000000e+00 : f32
    %983 = vector.broadcast %cst_335 : f32 to vector<8x128xf32>
    %984 = arith.subf %983, %977 : vector<8x128xf32>
    %985 = arith.mulf %984, %982 : vector<8x128xf32>
    %986 = arith.mulf %977, %800 : vector<8x128xf32>
    %987 = arith.addf %985, %986 : vector<8x128xf32>
    %c5_336 = arith.constant 5 : index
    %c0_337 = arith.constant 0 : index
    %c0_338 = arith.constant 0 : index
    %988 = vector.load %arg13[%c5_336, %c0_337, %c0_338] : memref<8x8x128xf32, #tpu.memory_space<vmem>>, vector<1x8x128xf32>
    %989 = vector.shape_cast %988 : vector<1x8x128xf32> to vector<8x128xf32>
    %990 = vector.shape_cast %987 : vector<8x128xf32> to vector<1x8x128xf32>
    tpu.vector_store %arg13[%c5_336, %c0_337, %c0_338], %990 {strides = array<i32>} : memref<8x8x128xf32, #tpu.memory_space<vmem>>, vector<1x8x128xf32>,
    %991 = arith.truncf %987 : vector<8x128xf32> to vector<8x128xbf16>
    %cst_339 = arith.constant dense<0.000000e+00> : vector<8x512xf32>
    %992 = tpu.matmul %991, %12, %cst_339 {dimension_numbers = #tpu.dot_dimension_numbers<[1], [0], [0], [1], [0, 0, 1, 1], [], []>} : vector<8x128xbf16>, vector<128x512xbf16>, vector<8x512xf32> -> vector<8x512xf32>
    %993 = vector.broadcast %13 : vector<1x512xf32> to vector<8x512xf32>
    %994 = arith.addf %992, %993 : vector<8x512xf32>
    %995 = vector.extract_strided_slice %994 {offsets = [0, 384], sizes = [8, 64], strides = [1, 1]} : vector<8x512xf32> to vector<8x64xf32>
    %996 = vector.extract_strided_slice %994 {offsets = [0, 448], sizes = [8, 64], strides = [1, 1]} : vector<8x512xf32> to vector<8x64xf32>
    %997 = vector.broadcast %14 : vector<1x128xf32> to vector<8x128xf32>
    %998 = arith.mulf %987, %997 : vector<8x128xf32>
    %cst_340 = arith.constant dense<0.000000e+00> : vector<8xf32>
    %999 = vector.multi_reduction <add>, %998, %cst_340 [1] : vector<8x128xf32> to vector<8xf32>
    %1000 = vector.shape_cast %999 : vector<8xf32> to vector<8x1xf32>
    %1001 = vector.broadcast %15 : vector<1x1xf32> to vector<8x1xf32>
    %1002 = arith.addf %1000, %1001 : vector<8x1xf32>
    %c0_i32_341 = arith.constant 0 : i32
    %1003 = vector.broadcast %c0_i32_341 : i32 to vector<8x3xi32>
    %1004 = arith.cmpi eq, %17, %1003 : vector<8x3xi32>
    %c0_342 = arith.constant 0 : index
    %c0_343 = arith.constant 0 : index
    %c0_344 = arith.constant 0 : index
    %1005 = vector.load %arg14[%c0_342, %c0_343, %c0_344] : memref<3x8x64xf32, #tpu.memory_space<vmem>>, vector<1x8x64xf32>
    %1006 = vector.shape_cast %1005 : vector<1x8x64xf32> to vector<8x64xf32>
    %1007 = arith.mulf %995, %1006 : vector<8x64xf32>
    %cst_345 = arith.constant dense<0.000000e+00> : vector<8xf32>
    %1008 = vector.multi_reduction <add>, %1007, %cst_345 [1] : vector<8x64xf32> to vector<8xf32>
    %1009 = vector.shape_cast %1008 : vector<8xf32> to vector<8x1xf32>
    %cst_346 = arith.constant 0.000000e+00 : f32
    %1010 = vector.shape_cast %1009 : vector<8x1xf32> to vector<8x1xf32>
    %1011 = vector.broadcast %1010 : vector<8x1xf32> to vector<8x3xf32>
    %1012 = vector.broadcast %cst_346 : f32 to vector<8x3xf32>
    %1013 = arith.select %1004, %1011, %1012 : vector<8x3xi1>, vector<8x3xf32>
    %cst_347 = arith.constant 0.000000e+00 : f32
    %1014 = vector.broadcast %cst_347 : f32 to vector<8x3xf32>
    %1015 = arith.addf %1014, %1013 : vector<8x3xf32>
    %c1_i32_348 = arith.constant 1 : i32
    %1016 = vector.broadcast %c1_i32_348 : i32 to vector<8x3xi32>
    %1017 = arith.cmpi eq, %17, %1016 : vector<8x3xi32>
    %c1_349 = arith.constant 1 : index
    %c0_350 = arith.constant 0 : index
    %c0_351 = arith.constant 0 : index
    %1018 = vector.load %arg14[%c1_349, %c0_350, %c0_351] : memref<3x8x64xf32, #tpu.memory_space<vmem>>, vector<1x8x64xf32>
    %1019 = vector.shape_cast %1018 : vector<1x8x64xf32> to vector<8x64xf32>
    %1020 = arith.mulf %995, %1019 : vector<8x64xf32>
    %cst_352 = arith.constant dense<0.000000e+00> : vector<8xf32>
    %1021 = vector.multi_reduction <add>, %1020, %cst_352 [1] : vector<8x64xf32> to vector<8xf32>
    %1022 = vector.shape_cast %1021 : vector<8xf32> to vector<8x1xf32>
    %cst_353 = arith.constant 0.000000e+00 : f32
    %1023 = vector.shape_cast %1022 : vector<8x1xf32> to vector<8x1xf32>
    %1024 = vector.broadcast %1023 : vector<8x1xf32> to vector<8x3xf32>
    %1025 = vector.broadcast %cst_353 : f32 to vector<8x3xf32>
    %1026 = arith.select %1017, %1024, %1025 : vector<8x3xi1>, vector<8x3xf32>
    %1027 = arith.addf %1015, %1026 : vector<8x3xf32>
    %c2_i32_354 = arith.constant 2 : i32
    %1028 = vector.broadcast %c2_i32_354 : i32 to vector<8x3xi32>
    %1029 = arith.cmpi eq, %17, %1028 : vector<8x3xi32>
    %c2_355 = arith.constant 2 : index
    %c0_356 = arith.constant 0 : index
    %c0_357 = arith.constant 0 : index
    %1030 = vector.load %arg14[%c2_355, %c0_356, %c0_357] : memref<3x8x64xf32, #tpu.memory_space<vmem>>, vector<1x8x64xf32>
    %1031 = vector.shape_cast %1030 : vector<1x8x64xf32> to vector<8x64xf32>
    %1032 = arith.mulf %995, %1031 : vector<8x64xf32>
    %cst_358 = arith.constant dense<0.000000e+00> : vector<8xf32>
    %1033 = vector.multi_reduction <add>, %1032, %cst_358 [1] : vector<8x64xf32> to vector<8xf32>
    %1034 = vector.shape_cast %1033 : vector<8xf32> to vector<8x1xf32>
    %cst_359 = arith.constant 0.000000e+00 : f32
    %1035 = vector.shape_cast %1034 : vector<8x1xf32> to vector<8x1xf32>
    %1036 = vector.broadcast %1035 : vector<8x1xf32> to vector<8x3xf32>
    %1037 = vector.broadcast %cst_359 : f32 to vector<8x3xf32>
    %1038 = arith.select %1029, %1036, %1037 : vector<8x3xi1>, vector<8x3xf32>
    %1039 = arith.addf %1027, %1038 : vector<8x3xf32>
    %cst_360 = arith.constant dense<0xFF800000> : vector<8xf32>
    %1040 = vector.multi_reduction <maximumf>, %1039, %cst_360 [1] : vector<8x3xf32> to vector<8xf32>
    %1041 = vector.shape_cast %1040 : vector<8xf32> to vector<8x1xf32>
    %1042 = vector.broadcast %1041 : vector<8x1xf32> to vector<8x3xf32>
    %1043 = arith.subf %1039, %1042 : vector<8x3xf32>
    %1044 = math.exp %1043 : vector<8x3xf32>
    %cst_361 = arith.constant dense<0.000000e+00> : vector<8xf32>
    %1045 = vector.multi_reduction <add>, %1044, %cst_361 [1] : vector<8x3xf32> to vector<8xf32>
    %1046 = vector.shape_cast %1045 : vector<8xf32> to vector<8x1xf32>
    %1047 = math.log %1046 : vector<8x1xf32>
    %1048 = vector.broadcast %1047 : vector<8x1xf32> to vector<8x3xf32>
    %1049 = arith.subf %1043, %1048 : vector<8x3xf32>
    %1050 = vector.broadcast %1046 : vector<8x1xf32> to vector<8x3xf32>
    %1051 = arith.divf %1044, %1050 : vector<8x3xf32>
    %1052 = arith.mulf %1051, %1049 : vector<8x3xf32>
    %cst_362 = arith.constant dense<0.000000e+00> : vector<8xf32>
    %1053 = vector.multi_reduction <add>, %1052, %cst_362 [1] : vector<8x3xf32> to vector<8xf32>
    %1054 = vector.shape_cast %1053 : vector<8xf32> to vector<8x1xf32>
    %cst_363 = arith.constant 0.000000e+00 : f32
    %1055 = vector.broadcast %cst_363 : f32 to vector<8x1xf32>
    %1056 = arith.subf %1055, %1054 : vector<8x1xf32>
    %c5_364 = arith.constant 5 : index
    %c0_365 = arith.constant 0 : index
    %c0_366 = arith.constant 0 : index
    %1057 = vector.load %arg5[%c5_364, %c0_365, %c0_366] : memref<8x8x1xf32, #tpu.memory_space<vmem>>, vector<1x8x1xf32>
    %1058 = vector.shape_cast %1057 : vector<1x8x1xf32> to vector<8x1xf32>
    %1059 = vector.extract_strided_slice %1051 {offsets = [0, 0], sizes = [8, 1], strides = [1, 1]} : vector<8x3xf32> to vector<8x1xf32>
    %1060 = arith.cmpf oge, %1058, %1059 : vector<8x1xf32>
    %1061 = arith.extui %1060 : vector<8x1xi1> to vector<8x1xi32>
    %1062 = vector.extract_strided_slice %1051 {offsets = [0, 1], sizes = [8, 1], strides = [1, 1]} : vector<8x3xf32> to vector<8x1xf32>
    %1063 = arith.addf %1059, %1062 : vector<8x1xf32>
    %1064 = arith.cmpf oge, %1058, %1063 : vector<8x1xf32>
    %1065 = arith.extui %1064 : vector<8x1xi1> to vector<8x1xi32>
    %1066 = arith.addi %1061, %1065 : vector<8x1xi32>
    %1067 = vector.broadcast %1066 : vector<8x1xi32> to vector<8x3xi32>
    %1068 = arith.cmpi eq, %17, %1067 : vector<8x3xi32>
    %1069 = arith.extui %1068 : vector<8x3xi1> to vector<8x3xi32>
    %1070 = arith.sitofp %1069 : vector<8x3xi32> to vector<8x3xf32>
    %1071 = arith.mulf %1070, %1049 : vector<8x3xf32>
    %cst_367 = arith.constant dense<0.000000e+00> : vector<8xf32>
    %1072 = vector.multi_reduction <add>, %1071, %cst_367 [1] : vector<8x3xf32> to vector<8xf32>
    %1073 = vector.shape_cast %1072 : vector<8xf32> to vector<8x1xf32>
    %c5_i32_368 = arith.constant 5 : i32
    %1074 = arith.addi %16, %c5_i32_368 : i32
    %c2_i32_369 = arith.constant 2 : i32
    %1075 = arith.minsi %1074, %c2_i32_369 : i32
    %c3_i32_370 = arith.constant 3 : i32
    %1076 = arith.cmpi slt, %1074, %c3_i32_370 : i32
    %1077 = arith.extui %1076 : i1 to i32
    %1078 = arith.sitofp %1077 : i32 to f32
    %1079 = arith.index_cast %1075 : i32 to index
    %c0_371 = arith.constant 0 : index
    %c0_372 = arith.constant 0 : index
    %1080 = vector.load %arg14[%1079, %c0_371, %c0_372] : memref<3x8x64xf32, #tpu.memory_space<vmem>>, vector<1x8x64xf32>
    %1081 = vector.shape_cast %1080 : vector<1x8x64xf32> to vector<8x64xf32>
    %1082 = vector.broadcast %1078 : f32 to vector<8x64xf32>
    %1083 = arith.mulf %1082, %996 : vector<8x64xf32>
    %1084 = arith.addf %1081, %1083 : vector<8x64xf32>
    %1085 = arith.index_cast %1075 : i32 to index
    %c0_373 = arith.constant 0 : index
    %c0_374 = arith.constant 0 : index
    %1086 = vector.load %arg14[%1085, %c0_373, %c0_374] : memref<3x8x64xf32, #tpu.memory_space<vmem>>, vector<1x8x64xf32>
    %1087 = vector.shape_cast %1086 : vector<1x8x64xf32> to vector<8x64xf32>
    %1088 = vector.shape_cast %1084 : vector<8x64xf32> to vector<1x8x64xf32>
    tpu.vector_store %arg14[%1085, %c0_373, %c0_374], %1088 {strides = array<i32>} : memref<3x8x64xf32, #tpu.memory_space<vmem>>, vector<1x8x64xf32>,
    %1089 = arith.sitofp %1066 : vector<8x1xi32> to vector<8x1xf32>
    %1090 = vector.extract_strided_slice %1051 {offsets = [0, 0], sizes = [8, 1], strides = [1, 1]} : vector<8x3xf32> to vector<8x1xf32>
    %1091 = vector.extract_strided_slice %1051 {offsets = [0, 1], sizes = [8, 1], strides = [1, 1]} : vector<8x3xf32> to vector<8x1xf32>
    %1092 = vector.extract_strided_slice %1051 {offsets = [0, 2], sizes = [8, 1], strides = [1, 1]} : vector<8x3xf32> to vector<8x1xf32>
    %c0_i32_375 = arith.constant 0 : i32
    %1093 = vector.broadcast %c0_i32_375 : i32 to vector<8x128xi32>
    %1094 = arith.cmpi eq, %18, %1093 : vector<8x128xi32>
    %cst_376 = arith.constant 0.000000e+00 : f32
    %1095 = vector.shape_cast %1089 : vector<8x1xf32> to vector<8x1xf32>
    %1096 = vector.broadcast %1095 : vector<8x1xf32> to vector<8x128xf32>
    %1097 = vector.broadcast %cst_376 : f32 to vector<8x128xf32>
    %1098 = arith.select %1094, %1096, %1097 : vector<8x128xi1>, vector<8x128xf32>
    %cst_377 = arith.constant 0.000000e+00 : f32
    %1099 = vector.broadcast %cst_377 : f32 to vector<8x128xf32>
    %1100 = arith.addf %1099, %1098 : vector<8x128xf32>
    %c1_i32_378 = arith.constant 1 : i32
    %1101 = vector.broadcast %c1_i32_378 : i32 to vector<8x128xi32>
    %1102 = arith.cmpi eq, %18, %1101 : vector<8x128xi32>
    %cst_379 = arith.constant 0.000000e+00 : f32
    %1103 = vector.shape_cast %1073 : vector<8x1xf32> to vector<8x1xf32>
    %1104 = vector.broadcast %1103 : vector<8x1xf32> to vector<8x128xf32>
    %1105 = vector.broadcast %cst_379 : f32 to vector<8x128xf32>
    %1106 = arith.select %1102, %1104, %1105 : vector<8x128xi1>, vector<8x128xf32>
    %1107 = arith.addf %1100, %1106 : vector<8x128xf32>
    %c2_i32_380 = arith.constant 2 : i32
    %1108 = vector.broadcast %c2_i32_380 : i32 to vector<8x128xi32>
    %1109 = arith.cmpi eq, %18, %1108 : vector<8x128xi32>
    %cst_381 = arith.constant 0.000000e+00 : f32
    %1110 = vector.shape_cast %1056 : vector<8x1xf32> to vector<8x1xf32>
    %1111 = vector.broadcast %1110 : vector<8x1xf32> to vector<8x128xf32>
    %1112 = vector.broadcast %cst_381 : f32 to vector<8x128xf32>
    %1113 = arith.select %1109, %1111, %1112 : vector<8x128xi1>, vector<8x128xf32>
    %1114 = arith.addf %1107, %1113 : vector<8x128xf32>
    %c3_i32_382 = arith.constant 3 : i32
    %1115 = vector.broadcast %c3_i32_382 : i32 to vector<8x128xi32>
    %1116 = arith.cmpi eq, %18, %1115 : vector<8x128xi32>
    %cst_383 = arith.constant 0.000000e+00 : f32
    %1117 = vector.shape_cast %1002 : vector<8x1xf32> to vector<8x1xf32>
    %1118 = vector.broadcast %1117 : vector<8x1xf32> to vector<8x128xf32>
    %1119 = vector.broadcast %cst_383 : f32 to vector<8x128xf32>
    %1120 = arith.select %1116, %1118, %1119 : vector<8x128xi1>, vector<8x128xf32>
    %1121 = arith.addf %1114, %1120 : vector<8x128xf32>
    %c4_i32_384 = arith.constant 4 : i32
    %1122 = vector.broadcast %c4_i32_384 : i32 to vector<8x128xi32>
    %1123 = arith.cmpi eq, %18, %1122 : vector<8x128xi32>
    %cst_385 = arith.constant 0.000000e+00 : f32
    %1124 = vector.shape_cast %1090 : vector<8x1xf32> to vector<8x1xf32>
    %1125 = vector.broadcast %1124 : vector<8x1xf32> to vector<8x128xf32>
    %1126 = vector.broadcast %cst_385 : f32 to vector<8x128xf32>
    %1127 = arith.select %1123, %1125, %1126 : vector<8x128xi1>, vector<8x128xf32>
    %1128 = arith.addf %1121, %1127 : vector<8x128xf32>
    %c5_i32_386 = arith.constant 5 : i32
    %1129 = vector.broadcast %c5_i32_386 : i32 to vector<8x128xi32>
    %1130 = arith.cmpi eq, %18, %1129 : vector<8x128xi32>
    %cst_387 = arith.constant 0.000000e+00 : f32
    %1131 = vector.shape_cast %1091 : vector<8x1xf32> to vector<8x1xf32>
    %1132 = vector.broadcast %1131 : vector<8x1xf32> to vector<8x128xf32>
    %1133 = vector.broadcast %cst_387 : f32 to vector<8x128xf32>
    %1134 = arith.select %1130, %1132, %1133 : vector<8x128xi1>, vector<8x128xf32>
    %1135 = arith.addf %1128, %1134 : vector<8x128xf32>
    %c6_i32_388 = arith.constant 6 : i32
    %1136 = vector.broadcast %c6_i32_388 : i32 to vector<8x128xi32>
    %1137 = arith.cmpi eq, %18, %1136 : vector<8x128xi32>
    %cst_389 = arith.constant 0.000000e+00 : f32
    %1138 = vector.shape_cast %1092 : vector<8x1xf32> to vector<8x1xf32>
    %1139 = vector.broadcast %1138 : vector<8x1xf32> to vector<8x128xf32>
    %1140 = vector.broadcast %cst_389 : f32 to vector<8x128xf32>
    %1141 = arith.select %1137, %1139, %1140 : vector<8x128xi1>, vector<8x128xf32>
    %1142 = arith.addf %1135, %1141 : vector<8x128xf32>
    %c5_390 = arith.constant 5 : index
    %c0_391 = arith.constant 0 : index
    %c0_392 = arith.constant 0 : index
    %1143 = vector.load %arg12[%c5_390, %c0_391, %c0_392] : memref<8x8x128xf32, #tpu.memory_space<vmem>>, vector<1x8x128xf32>
    %1144 = vector.shape_cast %1143 : vector<1x8x128xf32> to vector<8x128xf32>
    %1145 = vector.shape_cast %1142 : vector<8x128xf32> to vector<1x8x128xf32>
    tpu.vector_store %arg12[%c5_390, %c0_391, %c0_392], %1145 {strides = array<i32>} : memref<8x8x128xf32, #tpu.memory_space<vmem>>, vector<1x8x128xf32>,
    %c6 = arith.constant 6 : index
    %c0_393 = arith.constant 0 : index
    %c0_394 = arith.constant 0 : index
    %1146 = vector.load %arg15[%c6, %c0_393, %c0_394] : memref<8x8x384xf32, #tpu.memory_space<vmem>>, vector<1x8x384xf32>
    %1147 = vector.shape_cast %1146 : vector<1x8x384xf32> to vector<8x384xf32>
    %1148 = vector.extract_strided_slice %994 {offsets = [0, 0], sizes = [8, 384], strides = [1, 1]} : vector<8x512xf32> to vector<8x384xf32>
    %1149 = vector.extract_strided_slice %1147 {offsets = [0, 0], sizes = [8, 128], strides = [1, 1]} : vector<8x384xf32> to vector<8x128xf32>
    %1150 = vector.extract_strided_slice %1148 {offsets = [0, 0], sizes = [8, 128], strides = [1, 1]} : vector<8x384xf32> to vector<8x128xf32>
    %1151 = arith.addf %1149, %1150 : vector<8x128xf32>
    %1152 = arith.negf %1151 : vector<8x128xf32>
    %1153 = math.exp %1152 : vector<8x128xf32>
    %cst_395 = arith.constant 1.000000e+00 : f32
    %1154 = vector.broadcast %cst_395 : f32 to vector<8x128xf32>
    %1155 = arith.addf %1154, %1153 : vector<8x128xf32>
    %1156 = arith.divf %1154, %1155 : vector<8x128xf32>
    %1157 = vector.extract_strided_slice %1147 {offsets = [0, 128], sizes = [8, 128], strides = [1, 1]} : vector<8x384xf32> to vector<8x128xf32>
    %1158 = vector.extract_strided_slice %1148 {offsets = [0, 128], sizes = [8, 128], strides = [1, 1]} : vector<8x384xf32> to vector<8x128xf32>
    %1159 = arith.addf %1157, %1158 : vector<8x128xf32>
    %1160 = arith.negf %1159 : vector<8x128xf32>
    %1161 = math.exp %1160 : vector<8x128xf32>
    %cst_396 = arith.constant 1.000000e+00 : f32
    %1162 = vector.broadcast %cst_396 : f32 to vector<8x128xf32>
    %1163 = arith.addf %1162, %1161 : vector<8x128xf32>
    %1164 = arith.divf %1162, %1163 : vector<8x128xf32>
    %1165 = vector.extract_strided_slice %1147 {offsets = [0, 256], sizes = [8, 128], strides = [1, 1]} : vector<8x384xf32> to vector<8x128xf32>
    %1166 = vector.extract_strided_slice %1148 {offsets = [0, 256], sizes = [8, 128], strides = [1, 1]} : vector<8x384xf32> to vector<8x128xf32>
    %1167 = arith.mulf %1156, %1166 : vector<8x128xf32>
    %1168 = arith.addf %1165, %1167 : vector<8x128xf32>
    %1169 = math.tanh %1168 : vector<8x128xf32>
    %cst_397 = arith.constant 1.000000e+00 : f32
    %1170 = vector.broadcast %cst_397 : f32 to vector<8x128xf32>
    %1171 = arith.subf %1170, %1164 : vector<8x128xf32>
    %1172 = arith.mulf %1171, %1169 : vector<8x128xf32>
    %1173 = arith.mulf %1164, %987 : vector<8x128xf32>
    %1174 = arith.addf %1172, %1173 : vector<8x128xf32>
    %c6_398 = arith.constant 6 : index
    %c0_399 = arith.constant 0 : index
    %c0_400 = arith.constant 0 : index
    %1175 = vector.load %arg13[%c6_398, %c0_399, %c0_400] : memref<8x8x128xf32, #tpu.memory_space<vmem>>, vector<1x8x128xf32>
    %1176 = vector.shape_cast %1175 : vector<1x8x128xf32> to vector<8x128xf32>
    %1177 = vector.shape_cast %1174 : vector<8x128xf32> to vector<1x8x128xf32>
    tpu.vector_store %arg13[%c6_398, %c0_399, %c0_400], %1177 {strides = array<i32>} : memref<8x8x128xf32, #tpu.memory_space<vmem>>, vector<1x8x128xf32>,
    %1178 = arith.truncf %1174 : vector<8x128xf32> to vector<8x128xbf16>
    %cst_401 = arith.constant dense<0.000000e+00> : vector<8x512xf32>
    %1179 = tpu.matmul %1178, %12, %cst_401 {dimension_numbers = #tpu.dot_dimension_numbers<[1], [0], [0], [1], [0, 0, 1, 1], [], []>} : vector<8x128xbf16>, vector<128x512xbf16>, vector<8x512xf32> -> vector<8x512xf32>
    %1180 = vector.broadcast %13 : vector<1x512xf32> to vector<8x512xf32>
    %1181 = arith.addf %1179, %1180 : vector<8x512xf32>
    %1182 = vector.extract_strided_slice %1181 {offsets = [0, 384], sizes = [8, 64], strides = [1, 1]} : vector<8x512xf32> to vector<8x64xf32>
    %1183 = vector.extract_strided_slice %1181 {offsets = [0, 448], sizes = [8, 64], strides = [1, 1]} : vector<8x512xf32> to vector<8x64xf32>
    %1184 = vector.broadcast %14 : vector<1x128xf32> to vector<8x128xf32>
    %1185 = arith.mulf %1174, %1184 : vector<8x128xf32>
    %cst_402 = arith.constant dense<0.000000e+00> : vector<8xf32>
    %1186 = vector.multi_reduction <add>, %1185, %cst_402 [1] : vector<8x128xf32> to vector<8xf32>
    %1187 = vector.shape_cast %1186 : vector<8xf32> to vector<8x1xf32>
    %1188 = vector.broadcast %15 : vector<1x1xf32> to vector<8x1xf32>
    %1189 = arith.addf %1187, %1188 : vector<8x1xf32>
    %c0_i32_403 = arith.constant 0 : i32
    %1190 = vector.broadcast %c0_i32_403 : i32 to vector<8x3xi32>
    %1191 = arith.cmpi eq, %17, %1190 : vector<8x3xi32>
    %c0_404 = arith.constant 0 : index
    %c0_405 = arith.constant 0 : index
    %c0_406 = arith.constant 0 : index
    %1192 = vector.load %arg14[%c0_404, %c0_405, %c0_406] : memref<3x8x64xf32, #tpu.memory_space<vmem>>, vector<1x8x64xf32>
    %1193 = vector.shape_cast %1192 : vector<1x8x64xf32> to vector<8x64xf32>
    %1194 = arith.mulf %1182, %1193 : vector<8x64xf32>
    %cst_407 = arith.constant dense<0.000000e+00> : vector<8xf32>
    %1195 = vector.multi_reduction <add>, %1194, %cst_407 [1] : vector<8x64xf32> to vector<8xf32>
    %1196 = vector.shape_cast %1195 : vector<8xf32> to vector<8x1xf32>
    %cst_408 = arith.constant 0.000000e+00 : f32
    %1197 = vector.shape_cast %1196 : vector<8x1xf32> to vector<8x1xf32>
    %1198 = vector.broadcast %1197 : vector<8x1xf32> to vector<8x3xf32>
    %1199 = vector.broadcast %cst_408 : f32 to vector<8x3xf32>
    %1200 = arith.select %1191, %1198, %1199 : vector<8x3xi1>, vector<8x3xf32>
    %cst_409 = arith.constant 0.000000e+00 : f32
    %1201 = vector.broadcast %cst_409 : f32 to vector<8x3xf32>
    %1202 = arith.addf %1201, %1200 : vector<8x3xf32>
    %c1_i32_410 = arith.constant 1 : i32
    %1203 = vector.broadcast %c1_i32_410 : i32 to vector<8x3xi32>
    %1204 = arith.cmpi eq, %17, %1203 : vector<8x3xi32>
    %c1_411 = arith.constant 1 : index
    %c0_412 = arith.constant 0 : index
    %c0_413 = arith.constant 0 : index
    %1205 = vector.load %arg14[%c1_411, %c0_412, %c0_413] : memref<3x8x64xf32, #tpu.memory_space<vmem>>, vector<1x8x64xf32>
    %1206 = vector.shape_cast %1205 : vector<1x8x64xf32> to vector<8x64xf32>
    %1207 = arith.mulf %1182, %1206 : vector<8x64xf32>
    %cst_414 = arith.constant dense<0.000000e+00> : vector<8xf32>
    %1208 = vector.multi_reduction <add>, %1207, %cst_414 [1] : vector<8x64xf32> to vector<8xf32>
    %1209 = vector.shape_cast %1208 : vector<8xf32> to vector<8x1xf32>
    %cst_415 = arith.constant 0.000000e+00 : f32
    %1210 = vector.shape_cast %1209 : vector<8x1xf32> to vector<8x1xf32>
    %1211 = vector.broadcast %1210 : vector<8x1xf32> to vector<8x3xf32>
    %1212 = vector.broadcast %cst_415 : f32 to vector<8x3xf32>
    %1213 = arith.select %1204, %1211, %1212 : vector<8x3xi1>, vector<8x3xf32>
    %1214 = arith.addf %1202, %1213 : vector<8x3xf32>
    %c2_i32_416 = arith.constant 2 : i32
    %1215 = vector.broadcast %c2_i32_416 : i32 to vector<8x3xi32>
    %1216 = arith.cmpi eq, %17, %1215 : vector<8x3xi32>
    %c2_417 = arith.constant 2 : index
    %c0_418 = arith.constant 0 : index
    %c0_419 = arith.constant 0 : index
    %1217 = vector.load %arg14[%c2_417, %c0_418, %c0_419] : memref<3x8x64xf32, #tpu.memory_space<vmem>>, vector<1x8x64xf32>
    %1218 = vector.shape_cast %1217 : vector<1x8x64xf32> to vector<8x64xf32>
    %1219 = arith.mulf %1182, %1218 : vector<8x64xf32>
    %cst_420 = arith.constant dense<0.000000e+00> : vector<8xf32>
    %1220 = vector.multi_reduction <add>, %1219, %cst_420 [1] : vector<8x64xf32> to vector<8xf32>
    %1221 = vector.shape_cast %1220 : vector<8xf32> to vector<8x1xf32>
    %cst_421 = arith.constant 0.000000e+00 : f32
    %1222 = vector.shape_cast %1221 : vector<8x1xf32> to vector<8x1xf32>
    %1223 = vector.broadcast %1222 : vector<8x1xf32> to vector<8x3xf32>
    %1224 = vector.broadcast %cst_421 : f32 to vector<8x3xf32>
    %1225 = arith.select %1216, %1223, %1224 : vector<8x3xi1>, vector<8x3xf32>
    %1226 = arith.addf %1214, %1225 : vector<8x3xf32>
    %cst_422 = arith.constant dense<0xFF800000> : vector<8xf32>
    %1227 = vector.multi_reduction <maximumf>, %1226, %cst_422 [1] : vector<8x3xf32> to vector<8xf32>
    %1228 = vector.shape_cast %1227 : vector<8xf32> to vector<8x1xf32>
    %1229 = vector.broadcast %1228 : vector<8x1xf32> to vector<8x3xf32>
    %1230 = arith.subf %1226, %1229 : vector<8x3xf32>
    %1231 = math.exp %1230 : vector<8x3xf32>
    %cst_423 = arith.constant dense<0.000000e+00> : vector<8xf32>
    %1232 = vector.multi_reduction <add>, %1231, %cst_423 [1] : vector<8x3xf32> to vector<8xf32>
    %1233 = vector.shape_cast %1232 : vector<8xf32> to vector<8x1xf32>
    %1234 = math.log %1233 : vector<8x1xf32>
    %1235 = vector.broadcast %1234 : vector<8x1xf32> to vector<8x3xf32>
    %1236 = arith.subf %1230, %1235 : vector<8x3xf32>
    %1237 = vector.broadcast %1233 : vector<8x1xf32> to vector<8x3xf32>
    %1238 = arith.divf %1231, %1237 : vector<8x3xf32>
    %1239 = arith.mulf %1238, %1236 : vector<8x3xf32>
    %cst_424 = arith.constant dense<0.000000e+00> : vector<8xf32>
    %1240 = vector.multi_reduction <add>, %1239, %cst_424 [1] : vector<8x3xf32> to vector<8xf32>
    %1241 = vector.shape_cast %1240 : vector<8xf32> to vector<8x1xf32>
    %cst_425 = arith.constant 0.000000e+00 : f32
    %1242 = vector.broadcast %cst_425 : f32 to vector<8x1xf32>
    %1243 = arith.subf %1242, %1241 : vector<8x1xf32>
    %c6_426 = arith.constant 6 : index
    %c0_427 = arith.constant 0 : index
    %c0_428 = arith.constant 0 : index
    %1244 = vector.load %arg5[%c6_426, %c0_427, %c0_428] : memref<8x8x1xf32, #tpu.memory_space<vmem>>, vector<1x8x1xf32>
    %1245 = vector.shape_cast %1244 : vector<1x8x1xf32> to vector<8x1xf32>
    %1246 = vector.extract_strided_slice %1238 {offsets = [0, 0], sizes = [8, 1], strides = [1, 1]} : vector<8x3xf32> to vector<8x1xf32>
    %1247 = arith.cmpf oge, %1245, %1246 : vector<8x1xf32>
    %1248 = arith.extui %1247 : vector<8x1xi1> to vector<8x1xi32>
    %1249 = vector.extract_strided_slice %1238 {offsets = [0, 1], sizes = [8, 1], strides = [1, 1]} : vector<8x3xf32> to vector<8x1xf32>
    %1250 = arith.addf %1246, %1249 : vector<8x1xf32>
    %1251 = arith.cmpf oge, %1245, %1250 : vector<8x1xf32>
    %1252 = arith.extui %1251 : vector<8x1xi1> to vector<8x1xi32>
    %1253 = arith.addi %1248, %1252 : vector<8x1xi32>
    %1254 = vector.broadcast %1253 : vector<8x1xi32> to vector<8x3xi32>
    %1255 = arith.cmpi eq, %17, %1254 : vector<8x3xi32>
    %1256 = arith.extui %1255 : vector<8x3xi1> to vector<8x3xi32>
    %1257 = arith.sitofp %1256 : vector<8x3xi32> to vector<8x3xf32>
    %1258 = arith.mulf %1257, %1236 : vector<8x3xf32>
    %cst_429 = arith.constant dense<0.000000e+00> : vector<8xf32>
    %1259 = vector.multi_reduction <add>, %1258, %cst_429 [1] : vector<8x3xf32> to vector<8xf32>
    %1260 = vector.shape_cast %1259 : vector<8xf32> to vector<8x1xf32>
    %c6_i32_430 = arith.constant 6 : i32
    %1261 = arith.addi %16, %c6_i32_430 : i32
    %c2_i32_431 = arith.constant 2 : i32
    %1262 = arith.minsi %1261, %c2_i32_431 : i32
    %c3_i32_432 = arith.constant 3 : i32
    %1263 = arith.cmpi slt, %1261, %c3_i32_432 : i32
    %1264 = arith.extui %1263 : i1 to i32
    %1265 = arith.sitofp %1264 : i32 to f32
    %1266 = arith.index_cast %1262 : i32 to index
    %c0_433 = arith.constant 0 : index
    %c0_434 = arith.constant 0 : index
    %1267 = vector.load %arg14[%1266, %c0_433, %c0_434] : memref<3x8x64xf32, #tpu.memory_space<vmem>>, vector<1x8x64xf32>
    %1268 = vector.shape_cast %1267 : vector<1x8x64xf32> to vector<8x64xf32>
    %1269 = vector.broadcast %1265 : f32 to vector<8x64xf32>
    %1270 = arith.mulf %1269, %1183 : vector<8x64xf32>
    %1271 = arith.addf %1268, %1270 : vector<8x64xf32>
    %1272 = arith.index_cast %1262 : i32 to index
    %c0_435 = arith.constant 0 : index
    %c0_436 = arith.constant 0 : index
    %1273 = vector.load %arg14[%1272, %c0_435, %c0_436] : memref<3x8x64xf32, #tpu.memory_space<vmem>>, vector<1x8x64xf32>
    %1274 = vector.shape_cast %1273 : vector<1x8x64xf32> to vector<8x64xf32>
    %1275 = vector.shape_cast %1271 : vector<8x64xf32> to vector<1x8x64xf32>
    tpu.vector_store %arg14[%1272, %c0_435, %c0_436], %1275 {strides = array<i32>} : memref<3x8x64xf32, #tpu.memory_space<vmem>>, vector<1x8x64xf32>,
    %1276 = arith.sitofp %1253 : vector<8x1xi32> to vector<8x1xf32>
    %1277 = vector.extract_strided_slice %1238 {offsets = [0, 0], sizes = [8, 1], strides = [1, 1]} : vector<8x3xf32> to vector<8x1xf32>
    %1278 = vector.extract_strided_slice %1238 {offsets = [0, 1], sizes = [8, 1], strides = [1, 1]} : vector<8x3xf32> to vector<8x1xf32>
    %1279 = vector.extract_strided_slice %1238 {offsets = [0, 2], sizes = [8, 1], strides = [1, 1]} : vector<8x3xf32> to vector<8x1xf32>
    %c0_i32_437 = arith.constant 0 : i32
    %1280 = vector.broadcast %c0_i32_437 : i32 to vector<8x128xi32>
    %1281 = arith.cmpi eq, %18, %1280 : vector<8x128xi32>
    %cst_438 = arith.constant 0.000000e+00 : f32
    %1282 = vector.shape_cast %1276 : vector<8x1xf32> to vector<8x1xf32>
    %1283 = vector.broadcast %1282 : vector<8x1xf32> to vector<8x128xf32>
    %1284 = vector.broadcast %cst_438 : f32 to vector<8x128xf32>
    %1285 = arith.select %1281, %1283, %1284 : vector<8x128xi1>, vector<8x128xf32>
    %cst_439 = arith.constant 0.000000e+00 : f32
    %1286 = vector.broadcast %cst_439 : f32 to vector<8x128xf32>
    %1287 = arith.addf %1286, %1285 : vector<8x128xf32>
    %c1_i32_440 = arith.constant 1 : i32
    %1288 = vector.broadcast %c1_i32_440 : i32 to vector<8x128xi32>
    %1289 = arith.cmpi eq, %18, %1288 : vector<8x128xi32>
    %cst_441 = arith.constant 0.000000e+00 : f32
    %1290 = vector.shape_cast %1260 : vector<8x1xf32> to vector<8x1xf32>
    %1291 = vector.broadcast %1290 : vector<8x1xf32> to vector<8x128xf32>
    %1292 = vector.broadcast %cst_441 : f32 to vector<8x128xf32>
    %1293 = arith.select %1289, %1291, %1292 : vector<8x128xi1>, vector<8x128xf32>
    %1294 = arith.addf %1287, %1293 : vector<8x128xf32>
    %c2_i32_442 = arith.constant 2 : i32
    %1295 = vector.broadcast %c2_i32_442 : i32 to vector<8x128xi32>
    %1296 = arith.cmpi eq, %18, %1295 : vector<8x128xi32>
    %cst_443 = arith.constant 0.000000e+00 : f32
    %1297 = vector.shape_cast %1243 : vector<8x1xf32> to vector<8x1xf32>
    %1298 = vector.broadcast %1297 : vector<8x1xf32> to vector<8x128xf32>
    %1299 = vector.broadcast %cst_443 : f32 to vector<8x128xf32>
    %1300 = arith.select %1296, %1298, %1299 : vector<8x128xi1>, vector<8x128xf32>
    %1301 = arith.addf %1294, %1300 : vector<8x128xf32>
    %c3_i32_444 = arith.constant 3 : i32
    %1302 = vector.broadcast %c3_i32_444 : i32 to vector<8x128xi32>
    %1303 = arith.cmpi eq, %18, %1302 : vector<8x128xi32>
    %cst_445 = arith.constant 0.000000e+00 : f32
    %1304 = vector.shape_cast %1189 : vector<8x1xf32> to vector<8x1xf32>
    %1305 = vector.broadcast %1304 : vector<8x1xf32> to vector<8x128xf32>
    %1306 = vector.broadcast %cst_445 : f32 to vector<8x128xf32>
    %1307 = arith.select %1303, %1305, %1306 : vector<8x128xi1>, vector<8x128xf32>
    %1308 = arith.addf %1301, %1307 : vector<8x128xf32>
    %c4_i32_446 = arith.constant 4 : i32
    %1309 = vector.broadcast %c4_i32_446 : i32 to vector<8x128xi32>
    %1310 = arith.cmpi eq, %18, %1309 : vector<8x128xi32>
    %cst_447 = arith.constant 0.000000e+00 : f32
    %1311 = vector.shape_cast %1277 : vector<8x1xf32> to vector<8x1xf32>
    %1312 = vector.broadcast %1311 : vector<8x1xf32> to vector<8x128xf32>
    %1313 = vector.broadcast %cst_447 : f32 to vector<8x128xf32>
    %1314 = arith.select %1310, %1312, %1313 : vector<8x128xi1>, vector<8x128xf32>
    %1315 = arith.addf %1308, %1314 : vector<8x128xf32>
    %c5_i32_448 = arith.constant 5 : i32
    %1316 = vector.broadcast %c5_i32_448 : i32 to vector<8x128xi32>
    %1317 = arith.cmpi eq, %18, %1316 : vector<8x128xi32>
    %cst_449 = arith.constant 0.000000e+00 : f32
    %1318 = vector.shape_cast %1278 : vector<8x1xf32> to vector<8x1xf32>
    %1319 = vector.broadcast %1318 : vector<8x1xf32> to vector<8x128xf32>
    %1320 = vector.broadcast %cst_449 : f32 to vector<8x128xf32>
    %1321 = arith.select %1317, %1319, %1320 : vector<8x128xi1>, vector<8x128xf32>
    %1322 = arith.addf %1315, %1321 : vector<8x128xf32>
    %c6_i32_450 = arith.constant 6 : i32
    %1323 = vector.broadcast %c6_i32_450 : i32 to vector<8x128xi32>
    %1324 = arith.cmpi eq, %18, %1323 : vector<8x128xi32>
    %cst_451 = arith.constant 0.000000e+00 : f32
    %1325 = vector.shape_cast %1279 : vector<8x1xf32> to vector<8x1xf32>
    %1326 = vector.broadcast %1325 : vector<8x1xf32> to vector<8x128xf32>
    %1327 = vector.broadcast %cst_451 : f32 to vector<8x128xf32>
    %1328 = arith.select %1324, %1326, %1327 : vector<8x128xi1>, vector<8x128xf32>
    %1329 = arith.addf %1322, %1328 : vector<8x128xf32>
    %c6_452 = arith.constant 6 : index
    %c0_453 = arith.constant 0 : index
    %c0_454 = arith.constant 0 : index
    %1330 = vector.load %arg12[%c6_452, %c0_453, %c0_454] : memref<8x8x128xf32, #tpu.memory_space<vmem>>, vector<1x8x128xf32>
    %1331 = vector.shape_cast %1330 : vector<1x8x128xf32> to vector<8x128xf32>
    %1332 = vector.shape_cast %1329 : vector<8x128xf32> to vector<1x8x128xf32>
    tpu.vector_store %arg12[%c6_452, %c0_453, %c0_454], %1332 {strides = array<i32>} : memref<8x8x128xf32, #tpu.memory_space<vmem>>, vector<1x8x128xf32>,
    %c7 = arith.constant 7 : index
    %c0_455 = arith.constant 0 : index
    %c0_456 = arith.constant 0 : index
    %1333 = vector.load %arg15[%c7, %c0_455, %c0_456] : memref<8x8x384xf32, #tpu.memory_space<vmem>>, vector<1x8x384xf32>
    %1334 = vector.shape_cast %1333 : vector<1x8x384xf32> to vector<8x384xf32>
    %1335 = vector.extract_strided_slice %1181 {offsets = [0, 0], sizes = [8, 384], strides = [1, 1]} : vector<8x512xf32> to vector<8x384xf32>
    %1336 = vector.extract_strided_slice %1334 {offsets = [0, 0], sizes = [8, 128], strides = [1, 1]} : vector<8x384xf32> to vector<8x128xf32>
    %1337 = vector.extract_strided_slice %1335 {offsets = [0, 0], sizes = [8, 128], strides = [1, 1]} : vector<8x384xf32> to vector<8x128xf32>
    %1338 = arith.addf %1336, %1337 : vector<8x128xf32>
    %1339 = arith.negf %1338 : vector<8x128xf32>
    %1340 = math.exp %1339 : vector<8x128xf32>
    %cst_457 = arith.constant 1.000000e+00 : f32
    %1341 = vector.broadcast %cst_457 : f32 to vector<8x128xf32>
    %1342 = arith.addf %1341, %1340 : vector<8x128xf32>
    %1343 = arith.divf %1341, %1342 : vector<8x128xf32>
    %1344 = vector.extract_strided_slice %1334 {offsets = [0, 128], sizes = [8, 128], strides = [1, 1]} : vector<8x384xf32> to vector<8x128xf32>
    %1345 = vector.extract_strided_slice %1335 {offsets = [0, 128], sizes = [8, 128], strides = [1, 1]} : vector<8x384xf32> to vector<8x128xf32>
    %1346 = arith.addf %1344, %1345 : vector<8x128xf32>
    %1347 = arith.negf %1346 : vector<8x128xf32>
    %1348 = math.exp %1347 : vector<8x128xf32>
    %cst_458 = arith.constant 1.000000e+00 : f32
    %1349 = vector.broadcast %cst_458 : f32 to vector<8x128xf32>
    %1350 = arith.addf %1349, %1348 : vector<8x128xf32>
    %1351 = arith.divf %1349, %1350 : vector<8x128xf32>
    %1352 = vector.extract_strided_slice %1334 {offsets = [0, 256], sizes = [8, 128], strides = [1, 1]} : vector<8x384xf32> to vector<8x128xf32>
    %1353 = vector.extract_strided_slice %1335 {offsets = [0, 256], sizes = [8, 128], strides = [1, 1]} : vector<8x384xf32> to vector<8x128xf32>
    %1354 = arith.mulf %1343, %1353 : vector<8x128xf32>
    %1355 = arith.addf %1352, %1354 : vector<8x128xf32>
    %1356 = math.tanh %1355 : vector<8x128xf32>
    %cst_459 = arith.constant 1.000000e+00 : f32
    %1357 = vector.broadcast %cst_459 : f32 to vector<8x128xf32>
    %1358 = arith.subf %1357, %1351 : vector<8x128xf32>
    %1359 = arith.mulf %1358, %1356 : vector<8x128xf32>
    %1360 = arith.mulf %1351, %1174 : vector<8x128xf32>
    %1361 = arith.addf %1359, %1360 : vector<8x128xf32>
    %c7_460 = arith.constant 7 : index
    %c0_461 = arith.constant 0 : index
    %c0_462 = arith.constant 0 : index
    %1362 = vector.load %arg13[%c7_460, %c0_461, %c0_462] : memref<8x8x128xf32, #tpu.memory_space<vmem>>, vector<1x8x128xf32>
    %1363 = vector.shape_cast %1362 : vector<1x8x128xf32> to vector<8x128xf32>
    %1364 = vector.shape_cast %1361 : vector<8x128xf32> to vector<1x8x128xf32>
    tpu.vector_store %arg13[%c7_460, %c0_461, %c0_462], %1364 {strides = array<i32>} : memref<8x8x128xf32, #tpu.memory_space<vmem>>, vector<1x8x128xf32>,
    %1365 = arith.truncf %1361 : vector<8x128xf32> to vector<8x128xbf16>
    %cst_463 = arith.constant dense<0.000000e+00> : vector<8x512xf32>
    %1366 = tpu.matmul %1365, %12, %cst_463 {dimension_numbers = #tpu.dot_dimension_numbers<[1], [0], [0], [1], [0, 0, 1, 1], [], []>} : vector<8x128xbf16>, vector<128x512xbf16>, vector<8x512xf32> -> vector<8x512xf32>
    %1367 = vector.broadcast %13 : vector<1x512xf32> to vector<8x512xf32>
    %1368 = arith.addf %1366, %1367 : vector<8x512xf32>
    %1369 = vector.extract_strided_slice %1368 {offsets = [0, 384], sizes = [8, 64], strides = [1, 1]} : vector<8x512xf32> to vector<8x64xf32>
    %1370 = vector.extract_strided_slice %1368 {offsets = [0, 448], sizes = [8, 64], strides = [1, 1]} : vector<8x512xf32> to vector<8x64xf32>
    %1371 = vector.broadcast %14 : vector<1x128xf32> to vector<8x128xf32>
    %1372 = arith.mulf %1361, %1371 : vector<8x128xf32>
    %cst_464 = arith.constant dense<0.000000e+00> : vector<8xf32>
    %1373 = vector.multi_reduction <add>, %1372, %cst_464 [1] : vector<8x128xf32> to vector<8xf32>
    %1374 = vector.shape_cast %1373 : vector<8xf32> to vector<8x1xf32>
    %1375 = vector.broadcast %15 : vector<1x1xf32> to vector<8x1xf32>
    %1376 = arith.addf %1374, %1375 : vector<8x1xf32>
    %c0_i32_465 = arith.constant 0 : i32
    %1377 = vector.broadcast %c0_i32_465 : i32 to vector<8x3xi32>
    %1378 = arith.cmpi eq, %17, %1377 : vector<8x3xi32>
    %c0_466 = arith.constant 0 : index
    %c0_467 = arith.constant 0 : index
    %c0_468 = arith.constant 0 : index
    %1379 = vector.load %arg14[%c0_466, %c0_467, %c0_468] : memref<3x8x64xf32, #tpu.memory_space<vmem>>, vector<1x8x64xf32>
    %1380 = vector.shape_cast %1379 : vector<1x8x64xf32> to vector<8x64xf32>
    %1381 = arith.mulf %1369, %1380 : vector<8x64xf32>
    %cst_469 = arith.constant dense<0.000000e+00> : vector<8xf32>
    %1382 = vector.multi_reduction <add>, %1381, %cst_469 [1] : vector<8x64xf32> to vector<8xf32>
    %1383 = vector.shape_cast %1382 : vector<8xf32> to vector<8x1xf32>
    %cst_470 = arith.constant 0.000000e+00 : f32
    %1384 = vector.shape_cast %1383 : vector<8x1xf32> to vector<8x1xf32>
    %1385 = vector.broadcast %1384 : vector<8x1xf32> to vector<8x3xf32>
    %1386 = vector.broadcast %cst_470 : f32 to vector<8x3xf32>
    %1387 = arith.select %1378, %1385, %1386 : vector<8x3xi1>, vector<8x3xf32>
    %cst_471 = arith.constant 0.000000e+00 : f32
    %1388 = vector.broadcast %cst_471 : f32 to vector<8x3xf32>
    %1389 = arith.addf %1388, %1387 : vector<8x3xf32>
    %c1_i32_472 = arith.constant 1 : i32
    %1390 = vector.broadcast %c1_i32_472 : i32 to vector<8x3xi32>
    %1391 = arith.cmpi eq, %17, %1390 : vector<8x3xi32>
    %c1_473 = arith.constant 1 : index
    %c0_474 = arith.constant 0 : index
    %c0_475 = arith.constant 0 : index
    %1392 = vector.load %arg14[%c1_473, %c0_474, %c0_475] : memref<3x8x64xf32, #tpu.memory_space<vmem>>, vector<1x8x64xf32>
    %1393 = vector.shape_cast %1392 : vector<1x8x64xf32> to vector<8x64xf32>
    %1394 = arith.mulf %1369, %1393 : vector<8x64xf32>
    %cst_476 = arith.constant dense<0.000000e+00> : vector<8xf32>
    %1395 = vector.multi_reduction <add>, %1394, %cst_476 [1] : vector<8x64xf32> to vector<8xf32>
    %1396 = vector.shape_cast %1395 : vector<8xf32> to vector<8x1xf32>
    %cst_477 = arith.constant 0.000000e+00 : f32
    %1397 = vector.shape_cast %1396 : vector<8x1xf32> to vector<8x1xf32>
    %1398 = vector.broadcast %1397 : vector<8x1xf32> to vector<8x3xf32>
    %1399 = vector.broadcast %cst_477 : f32 to vector<8x3xf32>
    %1400 = arith.select %1391, %1398, %1399 : vector<8x3xi1>, vector<8x3xf32>
    %1401 = arith.addf %1389, %1400 : vector<8x3xf32>
    %c2_i32_478 = arith.constant 2 : i32
    %1402 = vector.broadcast %c2_i32_478 : i32 to vector<8x3xi32>
    %1403 = arith.cmpi eq, %17, %1402 : vector<8x3xi32>
    %c2_479 = arith.constant 2 : index
    %c0_480 = arith.constant 0 : index
    %c0_481 = arith.constant 0 : index
    %1404 = vector.load %arg14[%c2_479, %c0_480, %c0_481] : memref<3x8x64xf32, #tpu.memory_space<vmem>>, vector<1x8x64xf32>
    %1405 = vector.shape_cast %1404 : vector<1x8x64xf32> to vector<8x64xf32>
    %1406 = arith.mulf %1369, %1405 : vector<8x64xf32>
    %cst_482 = arith.constant dense<0.000000e+00> : vector<8xf32>
    %1407 = vector.multi_reduction <add>, %1406, %cst_482 [1] : vector<8x64xf32> to vector<8xf32>
    %1408 = vector.shape_cast %1407 : vector<8xf32> to vector<8x1xf32>
    %cst_483 = arith.constant 0.000000e+00 : f32
    %1409 = vector.shape_cast %1408 : vector<8x1xf32> to vector<8x1xf32>
    %1410 = vector.broadcast %1409 : vector<8x1xf32> to vector<8x3xf32>
    %1411 = vector.broadcast %cst_483 : f32 to vector<8x3xf32>
    %1412 = arith.select %1403, %1410, %1411 : vector<8x3xi1>, vector<8x3xf32>
    %1413 = arith.addf %1401, %1412 : vector<8x3xf32>
    %cst_484 = arith.constant dense<0xFF800000> : vector<8xf32>
    %1414 = vector.multi_reduction <maximumf>, %1413, %cst_484 [1] : vector<8x3xf32> to vector<8xf32>
    %1415 = vector.shape_cast %1414 : vector<8xf32> to vector<8x1xf32>
    %1416 = vector.broadcast %1415 : vector<8x1xf32> to vector<8x3xf32>
    %1417 = arith.subf %1413, %1416 : vector<8x3xf32>
    %1418 = math.exp %1417 : vector<8x3xf32>
    %cst_485 = arith.constant dense<0.000000e+00> : vector<8xf32>
    %1419 = vector.multi_reduction <add>, %1418, %cst_485 [1] : vector<8x3xf32> to vector<8xf32>
    %1420 = vector.shape_cast %1419 : vector<8xf32> to vector<8x1xf32>
    %1421 = math.log %1420 : vector<8x1xf32>
    %1422 = vector.broadcast %1421 : vector<8x1xf32> to vector<8x3xf32>
    %1423 = arith.subf %1417, %1422 : vector<8x3xf32>
    %1424 = vector.broadcast %1420 : vector<8x1xf32> to vector<8x3xf32>
    %1425 = arith.divf %1418, %1424 : vector<8x3xf32>
    %1426 = arith.mulf %1425, %1423 : vector<8x3xf32>
    %cst_486 = arith.constant dense<0.000000e+00> : vector<8xf32>
    %1427 = vector.multi_reduction <add>, %1426, %cst_486 [1] : vector<8x3xf32> to vector<8xf32>
    %1428 = vector.shape_cast %1427 : vector<8xf32> to vector<8x1xf32>
    %cst_487 = arith.constant 0.000000e+00 : f32
    %1429 = vector.broadcast %cst_487 : f32 to vector<8x1xf32>
    %1430 = arith.subf %1429, %1428 : vector<8x1xf32>
    %c7_488 = arith.constant 7 : index
    %c0_489 = arith.constant 0 : index
    %c0_490 = arith.constant 0 : index
    %1431 = vector.load %arg5[%c7_488, %c0_489, %c0_490] : memref<8x8x1xf32, #tpu.memory_space<vmem>>, vector<1x8x1xf32>
    %1432 = vector.shape_cast %1431 : vector<1x8x1xf32> to vector<8x1xf32>
    %1433 = vector.extract_strided_slice %1425 {offsets = [0, 0], sizes = [8, 1], strides = [1, 1]} : vector<8x3xf32> to vector<8x1xf32>
    %1434 = arith.cmpf oge, %1432, %1433 : vector<8x1xf32>
    %1435 = arith.extui %1434 : vector<8x1xi1> to vector<8x1xi32>
    %1436 = vector.extract_strided_slice %1425 {offsets = [0, 1], sizes = [8, 1], strides = [1, 1]} : vector<8x3xf32> to vector<8x1xf32>
    %1437 = arith.addf %1433, %1436 : vector<8x1xf32>
    %1438 = arith.cmpf oge, %1432, %1437 : vector<8x1xf32>
    %1439 = arith.extui %1438 : vector<8x1xi1> to vector<8x1xi32>
    %1440 = arith.addi %1435, %1439 : vector<8x1xi32>
    %1441 = vector.broadcast %1440 : vector<8x1xi32> to vector<8x3xi32>
    %1442 = arith.cmpi eq, %17, %1441 : vector<8x3xi32>
    %1443 = arith.extui %1442 : vector<8x3xi1> to vector<8x3xi32>
    %1444 = arith.sitofp %1443 : vector<8x3xi32> to vector<8x3xf32>
    %1445 = arith.mulf %1444, %1423 : vector<8x3xf32>
    %cst_491 = arith.constant dense<0.000000e+00> : vector<8xf32>
    %1446 = vector.multi_reduction <add>, %1445, %cst_491 [1] : vector<8x3xf32> to vector<8xf32>
    %1447 = vector.shape_cast %1446 : vector<8xf32> to vector<8x1xf32>
    %c7_i32 = arith.constant 7 : i32
    %1448 = arith.addi %16, %c7_i32 : i32
    %c2_i32_492 = arith.constant 2 : i32
    %1449 = arith.minsi %1448, %c2_i32_492 : i32
    %c3_i32_493 = arith.constant 3 : i32
    %1450 = arith.cmpi slt, %1448, %c3_i32_493 : i32
    %1451 = arith.extui %1450 : i1 to i32
    %1452 = arith.sitofp %1451 : i32 to f32
    %1453 = arith.index_cast %1449 : i32 to index
    %c0_494 = arith.constant 0 : index
    %c0_495 = arith.constant 0 : index
    %1454 = vector.load %arg14[%1453, %c0_494, %c0_495] : memref<3x8x64xf32, #tpu.memory_space<vmem>>, vector<1x8x64xf32>
    %1455 = vector.shape_cast %1454 : vector<1x8x64xf32> to vector<8x64xf32>
    %1456 = vector.broadcast %1452 : f32 to vector<8x64xf32>
    %1457 = arith.mulf %1456, %1370 : vector<8x64xf32>
    %1458 = arith.addf %1455, %1457 : vector<8x64xf32>
    %1459 = arith.index_cast %1449 : i32 to index
    %c0_496 = arith.constant 0 : index
    %c0_497 = arith.constant 0 : index
    %1460 = vector.load %arg14[%1459, %c0_496, %c0_497] : memref<3x8x64xf32, #tpu.memory_space<vmem>>, vector<1x8x64xf32>
    %1461 = vector.shape_cast %1460 : vector<1x8x64xf32> to vector<8x64xf32>
    %1462 = vector.shape_cast %1458 : vector<8x64xf32> to vector<1x8x64xf32>
    tpu.vector_store %arg14[%1459, %c0_496, %c0_497], %1462 {strides = array<i32>} : memref<3x8x64xf32, #tpu.memory_space<vmem>>, vector<1x8x64xf32>,
    %1463 = arith.sitofp %1440 : vector<8x1xi32> to vector<8x1xf32>
    %1464 = vector.extract_strided_slice %1425 {offsets = [0, 0], sizes = [8, 1], strides = [1, 1]} : vector<8x3xf32> to vector<8x1xf32>
    %1465 = vector.extract_strided_slice %1425 {offsets = [0, 1], sizes = [8, 1], strides = [1, 1]} : vector<8x3xf32> to vector<8x1xf32>
    %1466 = vector.extract_strided_slice %1425 {offsets = [0, 2], sizes = [8, 1], strides = [1, 1]} : vector<8x3xf32> to vector<8x1xf32>
    %c0_i32_498 = arith.constant 0 : i32
    %1467 = vector.broadcast %c0_i32_498 : i32 to vector<8x128xi32>
    %1468 = arith.cmpi eq, %18, %1467 : vector<8x128xi32>
    %cst_499 = arith.constant 0.000000e+00 : f32
    %1469 = vector.shape_cast %1463 : vector<8x1xf32> to vector<8x1xf32>
    %1470 = vector.broadcast %1469 : vector<8x1xf32> to vector<8x128xf32>
    %1471 = vector.broadcast %cst_499 : f32 to vector<8x128xf32>
    %1472 = arith.select %1468, %1470, %1471 : vector<8x128xi1>, vector<8x128xf32>
    %cst_500 = arith.constant 0.000000e+00 : f32
    %1473 = vector.broadcast %cst_500 : f32 to vector<8x128xf32>
    %1474 = arith.addf %1473, %1472 : vector<8x128xf32>
    %c1_i32_501 = arith.constant 1 : i32
    %1475 = vector.broadcast %c1_i32_501 : i32 to vector<8x128xi32>
    %1476 = arith.cmpi eq, %18, %1475 : vector<8x128xi32>
    %cst_502 = arith.constant 0.000000e+00 : f32
    %1477 = vector.shape_cast %1447 : vector<8x1xf32> to vector<8x1xf32>
    %1478 = vector.broadcast %1477 : vector<8x1xf32> to vector<8x128xf32>
    %1479 = vector.broadcast %cst_502 : f32 to vector<8x128xf32>
    %1480 = arith.select %1476, %1478, %1479 : vector<8x128xi1>, vector<8x128xf32>
    %1481 = arith.addf %1474, %1480 : vector<8x128xf32>
    %c2_i32_503 = arith.constant 2 : i32
    %1482 = vector.broadcast %c2_i32_503 : i32 to vector<8x128xi32>
    %1483 = arith.cmpi eq, %18, %1482 : vector<8x128xi32>
    %cst_504 = arith.constant 0.000000e+00 : f32
    %1484 = vector.shape_cast %1430 : vector<8x1xf32> to vector<8x1xf32>
    %1485 = vector.broadcast %1484 : vector<8x1xf32> to vector<8x128xf32>
    %1486 = vector.broadcast %cst_504 : f32 to vector<8x128xf32>
    %1487 = arith.select %1483, %1485, %1486 : vector<8x128xi1>, vector<8x128xf32>
    %1488 = arith.addf %1481, %1487 : vector<8x128xf32>
    %c3_i32_505 = arith.constant 3 : i32
    %1489 = vector.broadcast %c3_i32_505 : i32 to vector<8x128xi32>
    %1490 = arith.cmpi eq, %18, %1489 : vector<8x128xi32>
    %cst_506 = arith.constant 0.000000e+00 : f32
    %1491 = vector.shape_cast %1376 : vector<8x1xf32> to vector<8x1xf32>
    %1492 = vector.broadcast %1491 : vector<8x1xf32> to vector<8x128xf32>
    %1493 = vector.broadcast %cst_506 : f32 to vector<8x128xf32>
    %1494 = arith.select %1490, %1492, %1493 : vector<8x128xi1>, vector<8x128xf32>
    %1495 = arith.addf %1488, %1494 : vector<8x128xf32>
    %c4_i32_507 = arith.constant 4 : i32
    %1496 = vector.broadcast %c4_i32_507 : i32 to vector<8x128xi32>
    %1497 = arith.cmpi eq, %18, %1496 : vector<8x128xi32>
    %cst_508 = arith.constant 0.000000e+00 : f32
    %1498 = vector.shape_cast %1464 : vector<8x1xf32> to vector<8x1xf32>
    %1499 = vector.broadcast %1498 : vector<8x1xf32> to vector<8x128xf32>
    %1500 = vector.broadcast %cst_508 : f32 to vector<8x128xf32>
    %1501 = arith.select %1497, %1499, %1500 : vector<8x128xi1>, vector<8x128xf32>
    %1502 = arith.addf %1495, %1501 : vector<8x128xf32>
    %c5_i32_509 = arith.constant 5 : i32
    %1503 = vector.broadcast %c5_i32_509 : i32 to vector<8x128xi32>
    %1504 = arith.cmpi eq, %18, %1503 : vector<8x128xi32>
    %cst_510 = arith.constant 0.000000e+00 : f32
    %1505 = vector.shape_cast %1465 : vector<8x1xf32> to vector<8x1xf32>
    %1506 = vector.broadcast %1505 : vector<8x1xf32> to vector<8x128xf32>
    %1507 = vector.broadcast %cst_510 : f32 to vector<8x128xf32>
    %1508 = arith.select %1504, %1506, %1507 : vector<8x128xi1>, vector<8x128xf32>
    %1509 = arith.addf %1502, %1508 : vector<8x128xf32>
    %c6_i32_511 = arith.constant 6 : i32
    %1510 = vector.broadcast %c6_i32_511 : i32 to vector<8x128xi32>
    %1511 = arith.cmpi eq, %18, %1510 : vector<8x128xi32>
    %cst_512 = arith.constant 0.000000e+00 : f32
    %1512 = vector.shape_cast %1466 : vector<8x1xf32> to vector<8x1xf32>
    %1513 = vector.broadcast %1512 : vector<8x1xf32> to vector<8x128xf32>
    %1514 = vector.broadcast %cst_512 : f32 to vector<8x128xf32>
    %1515 = arith.select %1511, %1513, %1514 : vector<8x128xi1>, vector<8x128xf32>
    %1516 = arith.addf %1509, %1515 : vector<8x128xf32>
    %c7_513 = arith.constant 7 : index
    %c0_514 = arith.constant 0 : index
    %c0_515 = arith.constant 0 : index
    %1517 = vector.load %arg12[%c7_513, %c0_514, %c0_515] : memref<8x8x128xf32, #tpu.memory_space<vmem>>, vector<1x8x128xf32>
    %1518 = vector.shape_cast %1517 : vector<1x8x128xf32> to vector<8x128xf32>
    %1519 = vector.shape_cast %1516 : vector<8x128xf32> to vector<1x8x128xf32>
    tpu.vector_store %arg12[%c7_513, %c0_514, %c0_515], %1519 {strides = array<i32>} : memref<8x8x128xf32, #tpu.memory_space<vmem>>, vector<1x8x128xf32>,
    return
  }
  func.func @transform_0(%arg0: i32) -> i32 {
    %c0_i32 = arith.constant 0 : i32
    %c0_i32_0 = arith.constant 0 : i32
    return %c0_i32 : i32
  }
  func.func @transform_1(%arg0: i32) -> (i32, i32, i32) {
    %c0_i32 = arith.constant 0 : i32
    %c0_i32_0 = arith.constant 0 : i32
    %c0_i32_1 = arith.constant 0 : i32
    return %c0_i32, %arg0, %c0_i32_0 : i32, i32, i32
  }
  func.func @transform_2(%arg0: i32) -> (i32, i32) {
    %c0_i32 = arith.constant 0 : i32
    %c0_i32_0 = arith.constant 0 : i32
    return %arg0, %c0_i32 : i32, i32
  }
  func.func @transform_3(%arg0: i32) -> (i32, i32, i32) {
    %c0_i32 = arith.constant 0 : i32
    %c0_i32_0 = arith.constant 0 : i32
    %c0_i32_1 = arith.constant 0 : i32
    return %c0_i32, %arg0, %c0_i32_0 : i32, i32, i32
  }
  func.func @transform_4(%arg0: i32) -> (i32, i32, i32) {
    %c0_i32 = arith.constant 0 : i32
    %c0_i32_0 = arith.constant 0 : i32
    %c0_i32_1 = arith.constant 0 : i32
    return %c0_i32, %arg0, %c0_i32_0 : i32, i32, i32
  }
  func.func @transform_5(%arg0: i32) -> (i32, i32) {
    %c0_i32 = arith.constant 0 : i32
    %c0_i32_0 = arith.constant 0 : i32
    %c0_i32_1 = arith.constant 0 : i32
    return %c0_i32, %c0_i32_0 : i32, i32
  }
  func.func @transform_6(%arg0: i32) -> (i32, i32) {
    %c0_i32 = arith.constant 0 : i32
    %c0_i32_0 = arith.constant 0 : i32
    %c0_i32_1 = arith.constant 0 : i32
    return %c0_i32, %c0_i32_0 : i32, i32
  }
  func.func @transform_7(%arg0: i32) -> (i32, i32) {
    %c0_i32 = arith.constant 0 : i32
    %c0_i32_0 = arith.constant 0 : i32
    %c0_i32_1 = arith.constant 0 : i32
    return %c0_i32, %c0_i32_0 : i32, i32
  }
  func.func @transform_8(%arg0: i32) -> (i32, i32) {
    %c0_i32 = arith.constant 0 : i32
    %c0_i32_0 = arith.constant 0 : i32
    %c0_i32_1 = arith.constant 0 : i32
    return %c0_i32, %c0_i32_0 : i32, i32
  }
  func.func @transform_9(%arg0: i32) -> (i32, i32) {
    %c0_i32 = arith.constant 0 : i32
    %c0_i32_0 = arith.constant 0 : i32
    %c0_i32_1 = arith.constant 0 : i32
    return %c0_i32, %c0_i32_0 : i32, i32
  }
  func.func @transform_10(%arg0: i32) -> (i32, i32) {
    %c0_i32 = arith.constant 0 : i32
    %c0_i32_0 = arith.constant 0 : i32
    %c0_i32_1 = arith.constant 0 : i32
    return %c0_i32, %c0_i32_0 : i32, i32
  }
  func.func @transform_11(%arg0: i32) -> (i32, i32, i32) {
    %c0_i32 = arith.constant 0 : i32
    %c0_i32_0 = arith.constant 0 : i32
    %c0_i32_1 = arith.constant 0 : i32
    return %c0_i32, %arg0, %c0_i32_0 : i32, i32, i32
  }
  func.func @transform_12(%arg0: i32) -> (i32, i32, i32) {
    %c0_i32 = arith.constant 0 : i32
    %c0_i32_0 = arith.constant 0 : i32
    %c0_i32_1 = arith.constant 0 : i32
    return %c0_i32, %arg0, %c0_i32_0 : i32, i32, i32
  }
  func.func @transform_13(%arg0: i32) -> (i32, i32, i32) {
    %c0_i32 = arith.constant 0 : i32
    %c0_i32_0 = arith.constant 0 : i32
    %c0_i32_1 = arith.constant 0 : i32
    return %c0_i32, %arg0, %c0_i32_0 : i32, i32, i32
  }
}

</mosaic_0001>

<bundles_post_ra>
// kernel: tpu_custom_call.1
= control target key start
LH: loop header
LB: loop body
LE: loop exit
PB: predicated region body
PF: predicated region fallthrough
CT: control target
= control target key end

     0   :  { %s5730_s0 = inlined_call_operand.<no memory space> [shape: s32[1], index: 0, kind: input, shape index: {}]   ;;  %s5731_s1 = inlined_call_operand.vmem [shape: f32[8,16,32], index: 1, kind: input, shape index: {}]   ;;  %s5732_s2 = inlined_call_operand.vmem [shape: f32[16,128], index: 2, kind: input, shape index: {}]   ;;  %s5733_s3 = inlined_call_operand.hbm [shape: f32[3,16,64], index: 3, kind: input, shape index: {}, may-alias: {3,13}]   ;;  %s5734_s4 = inlined_call_operand.vmem [shape: f32[8,16,1], index: 4, kind: input, shape index: {}]   ;;  %s5735_s5 = inlined_call_operand.vmem [shape: bf16[32,384], index: 5, kind: input, shape index: {}]   ;;  %s5736_s6 = inlined_call_operand.vmem [shape: f32[1,384], index: 6, kind: input, shape index: {}]   ;;  %s5737_s7 = inlined_call_operand.hbm [shape: bf16[128,512], index: 7, kind: input, shape index: {}]   ;;  %s5738_s8 = inlined_call_operand.vmem [shape: f32[1,512], index: 8, kind: input, shape index: {}]   ;;  %s5739_s9 = inlined_call_operand.vmem [shape: f32[1,128], index: 9, kind: input, shape index: {}]   ;;  %s5740_s10 = inlined_call_operand.<no memory space> [shape: f32[1,1], index: 10, kind: input, shape index: {}]   ;;  %s5741_s11 = inlined_call_operand.hbm [shape: f32[8,16,128], index: 11, kind: output, shape index: {0}]   ;;  %s5742_s12 = inlined_call_operand.hbm [shape: f32[8,16,128], index: 12, kind: output, shape index: {1}]   ;;  %s5743_s13 = inlined_call_operand.hbm [shape: f32[3,16,64], index: 13, kind: output, shape index: {2}, may-alias: {3,13}]  }
   0x1   :  { %5769 = sst [smem:[#allocation48_spill]] %s5731_s1  ;;  %v20_v0 = vstv %s5740_s10 }
   0x2   :  { %5770 = sst [smem:[#allocation49_spill]] %s5737_s7  ;;  %21 = vst [vmem:[#allocation4] sm:$0x1] %v20_v0 }
   0x3   :  { %5771 = sst [smem:[#allocation50_spill]] %s5741_s11 }
   0x4   :  { %5772 = sst [smem:[#allocation51_spill]] %s5743_s13 }
   0x5   :  { %19 = sst [smem:[#allocation3]] %s5730_s0 }
   0x6   :  { %22 = vsyncpa [#allocation7], 0 }
   0x7   :  { %24 = vsyncpa [#allocation7 + $0x1], 0 }
   0x8   :  { %25 = vsyncpa [#allocation11], 0 }
   0x9   :  { %26 = vsyncpa [#allocation8], 0 }
   0xa   :  { %28 = vsyncpa [#allocation8 + $0x1], 0 }
   0xb   :  { %29 = vsyncpa [#allocation14], 0 }
   0xc   :  { %31 = vsyncpa [#allocation14 + $0x1], 0  ;;  %s4093_s29 = smov 0   ;;  %s4095_s30 = smov 0  }
   0xd   :  { %s4097_s14 = smov 0   ;;  %s4099_s15 = smov 0  }
   0xe LB: > { %5773 = sst [smem:[#allocation20_spill]] %s3988_s29  ;;  %s4114_s0 = sadd.s32 4294967295, %s4000_s15   ;;  %s4000_s15 = sphi %s4099_s15, %s5848_s15   ;;  %s3996_s14 = sphi %s4097_s14, %s5850_s14   ;;  %s3992_s30 = sphi %s4095_s30, %s5852_s30   ;;  %s3988_s29 = sphi %s4093_s29, %s5851_s29  }
   0xf   : > { %5774 = sst [smem:[#allocation21_spill]] %s3996_s14  ;;  %s5744_s10 = sadd.s32 4294967294, %s4000_s15  }
  0x10   : > { %s4118_s16 = sadd.s32 1, %s4000_s15   ;;  %s65_s17 = sadd.s32 1, %s3996_s14 }
  0x11   : > { %5775 = sst [smem:[#allocation22_spill]] %s4118_s16  ;;  %s62_s18 = ssub.s32 %s4000_s15, %s4118_s16 }
  0x12   : > { %p72_p0 = scmp.ne.s32.totalorder %s3996_s14, %s3992_s30  ;;  %p63_p1 = scmp.eq.s32.totalorder %s62_s18, 0 }
  0x13   : > { %p73_p2 = scmp.eq.s32.totalorder %s4000_s15, 0  ;;  %p130_p3 = scmp.ne.s32.totalorder %s3992_s30, %s3988_s29 }
  0x14   : > { %p131_p4 = scmp.eq.s32.totalorder %s4114_s0, 0  ;;  %p306_p7 = scmp.eq.s32.totalorder %s4114_s0, 1 }
  0x15   : > { %s4130_s19 = scalar_select %p63_p1, %s3996_s14, %s65_s17  }
  0x16   : > { %p4132_p5 = por %p73_p2, %p72_p0  ;;  %p4138_p6 = por %p131_p4, %p130_p3 }
  0x17   : > { %5776 = sst [smem:[#allocation23_spill]] %s4130_s19  ;;  %p312_p8 = scmp.eq.s32.totalorder %s5744_s10, 1 }
  0x18   : > { %p3289_p9 = scmp.ge.s32.totalorder %s4000_s15, 1  ;;  %p371_p10 = scmp.lt.s32.totalorder %s4000_s15, 3 }
  0x19   : > { %p4147_p11 = por %p306_p7, %p72_p0  ;;  %p4151_p12 = por %p312_p8, %p130_p3 }
  0x1a   : > { %p4155_p13 = pnand %p3289_p9, %p371_p10  ;;  %s5783_s7 = sld [smem:[#allocation49_spill]] }
  0x1b   : > { %s5780_s23 = scalar_select %p4151_p12, 1, 0 }
  0x1c   : > { %p3596_p1 = pneg %p4155_p13  ;;  %s4002_s28 = smov [#allocation10]  }
  0x1d   : > { %5781 = sst [smem:[#allocation24_spill]] %s5780_s23  ;;  %s393_s17 = sshll.u32 %s4002_s28, 4  ;;  %s394_s17 = int_to_ptr.vmem [resolvable:$true] %s393_s17 }
  0x1e   : > { %p3597_p0 = pnand %p3596_p1, %p131_p4  ;;  %s4003_s18 = smov 256  }
  0x1f   : > { %s4004_s10 = smov 16   ;;  %p3291_p2 = scmp.ge.s32.totalorder %s4000_s15, 2 }
  0x20   : > { %s391_s27 = sshll.u32 %s5783_s7, 4  ;;  %s392_s27 = int_to_ptr.hbm [resolvable:$true] %s391_s27 }
  0x21   : > { %3599 = dma.hbm_to_vmem [thread:$0]  (!%p3597_p0), %s392_s27, 4096, %s394_s17, [#allocation11], %s4003_s18, %s4003_s18, %s4004_s10  }
  0x22   : > { %412 = sbr.rel (%p3291_p2) target bundleno = 84 (0x54), region = 44 }
  0x27   : > { %415 = sbr.rel (!%p4132_p5) target bundleno = 57 (0x39), region = 48  ;;  %s417_s25 = sand.u32 (%p4132_p5), 1, %s3996_s14  }
  0x28   : > { %s3293_s26 = sshll.u32 (%p4132_p5), %s4000_s15, 3  ;;  %s3292_s7 = sshll.u32 (%p4132_p5), %s417_s25, 6 }
  0x29   : > { %s5784_s1 = sld [smem:[#allocation48_spill]] (%p4132_p5)  ;;  %s419_s10 = scalar_lea.vmem (%p4132_p5), [#allocation5], %s3292_s7 }
  0x2f   : > { %s421_s16 = scalar_lea.vmem %s5784_s1, %s3293_s26 }
  0x30   : > { %v464_v1 = vld [vmem:[%s421_s16] sm:$0xff]  ;;  %v466_v2 = vld [vmem:[%s421_s16 + $0x10] sm:$0xff] }
  0x31   : > { %v468_v3 = vld [vmem:[%s421_s16 + $0x20] sm:$0xff]  ;;  %465 = vst [vmem:[%s419_s10] sm:$0xff] %v464_v1  ;;  %v470_v4 = vld [vmem:[%s421_s16 + $0x30] sm:$0xff] }
  0x32   : > { %467 = vst [vmem:[%s419_s10 + $0x8] sm:$0xff] %v466_v2  ;;  %v472_v5 = vld [vmem:[%s421_s16 + $0x40] sm:$0xff]  ;;  %v474_v6 = vld [vmem:[%s421_s16 + $0x50] sm:$0xff] }
  0x33   : > { %469 = vst [vmem:[%s419_s10 + $0x10] sm:$0xff] %v468_v3  ;;  %v476_v7 = vld [vmem:[%s421_s16 + $0x60] sm:$0xff]  ;;  %v478_v8 = vld [vmem:[%s421_s16 + $0x70] sm:$0xff] }
  0x34   : > { %471 = vst [vmem:[%s419_s10 + $0x18] sm:$0xff] %v470_v4 }
  0x35   : > { %473 = vst [vmem:[%s419_s10 + $0x20] sm:$0xff] %v472_v5 }
  0x36   : > { %475 = vst [vmem:[%s419_s10 + $0x28] sm:$0xff] %v474_v6 }
  0x37   : > { %477 = vst [vmem:[%s419_s10 + $0x30] sm:$0xff] %v476_v7 }
  0x38   : > { %479 = vst [vmem:[%s419_s10 + $0x38] sm:$0xff] %v478_v8 }
  0x39 PF: > { %s4177_s19 = sand.u32 1, %s3996_s14   ;;  %s3294_s7 = sshll.u32 %s4000_s15, 3 }
  0x3a   : > { %s3582_s27 = smul.u32 24, %s4177_s19  ;;  %s501_s25 = scalar_lea.hbm %s5733_s3, %s3294_s7 }
  0x3b   : > { %s502_s16 = sshll.u32 %s501_s25, 4  ;;  %s494_s10 = scalar_lea.sflag [#allocation7], %s4177_s19  ;;  %s503_s16 = int_to_ptr.hbm [resolvable:$true] %s502_s16 }
  0x3c   : > { %s497_s26 = scalar_lea.vmem [#allocation6], %s3582_s27  ;;  %s3842_s1 = sshra.s32 %s503_s16, 4  ;;  %s3843_s1 = int_to_ptr.hbm [resolvable:$true] %s3842_s1 }
  0x3d   : > { %s504_s28 = sshll.u32 %s497_s26, 4  ;;  %s3844_s23 = scalar_lea.hbm %s3843_s1, 24  ;;  %s505_s28 = int_to_ptr.vmem [resolvable:$true] %s504_s28 }
  0x3e   : > { %p3845_p3 = scmp.ne.s32.totalorder %s3843_s1, %s3844_s23  ;;  %s3848_s11 = scalar_lea.hbm %s5733_s3, 48 }
  0x3f   : > { %p3849_p9 = scmp.lt.s32.totalorder %s3843_s1, %s5733_s3  ;;  %p3850_p10 = scmp.lt.s32.totalorder %s3848_s11, %s3844_s23 }
  0x40   : > { %p3846_p7 = pnand %p3845_p3, %p4132_p5 }
  0x41   : > { %p3851_p1 = por %p3850_p10, %p3849_p9 }
  0x42   : > { %p3847_p8 = pneg %p3846_p7 }
  0x44   : > { %p3852_p0 = pnand %p3851_p1, %p3847_p8 }
  0x46   : > { %3855 = shalt.err (!%p3852_p0)
}
  0x47   : > { %s4005_s27 = smov 256   ;;  %s4006_s18 = smov 128  }
  0x48   : > { %s4007_s25 = smov 8   ;;  %513 = sbr.rel (!%p4132_p5) target bundleno = 84 (0x54), region = 94 }
  0x49   : > { %3586 = dma.hbm_to_vmem [thread:$0]  (%p4132_p5), %s503_s16, 384, %s505_s28, %s494_s10, %s4005_s27, %s4006_s18, %s4007_s25  }
  0x4a   : > { %s3295_s29 = sshll.u32 (%p4132_p5), %s4177_s19, 6  ;;  %s519_s1 = scalar_lea.vmem (%p4132_p5), %s5734_s4, %s3294_s7 }
  0x4b   : > { %v562_v9 = vld [vmem:[%s519_s1] sm:$0xff] (%p4132_p5)  ;;  %v564_v10 = vld [vmem:[%s519_s1 + $0x10] sm:$0xff] (%p4132_p5)  ;;  %s517_s11 = scalar_lea.vmem (%p4132_p5), [#allocation9], %s3295_s29 }
  0x4c   : > { %v566_v11 = vld [vmem:[%s519_s1 + $0x20] sm:$0xff] (%p4132_p5)  ;;  %563 = vst [vmem:[%s517_s11] sm:$0xff] (%p4132_p5), %v562_v9  ;;  %v568_v12 = vld [vmem:[%s519_s1 + $0x30] sm:$0xff] (%p4132_p5) }
  0x4d   : > { %565 = vst [vmem:[%s517_s11 + $0x8] sm:$0xff] %v564_v10  ;;  %v570_v13 = vld [vmem:[%s519_s1 + $0x40] sm:$0xff]  ;;  %v572_v14 = vld [vmem:[%s519_s1 + $0x50] sm:$0xff] }
  0x4e   : > { %567 = vst [vmem:[%s517_s11 + $0x10] sm:$0xff] %v566_v11  ;;  %v574_v15 = vld [vmem:[%s519_s1 + $0x60] sm:$0xff]  ;;  %v576_v16 = vld [vmem:[%s519_s1 + $0x70] sm:$0xff] }
  0x4f   : > { %569 = vst [vmem:[%s517_s11 + $0x18] sm:$0xff] %v568_v12 }
  0x50   : > { %571 = vst [vmem:[%s517_s11 + $0x20] sm:$0xff] %v570_v13 }
  0x51   : > { %573 = vst [vmem:[%s517_s11 + $0x28] sm:$0xff] %v572_v14 }
  0x52   : > { %575 = vst [vmem:[%s517_s11 + $0x30] sm:$0xff] %v574_v15 }
  0x53   : > { %577 = vst [vmem:[%s517_s11 + $0x38] sm:$0xff] %v576_v16 }
  0x54 PF: > { %586 = sbr.rel (%p4155_p13) target bundleno = 2629 (0xa45), region = 132 }
  0x59   : > { %s4208_s20 = sand.u32 1, %s3992_s30  }
  0x5a   : > { %s4211_s23 = sshll.u32 %s4208_s20, 6  ;;  %s3583_s19 = smul.u32 24, %s4208_s20 }
  0x5b   : > { %s4215_s7 = scalar_lea.vmem [#allocation5], %s4211_s23  ;;  %s596_s16 = scalar_lea.sflag [#allocation7], %s4208_s20 }
  0x5c   : > { %s4220_s26 = scalar_lea.vmem [#allocation6], %s3583_s19 }
  0x5d   : > { %3971 = dma.done.wait (%p4138_p6), %s596_s16, 384  }
  0x5e   : > { %3973 = vsyncadd (%p4138_p6), %s596_s16, 4294966912  ;;  %s4227_s24 = scalar_lea.vmem [#allocation9], %s4211_s23 }
  0x5f   : > { %3975 = dma.done.wait (%p131_p4), [#allocation11], 4096  }
  0x60   : > { %3977 = vsyncadd (%p131_p4), [#allocation11], 4294963200  ;;  %v3318_v17 = vld [vmem:[%s5735_s5 + $0x18] sm:$0xf]  ;;  %v3548_v18 = vld [vmem:[%s5735_s5 + $0x20] sm:$0xf0] }
  0x61   : > { %v3426_v19 = vld [vmem:[#allocation10 + $0xe0] sm:$0xf]  ;;  %v3319_v20 = vor.u32 %v3548_v18, %v3318_v17  ;;  %v3580_v21 = vld [vmem:[#allocation10 + $0xec] sm:$0xf0]  ;;  %v3545_v23 = vld [vmem:[%s5735_s5 + $0x8] sm:$0xf0] }
  0x62   : > { %v3306_v22 = vld [vmem:[%s5735_s5] sm:$0xf]  ;;  %v4245_v24 = vor.u32 %v3580_v21, %v3426_v19  ;;  %v3414_v25 = vld [vmem:[#allocation10 + $0xc0] sm:$0xf]  ;;  %v690_v29 = vld [vmem:[%s4215_s7 + $0x8] sm:$0xff]  ;;  %vm749_vm0 = vcmask 261120  }
  0x63   : > { %v3576_v26 = vld [vmem:[#allocation10 + $0xcc] sm:$0xf0]  ;;  %768 = vmatpush.bf16.msra.mxu0 %v3319_v20  ;;  %v3307_v27 = vor.u32 %v3545_v23, %v3306_v22  ;;  %v3402_v31 = vld [vmem:[#allocation10 + $0xa0] sm:$0xf]  ;;  %v3434_v34 = vld [vmem:[#allocation10 + $0xe8] sm:$0xf] }
  0x64   : > { %v689_v28 = vld [vmem:[%s4215_s7] sm:$0xff]  ;;  %1050 = vmatpush.bf16.msra.mxu3 %v4245_v24  ;;  %v4250_v30 = vor.u32 %v3576_v26, %v3414_v25  ;;  %v3581_v35 = vld [vmem:[#allocation10 + $0xf4] sm:$0xf0]  ;;  %v3390_v38 = vld [vmem:[#allocation10 + $0x80] sm:$0xf]  ;;  %p677_p4 = scmp.lt.s32.totalorder %s4114_s0, 1 }
  0x65   : > { %v3572_v32 = vld [vmem:[#allocation10 + $0xac] sm:$0xf0]  ;;  %v4252_v33 = vpack.c.bf16 %v690_v29, %v689_v28  ;;  %v4257_v37 = vor.u32 %v3581_v35, %v3434_v34  ;;  %v3422_v40 = vld [vmem:[#allocation10 + $0xc8] sm:$0xf]  ;;  %v3577_v41 = vld [vmem:[#allocation10 + $0xd4] sm:$0xf0] }
  0x66   : > { %v4255_v36 = vor.u32 %v3572_v32, %v3402_v31  ;;  %v3568_v39 = vld [vmem:[#allocation10 + $0x8c] sm:$0xf0]  ;;  %v4262_v42 = vor.u32 %v3577_v41, %v3422_v40  ;;  %v3410_v44 = vld [vmem:[#allocation10 + $0xa8] sm:$0xf]  ;;  %v3573_v45 = vld [vmem:[#allocation10 + $0xb4] sm:$0xf0] }
  0x67   : > { %769 = vmatpush.bf16.msra.mxu0 %v3307_v27  ;;  %v4265_v43 = vor.u32 %v3568_v39, %v3390_v38  ;;  %v3378_v46 = vld [vmem:[#allocation10 + $0x60] sm:$0xf]  ;;  %v3564_v47 = vld [vmem:[#allocation10 + $0x6c] sm:$0xf0]  ;;  %v4269_v48 = vor.u32 %v3573_v45, %v3410_v44  ;;  %v3398_v52 = vld [vmem:[#allocation10 + $0x88] sm:$0xf] }
  0x68   : > { %1051 = vmatpush.bf16.msra.mxu3 %v4250_v30  ;;  %v4272_v49 = vor.u32 %v3564_v47, %v3378_v46  ;;  %v3366_v50 = vld [vmem:[#allocation10 + $0x40] sm:$0xf]  ;;  %v3560_v51 = vld [vmem:[#allocation10 + $0x4c] sm:$0xf0]  ;;  %v3569_v53 = vld [vmem:[#allocation10 + $0x94] sm:$0xf0] }
  0x69   : > { %s678_s14 = scalar_select %p677_p4, %s4114_s0, 1  ;;  %v691_v54 = vld [vmem:[%s4215_s7 + $0x10] sm:$0xff]  ;;  %v692_v55 = vld [vmem:[%s4215_s7 + $0x18] sm:$0xff]  ;;  %v4278_v56 = vor.u32 %v3569_v53, %v3398_v52  ;;  %v4281_v57 = vor.u32 %v3560_v51, %v3366_v50  ;;  %v3320_v59 = vld [vmem:[%s5735_s5 + $0x24] sm:$0xf0]  ;;  %vm685_vm9 = vcmask 523264  }
  0x6a   : > { %3328 = vmatmul.msk.bf16.vlgmr.msra.gmra.mxu0 %vm749_vm0, %v4252_v33  ;;  %v3547_v58 = vld [vmem:[%s5735_s5 + $0x1c] sm:$0xf]  ;;  %v3354_v60 = vld [vmem:[#allocation10 + $0x20] sm:$0xf]  ;;  %v3556_v61 = vld [vmem:[#allocation10 + $0x2c] sm:$0xf0]  ;;  %v4289_v63 = vpack.c.bf16 %v692_v55, %v691_v54 }
  0x6b   : > { %1076 = vmatpush.bf16.msrb.mxu0 %v4257_v37  ;;  %v3323_v62 = vor.u32 %v3547_v58, %v3320_v59  ;;  %s3303_s28 = sshll.u32 %s678_s14, 3  ;;  %v4293_v0 = vor.u32 %v3556_v61, %v3354_v60  ;;  %v3342_v1 = vld [vmem:[#allocation10] sm:$0xf]  ;;  %v3552_v2 = vld [vmem:[#allocation10 + $0xc] sm:$0xf0]  ;;  %v694_v40 = vld [vmem:[%s4215_s7 + $0x28] sm:$0xff] }
  0x6c   : > { %1052 = vmatpush.bf16.msra.mxu3 %v4255_v36  ;;  %v3544_v3 = vld [vmem:[%s5735_s5 + $0x4] sm:$0xf]  ;;  %s680_s18 = scalar_lea.vmem %s5732_s2, %s3303_s28  ;;  %v3308_v4 = vld [vmem:[%s5735_s5 + $0xc] sm:$0xf0]  ;;  %v3386_v5 = vld [vmem:[#allocation10 + $0x68] sm:$0xf]  ;;  %v4309_v11 = vor.u32 %v3552_v2, %v3342_v1 }
  0x6d   : > { %797 = vmatpush.bf16.msra.mxu1 %v3323_v62  ;;  %v3565_v6 = vld [vmem:[#allocation10 + $0x74] sm:$0xf0]  ;;  %v3578_v7 = vld [vmem:[#allocation10 + $0xe4] sm:$0xf]  ;;  %v3428_v8 = vld [vmem:[#allocation10 + $0xf0] sm:$0xf0]  ;;  %v3311_v9 = vor.u32 %v3544_v3, %v3308_v4 }
  0x6e   : > { %v4306_v10 = vor.u32 %v3565_v6, %v3386_v5  ;;  %v4311_v12 = vld [vmem:[%s680_s18] sm:$0xff]  ;;  %v4313_v13 = vor.u32 %v3578_v7, %v3428_v8  ;;  %v3549_v15 = vld [vmem:[%s5735_s5 + $0x28] sm:$0xf0]  ;;  %v3374_v16 = vld [vmem:[#allocation10 + $0x48] sm:$0xf]  ;;  %s4521_s14 = scalar_lea.vmem [#allocation13], %s4211_s23 }
  0x6f   : > { %1077 = vmatpush.bf16.msrb.mxu0 %v4262_v42  ;;  %v3326_v14 = vld [vmem:[%s5735_s5 + $0x20] sm:$0xf]  ;;  %v3574_v17 = vld [vmem:[#allocation10 + $0xc4] sm:$0xf]  ;;  %v3416_v18 = vld [vmem:[#allocation10 + $0xd0] sm:$0xf0]  ;;  %v4325_v21 = vpack.c.bf16 %v4311_v12, %v4311_v12 }
  0x70   : > { %1053 = vmatpush.bf16.msra.mxu3 %v4265_v43  ;;  %v3327_v19 = vor.u32 %v3549_v15, %v3326_v14  ;;  %v3561_v20 = vld [vmem:[#allocation10 + $0x54] sm:$0xf0]  ;;  %v3546_v25 = vld [vmem:[%s5735_s5 + $0x10] sm:$0xf0]  ;;  %v3362_v26 = vld [vmem:[#allocation10 + $0x28] sm:$0xf]  ;;  %v4339_v27 = vor.u32 %v3574_v17, %v3416_v18 }
  0x71   : > { %798 = vmatpush.bf16.msra.mxu1 %v3311_v9  ;;  %v4329_v22 = vor.u32 %v3561_v20, %v3374_v16  ;;  %v3314_v23 = vld [vmem:[%s5735_s5 + $0x8] sm:$0xf]  ;;  %v3570_v28 = vld [vmem:[#allocation10 + $0xa4] sm:$0xf]  ;;  %v3350_v35 = vld [vmem:[#allocation10 + $0x8] sm:$0xf] }
  0x72   : > { %826 = vmatpush.bf16.msra.mxu2 %v3327_v19  ;;  %v3315_v29 = vor.u32 %v3546_v25, %v3314_v23  ;;  %v3557_v31 = vld [vmem:[#allocation10 + $0x34] sm:$0xf0]  ;;  %v3404_v32 = vld [vmem:[#allocation10 + $0xb0] sm:$0xf0]  ;;  %v3566_v46 = vld [vmem:[#allocation10 + $0x84] sm:$0xf] }
  0x73   : > { %1078 = vmatpush.bf16.msrb.mxu0 %v4269_v48  ;;  %v4342_v34 = vor.u32 %v3557_v31, %v3362_v26  ;;  %v3553_v38 = vld [vmem:[#allocation10 + $0x14] sm:$0xf0]  ;;  %v693_v39 = vld [vmem:[%s4215_s7 + $0x20] sm:$0xff]  ;;  %v4349_v41 = vor.u32 %v3570_v28, %v3404_v32  ;;  %v3562_v51 = vld [vmem:[#allocation10 + $0x64] sm:$0xf]  ;;  %s4576_s13 = scalar_lea.vmem [#allocation15], %s3583_s19 }
  0x74   : > { %1054 = vmatpush.bf16.msra.mxu3 %v4272_v49  ;;  %3332 = vmatmul.msk.bf16.vlgmr.msra.gmra.mxu1 %vm749_vm0, %v4252_v33  ;;  %v4352_v44 = vor.u32 %v3553_v38, %v3350_v35  ;;  %v699_v45 = vpack.c.bf16 %v694_v40, %v693_v39  ;;  %v3392_v47 = vld [vmem:[#allocation10 + $0x90] sm:$0xf0]  ;;  %v3554_v58 = vld [vmem:[#allocation10 + $0x24] sm:$0xf]  ;;  %v696_v61 = vld [vmem:[%s4215_s7 + $0x38] sm:$0xff]  ;;  %s4592_s19 = sld [smem:[#allocation3]] }
  0x75   : > { %1173 = vmatpush.bf16.msrb.mxu1 %v4245_v24  ;;  %v4359_v50 = vor.u32 %v3566_v46, %v3392_v47  ;;  %v3380_v52 = vld [vmem:[#allocation10 + $0x70] sm:$0xf0]  ;;  %v695_v60 = vld [vmem:[%s4215_s7 + $0x30] sm:$0xff]  ;;  %v4436_v5 = vld [vmem:[%s5736_s6] sm:$0x7]  ;;  %s4008_s11 = smov 64  }
  0x76   : > { %827 = vmatpush.bf16.msra.mxu2 %v3315_v29  ;;  %v4366_v53 = vor.u32 %v3562_v51, %v3380_v52  ;;  %v3368_v54 = vld [vmem:[#allocation10 + $0x50] sm:$0xf0]  ;;  %v700_v1 = vpack.c.bf16 %v696_v61, %v695_v60  ;;  %v3550_v2 = vld [vmem:[#allocation10 + $0x4] sm:$0xf]  ;;  %v711_v6 = vperm.slane %v4436_v5, 0 }
  0x77   : > { %1079 = vmatpush.bf16.msrb.mxu0 %v4278_v56  ;;  %v3356_v59 = vld [vmem:[#allocation10 + $0x30] sm:$0xf0]  ;;  %v4448_v17 = vld [vmem:[%s5738_s8] sm:$0xf]  ;;  %v3466_v29 = vld [vmem:[#allocation10 + $0xf8] sm:$0xf0] }
  0x78   : > { %1055 = vmatpush.bf16.msra.mxu3 %v4281_v57  ;;  %v4380_v62 = vor.u32 %v3554_v58, %v3356_v59  ;;  %v3344_v3 = vld [vmem:[#allocation10 + $0x10] sm:$0xf0]  ;;  %v4451_v18 = vperm.slane %v4448_v17, 0  ;;  %v3579_v28 = vld [vmem:[#allocation10 + $0xec] sm:$0xf] }
  0x79   : > { %1174 = vmatpush.bf16.msrb.mxu1 %v4250_v30  ;;  %3336 = vmatmul.msk.bf16.vlgmr.msra.gmra.mxu2 %vm749_vm0, %v4252_v33  ;;  %v3558_v33 = vld [vmem:[#allocation10 + $0x44] sm:$0xf]  ;;  %v4387_v4 = vor.u32 %v3550_v2, %v3344_v3  ;;  %v4456_v32 = vor.u32 %v3579_v28, %v3466_v29  ;;  %v3575_v38 = vld [vmem:[#allocation10 + $0xcc] sm:$0xf]  ;;  %v3462_v39 = vld [vmem:[#allocation10 + $0xd8] sm:$0xf0] }
  0x7a   : > { %3329 = vmatmul.msk.bf16.gmra.mxu0 %vm749_vm0, %v4289_v63  ;;  %1186 = vmatpush.bf16.msrb.mxu2 %v4313_v13  ;;  %v4373_v55 = vor.u32 %v3558_v33, %v3368_v54  ;;  %5786 = vst [vmem:[#allocation26_spill] sm:$0xff] %v4451_v18  ;;  %v3571_v47 = vld [vmem:[#allocation10 + $0xac] sm:$0xf]  ;;  %v3458_v51 = vld [vmem:[#allocation10 + $0xb8] sm:$0xf0]  ;;  %v4483_v29 = vperm.slane %v4448_v17, 1 }
  0x7b   : > { %1080 = vmatpush.bf16.msrb.mxu0 %v4306_v10  ;;  %v4464_v33 = vor.u32 %v3571_v47, %v3458_v51  ;;  %v3567_v58 = vld [vmem:[#allocation10 + $0x8c] sm:$0xf]  ;;  %v3454_v60 = vld [vmem:[#allocation10 + $0x98] sm:$0xf0]  ;;  %p1317_p5 = scmp.lt.s32.totalorder %s4592_s19, 3  ;;  %p1315_p6 = scmp.lt.s32.totalorder %s4592_s19, 2 }
  0x7c   : > { %1056 = vmatpush.bf16.msra.mxu3 %v4293_v0  ;;  %v3563_v2 = vld [vmem:[#allocation10 + $0x6c] sm:$0xf]  ;;  %v3450_v3 = vld [vmem:[#allocation10 + $0x78] sm:$0xf0]  ;;  %5792 = vst [vmem:[#allocation32_spill] sm:$0xff] %v4483_v29  ;;  %s4679_s17 = sadd.s32 1, %s4592_s19 }
  0x7d   : > { %1175 = vmatpush.bf16.msrb.mxu1 %v4255_v36  ;;  %v3551_v47 = vld [vmem:[#allocation10 + $0xc] sm:$0xf]  ;;  %v3438_v51 = vld [vmem:[#allocation10 + $0x18] sm:$0xf0]  ;;  %s1316_s16 = scalar_select %p1315_p6, %s4592_s19, 2 }
  0x7e   : > { %1187 = vmatpush.bf16.msrb.mxu2 %v4339_v27  ;;  %p1561_p13 = scmp.lt.s32.totalorder %s4679_s17, 3  ;;  %p1559_p3 = scmp.lt.s32.totalorder %s4679_s17, 2 }
  0x7f   : > { %1081 = vmatpush.bf16.msrb.mxu0 %v4329_v22  ;;  %s3473_s28 = sshll.u32 %s1316_s16, 3  ;;  %s4771_s25 = sadd.s32 2, %s4592_s19 }
  0x80   : > { %1057 = vmatpush.bf16.msra.mxu3 %v4309_v11  ;;  %s1321_s10 = scalar_lea.vmem %s4576_s13, %s3473_s28 [#allocation15]  ;;  %s5854_s17 = smov (!%p1559_p3, %s4679_s17), 2 }
  0x81   : > { %1176 = vmatpush.bf16.msrb.mxu1 %v4265_v43  ;;  %s1562_s7 = scalar_select %p1561_p13, 1, 0 }
  0x82   : > { %1188 = vmatpush.bf16.msrb.mxu2 %v4349_v41  ;;  %s3481_s21 = sshll.u32 %s5854_s17, 3  ;;  %p1802_p7 = scmp.lt.s32.totalorder %s4771_s25, 3 }
  0x83   : > { %1058 = vmatmul.bf16.vlgmr.msra.gmra.mxu3 %v4325_v21  ;;  %1082 = vmatpush.bf16.msrb.mxu0 %v4342_v34  ;;  %s1563_s27 = scvt.s32.f32 %s1562_s7  ;;  %s1565_s18 = scalar_lea.vmem %s4576_s13, %s3481_s21 [#allocation15] }
  0x84   : > { %1063 = vmatpush.bf16.msrb.mxu3 %v4313_v13  ;;  %3333 = vmatmul.msk.bf16.gmra.mxu1 %vm749_vm0, %v4289_v63  ;;  %s1803_s29 = scalar_select %p1802_p7, 1, 0 }
  0x85   : > { %1177 = vmatpush.bf16.msrb.mxu1 %v4272_v49  ;;  %p1800_p8 = scmp.lt.s32.totalorder %s4771_s25, 2  ;;  %s4902_s7 = sadd.s32 3, %s4592_s19 }
  0x86   : > { %1189 = vmatpush.bf16.msrb.mxu2 %v4359_v50  ;;  %p2043_p9 = scmp.lt.s32.totalorder %s4902_s7, 3  ;;  %p2041_p10 = scmp.lt.s32.totalorder %s4902_s7, 2 }
  0x87   : > { %1083 = vmatpush.bf16.msrb.mxu0 %v4352_v44  ;;  %s5856_s25 = smov (!%p1800_p8, %s4771_s25), 2  ;;  %s5123_s17 = sadd.s32 5, %s4592_s19 }
  0x88   : > { %1064 = vmatpush.bf16.msrb.mxu3 %v4339_v27  ;;  %s3490_s16 = sshll.u32 %s5856_s25, 3  ;;  %s5858_s7 = smov (!%p2041_p10, %s4902_s7), 2 }
  0x89   : > { %1178 = vmatpush.bf16.msrb.mxu1 %v4281_v57  ;;  %3337 = vmatmul.msk.bf16.gmra.mxu2 %vm749_vm0, %v4289_v63  ;;  %s1806_s28 = scalar_lea.vmem %s4576_s13, %s3490_s16 [#allocation15]  ;;  %p2525_p4 = scmp.lt.s32.totalorder %s5123_s17, 3 }
  0x8a   : > { %3330 = vmatmul.msk.bf16.gmra.mxu0 %vm749_vm0, %v699_v45  ;;  %1190 = vmatpush.bf16.msrb.mxu2 %v4366_v53 }
  0x8b   : > { %1212 = vmatpush.bf16.msra.mxu0 %v4456_v32 }
  0x8c   : > { %1065 = vmatpush.bf16.msrb.mxu3 %v4349_v41 }
  0x8d   : > { %1179 = vmatpush.bf16.msrb.mxu1 %v4293_v0 }
  0x8e   : > { %1191 = vmatpush.bf16.msrb.mxu2 %v4373_v55 }
  0x90   : > { %1066 = vmatpush.bf16.msrb.mxu3 %v4359_v50 }
  0x91   : > { %1180 = vmatpush.bf16.msrb.mxu1 %v4309_v11 }
  0x92   : > { %1192 = vmatpush.bf16.msrb.mxu2 %v4380_v62 }
  0x94   : > { %1067 = vmatpush.bf16.msrb.mxu3 %v4366_v53  ;;  %3334 = vmatmul.msk.bf16.gmra.mxu1 %vm749_vm0, %v699_v45 }
  0x95   : > { %1427 = vmatpush.bf16.msra.mxu1 %v4245_v24 }
  0x96   : > { %1193 = vmatpush.bf16.msrb.mxu2 %v4387_v4 }
  0x98   : > { %1068 = vmatpush.bf16.msrb.mxu3 %v4373_v55 }
  0x99   : > { %1428 = vmatpush.bf16.msra.mxu1 %v4250_v30  ;;  %3338 = vmatmul.msk.bf16.gmra.mxu2 %vm749_vm0, %v699_v45  ;;  %v4459_v45 = vor.u32 %v3575_v38, %v3462_v39 }
  0x9a   : > { %3331 = vmatmul.msk.bf16.gmra.mxu0 %vm749_vm0, %v700_v1  ;;  %1440 = vmatpush.bf16.msra.mxu2 %v4313_v13 }
  0x9b   : > { %1213 = vmatpush.bf16.msra.mxu0 %v4459_v45 }
  0x9c   : > { %1069 = vmatpush.bf16.msrb.mxu3 %v4380_v62 }
  0x9d   : > { %1429 = vmatpush.bf16.msra.mxu1 %v4255_v36 }
  0x9e   : > { %1441 = vmatpush.bf16.msra.mxu2 %v4339_v27 }
  0x9f   : > { %1214 = vmatpush.bf16.msra.mxu0 %v4464_v33 }
  0xa0   : > { %1070 = vmatpush.bf16.msrb.mxu3 %v4387_v4 }
  0xa1   : > { %1430 = vmatpush.bf16.msra.mxu1 %v4265_v43 }
  0xa2   : > { %1442 = vmatpush.bf16.msra.mxu2 %v4349_v41 }
  0xa3   : > { %1071 = vmatmul.bf16.vlgmr.msrb.gmra.mxu3 %v4325_v21 }
  0xa4   : > { %1199 = vmatpush.bf16.msra.mxu3 %v4257_v37  ;;  %3335 = vmatmul.msk.bf16.gmra.mxu1 %vm749_vm0, %v700_v1 }
  0xa5   : > { %1431 = vmatpush.bf16.msra.mxu1 %v4272_v49 }
  0xa6   : > { %1443 = vmatpush.bf16.msra.mxu2 %v4359_v50 }
  0xa8   : > { %1200 = vmatpush.bf16.msra.mxu3 %v4262_v42 }
  0xa9   : > { %1432 = vmatpush.bf16.msra.mxu1 %v4281_v57  ;;  %3339 = vmatmul.msk.bf16.gmra.mxu2 %vm749_vm0, %v700_v1  ;;  %v4469_v1 = vor.u32 %v3567_v58, %v3454_v60 }
  0xaa   : > { %1084 = vmatmul.bf16.vlgmr.msrb.gmra.mxu0 %v4325_v21  ;;  %1444 = vmatpush.bf16.msra.mxu2 %v4366_v53 }
  0xab   : > { %1215 = vmatpush.bf16.msra.mxu0 %v4469_v1 }
  0xac   : > { %1201 = vmatpush.bf16.msra.mxu3 %v4269_v48 }
  0xad   : > { %1433 = vmatpush.bf16.msra.mxu1 %v4293_v0 }
  0xae   : > { %1445 = vmatpush.bf16.msra.mxu2 %v4373_v55 }
  0xb0   : > { %1202 = vmatpush.bf16.msra.mxu3 %v4278_v56 }
  0xb1   : > { %1434 = vmatpush.bf16.msra.mxu1 %v4309_v11 }
  0xb2   : > { %1446 = vmatpush.bf16.msra.mxu2 %v4380_v62 }
  0xb4   : > { %1203 = vmatpush.bf16.msra.mxu3 %v4306_v10 }
  0xb6   : > { %1447 = vmatpush.bf16.msra.mxu2 %v4387_v4 }
  0xb8   : > { %1204 = vmatpush.bf16.msra.mxu3 %v4329_v22 }
  0xbc   : > { %1205 = vmatpush.bf16.msra.mxu3 %v4342_v34 }
  0xc0   : > { %1206 = vmatpush.bf16.msra.mxu3 %v4352_v44 }
  0xc4   : > { %1453 = vmatpush.bf16.msrb.mxu3 %v4257_v37 }
  0xc8   : > { %1454 = vmatpush.bf16.msrb.mxu3 %v4262_v42 }
  0xcc   : > { %1455 = vmatpush.bf16.msrb.mxu3 %v4269_v48 }
  0xd0   : > { %1456 = vmatpush.bf16.msrb.mxu3 %v4278_v56 }
  0xd4   : > { %1457 = vmatpush.bf16.msrb.mxu3 %v4306_v10 }
  0xd8   : > { %1458 = vmatpush.bf16.msrb.mxu3 %v4329_v22 }
  0xdc   : > { %1459 = vmatpush.bf16.msrb.mxu3 %v4342_v34 }
  0xe0   : > { %1460 = vmatpush.bf16.msrb.mxu3 %v4352_v44 }
  0xe7   : > { %v771_v63 = vpop.f32.mrf.mxu0 }
  0xe8   : > { %v772_v20 = vadd.f32 %v771_v63, %v711_v6  ;;  %v4472_v63 = vor.u32 %v3563_v2, %v3450_v3 }
  0xea   : > { %1216 = vmatpush.bf16.msra.mxu0 %v4472_v63 }
  0xef   : > { %v773_v7 = vpop.f32.mrf.mxu0 }
  0xf0   : > { %v4439_v8 = vadd.f32 %v773_v7, %v711_v6  ;;  %v3559_v7 = vld [vmem:[#allocation10 + $0x4c] sm:$0xf] }
  0xf7   : > { %v776_v9 = vpop.f32.mrf.mxu0 }
  0xf8   : > { %v4441_v14 = vadd.f32 %v776_v9, %v711_v6  ;;  %v3446_v9 = vld [vmem:[#allocation10 + $0x58] sm:$0xf0] }
  0xff   : > { %v778_v15 = vpop.f32.mrf.mxu0 }
 0x100   : > { %v4443_v16 = vadd.f32 %v778_v15, %v711_v6  ;;  %v4475_v15 = vperm.slane %v4436_v5, 1 }
 0x102   : > { %5785 = vst [vmem:[#allocation25_spill] sm:$0xff] %v4443_v16 }
 0x103   : > { %5790 = vst [vmem:[#allocation30_spill] sm:$0xff] %v4475_v15 }
 0x106   : > { %v1059_v19 = vpop.f32.mrf.mxu3 }
 0x107   : > { %v1060_v21 = vadd.f32 %v1059_v19, %v4451_v18  ;;  %v781_v23 = vpop.f32.mrf.mxu0  ;;  %v4478_v19 = vor.u32 %v3559_v7, %v3446_v9  ;;  %v4496_v9 = vperm.slane %v4448_v17, 2 }
 0x108   : > { %v4454_v25 = vadd.f32 %v781_v23, %v711_v6  ;;  %v3442_v23 = vld [vmem:[#allocation10 + $0x38] sm:$0xf0] }
 0x109   : > { %v1092_v26 = vadd.f32 %v1060_v21, %v772_v20  ;;  %v3555_v21 = vld [vmem:[#allocation10 + $0x2c] sm:$0xf]  ;;  %1217 = vmatpush.bf16.msra.mxu0 %v4478_v19 }
 0x10a   : > { %5787 = vst [vmem:[#allocation27_spill] sm:$0xff] %v4454_v25  ;;  %v4487_v38 = vor.u32 %v3555_v21, %v3442_v23 }
 0x10b   : > { %v3436_v31 = vmul.f32 -1.442695, %v1092_v26 }
 0x10d   : > { %3680 = vpow2.f32 %v3436_v31  ;;  %v800_v31 = vpop.f32.mrf.mxu1  ;;  %1218 = vmatpush.bf16.msra.mxu0 %v4487_v38 }
 0x10e   : > { %v1061_v35 = vpop.f32.mrf.mxu3 }
 0x10f   : > { %v783_v40 = vpop.f32.mrf.mxu0  ;;  %v801_v35 = vadd.f32 %v800_v31, %v4475_v15 }
 0x110   : > { %v4461_v46 = vadd.f32 %v783_v40, %v711_v6 }
 0x112   : > { %5788 = vst [vmem:[#allocation28_spill] sm:$0xff] %v4461_v46 }
 0x113   : > { %v3681_v52 = vpop.eup %3680 }
 0x114   : > { %v1096_v54 = vadd.f32 1.0, %v3681_v52 }
 0x116   : > { %3682 = vrcp.f32 %v1096_v54  ;;  %v1108_v31 = vand.u32 2147483648, %v1096_v54  ;;  %vm1102_vm2 = vweird.f32 %v1096_v54 }
 0x117   : > { %v786_v59 = vpop.f32.mrf.mxu0 }
 0x118   : > { %v4467_v61 = vadd.f32 %v786_v59, %v711_v6 }
 0x11a   : > { %5789 = vst [vmem:[#allocation29_spill] sm:$0xff] %v4467_v61 }
 0x11c   : > { %v3683_v26 = vpop.eup %3682 }
 0x11d   : > { %v1098_v40 = vmul.f32 %v3683_v26, %v1096_v54  ;;  %vm1103_vm1 = vweird.f32 %v3683_v26 }
 0x11e   : > { %vm1104_vm3 = vmor %vm1102_vm2, %vm1103_vm1 }
 0x11f   : > { %v788_v20 = vpop.f32.mrf.mxu0  ;;  %v1099_v60 = vsub.f32 1.0, %v1098_v40 }
 0x120   : > { %v4480_v28 = vadd.f32 %v788_v20, %v711_v6  ;;  %v4491_v6 = vor.u32 %v3551_v47, %v3438_v51  ;;  %v4501_v51 = vperm.slane %v4436_v5, 2 }
 0x121   : > { %v1100_v3 = vmul.f32 %v3683_v26, %v1099_v60 }
 0x122   : > { %5791 = vst [vmem:[#allocation31_spill] sm:$0xff] %v4480_v28  ;;  %1219 = vmatpush.bf16.msra.mxu0 %v4491_v6 }
 0x123   : > { %v1101_v20 = vadd.f32 %v3683_v26, %v1100_v3 }
 0x125   : > { %v1105_v47 = vsel %vm1104_vm3, %v3683_v26, %v1101_v20 }
 0x126   : > { %v1072_v39 = vpop.f32.mrf.mxu3  ;;  %1466 = vmatpush.bf16.msrb.mxu0 %v4456_v32 }
 0x127   : > { %v1073_v52 = vadd.f32 %v1072_v39, %v4483_v29  ;;  %v1085_v59 = vpop.f32.mrf.mxu0  ;;  %v1106_v39 = vand.u32 2147483647, %v1096_v54 }
 0x128   : > { %v1086_v40 = vadd.f32 %v1085_v59, %v4496_v9 }
 0x129   : > { %v1112_v58 = vadd.f32 %v1073_v52, %v801_v35  ;;  %v1109_v52 = vor.u32 1.1754944e-38, %v1108_v31  ;;  %vm1107_vm4 = vcmp.eq.f32.partialorder %v1106_v39, 8.507059e+37 }
 0x12a   : > { %1467 = vmatpush.bf16.msrb.mxu0 %v4459_v45 }
 0x12b   : > { %v3437_v2 = vmul.f32 -1.442695, %v1112_v58  ;;  %v829_v58 = vpop.f32.mrf.mxu2  ;;  %v1110_v60 = vsel %vm1107_vm4, %v1109_v52, %v1105_v47 }
 0x12c   : > { %v830_v3 = vadd.f32 %v829_v58, %v4501_v51 }
 0x12d   : > { %3684 = vpow2.f32 %v3437_v2  ;;  %v1132_v2 = vmul.f32 %v1110_v60, %v1086_v40 }
 0x12e   : > { %v1074_v7 = vpop.f32.mrf.mxu3  ;;  %1468 = vmatpush.bf16.msrb.mxu0 %v4464_v33 }
 0x12f   : > { %v1087_v21 = vpop.f32.mrf.mxu0 }
 0x130   : > { %v1133_v21 = vadd.f32 %v1132_v2, %v830_v3  ;;  %v4513_v2 = vld [vmem:[%s5739_s9] ss:$0 sm:$0xff] }
 0x132   : > { %1469 = vmatpush.bf16.msrb.mxu0 %v4469_v1 }
 0x133   : > { %v3685_v23 = vpop.eup %3684 }
 0x134   : > { %v1116_v35 = vadd.f32 1.0, %v3685_v23 }
 0x136   : > { %3686 = vrcp.f32 %v1116_v35  ;;  %1470 = vmatpush.bf16.msrb.mxu0 %v4472_v63  ;;  %v1128_v59 = vand.u32 2147483648, %v1116_v35  ;;  %v1126_v20 = vand.u32 2147483647, %v1116_v35  ;;  %vm1122_vm6 = vweird.f32 %v1116_v35 }
 0x137   : > { %3688 = vtanh.f32 %v1133_v21 }
 0x138   : > { %v1129_v31 = vor.u32 1.1754944e-38, %v1128_v59  ;;  %vm1127_vm8 = vcmp.eq.f32.partialorder %v1126_v20, 8.507059e+37 }
 0x13a   : > { %1471 = vmatpush.bf16.msrb.mxu0 %v4478_v19 }
 0x13c   : > { %v3687_v54 = vpop.eup %3686 }
 0x13d   : > { %v1118_v7 = vmul.f32 %v3687_v54, %v1116_v35  ;;  %vm1123_vm5 = vweird.f32 %v3687_v54  ;;  %v3689_v52 = vpop.eup %3688 }
 0x13e   : > { %vm1124_vm7 = vmor %vm1122_vm6, %vm1123_vm5  ;;  %1472 = vmatpush.bf16.msrb.mxu0 %v4487_v38  ;;  %vm1261_vm5 = vcmask 23552  }
 0x13f   : > { %v1119_v26 = vsub.f32 1.0, %v1118_v7  ;;  %v4559_v7 = vpop.f32.mrf.mxu2 }
 0x141   : > { %v1120_v5 = vmul.f32 %v3687_v54, %v1119_v26 }
 0x142   : > { %1473 = vmatpush.bf16.msrb.mxu0 %v4491_v6 }
 0x143   : > { %v1121_v23 = vadd.f32 %v3687_v54, %v1120_v5 }
 0x145   : > { %v1125_v39 = vsel %vm1124_vm7, %v3687_v54, %v1121_v23  ;;  %v802_v54 = vpop.f32.mrf.mxu1  ;;  %v683_v23 = vld [vmem:[%s4220_s26 + $0x8] sm:$0xff] }
 0x146   : > { %v1130_v40 = vsel %vm1127_vm8, %v1129_v31, %v1125_v39  ;;  %v684_v31 = vld [vmem:[%s4220_s26 + $0x10] sm:$0xff]  ;;  %v682_v39 = vld [vmem:[%s4220_s26] sm:$0xff]  ;;  %687 = vst.msk [vmem:[%s4576_s13 + $0x8] sm:$0xff] %vm685_vm9, %v683_v23  ;;  %s1318_s26 = scalar_select %p1317_p5, 1, 0  ;;  %v4602_v23 = vperm.slane %v4448_v17, 3 }
 0x147   : > { %v1135_v47 = vsub.f32 1.0, %v1130_v40  ;;  %v1137_v60 = vmul.f32 %v1130_v40, %v4311_v12  ;;  %v4563_v26 = vpop.f32.mrf.mxu2  ;;  %688 = vst.msk [vmem:[%s4576_s13 + $0x10] sm:$0xff] %vm685_vm9, %v684_v31  ;;  %p2523_p5 = scmp.lt.s32.totalorder %s5123_s17, 2 }
 0x148   : > { %5793 = vst [vmem:[#allocation33_spill] sm:$0xff] %v4563_v26  ;;  %s1319_s1 = scvt.s32.f32 %s1318_s26  ;;  %s1804_s26 = scvt.s32.f32 %s1803_s29 }
 0x149   : > { %v1136_v58 = vmul.f32 %v3689_v52, %v1135_v47  ;;  %686 = vst.msk [vmem:[%s4576_s13] sm:$0xff] %vm685_vm9, %v682_v39  ;;  %s4994_s29 = sadd.s32 4, %s4592_s19  ;;  %s5862_s17 = smov (!%p2523_p5, %s5123_s17), 2 }
 0x14a   : > { %5804 = vst [vmem:[#allocation44_spill] sm:$0xff] %v4602_v23  ;;  %p2284_p1 = scmp.lt.s32.totalorder %s4994_s29, 3  ;;  %p2282_p0 = scmp.lt.s32.totalorder %s4994_s29, 2 }
 0x14b   : > { %v4516_v35 = vadd.f32 %v1137_v60, %v1136_v58 }
 0x14c   : > { %s5860_s29 = smov (!%p2282_p0, %s4994_s29), 2 }
 0x14d   : > { %v1228_v3 = vmul.f32 %v4513_v2, %v4516_v35  ;;  %1139 = vst [vmem:[%s4521_s14] sm:$0xff] %v4516_v35  ;;  %v1140_v12 = vpack.c.bf16 %v4516_v35, %v4516_v35  ;;  %v4561_v21 = vpop.f32.mrf.mxu1  ;;  %v3470_v61 = vld [vmem:[%s4576_s13 + $0x8] sm:$0xff] }
 0x14f   : > { %1229 = vadd.xlane.f32.xlu0 %v1228_v3  ;;  %1181 = vmatmul.bf16.vlgmr.msrb.gmra.mxu1 %v1140_v12  ;;  %v4567_v5 = vpop.f32.mrf.mxu2 }
 0x150   : > { %1194 = vmatmul.bf16.vlgmr.msrb.gmra.mxu2 %v1140_v12  ;;  %1207 = vmatmul.bf16.vlgmr.msra.gmra.mxu3 %v1140_v12  ;;  %5795 = vst [vmem:[#allocation35_spill] sm:$0xff] %v4567_v5 }
 0x151   : > { %1220 = vmatmul.bf16.vlgmr.msra.gmra.mxu0 %v1140_v12  ;;  %1668 = vmatpush.bf16.msrb.mxu1 %v4245_v24 }
 0x152   : > { %1681 = vmatpush.bf16.msrb.mxu2 %v4313_v13  ;;  %1694 = vmatpush.bf16.msra.mxu3 %v4257_v37 }
 0x153   : > { %1707 = vmatpush.bf16.msra.mxu0 %v4456_v32 }
 0x155   : > { %1669 = vmatpush.bf16.msrb.mxu1 %v4250_v30  ;;  %v4565_v59 = vpop.f32.mrf.mxu1 }
 0x156   : > { %1682 = vmatpush.bf16.msrb.mxu2 %v4339_v27  ;;  %1695 = vmatpush.bf16.msra.mxu3 %v4262_v42  ;;  %5794 = vst [vmem:[#allocation34_spill] sm:$0xff] %v4565_v59 }
 0x157   : > { %1708 = vmatpush.bf16.msra.mxu0 %v4459_v45  ;;  %v4582_v40 = vpop.f32.mrf.mxu2 }
 0x158   : > { %5797 = vst [vmem:[#allocation37_spill] sm:$0xff] %v4582_v40  ;;  %v803_v40 = vadd.f32 %v802_v54, %v4475_v15 }
 0x159   : > { %1670 = vmatpush.bf16.msrb.mxu1 %v4255_v36 }
 0x15a   : > { %1683 = vmatpush.bf16.msrb.mxu2 %v4349_v41  ;;  %1696 = vmatpush.bf16.msra.mxu3 %v4269_v48 }
 0x15b   : > { %1709 = vmatpush.bf16.msra.mxu0 %v4464_v33 }
 0x15d   : > { %1671 = vmatpush.bf16.msrb.mxu1 %v4265_v43  ;;  %v4569_v20 = vpop.f32.mrf.mxu1 }
 0x15e   : > { %1684 = vmatpush.bf16.msrb.mxu2 %v4359_v50  ;;  %1697 = vmatpush.bf16.msra.mxu3 %v4278_v56  ;;  %5796 = vst [vmem:[#allocation36_spill] sm:$0xff] %v4569_v20 }
 0x15f   : > { %1710 = vmatpush.bf16.msra.mxu0 %v4469_v1  ;;  %v4588_v52 = vpop.f32.mrf.mxu2 }
 0x160   : > { %5799 = vst [vmem:[#allocation39_spill] sm:$0xff] %v4588_v52 }
 0x161   : > { %1672 = vmatpush.bf16.msrb.mxu1 %v4272_v49 }
 0x162   : > { %1685 = vmatpush.bf16.msrb.mxu2 %v4366_v53  ;;  %1698 = vmatpush.bf16.msra.mxu3 %v4306_v10 }
 0x163   : > { %1711 = vmatpush.bf16.msra.mxu0 %v4472_v63 }
 0x165   : > { %1673 = vmatpush.bf16.msrb.mxu1 %v4281_v57  ;;  %v4586_v47 = vpop.f32.mrf.mxu1 }
 0x166   : > { %1686 = vmatpush.bf16.msrb.mxu2 %v4373_v55  ;;  %1699 = vmatpush.bf16.msra.mxu3 %v4329_v22  ;;  %5798 = vst [vmem:[#allocation38_spill] sm:$0xff] %v4586_v47 }
 0x167   : > { %1712 = vmatpush.bf16.msra.mxu0 %v4478_v19  ;;  %v4594_v60 = vpop.f32.mrf.mxu2 }
 0x168   : > { %5801 = vst [vmem:[#allocation41_spill] sm:$0xff] %v4594_v60 }
 0x169   : > { %1674 = vmatpush.bf16.msrb.mxu1 %v4293_v0 }
 0x16a   : > { %1687 = vmatpush.bf16.msrb.mxu2 %v4380_v62  ;;  %1700 = vmatpush.bf16.msra.mxu3 %v4342_v34 }
 0x16b   : > { %1713 = vmatpush.bf16.msra.mxu0 %v4487_v38 }
 0x16d   : > { %1675 = vmatpush.bf16.msrb.mxu1 %v4309_v11  ;;  %v4590_v58 = vpop.f32.mrf.mxu1 }
 0x16e   : > { %1688 = vmatpush.bf16.msrb.mxu2 %v4387_v4  ;;  %1701 = vmatpush.bf16.msra.mxu3 %v4352_v44  ;;  %5800 = vst [vmem:[#allocation40_spill] sm:$0xff] %v4590_v58  ;;  %v1323_v58 = vstv %s1319_s1  ;;  %s4011_s1 = smov 127  }
 0x16f   : > { %1714 = vmatpush.bf16.msra.mxu0 %v4491_v6  ;;  %v4599_v12 = vpop.f32.mrf.mxu2 }
 0x170   : > { %5803 = vst [vmem:[#allocation43_spill] sm:$0xff] %v4599_v12 }
 0x175   : > { %v4596_v3 = vpop.f32.mrf.mxu1 }
 0x176   : > { %5802 = vst [vmem:[#allocation42_spill] sm:$0xff] %v4596_v3 }
 0x1cc   : > { %v1182_v31 = vpop.f32.mrf.mxu1 }
 0x1cd   : > { %v1183_v39 = vadd.f32 %v1182_v31, %v4451_v18 }
 0x1ce   : > { %v1221_v28 = vpop.f32.mrf.mxu0 }
 0x1cf   : > { %v1377_v52 = vadd.f32 %v1183_v39, %v4439_v8  ;;  %v4608_v60 = vadd.f32 %v1221_v28, %v4602_v23  ;;  %v3471_v39 = vld [vmem:[%s4576_s13 + $0x10] sm:$0xff] }
 0x1d1   : > { %v3474_v3 = vmul.f32 -1.442695, %v1377_v52  ;;  %v1324_v47 = vmul.f32 %v1323_v58, %v4608_v60  ;;  %v1246_v12 = vmul.f32 %v3470_v61, %v4608_v60  ;;  %v1255_v58 = vmul.f32 %v3471_v39, %v4608_v60 }
 0x1d3   : > { %3690 = vpow2.f32 %v3474_v3  ;;  %1326 = vrot.lane.b32.xlu0 %v1324_v47, %s4008_s11  ;;  %v1195_v17 = vpop.f32.mrf.mxu2  ;;  %v1208_v31 = vpop.f32.mrf.mxu3  ;;  %v1247_v46 = vsel %vm685_vm9, %v1246_v12, 0.0  ;;  %v1256_v59 = vsel %vm685_vm9, %v1255_v58, 0.0 }
 0x1d4   : > { %v1196_v8 = vadd.f32 %v1195_v17, %v4483_v29  ;;  %1248 = vadd.xlane.f32.xlu1 %v1247_v46  ;;  %v1184_v28 = vpop.f32.mrf.mxu1  ;;  %v1209_v58 = vadd.f32 %v1208_v31, %v4496_v9 }
 0x1d6   : > { %v1397_v52 = vadd.f32 %v1196_v8, %v803_v40  ;;  %v1223_v20 = vpop.f32.mrf.mxu0 }
 0x1d8   : > { %v3475_v61 = vmul.f32 -1.442695, %v1397_v52 }
 0x1d9   : > { %v3691_v3 = vpop.eup %3690 }
 0x1da   : > { %v1381_v25 = vadd.f32 1.0, %v3691_v3  ;;  %3692 = vpow2.f32 %v3475_v61 }
 0x1db   : > { %v1197_v47 = vpop.f32.mrf.mxu2  ;;  %v1210_v5 = vpop.f32.mrf.mxu3 }
 0x1dc   : > { %3694 = vrcp.f32 %v1381_v25  ;;  %1257 = vadd.xlane.f32.xlu1 %v1256_v59  ;;  %v1393_v40 = vand.u32 2147483648, %v1381_v25  ;;  %v1391_v8 = vand.u32 2147483647, %v1381_v25  ;;  %vm1387_vm11 = vweird.f32 %v1381_v25 }
 0x1de   : > { %v1394_v5 = vor.u32 1.1754944e-38, %v1393_v40  ;;  %vm1392_vm13 = vcmp.eq.f32.partialorder %v1391_v8, 8.507059e+37  ;;  %v1236_v8 = vld [vmem:[%s4576_s13] sm:$0xff] }
 0x1e0   : > { %v3693_v54 = vpop.eup %3692 }
 0x1e1   : > { %v1401_v12 = vadd.f32 1.0, %v3693_v54  ;;  %v832_v54 = vadd.f32 %v4559_v7, %v4501_v51  ;;  %v1237_v7 = vmul.f32 %v1236_v8, %v4608_v60  ;;  %v1322_v60 = vld [vmem:[%s1321_s10] sm:$0xff] }
 0x1e2   : > { %v3695_v17 = vpop.eup %3694 }
 0x1e3   : > { %3696 = vrcp.f32 %v1401_v12  ;;  %v1383_v46 = vmul.f32 %v3695_v17, %v1381_v25  ;;  %vm1388_vm10 = vweird.f32 %v3695_v17  ;;  %v1411_v26 = vand.u32 2147483647, %v1401_v12 }
 0x1e4   : > { %vm1389_vm12 = vmor %vm1387_vm11, %vm1388_vm10  ;;  %vm1407_vm15 = vweird.f32 %v1401_v12 }
 0x1e5   : > { %v1384_v28 = vsub.f32 1.0, %v1383_v46  ;;  %vm1412_vm1 = vcmp.eq.f32.partialorder %v1411_v26, 8.507059e+37 }
 0x1e7   : > { %v1385_v20 = vmul.f32 %v3695_v17, %v1384_v28  ;;  %v1413_v28 = vand.u32 2147483648, %v1401_v12 }
 0x1e9   : > { %v3697_v39 = vpop.eup %3696  ;;  %v1386_v52 = vadd.f32 %v3695_v17, %v1385_v20  ;;  %v1414_v31 = vor.u32 1.1754944e-38, %v1413_v28  ;;  %v5752_v28 = vmov 0  }
 0x1ea   : > { %v1403_v61 = vmul.f32 %v3697_v39, %v1401_v12  ;;  %vm1408_vm14 = vweird.f32 %v3697_v39  ;;  %3660 = vset.pattern.permute.xlu2 %v5752_v28 }
 0x1eb   : > { %v1390_v3 = vsel %vm1389_vm12, %v3695_v17, %v1386_v52  ;;  %vm1409_vm0 = vmor %vm1407_vm15, %vm1408_vm14 }
 0x1ec   : > { %v1404_v59 = vsub.f32 1.0, %v1403_v61  ;;  %v1395_v47 = vsel %vm1392_vm13, %v1394_v5, %v1390_v3 }
 0x1ed   : > { %v1417_v46 = vmul.f32 %v1395_v47, %v1209_v58  ;;  %v909_v47 = vlaneseq }
 0x1ee   : > { %v1405_v16 = vmul.f32 %v3697_v39, %v1404_v59 }
 0x1ef   : > { %v1418_v20 = vadd.f32 %v1417_v46, %v832_v54  ;;  %v4672_v46 = vand.u32 127, %v909_v47 }
 0x1f0   : > { %v1406_v25 = vadd.f32 %v3697_v39, %v1405_v16  ;;  %v1238_v16 = vsel %vm685_vm9, %v1237_v7, 0.0 }
 0x1f1   : > { %3698 = vtanh.f32 %v1418_v20  ;;  %vm1243_vm2 = vcmp.eq.s32.totalorder %v4672_v46, 1  ;;  %vm1235_vm3 = vcmp.eq.s32.totalorder %v4672_v46, 0  ;;  %vm1252_vm4 = vcmp.eq.s32.totalorder %v4672_v46, 2 }
 0x1f2   : > { %v1410_v17 = vsel %vm1409_vm0, %v3697_v39, %v1406_v25 }
 0x1f3   : > { %v1415_v40 = vsel %vm1412_vm1, %v1414_v31, %v1410_v17 }
 0x1f4   : > { %v1420_v52 = vsub.f32 1.0, %v1415_v40  ;;  %v1422_v58 = vmul.f32 %v1415_v40, %v4516_v35  ;;  %v4668_v35 = vpop.xlane.xlu0 %1229 }
 0x1f5   : > { %5805 = vst [vmem:[#allocation45_spill] sm:$0xff] %v4668_v35 }
 0x1f7   : > { %v3699_v61 = vpop.eup %3698 }
 0x1f8   : > { %v1421_v5 = vmul.f32 %v3699_v61, %v1420_v52 }
 0x1fa   : > { %v4625_v3 = vadd.f32 %v1422_v58, %v1421_v5 }
 0x1fc   : > { %v1479_v12 = vmul.f32 %v4513_v2, %v4625_v3  ;;  %3476 = vst [vmem:[%s4521_s14 + $0x8] sm:$0xff] %v4625_v3  ;;  %v1426_v26 = vpack.c.bf16 %v4625_v3, %v4625_v3 }
 0x1fd   : > { %1239 = vadd.xlane.f32.xlu0 %v1238_v16  ;;  %v1567_v16 = vstv %s1563_s27  ;;  %s2044_s27 = scalar_select %p2043_p9, 1, 0 }
 0x1fe   : > { %1480 = vadd.xlane.f32.xlu2 %v1479_v12  ;;  %1435 = vmatmul.bf16.vlgmr.msra.gmra.mxu1 %v1426_v26 }
 0x1ff   : > { %1448 = vmatmul.bf16.vlgmr.msra.gmra.mxu2 %v1426_v26  ;;  %1461 = vmatmul.bf16.vlgmr.msrb.gmra.mxu3 %v1426_v26  ;;  %s2045_s21 = scvt.s32.f32 %s2044_s27 }
 0x200   : > { %1474 = vmatmul.bf16.vlgmr.msrb.gmra.mxu0 %v1426_v26  ;;  %1909 = vmatpush.bf16.msra.mxu1 %v4245_v24 }
 0x201   : > { %1922 = vmatpush.bf16.msra.mxu2 %v4313_v13  ;;  %1935 = vmatpush.bf16.msrb.mxu3 %v4257_v37 }
 0x202   : > { %1948 = vmatpush.bf16.msrb.mxu0 %v4456_v32 }
 0x204   : > { %1910 = vmatpush.bf16.msra.mxu1 %v4250_v30 }
 0x205   : > { %1923 = vmatpush.bf16.msra.mxu2 %v4339_v27  ;;  %1936 = vmatpush.bf16.msrb.mxu3 %v4262_v42 }
 0x206   : > { %1949 = vmatpush.bf16.msrb.mxu0 %v4459_v45 }
 0x208   : > { %1911 = vmatpush.bf16.msra.mxu1 %v4255_v36 }
 0x209   : > { %1924 = vmatpush.bf16.msra.mxu2 %v4349_v41  ;;  %1937 = vmatpush.bf16.msrb.mxu3 %v4269_v48 }
 0x20a   : > { %1950 = vmatpush.bf16.msrb.mxu0 %v4464_v33 }
 0x20c   : > { %1912 = vmatpush.bf16.msra.mxu1 %v4265_v43 }
 0x20d   : > { %1925 = vmatpush.bf16.msra.mxu2 %v4359_v50  ;;  %1938 = vmatpush.bf16.msrb.mxu3 %v4278_v56 }
 0x20e   : > { %1951 = vmatpush.bf16.msrb.mxu0 %v4469_v1 }
 0x210   : > { %1913 = vmatpush.bf16.msra.mxu1 %v4272_v49 }
 0x211   : > { %1926 = vmatpush.bf16.msra.mxu2 %v4366_v53  ;;  %1939 = vmatpush.bf16.msrb.mxu3 %v4306_v10 }
 0x212   : > { %1952 = vmatpush.bf16.msrb.mxu0 %v4472_v63 }
 0x214   : > { %1914 = vmatpush.bf16.msra.mxu1 %v4281_v57 }
 0x215   : > { %1927 = vmatpush.bf16.msra.mxu2 %v4373_v55  ;;  %1940 = vmatpush.bf16.msrb.mxu3 %v4329_v22 }
 0x216   : > { %1953 = vmatpush.bf16.msrb.mxu0 %v4478_v19 }
 0x218   : > { %1915 = vmatpush.bf16.msra.mxu1 %v4293_v0 }
 0x219   : > { %1928 = vmatpush.bf16.msra.mxu2 %v4380_v62  ;;  %1941 = vmatpush.bf16.msrb.mxu3 %v4342_v34 }
 0x21a   : > { %1954 = vmatpush.bf16.msrb.mxu0 %v4487_v38 }
 0x21c   : > { %1916 = vmatpush.bf16.msra.mxu1 %v4309_v11 }
 0x21d   : > { %1929 = vmatpush.bf16.msra.mxu2 %v4387_v4  ;;  %1942 = vmatpush.bf16.msrb.mxu3 %v4352_v44 }
 0x21e   : > { %1955 = vmatpush.bf16.msrb.mxu0 %v4491_v6 }
 0x245   : > { %v1327_v39 = vpop.permute.xlu0 %1326 }
 0x246   : > { %v1329_v59 = vadd.f32 %v1327_v39, %v1322_v60 }
 0x247   : > { %v1249_v54 = vpop.xlane.xlu1 %1248 }
 0x248   : > { %1330 = vst.msk [vmem:[%s1321_s10] sm:$0xff] %vm685_vm9, %v1329_v59  ;;  %v1250_v31 = vsel %vm1243_vm2, %v1249_v54, 0.0 }
 0x24f   : > { %v1258_v20 = vpop.xlane.xlu1 %1257  ;;  %v3477_v60 = vld [vmem:[%s4576_s13 + $0x8] sm:$0xff] }
 0x250   : > { %v1259_v8 = vsel %vm1252_vm4, %v1258_v20, 0.0 }
 0x270   : > { %v1240_v25 = vpop.xlane.xlu0 %1239 }
 0x271   : > { %v1241_v17 = vsel %vm1235_vm3, %v1240_v25, 0.0 }
 0x272   : > { %v1251_v40 = vadd.f32 %v1250_v31, %v1241_v17  ;;  %v806_v31 = vadd.f32 %v4561_v21, %v4475_v15 }
 0x274   : > { %v4688_v52 = vadd.f32 %v1259_v8, %v1251_v40 }
 0x276   : > { %v1262_v61 = vsel %vm1261_vm5, %v4688_v52, -inf }
 0x277   : > { %1263 = vmax.xlane.f32.xlu2 %v1262_v61 }
 0x27b   : > { %v1436_v7 = vpop.f32.mrf.mxu1 }
 0x27c   : > { %v1437_v5 = vadd.f32 %v1436_v7, %v4451_v18 }
 0x27d   : > { %v1475_v58 = vpop.f32.mrf.mxu0 }
 0x27e   : > { %v1618_v12 = vadd.f32 %v1437_v5, %v4441_v14  ;;  %v4695_v26 = vadd.f32 %v1475_v58, %v4602_v23  ;;  %v1481_v5 = vpop.xlane.xlu2 %1480 }
 0x280   : > { %v3483_v39 = vmul.f32 -1.442695, %v1618_v12  ;;  %v1568_v59 = vmul.f32 %v1567_v16, %v4695_v26  ;;  %v1491_v47 = vmul.f32 %v3477_v60, %v4695_v26  ;;  %v4705_v60 = vld [vmem:[#allocation4] ss:$0 sm:$0xff] }
 0x281   : > { %5806 = vst [vmem:[#allocation46_spill] sm:$0xff] %v4705_v60 }
 0x282   : > { %3700 = vpow2.f32 %v3483_v39  ;;  %1570 = vrot.lane.b32.xlu1 %v1568_v59, %s4008_s11  ;;  %v1449_v54 = vpop.f32.mrf.mxu2  ;;  %v1462_v20 = vpop.f32.mrf.mxu3  ;;  %v1492_v25 = vsel %vm685_vm9, %v1491_v47, 0.0  ;;  %v1482_v39 = vadd.f32 %v4705_v60, %v1481_v5 }
 0x283   : > { %v1450_v14 = vadd.f32 %v1449_v54, %v4483_v29  ;;  %1493 = vadd.xlane.f32.xlu0 %v1492_v25  ;;  %v1438_v17 = vpop.f32.mrf.mxu1 }
 0x285   : > { %v1638_v40 = vadd.f32 %v1450_v14, %v806_v31  ;;  %v1477_v8 = vpop.f32.mrf.mxu0 }
 0x287   : > { %v3484_v61 = vmul.f32 -1.442695, %v1638_v40 }
 0x288   : > { %v3701_v7 = vpop.eup %3700 }
 0x289   : > { %v1622_v58 = vadd.f32 1.0, %v3701_v7  ;;  %3702 = vpow2.f32 %v3484_v61 }
 0x28a   : > { %v1451_v16 = vpop.f32.mrf.mxu2  ;;  %v1464_v12 = vpop.f32.mrf.mxu3 }
 0x28b   : > { %3704 = vrcp.f32 %v1622_v58  ;;  %v1634_v31 = vand.u32 2147483648, %v1622_v58  ;;  %v1632_v17 = vand.u32 2147483647, %v1622_v58  ;;  %vm1628_vm7 = vweird.f32 %v1622_v58 }
 0x28c   : > { %v1463_v16 = vadd.f32 %v1462_v20, %v4496_v9 }
 0x28d   : > { %v1635_v7 = vor.u32 1.1754944e-38, %v1634_v31  ;;  %vm1633_vm10 = vcmp.eq.f32.partialorder %v1632_v17, 8.507059e+37 }
 0x28f   : > { %v3703_v59 = vpop.eup %3702  ;;  %1589 = vperm.xlu2 %3660, %v1482_v39  }
 0x290   : > { %v1642_v21 = vadd.f32 1.0, %v3703_v59  ;;  %v5807_v59 = vld [vmem:[#allocation33_spill] sm:$0xff] }
 0x291   : > { %v3705_v47 = vpop.eup %3704  ;;  %v835_v28 = vadd.f32 %v5807_v59, %v4501_v51 }
 0x292   : > { %3706 = vrcp.f32 %v1642_v21  ;;  %v1624_v54 = vmul.f32 %v3705_v47, %v1622_v58  ;;  %vm1629_vm6 = vweird.f32 %v3705_v47  ;;  %v1652_v60 = vand.u32 2147483647, %v1642_v21 }
 0x293   : > { %vm1630_vm8 = vmor %vm1628_vm7, %vm1629_vm6  ;;  %vm1648_vm12 = vweird.f32 %v1642_v21 }
 0x294   : > { %v1625_v25 = vsub.f32 1.0, %v1624_v54  ;;  %v1654_v54 = vand.u32 2147483648, %v1642_v21  ;;  %vm1653_vm14 = vcmp.eq.f32.partialorder %v1652_v60, 8.507059e+37 }
 0x296   : > { %v1626_v14 = vmul.f32 %v3705_v47, %v1625_v25  ;;  %v1655_v31 = vor.u32 1.1754944e-38, %v1654_v54  ;;  %v1566_v54 = vld [vmem:[%s1565_s18] sm:$0xff] }
 0x298   : > { %v3707_v40 = vpop.eup %3706  ;;  %v1627_v8 = vadd.f32 %v3705_v47, %v1626_v14 }
 0x299   : > { %v1644_v61 = vmul.f32 %v3707_v40, %v1642_v21  ;;  %vm1649_vm11 = vweird.f32 %v3707_v40 }
 0x29a   : > { %v1631_v5 = vsel %vm1630_vm8, %v3705_v47, %v1627_v8  ;;  %vm1650_vm13 = vmor %vm1648_vm12, %vm1649_vm11 }
 0x29b   : > { %v1645_v12 = vsub.f32 1.0, %v1644_v61  ;;  %v1636_v39 = vsel %vm1633_vm10, %v1635_v7, %v1631_v5  ;;  %v1483_v61 = vld [vmem:[%s4576_s13] sm:$0xff] }
 0x29c   : > { %v1658_v25 = vmul.f32 %v1636_v39, %v1463_v16  ;;  %v1484_v5 = vmul.f32 %v1483_v61, %v4695_v26 }
 0x29d   : > { %v1646_v35 = vmul.f32 %v3707_v40, %v1645_v12 }
 0x29e   : > { %v1659_v14 = vadd.f32 %v1658_v25, %v835_v28 }
 0x29f   : > { %v1647_v58 = vadd.f32 %v3707_v40, %v1646_v35  ;;  %v1485_v35 = vsel %vm685_vm9, %v1484_v5, 0.0 }
 0x2a0   : > { %3708 = vtanh.f32 %v1659_v14 }
 0x2a1   : > { %v1651_v20 = vsel %vm1650_vm13, %v3707_v40, %v1647_v58 }
 0x2a2   : > { %v1656_v47 = vsel %vm1653_vm14, %v1655_v31, %v1651_v20 }
 0x2a3   : > { %v1661_v17 = vsub.f32 1.0, %v1656_v47  ;;  %v1663_v16 = vmul.f32 %v1656_v47, %v4625_v3  ;;  %v3478_v3 = vld [vmem:[%s4576_s13 + $0x10] sm:$0xff] }
 0x2a4   : > { %v1498_v60 = vmul.f32 %v3478_v3, %v4695_v26 }
 0x2a6   : > { %v3709_v8 = vpop.eup %3708  ;;  %v1499_v21 = vsel %vm685_vm9, %v1498_v60, 0.0 }
 0x2a7   : > { %v1662_v7 = vmul.f32 %v3709_v8, %v1661_v17 }
 0x2a9   : > { %v4714_v12 = vadd.f32 %v1663_v16, %v1662_v7 }
 0x2ab   : > { %3485 = vst [vmem:[%s4521_s14 + $0x10] sm:$0xff] %v4714_v12  ;;  %v1667_v28 = vpack.c.bf16 %v4714_v12, %v4714_v12  ;;  %v1720_v26 = vmul.f32 %v4513_v2, %v4714_v12 }
 0x2ac   : > { %1486 = vadd.xlane.f32.xlu1 %v1485_v35  ;;  %v1808_v35 = vstv %s1804_s26  ;;  %s2285_s26 = scalar_select %p2284_p1, 1, 0 }
 0x2ad   : > { %1676 = vmatmul.bf16.vlgmr.msrb.gmra.mxu1 %v1667_v28  ;;  %1689 = vmatmul.bf16.vlgmr.msrb.gmra.mxu2 %v1667_v28 }
 0x2ae   : > { %1702 = vmatmul.bf16.vlgmr.msra.gmra.mxu3 %v1667_v28  ;;  %1715 = vmatmul.bf16.vlgmr.msra.gmra.mxu0 %v1667_v28  ;;  %s2286_s16 = scvt.s32.f32 %s2285_s26 }
 0x2af   : > { %2150 = vmatpush.bf16.msrb.mxu1 %v4245_v24  ;;  %2163 = vmatpush.bf16.msrb.mxu2 %v4313_v13 }
 0x2b0   : > { %2176 = vmatpush.bf16.msra.mxu3 %v4257_v37  ;;  %2189 = vmatpush.bf16.msra.mxu0 %v4456_v32 }
 0x2b3   : > { %2151 = vmatpush.bf16.msrb.mxu1 %v4250_v30  ;;  %2164 = vmatpush.bf16.msrb.mxu2 %v4339_v27 }
 0x2b4   : > { %2177 = vmatpush.bf16.msra.mxu3 %v4262_v42  ;;  %2190 = vmatpush.bf16.msra.mxu0 %v4459_v45 }
 0x2b7   : > { %2152 = vmatpush.bf16.msrb.mxu1 %v4255_v36  ;;  %2165 = vmatpush.bf16.msrb.mxu2 %v4349_v41 }
 0x2b8   : > { %1500 = vadd.xlane.f32.xlu2 %v1499_v21  ;;  %2178 = vmatpush.bf16.msra.mxu3 %v4269_v48  ;;  %v5809_v21 = vld [vmem:[#allocation25_spill] sm:$0xff] }
 0x2b9   : > { %2191 = vmatpush.bf16.msra.mxu0 %v4464_v33 }
 0x2bb   : > { %2153 = vmatpush.bf16.msrb.mxu1 %v4265_v43  ;;  %2166 = vmatpush.bf16.msrb.mxu2 %v4359_v50 }
 0x2bc   : > { %2179 = vmatpush.bf16.msra.mxu3 %v4278_v56 }
 0x2bd   : > { %2192 = vmatpush.bf16.msra.mxu0 %v4469_v1 }
 0x2bf   : > { %2154 = vmatpush.bf16.msrb.mxu1 %v4272_v49  ;;  %2167 = vmatpush.bf16.msrb.mxu2 %v4366_v53 }
 0x2c0   : > { %1721 = vadd.xlane.f32.xlu2 %v1720_v26  ;;  %2180 = vmatpush.bf16.msra.mxu3 %v4306_v10 }
 0x2c1   : > { %2193 = vmatpush.bf16.msra.mxu0 %v4472_v63 }
 0x2c3   : > { %2155 = vmatpush.bf16.msrb.mxu1 %v4281_v57  ;;  %2168 = vmatpush.bf16.msrb.mxu2 %v4373_v55 }
 0x2c4   : > { %2181 = vmatpush.bf16.msra.mxu3 %v4329_v22 }
 0x2c5   : > { %2194 = vmatpush.bf16.msra.mxu0 %v4478_v19 }
 0x2c7   : > { %2156 = vmatpush.bf16.msrb.mxu1 %v4293_v0  ;;  %2169 = vmatpush.bf16.msrb.mxu2 %v4380_v62 }
 0x2c8   : > { %2182 = vmatpush.bf16.msra.mxu3 %v4342_v34 }
 0x2c9   : > { %2195 = vmatpush.bf16.msra.mxu0 %v4487_v38 }
 0x2cb   : > { %2157 = vmatpush.bf16.msrb.mxu1 %v4309_v11  ;;  %2170 = vmatpush.bf16.msrb.mxu2 %v4387_v4 }
 0x2cc   : > { %2183 = vmatpush.bf16.msra.mxu3 %v4352_v44 }
 0x2cd   : > { %2196 = vmatpush.bf16.msra.mxu0 %v4491_v6 }
 0x2ea   : > { %v1264_v2 = vpop.xlane.xlu2 %1263 }
 0x2eb   : > { %v4761_v40 = vsub.f32 %v4688_v52, %v1264_v2 }
 0x2ed   : > { %v1266_v39 = vmul.f32 1.442695, %v4761_v40 }
 0x2ef   : > { %3710 = vpow2.f32 %v1266_v39 }
 0x2f2   : > { %v4774_v52 = vpop.permute.xlu2 %1589 }
 0x2f3   : > { %5808 = vst [vmem:[#allocation33_spill] sm:$0xff] %v4774_v52 }
 0x2f4   : > { %v1571_v59 = vpop.permute.xlu1 %1570 }
 0x2f5   : > { %v4765_v25 = vpop.eup %3710  ;;  %v1573_v14 = vadd.f32 %v1571_v59, %v1566_v54 }
 0x2f6   : > { %v1268_v58 = vsel %vm1261_vm5, %v4765_v25, 0.0  ;;  %v1494_v20 = vpop.xlane.xlu0 %1493 }
 0x2f7   : > { %1574 = vst.msk [vmem:[%s1565_s18] sm:$0xff] %vm685_vm9, %v1573_v14  ;;  %1269 = vadd.xlane.f32.xlu2 %v1268_v58  ;;  %v1495_v17 = vsel %vm1243_vm2, %v1494_v20, 0.0  ;;  %v5810_v14 = vld [vmem:[#allocation34_spill] sm:$0xff]  ;;  %s3499_s18 = sshll.u32 %s5858_s7, 3 }
 0x2f8   : > { %v808_v58 = vadd.f32 %v5810_v14, %v4475_v15  ;;  %s2047_s25 = scalar_lea.vmem %s4576_s13, %s3499_s18 [#allocation15]  ;;  %s3517_s18 = sshll.u32 %s5862_s17, 3 }
 0x2f9   : > { %s2526_s7 = scalar_select %p2525_p4, 1, 0 }
 0x2fb   : > { %s2527_s27 = scvt.s32.f32 %s2526_s7  ;;  %s5599_s7 = sshll.u32 %s4114_s0, 3 }
 0x31f   : > { %v1487_v31 = vpop.xlane.xlu1 %1486 }
 0x320   : > { %v1488_v47 = vsel %vm1235_vm3, %v1487_v31, 0.0 }
 0x321   : > { %v1496_v61 = vadd.f32 %v1495_v17, %v1488_v47  ;;  %v1724_v17 = vld [vmem:[%s4576_s13] sm:$0xff] }
 0x32a   : > { %v1677_v8 = vpop.f32.mrf.mxu1 }
 0x32b   : > { %v1501_v7 = vpop.xlane.xlu2 %1500  ;;  %v1678_v16 = vadd.f32 %v1677_v8, %v4451_v18  ;;  %v1716_v5 = vpop.f32.mrf.mxu0 }
 0x32c   : > { %v1502_v28 = vsel %vm1252_vm4, %v1501_v7, 0.0  ;;  %v4784_v3 = vadd.f32 %v1716_v5, %v4602_v23  ;;  %v5811_v5 = vld [vmem:[#allocation46_spill] sm:$0xff] }
 0x32d   : > { %v4786_v60 = vadd.f32 %v1502_v28, %v1496_v61  ;;  %v1859_v26 = vadd.f32 %v1678_v16, %v5809_v21 }
 0x32e   : > { %v1809_v2 = vmul.f32 %v1808_v35, %v4784_v3  ;;  %v1725_v16 = vmul.f32 %v1724_v17, %v4784_v3 }
 0x32f   : > { %v3492_v39 = vmul.f32 -1.442695, %v1859_v26  ;;  %v1504_v59 = vsel %vm1261_vm5, %v4786_v60, -inf }
 0x330   : > { %1505 = vmax.xlane.f32.xlu1 %v1504_v59  ;;  %1811 = vrot.lane.b32.xlu0 %v1809_v2, %s4008_s11  ;;  %v1690_v54 = vpop.f32.mrf.mxu2  ;;  %v1726_v26 = vsel %vm685_vm9, %v1725_v16, 0.0 }
 0x331   : > { %3712 = vpow2.f32 %v3492_v39  ;;  %v1691_v31 = vadd.f32 %v1690_v54, %v4483_v29  ;;  %v1703_v20 = vpop.f32.mrf.mxu3 }
 0x332   : > { %v1679_v47 = vpop.f32.mrf.mxu1 }
 0x333   : > { %v1879_v8 = vadd.f32 %v1691_v31, %v808_v58  ;;  %v1722_v61 = vpop.xlane.xlu2 %1721  ;;  %v1718_v7 = vpop.f32.mrf.mxu0 }
 0x334   : > { %v1723_v35 = vadd.f32 %v5811_v5, %v1722_v61 }
 0x335   : > { %v3493_v28 = vmul.f32 -1.442695, %v1879_v8 }
 0x336   : > { %1830 = vperm.xlu2 %3660, %v1723_v35  }
 0x337   : > { %v3713_v21 = vpop.eup %3712  ;;  %3714 = vpow2.f32 %v3493_v28 }
 0x338   : > { %v1863_v2 = vadd.f32 1.0, %v3713_v21  ;;  %1727 = vadd.xlane.f32.xlu1 %v1726_v26  ;;  %v1692_v39 = vpop.f32.mrf.mxu2  ;;  %v1704_v26 = vadd.f32 %v1703_v20, %v4496_v9 }
 0x339   : > { %v1705_v59 = vpop.f32.mrf.mxu3 }
 0x33a   : > { %3716 = vrcp.f32 %v1863_v2  ;;  %v1875_v17 = vand.u32 2147483648, %v1863_v2  ;;  %v1873_v8 = vand.u32 2147483647, %v1863_v2  ;;  %vm1869_vm0 = vweird.f32 %v1863_v2  ;;  %v5812_v59 = vld [vmem:[#allocation35_spill] sm:$0xff] }
 0x33c   : > { %v1876_v16 = vor.u32 1.1754944e-38, %v1875_v17  ;;  %vm1874_vm6 = vcmp.eq.f32.partialorder %v1873_v8, 8.507059e+37 }
 0x33d   : > { %v3715_v54 = vpop.eup %3714 }
 0x33e   : > { %v1883_v14 = vadd.f32 1.0, %v3715_v54  ;;  %v837_v54 = vadd.f32 %v5812_v59, %v4501_v51 }
 0x340   : > { %v3717_v58 = vpop.eup %3716  ;;  %3718 = vrcp.f32 %v1883_v14  ;;  %v1893_v29 = vand.u32 2147483647, %v1883_v14  ;;  %vm1889_vm8 = vweird.f32 %v1883_v14 }
 0x341   : > { %v1865_v31 = vmul.f32 %v3717_v58, %v1863_v2  ;;  %vm1870_vm15 = vweird.f32 %v3717_v58 }
 0x342   : > { %vm1871_vm1 = vmor %vm1869_vm0, %vm1870_vm15  ;;  %vm1894_vm11 = vcmp.eq.f32.partialorder %v1893_v29, 8.507059e+37 }
 0x343   : > { %v1866_v47 = vsub.f32 1.0, %v1865_v31 }
 0x345   : > { %v1867_v7 = vmul.f32 %v3717_v58, %v1866_v47  ;;  %v1895_v47 = vand.u32 2147483648, %v1883_v14 }
 0x346   : > { %v3719_v61 = vpop.eup %3718 }
 0x347   : > { %v1885_v35 = vmul.f32 %v3719_v61, %v1883_v14  ;;  %v1868_v28 = vadd.f32 %v3717_v58, %v1867_v7  ;;  %vm1890_vm7 = vweird.f32 %v3719_v61  ;;  %v1896_v17 = vor.u32 1.1754944e-38, %v1895_v47 }
 0x348   : > { %vm1891_vm10 = vmor %vm1889_vm8, %vm1890_vm7 }
 0x349   : > { %v1886_v21 = vsub.f32 1.0, %v1885_v35  ;;  %v1872_v39 = vsel %vm1871_vm1, %v3717_v58, %v1868_v28  ;;  %v3486_v35 = vld [vmem:[%s4576_s13 + $0x8] sm:$0xff] }
 0x34a   : > { %v1877_v52 = vsel %vm1874_vm6, %v1876_v16, %v1872_v39  ;;  %v1732_v16 = vmul.f32 %v3486_v35, %v4784_v3 }
 0x34b   : > { %v1887_v31 = vmul.f32 %v3719_v61, %v1886_v21  ;;  %v1899_v5 = vmul.f32 %v1877_v52, %v1704_v26 }
 0x34c   : > { %v1733_v14 = vsel %vm685_vm9, %v1732_v16, 0.0 }
 0x34d   : > { %v1888_v7 = vadd.f32 %v3719_v61, %v1887_v31  ;;  %v1900_v2 = vadd.f32 %v1899_v5, %v837_v54  ;;  %v3487_v5 = vld [vmem:[%s4576_s13 + $0x10] sm:$0xff] }
 0x34f   : > { %v1892_v20 = vsel %vm1891_vm10, %v3719_v61, %v1888_v7  ;;  %3720 = vtanh.f32 %v1900_v2  ;;  %v1739_v61 = vmul.f32 %v3487_v5, %v4784_v3 }
 0x350   : > { %v1897_v58 = vsel %vm1894_vm11, %v1896_v17, %v1892_v20 }
 0x351   : > { %v1902_v8 = vsub.f32 1.0, %v1897_v58  ;;  %v1904_v52 = vmul.f32 %v1897_v58, %v4714_v12  ;;  %v1740_v39 = vsel %vm685_vm9, %v1739_v61, 0.0  ;;  %v5758_v12 = vmov 1  }
 0x352   : > { %3661 = vset.pattern.permute.xlu1 %v5758_v12  ;;  %3662 = vset.pattern.permute.xlu0 %v5758_v12  ;;  %v2049_v12 = vstv %s2045_s21  ;;  %s5191_s21 = scalar_lea.vmem [#allocation12], %s4211_s23  ;;  %s2529_s23 = scalar_lea.vmem %s4576_s13, %s3517_s18 [#allocation15] }
 0x355   : > { %v3721_v28 = vpop.eup %3720 }
 0x356   : > { %v1903_v21 = vmul.f32 %v3721_v28, %v1902_v8 }
 0x358   : > { %v4806_v26 = vadd.f32 %v1904_v52, %v1903_v21 }
 0x35a   : > { %3494 = vst [vmem:[%s4521_s14 + $0x18] sm:$0xff] %v4806_v26  ;;  %1734 = vadd.xlane.f32.xlu0 %v1733_v14  ;;  %v1908_v29 = vpack.c.bf16 %v4806_v26, %v4806_v26 }
 0x35c   : > { %1917 = vmatmul.bf16.vlgmr.msra.gmra.mxu1 %v1908_v29  ;;  %1930 = vmatmul.bf16.vlgmr.msra.gmra.mxu2 %v1908_v29 }
 0x35d   : > { %1943 = vmatmul.bf16.vlgmr.msrb.gmra.mxu3 %v1908_v29  ;;  %1956 = vmatmul.bf16.vlgmr.msrb.gmra.mxu0 %v1908_v29 }
 0x35e   : > { %2391 = vmatpush.bf16.msra.mxu1 %v4245_v24  ;;  %2404 = vmatpush.bf16.msra.mxu2 %v4313_v13 }
 0x35f   : > { %1741 = vadd.xlane.f32.xlu2 %v1740_v39  ;;  %2417 = vmatpush.bf16.msrb.mxu3 %v4257_v37 }
 0x360   : > { %2430 = vmatpush.bf16.msrb.mxu0 %v4456_v32 }
 0x362   : > { %2392 = vmatpush.bf16.msra.mxu1 %v4250_v30  ;;  %2405 = vmatpush.bf16.msra.mxu2 %v4339_v27 }
 0x363   : > { %2418 = vmatpush.bf16.msrb.mxu3 %v4262_v42 }
 0x364   : > { %2431 = vmatpush.bf16.msrb.mxu0 %v4459_v45 }
 0x366   : > { %2393 = vmatpush.bf16.msra.mxu1 %v4255_v36  ;;  %2406 = vmatpush.bf16.msra.mxu2 %v4349_v41 }
 0x367   : > { %2419 = vmatpush.bf16.msrb.mxu3 %v4269_v48 }
 0x368   : > { %2432 = vmatpush.bf16.msrb.mxu0 %v4464_v33 }
 0x36a   : > { %v1270_v3 = vpop.xlane.xlu2 %1269  ;;  %2394 = vmatpush.bf16.msra.mxu1 %v4265_v43  ;;  %2407 = vmatpush.bf16.msra.mxu2 %v4359_v50 }
 0x36b   : > { %3722 = vrcp.f32 %v1270_v3  ;;  %2420 = vmatpush.bf16.msrb.mxu3 %v4278_v56  ;;  %v1285_v7 = vand.u32 2147483648, %v1270_v3  ;;  %v1283_v17 = vand.u32 2147483647, %v1270_v3  ;;  %vm1279_vm13 = vweird.f32 %v1270_v3 }
 0x36c   : > { %2433 = vmatpush.bf16.msrb.mxu0 %v4469_v1  ;;  %3724 = vlog2.f32 %v1270_v3 }
 0x36d   : > { %v1286_v8 = vor.u32 1.1754944e-38, %v1285_v7  ;;  %vm1284_vm15 = vcmp.eq.f32.partialorder %v1283_v17, 8.507059e+37 }
 0x36e   : > { %2395 = vmatpush.bf16.msra.mxu1 %v4272_v49  ;;  %2408 = vmatpush.bf16.msra.mxu2 %v4366_v53 }
 0x36f   : > { %2421 = vmatpush.bf16.msrb.mxu3 %v4306_v10 }
 0x370   : > { %2434 = vmatpush.bf16.msrb.mxu0 %v4472_v63 }
 0x371   : > { %v3723_v59 = vpop.eup %3722 }
 0x372   : > { %v1275_v54 = vmul.f32 %v3723_v59, %v1270_v3  ;;  %2396 = vmatpush.bf16.msra.mxu1 %v4281_v57  ;;  %2409 = vmatpush.bf16.msra.mxu2 %v4373_v55  ;;  %v3725_v47 = vpop.eup %3724  ;;  %vm1280_vm12 = vweird.f32 %v3723_v59 }
 0x373   : > { %2422 = vmatpush.bf16.msrb.mxu3 %v4329_v22  ;;  %v1272_v58 = vmul.f32 0.6931472, %v3725_v47  ;;  %vm1281_vm14 = vmor %vm1279_vm13, %vm1280_vm12 }
 0x374   : > { %v1276_v31 = vsub.f32 1.0, %v1275_v54  ;;  %2435 = vmatpush.bf16.msrb.mxu0 %v4478_v19 }
 0x375   : > { %v4852_v21 = vsub.f32 %v4761_v40, %v1272_v58  ;;  %v1807_v40 = vld [vmem:[%s1806_s28] sm:$0xff] }
 0x376   : > { %v1277_v2 = vmul.f32 %v3723_v59, %v1276_v31  ;;  %2397 = vmatpush.bf16.msra.mxu1 %v4293_v0  ;;  %2410 = vmatpush.bf16.msra.mxu2 %v4380_v62 }
 0x377   : > { %2423 = vmatpush.bf16.msrb.mxu3 %v4342_v34 }
 0x378   : > { %v1278_v20 = vadd.f32 %v3723_v59, %v1277_v2  ;;  %2436 = vmatpush.bf16.msrb.mxu0 %v4487_v38 }
 0x37a   : > { %v1282_v35 = vsel %vm1281_vm14, %v3723_v59, %v1278_v20  ;;  %2398 = vmatpush.bf16.msra.mxu1 %v4309_v11  ;;  %2411 = vmatpush.bf16.msra.mxu2 %v4387_v4  ;;  %v4876_v59 = vld [vmem:[%s5739_s9] ss:$0 sm:$0xff] }
 0x37b   : > { %v1287_v28 = vsel %vm1284_vm15, %v1286_v8, %v1282_v35  ;;  %2424 = vmatpush.bf16.msrb.mxu3 %v4352_v44  ;;  %5814 = vst [vmem:[#allocation34_spill] sm:$0xff] %v4876_v59  ;;  %v1961_v54 = vmul.f32 %v4876_v59, %v4806_v26 }
 0x37c   : > { %v4849_v16 = vmul.f32 %v4765_v25, %v1287_v28  ;;  %2437 = vmatpush.bf16.msrb.mxu0 %v4491_v6 }
 0x37e   : > { %5813 = vst [vmem:[#allocation25_spill] sm:$0xff] %v4849_v16  ;;  %1353 = vperm.xlu2 %3660, %v4849_v16   ;;  %1298 = vrot.lane.b32.xlu1 %v4849_v16, %s4011_s1  ;;  %v1289_v52 = vmul.f32 %v4849_v16, %v4852_v21 }
 0x380   : > { %v1290_v14 = vsel %vm1261_vm5, %v1289_v52, 0.0 }
 0x381   : > { %1291 = vadd.xlane.f32.xlu0 %v1290_v14 }
 0x386   : > { %1360 = vperm.xlu1 %3661, %v4849_v16  }
 0x3a2   : > { %v1812_v25 = vpop.permute.xlu0 %1811 }
 0x3a3   : > { %v1506_v5 = vpop.xlane.xlu1 %1505  ;;  %v1814_v29 = vadd.f32 %v1812_v25, %v1807_v40 }
 0x3a4   : > { %v4867_v61 = vsub.f32 %v4786_v60, %v1506_v5  ;;  %v4882_v60 = vpop.permute.xlu2 %1830  ;;  %v5817_v5 = vld [vmem:[#allocation27_spill] sm:$0xff] }
 0x3a5   : > { %1815 = vst.msk [vmem:[%s1806_s28] sm:$0xff] %vm685_vm9, %v1814_v29  ;;  %s3508_s28 = sshll.u32 %s5860_s29, 3 }
 0x3a6   : > { %v1508_v39 = vmul.f32 1.442695, %v4867_v61  ;;  %5815 = vst [vmem:[#allocation35_spill] sm:$0xff] %v4882_v60  ;;  %v1294_v60 = vld [vmem:[%s4227_s24] sm:$0xff]  ;;  %s2288_s10 = scalar_lea.vmem %s4576_s13, %s3508_s28 [#allocation15] }
 0x3a7   : > { %vm1295_vm0 = vcmp.ge.f32.partialorder %v1294_v60, %v4849_v16 }
 0x3a8   : > { %3726 = vpow2.f32 %v1508_v39 }
 0x3ab   : > { %v1728_v7 = vpop.xlane.xlu1 %1727 }
 0x3ac   : > { %v1729_v17 = vsel %vm1235_vm3, %v1728_v7, 0.0  ;;  %v1965_v39 = vld [vmem:[%s4576_s13] sm:$0xff] }
 0x3ae   : > { %v4871_v3 = vpop.eup %3726 }
 0x3af   : > { %v1510_v31 = vsel %vm1261_vm5, %v4871_v3, 0.0 }
 0x3b0   : > { %1962 = vadd.xlane.f32.xlu1 %v1961_v54  ;;  %1511 = vadd.xlane.f32.xlu2 %v1510_v31 }
 0x3cd   : > { %v1735_v47 = vpop.xlane.xlu0 %1734 }
 0x3ce   : > { %v1736_v2 = vsel %vm1243_vm2, %v1735_v47, 0.0 }
 0x3cf   : > { %v1737_v20 = vadd.f32 %v1736_v2, %v1729_v17  ;;  %v5818_v2 = vld [vmem:[#allocation36_spill] sm:$0xff] }
 0x3d0   : > { %v811_v17 = vadd.f32 %v5818_v2, %v4475_v15 }
 0x3d2   : > { %v1742_v58 = vpop.xlane.xlu2 %1741 }
 0x3d3   : > { %v1743_v8 = vsel %vm1252_vm4, %v1742_v58, 0.0 }
 0x3d4   : > { %v4890_v35 = vadd.f32 %v1743_v8, %v1737_v20  ;;  %v5819_v20 = vld [vmem:[#allocation32_spill] sm:$0xff] }
 0x3d6   : > { %5816 = vst [vmem:[#allocation47_spill] sm:$0xff] %v4890_v35  ;;  %v1745_v28 = vsel %vm1261_vm5, %v4890_v35, -inf }
 0x3d7   : > { %1746 = vmax.xlane.f32.xlu1 %v1745_v28 }
 0x3d9   : > { %v1918_v52 = vpop.f32.mrf.mxu1 }
 0x3da   : > { %v1919_v14 = vadd.f32 %v1918_v52, %v4451_v18  ;;  %v1957_v40 = vpop.f32.mrf.mxu0 }
 0x3db   : > { %v4896_v25 = vadd.f32 %v1957_v40, %v4602_v23 }
 0x3dc   : > { %v2100_v29 = vadd.f32 %v1919_v14, %v5817_v5 }
 0x3dd   : > { %v1966_v54 = vmul.f32 %v1965_v39, %v4896_v25 }
 0x3de   : > { %v3501_v31 = vmul.f32 -1.442695, %v2100_v29 }
 0x3df   : > { %v1931_v47 = vpop.f32.mrf.mxu2  ;;  %v1967_v7 = vsel %vm685_vm9, %v1966_v54, 0.0 }
 0x3e0   : > { %3728 = vpow2.f32 %v3501_v31  ;;  %v1932_v58 = vadd.f32 %v1931_v47, %v5819_v20  ;;  %v1944_v8 = vpop.f32.mrf.mxu3  ;;  %1968 = vadd.xlane.f32.xlu0 %v1967_v7  ;;  %v2050_v47 = vmul.f32 %v2049_v12, %v4896_v25 }
 0x3e1   : > { %v1920_v28 = vpop.f32.mrf.mxu1 }
 0x3e2   : > { %v2120_v52 = vadd.f32 %v1932_v58, %v811_v17  ;;  %v1959_v14 = vpop.f32.mrf.mxu0 }
 0x3e4   : > { %v3502_v40 = vmul.f32 -1.442695, %v2120_v52 }
 0x3e6   : > { %v3729_v5 = vpop.eup %3728  ;;  %3730 = vpow2.f32 %v3502_v40  ;;  %v5820_v40 = vmov 0  }
 0x3e7   : > { %v2104_v29 = vadd.f32 1.0, %v3729_v5  ;;  %v1933_v39 = vpop.f32.mrf.mxu2  ;;  %v1296_v5 = vsel %vm1295_vm0, 1, %v5820_v40 }
 0x3e8   : > { %v1946_v54 = vpop.f32.mrf.mxu3 }
 0x3e9   : > { %3732 = vrcp.f32 %v2104_v29  ;;  %v2116_v14 = vand.u32 2147483648, %v2104_v29  ;;  %v2114_v54 = vand.u32 2147483647, %v2104_v29  ;;  %vm2110_vm7 = vweird.f32 %v2104_v29 }
 0x3eb   : > { %v2117_v23 = vor.u32 1.1754944e-38, %v2116_v14  ;;  %vm2115_vm10 = vcmp.eq.f32.partialorder %v2114_v54, 8.507059e+37 }
 0x3ec   : > { %v3731_v2 = vpop.eup %3730 }
 0x3ed   : > { %v2124_v31 = vadd.f32 1.0, %v3731_v2 }
 0x3ef   : > { %v3733_v7 = vpop.eup %3732  ;;  %3734 = vrcp.f32 %v2124_v31  ;;  %v2136_v18 = vand.u32 2147483648, %v2124_v31  ;;  %vm2130_vm12 = vweird.f32 %v2124_v31 }
 0x3f0   : > { %v2106_v28 = vmul.f32 %v3733_v7, %v2104_v29  ;;  %v1299_v17 = vpop.permute.xlu1 %1298  ;;  %2052 = vrot.lane.b32.xlu1 %v2050_v47, %s4008_s11  ;;  %vm2111_vm6 = vweird.f32 %v3733_v7 }
 0x3f1   : > { %v1301_v58 = vadd.f32 %v1299_v17, %v4849_v16  ;;  %vm2112_vm8 = vmor %vm2110_vm7, %vm2111_vm6 }
 0x3f2   : > { %v2107_v52 = vsub.f32 1.0, %v2106_v28  ;;  %v1945_v28 = vadd.f32 %v1944_v8, %v4496_v9 }
 0x3f3   : > { %vm1302_vm1 = vcmp.ge.f32.partialorder %v1294_v60, %v1301_v58  ;;  %v5821_v60 = vld [vmem:[#allocation37_spill] sm:$0xff] }
 0x3f4   : > { %v2108_v39 = vmul.f32 %v3733_v7, %v2107_v52  ;;  %v1303_v12 = vsel %vm1302_vm1, 1, %v5820_v40  ;;  %v840_v58 = vadd.f32 %v5821_v60, %v4501_v51 }
 0x3f5   : > { %v3735_v2 = vpop.eup %3734  ;;  %v1304_v59 = vadd.s32 %v1303_v12, %v1296_v5  ;;  %v2134_v5 = vand.u32 2147483647, %v2124_v31 }
 0x3f6   : > { %v2126_v20 = vmul.f32 %v3735_v2, %v2124_v31  ;;  %v2109_v15 = vadd.f32 %v3733_v7, %v2108_v39  ;;  %vm2131_vm11 = vweird.f32 %v3735_v2 }
 0x3f7   : > { %1306 = vperm.xlu2 %3660, %v1304_v59   ;;  %vm2132_vm13 = vmor %vm2130_vm12, %vm2131_vm11  ;;  %v1331_v14 = vcvt.s32.f32 %v1304_v59  ;;  %vm2135_vm14 = vcmp.eq.f32.partialorder %v2134_v5, 8.507059e+37  ;;  %v5823_v5 = vld [vmem:[#allocation47_spill] sm:$0xff] }
 0x3f8   : > { %v2127_v47 = vsub.f32 1.0, %v2126_v20  ;;  %v2113_v17 = vsel %vm2112_vm8, %v3733_v7, %v2109_v15  ;;  %v2137_v20 = vor.u32 1.1754944e-38, %v2136_v18  ;;  %v3496_v18 = vld [vmem:[%s4576_s13 + $0x10] sm:$0xff] }
 0x3f9   : > { %v2118_v52 = vsel %vm2115_vm10, %v2117_v23, %v2113_v17  ;;  %v2048_v17 = vld [vmem:[%s2047_s25] sm:$0xff] }
 0x3fa   : > { %v2128_v16 = vmul.f32 %v3735_v2, %v2127_v47  ;;  %v2140_v35 = vmul.f32 %v2118_v52, %v1945_v28 }
 0x3fc   : > { %v2129_v29 = vadd.f32 %v3735_v2, %v2128_v16  ;;  %v2141_v39 = vadd.f32 %v2140_v35, %v840_v58 }
 0x3fe   : > { %v2133_v12 = vsel %vm2132_vm13, %v3735_v2, %v2129_v29  ;;  %3736 = vtanh.f32 %v2141_v39  ;;  %v4013_v2 = vmov 0.0  }
 0x3ff   : > { %1334 = vperm.xlu2 %3660, %v1331_v14   ;;  %v2138_v15 = vsel %vm2135_vm14, %v2137_v20, %v2133_v12  ;;  %v5824_v14 = vld [vmem:[#allocation26_spill] sm:$0xff]  ;;  %v2290_v12 = vstv %s2286_s16 }
 0x400   : > { %v2143_v8 = vsub.f32 1.0, %v2138_v15  ;;  %v2145_v54 = vmul.f32 %v2138_v15, %v4806_v26  ;;  %v1980_v26 = vmul.f32 %v3496_v18, %v4896_v25 }
 0x404   : > { %v3737_v7 = vpop.eup %3736 }
 0x405   : > { %v2144_v23 = vmul.f32 %v3737_v7, %v2143_v8  ;;  %v5825_v8 = vld [vmem:[#allocation44_spill] sm:$0xff] }
 0x407   : > { %v4920_v47 = vadd.f32 %v2145_v54, %v2144_v23  ;;  %v5826_v23 = vld [vmem:[#allocation28_spill] sm:$0xff] }
 0x409   : > { %3503 = vst [vmem:[%s4521_s14 + $0x20] sm:$0xff] %v4920_v47  ;;  %v2149_v16 = vpack.c.bf16 %v4920_v47, %v4920_v47 }
 0x40b   : > { %2158 = vmatmul.bf16.vlgmr.msrb.gmra.mxu1 %v2149_v16  ;;  %2171 = vmatmul.bf16.vlgmr.msrb.gmra.mxu2 %v2149_v16 }
 0x40c   : > { %2184 = vmatmul.bf16.vlgmr.msra.gmra.mxu3 %v2149_v16  ;;  %2197 = vmatmul.bf16.vlgmr.msra.gmra.mxu0 %v2149_v16 }
 0x40d   : > { %2632 = vmatpush.bf16.msrb.mxu1 %v4245_v24  ;;  %2645 = vmatpush.bf16.msrb.mxu2 %v4313_v13  ;;  %v4012_v24 = vmov 2  }
 0x40e   : > { %2658 = vmatpush.bf16.msra.mxu3 %v4257_v37  ;;  %2671 = vmatpush.bf16.msra.mxu0 %v4456_v32  ;;  %v4945_v37 = vpop.permute.xlu2 %1353 }
 0x40f   : > { %3663 = vset.pattern.permute.xlu1 %v4012_v24 }
 0x411   : > { %2633 = vmatpush.bf16.msrb.mxu1 %v4250_v30  ;;  %2646 = vmatpush.bf16.msrb.mxu2 %v4339_v27  ;;  %v1981_v30 = vsel %vm685_vm9, %v1980_v26, 0.0 }
 0x412   : > { %2659 = vmatpush.bf16.msra.mxu3 %v4262_v42  ;;  %2672 = vmatpush.bf16.msra.mxu0 %v4459_v45 }
 0x415   : > { %2634 = vmatpush.bf16.msrb.mxu1 %v4255_v36  ;;  %2647 = vmatpush.bf16.msrb.mxu2 %v4349_v41  ;;  %v4947_v36 = vpop.permute.xlu1 %1360 }
 0x416   : > { %2660 = vmatpush.bf16.msra.mxu3 %v4269_v48  ;;  %2673 = vmatpush.bf16.msra.mxu0 %v4464_v33  ;;  %v5822_v48 = vld [vmem:[#allocation46_spill] sm:$0xff] }
 0x419   : > { %2635 = vmatpush.bf16.msrb.mxu1 %v4265_v43  ;;  %2648 = vmatpush.bf16.msrb.mxu2 %v4359_v50  ;;  %v3495_v50 = vld [vmem:[%s4576_s13 + $0x8] sm:$0xff] }
 0x41a   : > { %1982 = vadd.xlane.f32.xlu1 %v1981_v30  ;;  %2661 = vmatpush.bf16.msra.mxu3 %v4278_v56  ;;  %v5827_v30 = vld [vmem:[#allocation30_spill] sm:$0xff] }
 0x41b   : > { %2674 = vmatpush.bf16.msra.mxu0 %v4469_v1 }
 0x41d   : > { %2636 = vmatpush.bf16.msrb.mxu1 %v4272_v49  ;;  %2649 = vmatpush.bf16.msrb.mxu2 %v4366_v53  ;;  %v1973_v53 = vmul.f32 %v3495_v50, %v4896_v25 }
 0x41e   : > { %2662 = vmatpush.bf16.msra.mxu3 %v4306_v10 }
 0x41f   : > { %2675 = vmatpush.bf16.msra.mxu0 %v4472_v63 }
 0x421   : > { %2637 = vmatpush.bf16.msrb.mxu1 %v4281_v57  ;;  %2650 = vmatpush.bf16.msrb.mxu2 %v4373_v55  ;;  %v1974_v55 = vsel %vm685_vm9, %v1973_v53, 0.0 }
 0x422   : > { %2663 = vmatpush.bf16.msra.mxu3 %v4329_v22 }
 0x423   : > { %v1512_v42 = vpop.xlane.xlu2 %1511  ;;  %v1963_v43 = vpop.xlane.xlu1 %1962  ;;  %2676 = vmatpush.bf16.msra.mxu0 %v4478_v19 }
 0x424   : > { %3738 = vrcp.f32 %v1512_v42  ;;  %v1964_v56 = vadd.f32 %v5822_v48, %v1963_v43  ;;  %v1527_v13 = vand.u32 2147483648, %v1512_v42  ;;  %v1525_v22 = vand.u32 2147483647, %v1512_v42  ;;  %v5829_v48 = vld [vmem:[#allocation32_spill] sm:$0xff] }
 0x425   : > { %2638 = vmatpush.bf16.msrb.mxu1 %v4293_v0  ;;  %2651 = vmatpush.bf16.msrb.mxu2 %v4380_v62  ;;  %vm1521_vm0 = vweird.f32 %v1512_v42  ;;  %3740 = vlog2.f32 %v1512_v42 }
 0x426   : > { %2664 = vmatpush.bf16.msra.mxu3 %v4342_v34  ;;  %2071 = vperm.xlu2 %3660, %v1964_v56   ;;  %v1528_v34 = vor.u32 1.1754944e-38, %v1527_v13  ;;  %vm1526_vm6 = vcmp.eq.f32.partialorder %v1525_v22, 8.507059e+37 }
 0x427   : > { %2677 = vmatpush.bf16.msra.mxu0 %v4487_v38 }
 0x429   : > { %2639 = vmatpush.bf16.msrb.mxu1 %v4309_v11  ;;  %2652 = vmatpush.bf16.msrb.mxu2 %v4387_v4 }
 0x42a   : > { %v3739_v49 = vpop.eup %3738  ;;  %2665 = vmatpush.bf16.msra.mxu3 %v4352_v44 }
 0x42b   : > { %v1517_v57 = vmul.f32 %v3739_v49, %v1512_v42  ;;  %2678 = vmatpush.bf16.msra.mxu0 %v4491_v6  ;;  %vm1522_vm15 = vweird.f32 %v3739_v49  ;;  %v3741_v62 = vpop.eup %3740  ;;  %v5828_v42 = vld [vmem:[#allocation38_spill] sm:$0xff] }
 0x42c   : > { %vm1523_vm1 = vmor %vm1521_vm0, %vm1522_vm15  ;;  %v1514_v4 = vmul.f32 0.6931472, %v3741_v62  ;;  %v813_v43 = vadd.f32 %v5828_v42, %v5827_v30  ;;  %v5017_v62 = vpop.xlane.xlu0 %1291 }
 0x42d   : > { %v1518_v10 = vsub.f32 1.0, %v1517_v57  ;;  %v5830_v57 = vld [vmem:[#allocation34_spill] sm:$0xff] }
 0x42e   : > { %v4981_v59 = vsub.f32 %v4867_v61, %v1514_v4 }
 0x42f   : > { %v1519_v0 = vmul.f32 %v3739_v49, %v1518_v10  ;;  %v2202_v10 = vmul.f32 %v5830_v57, %v4920_v47 }
 0x431   : > { %v1520_v27 = vadd.f32 %v3739_v49, %v1519_v0 }
 0x433   : > { %v1524_v11 = vsel %vm1523_vm1, %v3739_v49, %v1520_v27 }
 0x434   : > { %v1529_v41 = vsel %vm1526_vm6, %v1528_v34, %v1524_v11 }
 0x435   : > { %v4968_v44 = vmul.f32 %v4871_v3, %v1529_v41 }
 0x437   : > { %1541 = vrot.lane.b32.xlu0 %v4968_v44, %s4011_s1  ;;  %1607 = vperm.xlu1 %3663, %v4968_v44   ;;  %v1531_v31 = vmul.f32 %v4968_v44, %v4981_v59 }
 0x439   : > { %v1532_v25 = vsel %vm1261_vm5, %v1531_v31, 0.0 }
 0x43f   : > { %1601 = vperm.xlu0 %3662, %v4968_v44  }
 0x447   : > { %3664 = vset.pattern.permute.xlu0 %v5820_v40 }
 0x44a   : > { %v1747_v3 = vpop.xlane.xlu1 %1746 }
 0x44b   : > { %v4998_v29 = vsub.f32 %v5823_v5, %v1747_v3 }
 0x44d   : > { %v1749_v15 = vmul.f32 1.442695, %v4998_v29 }
 0x44f   : > { %1975 = vadd.xlane.f32.xlu2 %v1974_v55  ;;  %3742 = vpow2.f32 %v1749_v15 }
 0x451   : > { %v1307_v35 = vpop.permute.xlu2 %1306 }
 0x452   : > { %vm1308_vm7 = vcmp.eq.s32.totalorder %v4672_v46, %v1307_v35 }
 0x453   : > { %v3472_v28 = vsel %vm1308_vm7, 1.0, %v4013_v2 }
 0x454   : > { %v1311_v61 = vmul.f32 %v3472_v28, %v4852_v21 }
 0x455   : > { %v5013_v34 = vpop.eup %3742 }
 0x456   : > { %v1312_v52 = vsel %vm1261_vm5, %v1311_v61, 0.0  ;;  %v1751_v55 = vsel %vm1261_vm5, %v5013_v34, 0.0 }
 0x461   : > { %1533 = vadd.xlane.f32.xlu1 %v1532_v25  ;;  %v5019_v25 = vpop.xlane.xlu0 %1968 }
 0x462   : > { %v2053_v60 = vpop.permute.xlu1 %2052 }
 0x463   : > { %v2055_v58 = vadd.f32 %v2053_v60, %v2048_v17 }
 0x465   : > { %2056 = vst.msk [vmem:[%s2047_s25] sm:$0xff] %vm685_vm9, %v2055_v58  ;;  %s5233_s25 = sadd.s32 6, %s4592_s19 }
 0x466   : > { %p2766_p6 = scmp.lt.s32.totalorder %s5233_s25, 3  ;;  %p2764_p13 = scmp.lt.s32.totalorder %s5233_s25, 2 }
 0x467   : > { %1595 = vperm.xlu2 %3660, %v4968_v44  }
 0x468   : > { %s2767_s29 = scalar_select %p2766_p6, 1, 0 }
 0x469   : > { %1313 = vadd.xlane.f32.xlu0 %v1312_v52  ;;  %s5864_s25 = smov (!%p2764_p13, %s5233_s25), 2 }
 0x46a   : > { %s2768_s26 = scvt.s32.f32 %s2767_s29  ;;  %s3526_s16 = sshll.u32 %s5864_s25, 3 }
 0x46b   : > { %s2770_s28 = scalar_lea.vmem %s4576_s13, %s3526_s16 [#allocation15]  ;;  %s3026_s25 = sand.u32 1, %s4114_s0  }
 0x46c   : > { %s3059_s29 = sshll.u32 %s4521_s14, 4  ;;  %s5607_s16 = scalar_lea.sflag [#allocation14], %s3026_s25  ;;  %s3060_s29 = int_to_ptr.vmem [resolvable:$true] %s3059_s29 }
 0x488   : > { %v2159_v39 = vpop.f32.mrf.mxu1 }
 0x489   : > { %v2160_v20 = vadd.f32 %v2159_v39, %v5824_v14  ;;  %v2198_v21 = vpop.f32.mrf.mxu0  ;;  %v3479_v39 = vld [vmem:[%s4227_s24 + $0x8] sm:$0xff] }
 0x48a   : > { %v5003_v7 = vadd.f32 %v2198_v21, %v5825_v8  ;;  %vm1538_vm13 = vcmp.ge.f32.partialorder %v3479_v39, %v4968_v44 }
 0x48b   : > { %v2341_v54 = vadd.f32 %v2160_v20, %v5826_v23  ;;  %v5831_v23 = vld [vmem:[#allocation39_spill] sm:$0xff] }
 0x48c   : > { %v2291_v16 = vmul.f32 %v2290_v12, %v5003_v7 }
 0x48d   : > { %v3510_v18 = vmul.f32 -1.442695, %v2341_v54  ;;  %v842_v54 = vadd.f32 %v5831_v23, %v4501_v51  ;;  %v2206_v23 = vld [vmem:[%s4576_s13] sm:$0xff] }
 0x48e   : > { %2293 = vrot.lane.b32.xlu1 %v2291_v16, %s4008_s11  ;;  %v2172_v26 = vpop.f32.mrf.mxu2 }
 0x48f   : > { %3744 = vpow2.f32 %v3510_v18  ;;  %v2173_v56 = vadd.f32 %v2172_v26, %v5829_v48  ;;  %v2185_v49 = vpop.f32.mrf.mxu3 }
 0x490   : > { %v2161_v13 = vpop.f32.mrf.mxu1  ;;  %2203 = vadd.xlane.f32.xlu2 %v2202_v10  ;;  %v2186_v12 = vadd.f32 %v2185_v49, %v4496_v9 }
 0x491   : > { %v2361_v0 = vadd.f32 %v2173_v56, %v813_v43  ;;  %v2200_v22 = vpop.f32.mrf.mxu0  ;;  %v1539_v13 = vsel %vm1538_vm13, 1, %v5820_v40 }
 0x493   : > { %v3511_v27 = vmul.f32 -1.442695, %v2361_v0 }
 0x495   : > { %v3745_v11 = vpop.eup %3744  ;;  %3746 = vpow2.f32 %v3511_v27 }
 0x496   : > { %v2345_v41 = vadd.f32 1.0, %v3745_v11  ;;  %v2174_v50 = vpop.f32.mrf.mxu2 }
 0x497   : > { %v2187_v53 = vpop.f32.mrf.mxu3 }
 0x498   : > { %3748 = vrcp.f32 %v2345_v41  ;;  %1752 = vadd.xlane.f32.xlu2 %v1751_v55  ;;  %v2357_v17 = vand.u32 2147483648, %v2345_v41  ;;  %v2355_v58 = vand.u32 2147483647, %v2345_v41  ;;  %vm2351_vm10 = vweird.f32 %v2345_v41  ;;  %v5030_v55 = vpop.permute.xlu2 %1334 }
 0x49a   : > { %v2358_v20 = vor.u32 1.1754944e-38, %v2357_v17  ;;  %vm2356_vm12 = vcmp.eq.f32.partialorder %v2355_v58, 8.507059e+37 }
 0x49b   : > { %v3747_v4 = vpop.eup %3746 }
 0x49c   : > { %v2365_v3 = vadd.f32 1.0, %v3747_v4 }
 0x49e   : > { %v3749_v35 = vpop.eup %3748  ;;  %3750 = vrcp.f32 %v2365_v3  ;;  %v2377_v26 = vand.u32 2147483648, %v2365_v3  ;;  %v2375_v56 = vand.u32 2147483647, %v2365_v3  ;;  %vm2371_vm15 = vweird.f32 %v2365_v3 }
 0x49f   : > { %v2347_v31 = vmul.f32 %v3749_v35, %v2345_v41  ;;  %vm2352_vm8 = vweird.f32 %v3749_v35 }
 0x4a0   : > { %vm2353_vm11 = vmor %vm2351_vm10, %vm2352_vm8  ;;  %v2378_v0 = vor.u32 1.1754944e-38, %v2377_v26  ;;  %vm2376_vm6 = vcmp.eq.f32.partialorder %v2375_v56, 8.507059e+37 }
 0x4a1   : > { %v2348_v28 = vsub.f32 1.0, %v2347_v31 }
 0x4a3   : > { %v2349_v60 = vmul.f32 %v3749_v35, %v2348_v28 }
 0x4a4   : > { %v3751_v61 = vpop.eup %3750 }
 0x4a5   : > { %v2367_v52 = vmul.f32 %v3751_v61, %v2365_v3  ;;  %v2350_v5 = vadd.f32 %v3749_v35, %v2349_v60  ;;  %vm2372_vm14 = vweird.f32 %v3751_v61  ;;  %v5042_v60 = vpop.permute.xlu2 %2071 }
 0x4a6   : > { %vm2373_vm0 = vmor %vm2371_vm15, %vm2372_vm14 }
 0x4a7   : > { %v2368_v21 = vsub.f32 1.0, %v2367_v52  ;;  %v2354_v15 = vsel %vm2353_vm11, %v3749_v35, %v2350_v5 }
 0x4a8   : > { %v2359_v16 = vsel %vm2356_vm12, %v2358_v20, %v2354_v15 }
 0x4a9   : > { %v2369_v18 = vmul.f32 %v3751_v61, %v2368_v21  ;;  %v2381_v42 = vmul.f32 %v2359_v16, %v2186_v12  ;;  %v1542_v43 = vpop.permute.xlu0 %1541  ;;  %v5832_v21 = vmov 1  }
 0x4aa   : > { %v1544_v57 = vadd.f32 %v1542_v43, %v4968_v44  ;;  %v3504_v44 = vld [vmem:[%s4576_s13 + $0x8] sm:$0xff] }
 0x4ab   : > { %v2370_v10 = vadd.f32 %v3751_v61, %v2369_v18  ;;  %v2382_v49 = vadd.f32 %v2381_v42, %v842_v54  ;;  %v2214_v4 = vmul.f32 %v3504_v44, %v5003_v7  ;;  %v2207_v54 = vmul.f32 %v2206_v23, %v5003_v7 }
 0x4ac   : > { %vm1545_vm1 = vcmp.ge.f32.partialorder %v3479_v39, %v1544_v57 }
 0x4ad   : > { %v2374_v22 = vsel %vm2373_vm0, %v3751_v61, %v2370_v10  ;;  %3752 = vtanh.f32 %v2382_v49  ;;  %v1546_v27 = vsel %vm1545_vm1, 1, %v5820_v40  ;;  %v2215_v28 = vsel %vm685_vm9, %v2214_v4, 0.0 }
 0x4ae   : > { %v1547_v11 = vadd.s32 %v1546_v27, %v1539_v13  ;;  %v2379_v41 = vsel %vm2376_vm6, %v2378_v0, %v2374_v22  ;;  %v1970_v61 = vsel %vm1235_vm3, %v5019_v25, 0.0  ;;  %v2208_v18 = vsel %vm685_vm9, %v2207_v54, 0.0 }
 0x4af   : > { %v2384_v50 = vsub.f32 1.0, %v2379_v41  ;;  %v2386_v35 = vmul.f32 %v2379_v41, %v4920_v47  ;;  %v1983_v47 = vpop.xlane.xlu1 %1982 }
 0x4b0   : > { %1549 = vperm.xlu2 %3660, %v1547_v11   ;;  %v1984_v39 = vsel %vm1252_vm4, %v1983_v47, 0.0  ;;  %v1575_v25 = vcvt.s32.f32 %v1547_v11 }
 0x4b1   : > { %v5090_v11 = vpop.permute.xlu0 %1601 }
 0x4b3   : > { %v3753_v53 = vpop.eup %3752 }
 0x4b4   : > { %v2385_v3 = vmul.f32 %v3753_v53, %v2384_v50 }
 0x4b6   : > { %v5034_v31 = vadd.f32 %v2386_v35, %v2385_v3 }
 0x4b7   : > { %v5067_v12 = vpop.permute.xlu1 %1607 }
 0x4b8   : > { %3512 = vst [vmem:[%s4521_s14 + $0x28] sm:$0xff] %v5034_v31  ;;  %2216 = vadd.xlane.f32.xlu1 %v2215_v28  ;;  %v2390_v17 = vpack.c.bf16 %v5034_v31, %v5034_v31  ;;  %3666 = vset.pattern.permute.xlu2 %v4012_v24 }
 0x4ba   : > { %2399 = vmatmul.bf16.vlgmr.msra.gmra.mxu1 %v2390_v17  ;;  %2412 = vmatmul.bf16.vlgmr.msra.gmra.mxu2 %v2390_v17 }
 0x4bb   : > { %2425 = vmatmul.bf16.vlgmr.msrb.gmra.mxu3 %v2390_v17  ;;  %2438 = vmatmul.bf16.vlgmr.msrb.gmra.mxu0 %v2390_v17 }
 0x4bc   : > { %2873 = vmatpush.bf16.msra.mxu1 %v4456_v32 }
 0x4c0   : > { %2874 = vmatpush.bf16.msra.mxu1 %v4459_v45  ;;  %v3505_v45 = vld [vmem:[%s4576_s13 + $0x10] sm:$0xff] }
 0x4c2   : > { %v1976_v58 = vpop.xlane.xlu2 %1975 }
 0x4c3   : > { %v1977_v52 = vsel %vm1243_vm2, %v1976_v58, 0.0  ;;  %v5834_v58 = vld [vmem:[#allocation40_spill] sm:$0xff] }
 0x4c4   : > { %2875 = vmatpush.bf16.msra.mxu1 %v4464_v33  ;;  %v1978_v5 = vadd.f32 %v1977_v52, %v1970_v61  ;;  %v2221_v33 = vmul.f32 %v3505_v45, %v5003_v7  ;;  %v816_v61 = vadd.f32 %v5834_v58, %v5827_v30 }
 0x4c6   : > { %v5054_v20 = vadd.f32 %v1984_v39, %v1978_v5 }
 0x4c8   : > { %2876 = vmatpush.bf16.msra.mxu1 %v4469_v1  ;;  %v1986_v32 = vsel %vm1261_vm5, %v5054_v20, -inf  ;;  %v2222_v1 = vsel %vm685_vm9, %v2221_v33, 0.0 }
 0x4c9   : > { %1987 = vmax.xlane.f32.xlu0 %v1986_v32 }
 0x4cc   : > { %2877 = vmatpush.bf16.msra.mxu1 %v4472_v63 }
 0x4d0   : > { %2878 = vmatpush.bf16.msra.mxu1 %v4478_v19  ;;  %v5073_v19 = vpop.permute.xlu2 %1595 }
 0x4d4   : > { %2879 = vmatpush.bf16.msra.mxu1 %v4487_v38  ;;  %v5071_v63 = vpop.xlane.xlu1 %1533  ;;  %v2289_v38 = vld [vmem:[%s2288_s10] sm:$0xff] }
 0x4d8   : > { %2880 = vmatpush.bf16.msra.mxu1 %v4491_v6 }
 0x4d9   : > { %2223 = vadd.xlane.f32.xlu2 %v2222_v1 }
 0x4dc   : > { %v5092_v41 = vpop.xlane.xlu0 %1313 }
 0x4dd   : > { %1578 = vperm.xlu0 %3664, %v1575_v25  }
 0x4e5   : > { %3665 = vset.pattern.permute.xlu0 %v5832_v21 }
 0x500   : > { %v2294_v6 = vpop.permute.xlu1 %2293 }
 0x501   : > { %v2296_v15 = vadd.f32 %v2294_v6, %v2289_v38 }
 0x503   : > { %2297 = vst.msk [vmem:[%s2288_s10] sm:$0xff] %vm685_vm9, %v2296_v15  ;;  %v5079_v16 = vpop.xlane.xlu2 %2203 }
 0x507   : > { %2209 = vadd.xlane.f32.xlu0 %v2208_v18 }
 0x50b   : > { %v1753_v26 = vpop.xlane.xlu2 %1752 }
 0x50c   : > { %3754 = vrcp.f32 %v1753_v26  ;;  %v1768_v57 = vand.u32 2147483648, %v1753_v26  ;;  %v1766_v49 = vand.u32 2147483647, %v1753_v26  ;;  %vm1762_vm8 = vweird.f32 %v1753_v26 }
 0x50d   : > { %3756 = vlog2.f32 %v1753_v26 }
 0x50e   : > { %v1769_v7 = vor.u32 1.1754944e-38, %v1768_v57  ;;  %vm1767_vm11 = vcmp.eq.f32.partialorder %v1766_v49, 8.507059e+37 }
 0x512   : > { %v3755_v42 = vpop.eup %3754 }
 0x513   : > { %v1758_v43 = vmul.f32 %v3755_v42, %v1753_v26  ;;  %vm1763_vm7 = vweird.f32 %v3755_v42  ;;  %v1550_v3 = vpop.permute.xlu2 %1549  ;;  %v3757_v28 = vpop.eup %3756 }
 0x514   : > { %vm1764_vm10 = vmor %vm1762_vm8, %vm1763_vm7  ;;  %vm1551_vm12 = vcmp.eq.s32.totalorder %v4672_v46, %v1550_v3  ;;  %v1755_v25 = vmul.f32 0.6931472, %v3757_v28 }
 0x515   : > { %v1759_v56 = vsub.f32 1.0, %v1758_v43  ;;  %v3480_v38 = vsel %vm1551_vm12, 1.0, %v4013_v2  ;;  %vm1343_vm12 = vcmp.eq.s32.totalorder %v4672_v46, 3 }
 0x516   : > { %v1554_v18 = vmul.f32 %v3480_v38, %v4981_v59 }
 0x517   : > { %v1760_v10 = vmul.f32 %v3755_v42, %v1759_v56 }
 0x518   : > { %v1555_v56 = vsel %vm1261_vm5, %v1554_v18, 0.0  ;;  %v2531_v18 = vstv %s2527_s27 }
 0x519   : > { %v1761_v13 = vadd.f32 %v3755_v42, %v1760_v10 }
 0x51b   : > { %v1765_v0 = vsel %vm1764_vm10, %v3755_v42, %v1761_v13 }
 0x51c   : > { %v1770_v22 = vsel %vm1767_vm11, %v1769_v7, %v1765_v0  ;;  %v3513_v7 = vld [vmem:[%s4576_s13 + $0x8] sm:$0xff] }
 0x51d   : > { %v5083_v27 = vmul.f32 %v5013_v34, %v1770_v22  ;;  %v5833_v34 = vld [vmem:[#allocation29_spill] sm:$0xff] }
 0x51f   : > { %1782 = vrot.lane.b32.xlu1 %v5083_v27, %s4011_s1  ;;  %1848 = vperm.xlu2 %3666, %v5083_v27  }
 0x520   : > { %1842 = vperm.xlu0 %3665, %v5083_v27  }
 0x527   : > { %3667 = vset.pattern.permute.xlu2 %v5820_v40 }
 0x537   : > { %v2400_v50 = vpop.f32.mrf.mxu1 }
 0x538   : > { %v2401_v44 = vadd.f32 %v2400_v50, %v5824_v14  ;;  %v2439_v53 = vpop.f32.mrf.mxu0 }
 0x539   : > { %v5117_v10 = vadd.f32 %v2439_v53, %v5825_v8 }
 0x53a   : > { %v2582_v4 = vadd.f32 %v2401_v44, %v5833_v34 }
 0x53b   : > { %v2455_v22 = vmul.f32 %v3513_v7, %v5117_v10  ;;  %v2217_v7 = vpop.xlane.xlu1 %2216 }
 0x53c   : > { %v3519_v35 = vmul.f32 -1.442695, %v2582_v4  ;;  %v1988_v17 = vpop.xlane.xlu0 %1987 }
 0x53d   : > { %v2413_v47 = vpop.f32.mrf.mxu2  ;;  %v5099_v52 = vsub.f32 %v5054_v20, %v1988_v17  ;;  %v5106_v20 = vsub.f32 %v4998_v29, %v1755_v25  ;;  %v2456_v4 = vsel %vm685_vm9, %v2455_v22, 0.0  ;;  %v2218_v22 = vsel %vm1243_vm2, %v2217_v7, 0.0 }
 0x53e   : > { %3758 = vpow2.f32 %v3519_v35  ;;  %v2414_v5 = vadd.f32 %v2413_v47, %v5829_v48  ;;  %v2426_v39 = vpop.f32.mrf.mxu3 }
 0x53f   : > { %v2402_v32 = vpop.f32.mrf.mxu1  ;;  %v1990_v45 = vmul.f32 1.442695, %v5099_v52  ;;  %v1772_v42 = vmul.f32 %v5083_v27, %v5106_v20  ;;  %v2427_v58 = vadd.f32 %v2426_v39, %v4496_v9 }
 0x540   : > { %v2602_v33 = vadd.f32 %v2414_v5, %v816_v61  ;;  %v2441_v1 = vpop.f32.mrf.mxu0  ;;  %v5835_v5 = vld [vmem:[#allocation41_spill] sm:$0xff] }
 0x541   : > { %3760 = vpow2.f32 %v1990_v45  ;;  %v1773_v59 = vsel %vm1261_vm5, %v1772_v42, 0.0  ;;  %v845_v32 = vadd.f32 %v5835_v5, %v4501_v51  ;;  %v2532_v42 = vmul.f32 %v2531_v18, %v5117_v10 }
 0x542   : > { %v3520_v6 = vmul.f32 -1.442695, %v2602_v33 }
 0x544   : > { %v3759_v15 = vpop.eup %3758  ;;  %3762 = vpow2.f32 %v3520_v6 }
 0x545   : > { %v2586_v23 = vadd.f32 1.0, %v3759_v15  ;;  %v2415_v54 = vpop.f32.mrf.mxu2 }
 0x546   : > { %v2428_v26 = vpop.f32.mrf.mxu3 }
 0x547   : > { %3764 = vrcp.f32 %v2586_v23  ;;  %v5111_v43 = vpop.eup %3760  ;;  %v2598_v44 = vand.u32 2147483648, %v2586_v23  ;;  %v2596_v53 = vand.u32 2147483647, %v2586_v23  ;;  %vm2592_vm14 = vweird.f32 %v2586_v23 }
 0x548   : > { %v1992_v57 = vsel %vm1261_vm5, %v5111_v43, 0.0 }
 0x549   : > { %1556 = vadd.xlane.f32.xlu1 %v1555_v56  ;;  %1993 = vadd.xlane.f32.xlu2 %v1992_v57  ;;  %v2599_v17 = vor.u32 1.1754944e-38, %v2598_v44  ;;  %vm2597_vm0 = vcmp.eq.f32.partialorder %v2596_v53, 8.507059e+37 }
 0x54a   : > { %v3763_v29 = vpop.eup %3762  ;;  %1774 = vadd.xlane.f32.xlu0 %v1773_v59 }
 0x54b   : > { %v2606_v49 = vadd.f32 1.0, %v3763_v29 }
 0x54d   : > { %v3765_v13 = vpop.eup %3764  ;;  %3766 = vrcp.f32 %v2606_v49  ;;  %v2618_v1 = vand.u32 2147483648, %v2606_v49  ;;  %v2616_v38 = vand.u32 2147483647, %v2606_v49  ;;  %vm2612_vm6 = vweird.f32 %v2606_v49 }
 0x54e   : > { %v2588_v0 = vmul.f32 %v3765_v13, %v2586_v23  ;;  %vm2593_vm13 = vweird.f32 %v3765_v13 }
 0x54f   : > { %vm2594_vm15 = vmor %vm2592_vm14, %vm2593_vm13  ;;  %v2619_v23 = vor.u32 1.1754944e-38, %v2618_v1  ;;  %vm2617_vm8 = vcmp.eq.f32.partialorder %v2616_v38, 8.507059e+37  ;;  %vm1351_vm13 = vcmp.eq.s32.totalorder %v4672_v46, 4  ;;  %vm1358_vm14 = vcmp.eq.s32.totalorder %v4672_v46, 5 }
 0x550   : > { %v2589_v50 = vsub.f32 1.0, %v2588_v0  ;;  %v2224_v0 = vpop.xlane.xlu2 %2223 }
 0x552   : > { %v2590_v34 = vmul.f32 %v3765_v13, %v2589_v50  ;;  %2457 = vadd.xlane.f32.xlu0 %v2456_v4 }
 0x553   : > { %v3767_v3 = vpop.eup %3766 }
 0x554   : > { %v2608_v35 = vmul.f32 %v3767_v3, %v2606_v49  ;;  %v2591_v28 = vadd.f32 %v3765_v13, %v2590_v34  ;;  %vm2613_vm1 = vweird.f32 %v3767_v3  ;;  %v2225_v34 = vsel %vm1252_vm4, %v2224_v0, 0.0 }
 0x555   : > { %vm2614_vm7 = vmor %vm2612_vm6, %vm2613_vm1 }
 0x556   : > { %v2609_v47 = vsub.f32 1.0, %v2608_v35  ;;  %v2595_v61 = vsel %vm2594_vm15, %v3765_v13, %v2591_v28  ;;  %v1579_v13 = vpop.permute.xlu0 %1578  ;;  %vm1365_vm15 = vcmp.eq.s32.totalorder %v4672_v46, 6 }
 0x557   : > { %v2600_v45 = vsel %vm2597_vm0, %v2599_v17, %v2595_v61  ;;  %v3514_v17 = vld [vmem:[%s4576_s13 + $0x10] sm:$0xff] }
 0x558   : > { %v2610_v33 = vmul.f32 %v3767_v3, %v2609_v47  ;;  %v2622_v25 = vmul.f32 %v2600_v45, %v2427_v58  ;;  %v3488_v47 = vld [vmem:[%s4227_s24 + $0x10] sm:$0xff]  ;;  %v2462_v58 = vmul.f32 %v3514_v17, %v5117_v10 }
 0x559   : > { %vm1779_vm10 = vcmp.ge.f32.partialorder %v3488_v47, %v5083_v27 }
 0x55a   : > { %v2611_v6 = vadd.f32 %v3767_v3, %v2610_v33  ;;  %v2623_v15 = vadd.f32 %v2622_v25, %v845_v32  ;;  %v2463_v32 = vsel %vm685_vm9, %v2462_v58, 0.0  ;;  %v1780_v33 = vsel %vm1779_vm10, 1, %v5820_v40 }
 0x55c   : > { %v2615_v39 = vsel %vm2614_vm7, %v3767_v3, %v2611_v6  ;;  %3768 = vtanh.f32 %v2623_v15  ;;  %v2447_v3 = vld [vmem:[%s4576_s13] sm:$0xff]  ;;  %v1581_v15 = vsel %vm1235_vm3, %v1579_v13, 0.0  ;;  %v1604_v13 = vsel %vm1358_vm14, %v5090_v11, 0.0 }
 0x55d   : > { %v2620_v54 = vsel %vm2617_vm8, %v2619_v23, %v2615_v39  ;;  %v2448_v35 = vmul.f32 %v2447_v3, %v5117_v10  ;;  %v1535_v10 = vsub.f32 0.0, %v5071_v63 }
 0x55e   : > { %v2625_v26 = vsub.f32 1.0, %v2620_v54  ;;  %v2627_v29 = vmul.f32 %v2620_v54, %v5034_v31 }
 0x55f   : > { %v2449_v28 = vsel %vm685_vm9, %v2448_v35, 0.0  ;;  %v1585_v54 = vsel %vm1252_vm4, %v1535_v10, 0.0  ;;  %v2530_v35 = vld [vmem:[%s2529_s23] sm:$0xff]  ;;  %v5838_v10 = vld [vmem:[#allocation42_spill] sm:$0xff] }
 0x562   : > { %v3769_v56 = vpop.eup %3768  ;;  %2534 = vrot.lane.b32.xlu1 %v2532_v42, %s4008_s11 }
 0x563   : > { %v2626_v57 = vmul.f32 %v3769_v56, %v2625_v26  ;;  %v5836_v26 = vld [vmem:[#allocation33_spill] sm:$0xff] }
 0x564   : > { %v1592_v63 = vsel %vm1343_vm12, %v5836_v26, 0.0 }
 0x565   : > { %v5133_v59 = vadd.f32 %v2627_v29, %v2626_v57  ;;  %v1598_v57 = vsel %vm1351_vm13, %v5073_v19, 0.0 }
 0x567   : > { %3521 = vst [vmem:[%s4521_s14 + $0x30] sm:$0xff] %v5133_v59  ;;  %v2631_v49 = vpack.c.bf16 %v5133_v59, %v5133_v59 }
 0x569   : > { %2640 = vmatmul.bf16.vlgmr.msrb.gmra.mxu1 %v2631_v49  ;;  %2653 = vmatmul.bf16.vlgmr.msrb.gmra.mxu2 %v2631_v49 }
 0x56a   : > { %2666 = vmatmul.bf16.vlgmr.msra.gmra.mxu3 %v2631_v49  ;;  %2679 = vmatmul.bf16.vlgmr.msra.gmra.mxu0 %v2631_v49 }
 0x579   : > { %v5163_v25 = vpop.permute.xlu2 %1848 }
 0x57a   : > { %v2210_v31 = vpop.xlane.xlu0 %2209 }
 0x57b   : > { %v2211_v50 = vsel %vm1235_vm3, %v2210_v31, 0.0  ;;  %v1610_v31 = vsel %vm1365_vm15, %v5067_v12, 0.0 }
 0x57c   : > { %v2219_v44 = vadd.f32 %v2218_v22, %v2211_v50 }
 0x57e   : > { %v5145_v53 = vadd.f32 %v2225_v34, %v2219_v44 }
 0x580   : > { %v2227_v4 = vsel %vm1261_vm5, %v5145_v53, -inf }
 0x581   : > { %2228 = vmax.xlane.f32.xlu2 %v2227_v4 }
 0x58c   : > { %2450 = vadd.xlane.f32.xlu1 %v2449_v28 }
 0x591   : > { %v1783_v61 = vpop.permute.xlu1 %1782 }
 0x592   : > { %v1785_v5 = vadd.f32 %v1783_v61, %v5083_v27  ;;  %v5837_v61 = vld [vmem:[#allocation31_spill] sm:$0xff] }
 0x594   : > { %vm1786_vm11 = vcmp.ge.f32.partialorder %v3488_v47, %v1785_v5  ;;  %2464 = vadd.xlane.f32.xlu1 %v2463_v32 }
 0x595   : > { %v1787_v45 = vsel %vm1786_vm11, 1, %v5820_v40 }
 0x596   : > { %v5160_v1 = vadd.s32 %v1787_v45, %v1780_v33 }
 0x599   : > { %1790 = vperm.xlu2 %3667, %v5160_v1  }
 0x5bc   : > { %v1557_v38 = vpop.xlane.xlu1 %1556  ;;  %v1994_v6 = vpop.xlane.xlu2 %1993 }
 0x5bd   : > { %v1583_v23 = vsel %vm1243_vm2, %v1557_v38, 0.0  ;;  %3770 = vrcp.f32 %v1994_v6  ;;  %v2009_v22 = vand.u32 2147483648, %v1994_v6  ;;  %v2007_v44 = vand.u32 2147483647, %v1994_v6 }
 0x5be   : > { %v1584_v39 = vadd.f32 %v1583_v23, %v1581_v15  ;;  %vm2003_vm1 = vweird.f32 %v1994_v6  ;;  %3772 = vlog2.f32 %v1994_v6  ;;  %v818_v38 = vadd.f32 %v5838_v10, %v5827_v30 }
 0x5bf   : > { %v2010_v11 = vor.u32 1.1754944e-38, %v2009_v22  ;;  %vm2008_vm7 = vcmp.eq.f32.partialorder %v2007_v44, 8.507059e+37 }
 0x5c0   : > { %v1586_v18 = vadd.f32 %v1585_v54, %v1584_v39 }
 0x5c2   : > { %v1593_v42 = vadd.f32 %v1592_v63, %v1586_v18 }
 0x5c3   : > { %v3771_v56 = vpop.eup %3770 }
 0x5c4   : > { %v1599_v29 = vadd.f32 %v1598_v57, %v1593_v42  ;;  %v1999_v49 = vmul.f32 %v3771_v56, %v1994_v6  ;;  %vm2004_vm0 = vweird.f32 %v3771_v56  ;;  %v3773_v33 = vpop.eup %3772 }
 0x5c5   : > { %vm2005_vm6 = vmor %vm2003_vm1, %vm2004_vm0  ;;  %v1996_v26 = vmul.f32 0.6931472, %v3773_v33 }
 0x5c6   : > { %v1605_v7 = vadd.f32 %v1604_v13, %v1599_v29  ;;  %v2000_v0 = vsub.f32 1.0, %v1999_v49 }
 0x5c7   : > { %v5216_v57 = vsub.f32 %v5099_v52, %v1996_v26 }
 0x5c8   : > { %v1611_v19 = vadd.f32 %v1610_v31, %v1605_v7  ;;  %v2001_v50 = vmul.f32 %v3771_v56, %v2000_v0 }
 0x5ca   : > { %3482 = vst [vmem:[%s5191_s21 + $0x8] sm:$0xff] %v1611_v19  ;;  %v2002_v34 = vadd.f32 %v3771_v56, %v2001_v50 }
 0x5cc   : > { %v2006_v4 = vsel %vm2005_vm6, %v3771_v56, %v2002_v34 }
 0x5cd   : > { %v2011_v3 = vsel %vm2008_vm7, %v2010_v11, %v2006_v4 }
 0x5ce   : > { %v5195_v12 = vmul.f32 %v5111_v43, %v2011_v3 }
 0x5d0   : > { %2089 = vperm.xlu1 %3663, %v5195_v12   ;;  %2023 = vrot.lane.b32.xlu0 %v5195_v12, %s4011_s1 }
 0x5d1   : > { %2077 = vperm.xlu2 %3667, %v5195_v12  }
 0x5d4   : > { %v2535_v28 = vpop.permute.xlu1 %2534 }
 0x5d5   : > { %v2537_v17 = vadd.f32 %v2535_v28, %v2530_v35 }
 0x5d7   : > { %2538 = vst.msk [vmem:[%s2529_s23] sm:$0xff] %vm685_vm9, %v2537_v17  ;;  %s3058_s23 = scalar_lea.hbm %s5742_s12, %s5599_s7 }
 0x5d8   : > { %2083 = vperm.xlu0 %3665, %v5195_v12   ;;  %3668 = vset.pattern.permute.xlu1 %v5832_v21 }
 0x5e0   : > { %3669 = vset.pattern.permute.xlu0 %v5820_v40 }
 0x5e6   : > { %v2641_v43 = vpop.f32.mrf.mxu1 }
 0x5e7   : > { %v2642_v47 = vadd.f32 %v2641_v43, %v5824_v14  ;;  %v5207_v58 = vpop.f32.mrf.mxu0  ;;  %v5213_v14 = vpop.permute.xlu0 %1842 }
 0x5e9   : > { %v2823_v5 = vadd.f32 %v2642_v47, %v5837_v61 }
 0x5eb   : > { %v3528_v32 = vmul.f32 -1.442695, %v2823_v5 }
 0x5ec   : > { %v2654_v45 = vpop.f32.mrf.mxu2 }
 0x5ed   : > { %3774 = vpow2.f32 %v3528_v32  ;;  %v2655_v15 = vadd.f32 %v2654_v45, %v5829_v48  ;;  %v2667_v23 = vpop.f32.mrf.mxu3  ;;  %v2013_v48 = vmul.f32 %v5195_v12, %v5216_v57 }
 0x5ee   : > { %v2643_v39 = vpop.f32.mrf.mxu1  ;;  %v2668_v5 = vadd.f32 %v2667_v23, %v4496_v9 }
 0x5ef   : > { %v2843_v54 = vadd.f32 %v2655_v15, %v818_v38  ;;  %v2682_v18 = vpop.f32.mrf.mxu0  ;;  %v5223_v7 = vpop.xlane.xlu0 %1774  ;;  %v2014_v22 = vsel %vm1261_vm5, %v2013_v48, 0.0  ;;  %v5839_v38 = vld [vmem:[#allocation43_spill] sm:$0xff] }
 0x5f0   : > { %v847_v15 = vadd.f32 %v5839_v38, %v4501_v51  ;;  %v3523_v38 = vld [vmem:[%s4576_s13 + $0x10] sm:$0xff] }
 0x5f1   : > { %v3529_v63 = vmul.f32 -1.442695, %v2843_v54 }
 0x5f3   : > { %v3775_v6 = vpop.eup %3774  ;;  %3776 = vpow2.f32 %v3529_v63 }
 0x5f4   : > { %v2827_v42 = vadd.f32 1.0, %v3775_v6  ;;  %v2656_v56 = vpop.f32.mrf.mxu2  ;;  %v2229_v29 = vpop.xlane.xlu2 %2228 }
 0x5f5   : > { %v2669_v30 = vpop.f32.mrf.mxu3  ;;  %v5221_v49 = vsub.f32 %v5145_v53, %v2229_v29 }
 0x5f6   : > { %3778 = vrcp.f32 %v2827_v42  ;;  %v2839_v34 = vand.u32 2147483648, %v2827_v42  ;;  %v2837_v3 = vand.u32 2147483647, %v2827_v42  ;;  %vm2833_vm11 = vweird.f32 %v2827_v42 }
 0x5f7   : > { %v2231_v0 = vmul.f32 1.442695, %v5221_v49  ;;  %v2458_v17 = vpop.xlane.xlu0 %2457 }
 0x5f8   : > { %v2840_v32 = vor.u32 1.1754944e-38, %v2839_v34  ;;  %vm2838_vm1 = vcmp.eq.f32.partialorder %v2837_v3, 8.507059e+37  ;;  %v2459_v39 = vsel %vm1243_vm2, %v2458_v17, 0.0  ;;  %v3522_v17 = vld [vmem:[%s4576_s13 + $0x8] sm:$0xff] }
 0x5f9   : > { %v3777_v13 = vpop.eup %3776  ;;  %3780 = vpow2.f32 %v2231_v0 }
 0x5fa   : > { %v2847_v31 = vadd.f32 1.0, %v3777_v13  ;;  %2015 = vadd.xlane.f32.xlu1 %v2014_v22  ;;  %v2681_v22 = vadd.f32 %v5207_v58, %v5825_v8  ;;  %v2688_v58 = vld [vmem:[%s4576_s13] sm:$0xff] }
 0x5fc   : > { %v3779_v52 = vpop.eup %3778  ;;  %3782 = vrcp.f32 %v2847_v31  ;;  %v1791_v50 = vpop.permute.xlu2 %1790  ;;  %v2859_v9 = vand.u32 2147483648, %v2847_v31  ;;  %v2857_v63 = vand.u32 2147483647, %v2847_v31  ;;  %vm2853_vm7 = vweird.f32 %v2847_v31 }
 0x5fd   : > { %v2829_v19 = vmul.f32 %v3779_v52, %v2827_v42  ;;  %vm1792_vm8 = vcmp.eq.s32.totalorder %v4672_v46, %v1791_v50  ;;  %vm2834_vm10 = vweird.f32 %v3779_v52 }
 0x5fe   : > { %v3489_v61 = vsel %vm1792_vm8, 1.0, %v4013_v2  ;;  %vm2835_vm0 = vmor %vm2833_vm11, %vm2834_vm10  ;;  %v2860_v48 = vor.u32 1.1754944e-38, %v2859_v9  ;;  %vm2858_vm10 = vcmp.eq.f32.partialorder %v2857_v63, 8.507059e+37 }
 0x5ff   : > { %v2830_v44 = vsub.f32 1.0, %v2829_v19  ;;  %v2451_v53 = vpop.xlane.xlu1 %2450  ;;  %v5228_v11 = vpop.eup %3780  ;;  %v1795_v18 = vmul.f32 %v3489_v61, %v5106_v20 }
 0x600   : > { %v2233_v28 = vsel %vm1261_vm5, %v5228_v11, 0.0  ;;  %v2452_v10 = vsel %vm1235_vm3, %v2451_v53, 0.0 }
 0x601   : > { %v2831_v4 = vmul.f32 %v3779_v52, %v2830_v44  ;;  %v2460_v6 = vadd.f32 %v2459_v39, %v2452_v10  ;;  %v1796_v20 = vsel %vm1261_vm5, %v1795_v18, 0.0 }
 0x602   : > { %v3783_v35 = vpop.eup %3782  ;;  %2234 = vadd.xlane.f32.xlu0 %v2233_v28 }
 0x603   : > { %v2849_v43 = vmul.f32 %v3783_v35, %v2847_v31  ;;  %v2832_v47 = vadd.f32 %v3779_v52, %v2831_v4  ;;  %vm2854_vm6 = vweird.f32 %v3783_v35 }
 0x604   : > { %vm2855_vm8 = vmor %vm2853_vm7, %vm2854_vm6 }
 0x605   : > { %v2850_v45 = vsub.f32 1.0, %v2849_v43  ;;  %v2836_v33 = vsel %vm2835_vm0, %v3779_v52, %v2832_v47  ;;  %v2772_v52 = vstv %s2768_s26  ;;  %v3497_v43 = vld [vmem:[%s4227_s24 + $0x18] sm:$0xff]  ;;  %v2696_v47 = vmul.f32 %v3522_v17, %v2681_v22  ;;  %s3061_s26 = sshll.u32 %s3058_s23, 4  ;;  %s3062_s26 = int_to_ptr.hbm [resolvable:$true] %s3061_s26 }
 0x606   : > { %v2841_v54 = vsel %vm2838_vm1, %v2840_v32, %v2836_v33  ;;  %v2773_v34 = vmul.f32 %v2772_v52, %v2681_v22  ;;  %vm2020_vm11 = vcmp.ge.f32.partialorder %v3497_v43, %v5195_v12 }
 0x607   : > { %v2851_v26 = vmul.f32 %v3783_v35, %v2850_v45  ;;  %v2863_v23 = vmul.f32 %v2841_v54, %v2668_v5  ;;  %v2465_v42 = vpop.xlane.xlu1 %2464  ;;  %v2697_v32 = vsel %vm685_vm9, %v2696_v47, 0.0  ;;  %v2021_v33 = vsel %vm2020_vm11, 1, %v5820_v40 }
 0x608   : > { %v2466_v51 = vsel %vm1252_vm4, %v2465_v42, 0.0 }
 0x609   : > { %v2852_v56 = vadd.f32 %v3783_v35, %v2851_v26  ;;  %v2864_v29 = vadd.f32 %v2863_v23, %v847_v15  ;;  %v5249_v30 = vadd.f32 %v2466_v51, %v2460_v6  ;;  %v2703_v15 = vmul.f32 %v3523_v38, %v2681_v22 }
 0x60a   : > { %1797 = vadd.xlane.f32.xlu0 %v1796_v20 }
 0x60b   : > { %v2856_v13 = vsel %vm2855_vm8, %v3783_v35, %v2852_v56  ;;  %3784 = vtanh.f32 %v2864_v29  ;;  %v2468_v0 = vsel %vm1261_vm5, %v5249_v30, -inf  ;;  %v2689_v35 = vmul.f32 %v2688_v58, %v2681_v22 }
 0x60c   : > { %v2861_v31 = vsel %vm2858_vm10, %v2860_v48, %v2856_v13  ;;  %2469 = vmax.xlane.f32.xlu2 %v2468_v0  ;;  %v2704_v39 = vsel %vm685_vm9, %v2703_v15, 0.0  ;;  %v2771_v0 = vld [vmem:[%s2770_s28] sm:$0xff] }
 0x60d   : > { %v2866_v19 = vsub.f32 1.0, %v2861_v31  ;;  %v2868_v53 = vmul.f32 %v2861_v31, %v5133_v59  ;;  %v2690_v28 = vsel %vm685_vm9, %v2689_v35, 0.0 }
 0x611   : > { %v3785_v50 = vpop.eup %3784 }
 0x612   : > { %v2867_v44 = vmul.f32 %v3785_v50, %v2866_v19 }
 0x613   : > { %2775 = vrot.lane.b32.xlu1 %v2773_v34, %s4008_s11 }
 0x614   : > { %v5258_v4 = vadd.f32 %v2868_v53, %v2867_v44 }
 0x616   : > { %3530 = vst [vmem:[%s4521_s14 + $0x38] sm:$0xff] %v5258_v4  ;;  %v2872_v3 = vpack.c.bf16 %v5258_v4, %v5258_v4 }
 0x618   : > { %2881 = vmatmul.bf16.vlgmr.msra.gmra.mxu1 %v2872_v3 }
 0x62b   : > { %v5299_v53 = vpop.permute.xlu2 %2077 }
 0x63d   : > { %2691 = vadd.xlane.f32.xlu1 %v2690_v28 }
 0x642   : > { %v2024_v61 = vpop.permute.xlu0 %2023  ;;  %v5280_v54 = vpop.permute.xlu1 %2089 }
 0x643   : > { %v2026_v5 = vadd.f32 %v2024_v61, %v5195_v12 }
 0x645   : > { %vm2027_vm0 = vcmp.ge.f32.partialorder %v3497_v43, %v2026_v5  ;;  %2698 = vadd.xlane.f32.xlu1 %v2697_v32 }
 0x646   : > { %v2028_v45 = vsel %vm2027_vm0, 1, %v5820_v40 }
 0x647   : > { %v5273_v10 = vadd.s32 %v2028_v45, %v2021_v33 }
 0x649   : > { %2031 = vperm.xlu2 %3667, %v5273_v10  }
 0x64a   : > { %v5278_v12 = vpop.permute.xlu0 %2083 }
 0x64d   : > { %2705 = vadd.xlane.f32.xlu1 %v2704_v39 }
 0x66d   : > { %v5284_v9 = vpop.xlane.xlu1 %2015 }
 0x675   : > { %v2235_v18 = vpop.xlane.xlu0 %2234 }
 0x676   : > { %3786 = vrcp.f32 %v2235_v18  ;;  %v2250_v42 = vand.u32 2147483648, %v2235_v18  ;;  %v2248_v29 = vand.u32 2147483647, %v2235_v18  ;;  %vm2244_vm6 = vweird.f32 %v2235_v18 }
 0x677   : > { %3788 = vlog2.f32 %v2235_v18 }
 0x678   : > { %v2251_v48 = vor.u32 1.1754944e-38, %v2250_v42  ;;  %vm2249_vm8 = vcmp.eq.f32.partialorder %v2248_v29, 8.507059e+37 }
 0x67c   : > { %v3787_v26 = vpop.eup %3786 }
 0x67d   : > { %v2240_v23 = vmul.f32 %v3787_v26, %v2235_v18  ;;  %v3789_v6 = vpop.eup %3788  ;;  %vm2245_vm1 = vweird.f32 %v3787_v26  ;;  %v5327_v42 = vpop.xlane.xlu0 %1797 }
 0x67e   : > { %v2237_v20 = vmul.f32 0.6931472, %v3789_v6  ;;  %vm2246_vm7 = vmor %vm2244_vm6, %vm2245_vm1 }
 0x67f   : > { %v2241_v63 = vsub.f32 1.0, %v2240_v23  ;;  %v2470_v58 = vpop.xlane.xlu2 %2469 }
 0x680   : > { %v5291_v50 = vsub.f32 %v5221_v49, %v2237_v20  ;;  %v5315_v15 = vsub.f32 %v5249_v30, %v2470_v58 }
 0x681   : > { %v2242_v56 = vmul.f32 %v3787_v26, %v2241_v63 }
 0x682   : > { %v2472_v39 = vmul.f32 1.442695, %v5315_v15 }
 0x683   : > { %v2243_v51 = vadd.f32 %v3787_v26, %v2242_v56 }
 0x684   : > { %3790 = vpow2.f32 %v2472_v39 }
 0x685   : > { %v2247_v13 = vsel %vm2246_vm7, %v3787_v26, %v2243_v51  ;;  %v2776_v31 = vpop.permute.xlu1 %2775  ;;  %v3506_v51 = vld [vmem:[%s4227_s24 + $0x20] sm:$0xff] }
 0x686   : > { %v2252_v22 = vsel %vm2249_vm8, %v2251_v48, %v2247_v13  ;;  %v2778_v52 = vadd.f32 %v2776_v31, %v2771_v0 }
 0x687   : > { %v5288_v19 = vmul.f32 %v5228_v11, %v2252_v22 }
 0x688   : > { %2779 = vst.msk [vmem:[%s2770_s28] sm:$0xff] %vm685_vm9, %v2778_v52  ;;  %s3884_s28 = sshra.s32 %s3062_s26, 4  ;;  %s3885_s28 = int_to_ptr.hbm [resolvable:$true] %s3884_s28 }
 0x689   : > { %2264 = vrot.lane.b32.xlu0 %v5288_v19, %s4011_s1  ;;  %v2254_v44 = vmul.f32 %v5288_v19, %v5291_v50  ;;  %vm2261_vm11 = vcmp.ge.f32.partialorder %v3506_v51, %v5288_v19  ;;  %s3886_s10 = scalar_lea.hbm %s3885_s28, 64  ;;  %p3891_p10 = scmp.lt.s32.totalorder %s3885_s28, %s5742_s12 }
 0x68a   : > { %v5318_v18 = vpop.eup %3790  ;;  %v2262_v0 = vsel %vm2261_vm11, 1, %v5820_v40  ;;  %p3887_p7 = scmp.ne.s32.totalorder %s3885_s28, %s3886_s10 }
 0x68b   : > { %v2255_v34 = vsel %vm1261_vm5, %v2254_v44, 0.0  ;;  %v2474_v23 = vsel %vm1261_vm5, %v5318_v18, 0.0 }
 0x68c   : > { %2256 = vadd.xlane.f32.xlu2 %v2255_v34  ;;  %p3888_p8 = pnand %p3887_p7, %p4147_p11 }
 0x68e   : > { %p3889_p9 = pneg %p3888_p8 }
 0x68f   : > { %v3531_v63 = vld [vmem:[%s4576_s13 + $0x8] sm:$0xff]  ;;  %v3532_v56 = vld [vmem:[%s4576_s13 + $0x10] sm:$0xff]  ;;  %v2890_v22 = vld [vmem:[%s4576_s13] sm:$0xff] }
 0x695   : > { %v2882_v3 = vpop.f32.mrf.mxu1 }
 0x696   : > { %v5321_v26 = vadd.f32 %v2882_v3, %v5825_v8 }
 0x698   : > { %v2898_v6 = vmul.f32 %v3531_v63, %v5321_v26  ;;  %v2905_v29 = vmul.f32 %v3532_v56, %v5321_v26  ;;  %v2891_v52 = vmul.f32 %v2890_v22, %v5321_v26 }
 0x69a   : > { %v2899_v30 = vsel %vm685_vm9, %v2898_v6, 0.0  ;;  %v2906_v8 = vsel %vm685_vm9, %v2905_v29, 0.0  ;;  %v2892_v44 = vsel %vm685_vm9, %v2891_v52, 0.0 }
 0x69d   : > { %v2884_v11 = vpop.f32.mrf.mxu1 }
 0x69e   : > { %v5349_v11 = vld [vmem:[%s5739_s9] ss:$0 sm:$0xff] }
 0x6a3   : > { %v2032_v35 = vpop.permute.xlu2 %2031 }
 0x6a4   : > { %vm2033_vm10 = vcmp.eq.s32.totalorder %v4672_v46, %v2032_v35  ;;  %v2684_v35 = vmul.f32 %v5349_v11, %v5133_v59 }
 0x6a5   : > { %v3498_v49 = vsel %vm2033_vm10, 1.0, %v4013_v2 }
 0x6a6   : > { %v2036_v28 = vmul.f32 %v3498_v49, %v5216_v57 }
 0x6a8   : > { %v2037_v17 = vsel %vm1261_vm5, %v2036_v28, 0.0 }
 0x6a9   : > { %2038 = vadd.xlane.f32.xlu1 %v2037_v17 }
 0x6b0   : > { %v2692_v43 = vpop.xlane.xlu1 %2691 }
 0x6b1   : > { %v2693_v5 = vsel %vm1235_vm3, %v2692_v43, 0.0  ;;  %v5359_v43 = vld [vmem:[#allocation4] ss:$0 sm:$0xff] }
 0x6b8   : > { %v2699_v47 = vpop.xlane.xlu1 %2698 }
 0x6b9   : > { %v2700_v61 = vsel %vm1243_vm2, %v2699_v47, 0.0  ;;  %v5840_v47 = vld [vmem:[#allocation45_spill] sm:$0xff] }
 0x6ba   : > { %v2701_v32 = vadd.f32 %v2700_v61, %v2693_v5  ;;  %v1234_v61 = vadd.f32 %v5359_v43, %v5840_v47 }
 0x6c0   : > { %v2706_v45 = vpop.xlane.xlu1 %2705 }
 0x6c1   : > { %v2707_v33 = vsel %vm1252_vm4, %v2706_v45, 0.0 }
 0x6c2   : > { %v2708_v38 = vadd.f32 %v2707_v33, %v2701_v32  ;;  %2324 = vperm.xlu1 %3668, %v5288_v19   ;;  %v1816_v32 = vcvt.s32.f32 %v5160_v1 }
 0x6c4   : > { %v2709_v57 = vsel %vm1261_vm5, %v2708_v38, -inf }
 0x6c5   : > { %2710 = vmax.xlane.f32.xlu0 %v2709_v57 }
 0x6ca   : > { %3670 = vset.pattern.permute.xlu1 %v4012_v24 }
 0x6ec   : > { %2475 = vadd.xlane.f32.xlu1 %v2474_v23 }
 0x6f4   : > { %2900 = vadd.xlane.f32.xlu1 %v2899_v30 }
 0x6fb   : > { %v2265_v20 = vpop.permute.xlu0 %2264 }
 0x6fc   : > { %v2267_v48 = vadd.f32 %v2265_v20, %v5288_v19  ;;  %2907 = vadd.xlane.f32.xlu1 %v2906_v8 }
 0x6fe   : > { %vm2268_vm0 = vcmp.ge.f32.partialorder %v3506_v51, %v2267_v48 }
 0x6ff   : > { %v2269_v13 = vsel %vm2268_vm0, 1, %v5820_v40  ;;  %v5357_v17 = vpop.xlane.xlu2 %2256 }
 0x700   : > { %v2270_v31 = vadd.s32 %v2269_v13, %v2262_v0 }
 0x702   : > { %2272 = vperm.xlu2 %3667, %v2270_v31  }
 0x715   : > { %2330 = vperm.xlu1 %3670, %v5288_v19  }
 0x71c   : > { %v5369_v57 = vpop.xlane.xlu1 %2038 }
 0x71d   : > { %3671 = vset.pattern.permute.xlu1 %v5820_v40 }
 0x72b   : > { %2893 = vadd.xlane.f32.xlu2 %v2892_v44 }
 0x734   : > { %v5371_v39 = vpop.permute.xlu1 %2324 }
 0x738   : > { %v2711_v34 = vpop.xlane.xlu0 %2710 }
 0x739   : > { %v5343_v3 = vsub.f32 %v2708_v38, %v2711_v34  ;;  %v2298_v38 = vcvt.s32.f32 %v2270_v31 }
 0x73b   : > { %v2713_v58 = vmul.f32 1.442695, %v5343_v3 }
 0x73d   : > { %3792 = vpow2.f32 %v2713_v58 }
 0x73f   : > { %2685 = vadd.xlane.f32.xlu1 %v2684_v35 }
 0x743   : > { %v5353_v49 = vpop.eup %3792 }
 0x744   : > { %v2715_v28 = vsel %vm1261_vm5, %v5353_v49, 0.0 }
 0x745   : > { %2716 = vadd.xlane.f32.xlu2 %v2715_v28  ;;  %v3811_v28 = vld [vmem:[%s4521_s14 + $0x28] sm:$0xff] }
 0x746   : > { %v2443_v47 = vmul.f32 %v3811_v28, %v5349_v11 }
 0x758   : > { %1346 = vperm.xlu1 %3671, %v1234_v61  }
 0x75c   : > { %v2273_v5 = vpop.permute.xlu2 %2272 }
 0x75d   : > { %vm2274_vm1 = vcmp.eq.s32.totalorder %v4672_v46, %v2273_v5 }
 0x75e   : > { %v3507_v59 = vsel %vm2274_vm1, 1.0, %v4013_v2 }
 0x75f   : > { %v2277_v45 = vmul.f32 %v3507_v59, %v5291_v50  ;;  %v2476_v23 = vpop.xlane.xlu1 %2475 }
 0x760   : > { %1819 = vperm.xlu1 %3671, %v1816_v32   ;;  %3794 = vrcp.f32 %v2476_v23  ;;  %v2491_v0 = vand.u32 2147483648, %v2476_v23  ;;  %vm2485_vm7 = vweird.f32 %v2476_v23  ;;  %v2489_v31 = vand.u32 2147483647, %v2476_v23 }
 0x761   : > { %v2278_v33 = vsel %vm1261_vm5, %v2277_v45, 0.0  ;;  %3796 = vlog2.f32 %v2476_v23 }
 0x762   : > { %2279 = vadd.xlane.f32.xlu0 %v2278_v33  ;;  %v2492_v34 = vor.u32 1.1754944e-38, %v2491_v0  ;;  %vm2490_vm10 = vcmp.eq.f32.partialorder %v2489_v31, 8.507059e+37 }
 0x766   : > { %v3795_v63 = vpop.eup %3794 }
 0x767   : > { %v2901_v6 = vpop.xlane.xlu1 %2900  ;;  %v2481_v30 = vmul.f32 %v3795_v63, %v2476_v23  ;;  %vm2486_vm6 = vweird.f32 %v3795_v63  ;;  %v3797_v44 = vpop.eup %3796 }
 0x768   : > { %1836 = vperm.xlu1 %3671, %v5083_v27   ;;  %v2902_v51 = vsel %vm1243_vm2, %v2901_v6, 0.0  ;;  %vm2487_vm8 = vmor %vm2485_vm7, %vm2486_vm6  ;;  %v2478_v35 = vmul.f32 0.6931472, %v3797_v44  ;;  %v1363_v44 = vsel %vm1358_vm14, %v4947_v36, 0.0 }
 0x769   : > { %v2482_v1 = vsub.f32 1.0, %v2481_v30 }
 0x76a   : > { %v5389_v5 = vsub.f32 %v5315_v15, %v2478_v35  ;;  %v1339_v15 = vsel %vm1243_vm2, %v5092_v41, 0.0  ;;  %v1824_v35 = vsel %vm1243_vm2, %v5327_v42, 0.0  ;;  %v1845_v42 = vsel %vm1358_vm14, %v5213_v14, 0.0 }
 0x76b   : > { %v2483_v56 = vmul.f32 %v3795_v63, %v2482_v1 }
 0x76d   : > { %v2484_v48 = vadd.f32 %v3795_v63, %v2483_v56  ;;  %v1293_v56 = vsub.f32 0.0, %v5017_v62 }
 0x76f   : > { %v2908_v50 = vpop.xlane.xlu1 %2907  ;;  %v2488_v52 = vsel %vm2487_vm8, %v3795_v63, %v2484_v48  ;;  %v1341_v41 = vsel %vm1252_vm4, %v1293_v56, 0.0 }
 0x770   : > { %2301 = vperm.xlu1 %3671, %v2298_v38   ;;  %v2909_v8 = vsel %vm1252_vm4, %v2908_v50, 0.0  ;;  %v2493_v58 = vsel %vm2490_vm10, %v2492_v34, %v2488_v52  ;;  %v1337_v50 = vsel %vm1235_vm3, %v5030_v55, 0.0  ;;  %v1776_v34 = vsub.f32 0.0, %v5223_v7 }
 0x771   : > { %v5386_v61 = vmul.f32 %v5318_v18, %v2493_v58 }
 0x773   : > { %v2495_v59 = vmul.f32 %v5386_v61, %v5389_v5 }
 0x775   : > { %v2496_v32 = vsel %vm1261_vm5, %v2495_v59, 0.0 }
 0x787   : > { %v5397_v33 = vpop.permute.xlu1 %2330 }
 0x79e   : > { %v2894_v29 = vpop.xlane.xlu2 %2893 }
 0x79f   : > { %v2895_v27 = vsel %vm1235_vm3, %v2894_v29, 0.0  ;;  %v1340_v29 = vadd.f32 %v1339_v15, %v1337_v50 }
 0x7a0   : > { %v2903_v20 = vadd.f32 %v2902_v51, %v2895_v27 }
 0x7a1   : > { %v1342_v62 = vadd.f32 %v1341_v41, %v1340_v29 }
 0x7a2   : > { %v5379_v13 = vadd.f32 %v2909_v8, %v2903_v20 }
 0x7a4   : > { %v2911_v22 = vsel %vm1261_vm5, %v5379_v13, -inf }
 0x7a5   : > { %2912 = vmax.xlane.f32.xlu2 %v2911_v22  ;;  %v1356_v22 = vsel %vm1351_vm13, %v4945_v37, 0.0 }
 0x7ad   : > { %2444 = vadd.xlane.f32.xlu2 %v2443_v47  ;;  %v1826_v47 = vsel %vm1252_vm4, %v1776_v34, 0.0 }
 0x7b2   : > { %v5400_v23 = vpop.xlane.xlu1 %2685 }
 0x7b5   : > { %2497 = vadd.xlane.f32.xlu2 %v2496_v32  ;;  %v5841_v32 = vld [vmem:[#allocation35_spill] sm:$0xff] }
 0x7b6   : > { %v1833_v36 = vsel %vm1343_vm12, %v5841_v32, 0.0 }
 0x7b8   : > { %v5394_v45 = vpop.xlane.xlu2 %2716 }
 0x7b9   : > { %3798 = vrcp.f32 %v5394_v45  ;;  %v2732_v6 = vand.u32 2147483648, %v5394_v45  ;;  %v2730_v1 = vand.u32 2147483647, %v5394_v45  ;;  %vm2726_vm0 = vweird.f32 %v5394_v45 }
 0x7bb   : > { %v2733_v27 = vor.u32 1.1754944e-38, %v2732_v6  ;;  %vm2731_vm6 = vcmp.eq.f32.partialorder %v2730_v1, 8.507059e+37  ;;  %v1851_v6 = vsel %vm1365_vm15, %v5163_v25, 0.0  ;;  %v2886_v1 = vmul.f32 %v5349_v11, %v5258_v4 }
 0x7bc   : > { %v2057_v4 = vcvt.s32.f32 %v5273_v10 }
 0x7bf   : > { %v3799_v38 = vpop.eup %3798 }
 0x7c0   : > { %v2722_v18 = vmul.f32 %v3799_v38, %v5394_v45  ;;  %vm2727_vm11 = vweird.f32 %v3799_v38 }
 0x7c1   : > { %vm2728_vm1 = vmor %vm2726_vm0, %vm2727_vm11 }
 0x7c2   : > { %v2723_v63 = vsub.f32 1.0, %v2722_v18 }
 0x7c4   : > { %v2724_v30 = vmul.f32 %v3799_v38, %v2723_v63 }
 0x7c6   : > { %v2725_v51 = vadd.f32 %v3799_v38, %v2724_v30 }
 0x7c8   : > { %v2729_v20 = vsel %vm2728_vm1, %v3799_v38, %v2725_v51 }
 0x7c9   : > { %v2734_v8 = vsel %vm2731_vm6, %v2733_v27, %v2729_v20 }
 0x7ca   : > { %v5415_v48 = vmul.f32 %v5353_v49, %v2734_v8  ;;  %v1347_v0 = vpop.permute.xlu1 %1346 }
 0x7cb   : > { %v1349_v55 = vsel %vm1343_vm12, %v1347_v0, 0.0 }
 0x7cc   : > { %v1350_v31 = vadd.f32 %v1349_v55, %v1342_v62 }
 0x7cd   : > { %2746 = vrot.lane.b32.xlu2 %v5415_v48, %s4011_s1 }
 0x7ce   : > { %v1357_v52 = vadd.f32 %v1356_v22, %v1350_v31 }
 0x7d0   : > { %v5427_v49 = vadd.f32 %v1363_v44, %v1357_v52 }
 0x7d2   : > { %v1820_v58 = vpop.permute.xlu1 %1819 }
 0x7d3   : > { %v1822_v37 = vsel %vm1235_vm3, %v1820_v58, 0.0 }
 0x7d4   : > { %v1825_v28 = vadd.f32 %v1824_v35, %v1822_v37  ;;  %v2258_v35 = vsub.f32 0.0, %v5357_v17 }
 0x7d5   : > { %v2280_v8 = vpop.xlane.xlu0 %2279 }
 0x7d6   : > { %v1827_v59 = vadd.f32 %v1826_v47, %v1825_v28  ;;  %v2308_v32 = vsel %vm1252_vm4, %v2258_v35, 0.0 }
 0x7d8   : > { %v1834_v7 = vadd.f32 %v1833_v36, %v1827_v59  ;;  %v2080_v59 = vsel %vm1351_vm13, %v5299_v53, 0.0  ;;  %v2092_v53 = vsel %vm1365_vm15, %v5280_v54, 0.0 }
 0x7da   : > { %v1837_v38 = vpop.permute.xlu1 %1836 }
 0x7db   : > { %v1839_v18 = vsel %vm1351_vm13, %v1837_v38, 0.0 }
 0x7dc   : > { %v1840_v63 = vadd.f32 %v1839_v18, %v1834_v7  ;;  %v2086_v18 = vsel %vm1358_vm14, %v5278_v12, 0.0 }
 0x7de   : > { %v1846_v15 = vadd.f32 %v1845_v42, %v1840_v63 }
 0x7e0   : > { %v1852_v30 = vadd.f32 %v1851_v6, %v1846_v15 }
 0x7e2   : > { %3491 = vst [vmem:[%s5191_s21 + $0x10] sm:$0xff] %v1852_v30  ;;  %v2302_v55 = vpop.permute.xlu1 %2301 }
 0x7e3   : > { %v2304_v52 = vsel %vm1235_vm3, %v2302_v55, 0.0 }
 0x7f6   : > { %2887 = vadd.xlane.f32.xlu2 %v2886_v1  ;;  %v2327_v1 = vsel %vm1358_vm14, %v5371_v39, 0.0 }
 0x80e   : > { %2318 = vperm.xlu2 %3667, %v5288_v19   ;;  %v2205_v19 = vadd.f32 %v5359_v43, %v5079_v16 }
 0x818   : > { %v2913_v56 = vpop.xlane.xlu2 %2912 }
 0x819   : > { %v5453_v50 = vsub.f32 %v5379_v13, %v2913_v56  ;;  %v3515_v56 = vld [vmem:[%s4227_s24 + $0x28] sm:$0xff] }
 0x81a   : > { %vm2502_vm7 = vcmp.ge.f32.partialorder %v3515_v56, %v5386_v61 }
 0x81b   : > { %v2915_v29 = vmul.f32 1.442695, %v5453_v50 }
 0x81d   : > { %3800 = vpow2.f32 %v2915_v29  ;;  %v2333_v29 = vsel %vm1365_vm15, %v5397_v33, 0.0 }
 0x81e   : > { %3802 = vlog2.f32 %v5394_v45  ;;  %v2017_v45 = vsub.f32 0.0, %v5284_v9  ;;  %v2306_v9 = vsel %vm1243_vm2, %v2280_v8, 0.0 }
 0x81f   : > { %v2307_v37 = vadd.f32 %v2306_v9, %v2304_v52 }
 0x820   : > { %v2445_v14 = vpop.xlane.xlu2 %2444  ;;  %v2067_v58 = vsel %vm1252_vm4, %v2017_v45, 0.0 }
 0x821   : > { %v2446_v51 = vadd.f32 %v5359_v43, %v2445_v14  ;;  %v2309_v38 = vadd.f32 %v2308_v32, %v2307_v37 }
 0x823   : > { %v5457_v27 = vpop.eup %3800  ;;  %2553 = vperm.xlu2 %3667, %v2446_v51  }
 0x824   : > { %v2917_v25 = vsel %vm1261_vm5, %v5457_v27, 0.0  ;;  %v3803_v11 = vpop.eup %3802 }
 0x825   : > { %2918 = vadd.xlane.f32.xlu0 %v2917_v25  ;;  %v2719_v13 = vmul.f32 0.6931472, %v3803_v11 }
 0x827   : > { %v5469_v20 = vsub.f32 %v5343_v3, %v2719_v13  ;;  %v2065_v3 = vsel %vm1243_vm2, %v5369_v57, 0.0  ;;  %v2074_v57 = vsel %vm1343_vm12, %v5042_v60, 0.0 }
 0x828   : > { %v5474_v16 = vpop.xlane.xlu2 %2497 }
 0x829   : > { %v2736_v10 = vmul.f32 %v5415_v48, %v5469_v20 }
 0x82b   : > { %v2737_v41 = vsel %vm1261_vm5, %v2736_v10, 0.0 }
 0x830   : > { %v2747_v62 = vpop.permute.xlu2 %2746 }
 0x831   : > { %v2749_v33 = vadd.f32 %v2747_v62, %v5415_v48 }
 0x839   : > { %2060 = vperm.xlu0 %3669, %v2057_v4   ;;  %v2503_v4 = vsel %vm2502_vm7, 1, %v5820_v40 }
 0x841   : > { %2312 = vperm.xlu0 %3669, %v2205_v19  }
 0x849   : > { %2505 = vrot.lane.b32.xlu0 %v5386_v61, %s4011_s1 }
 0x851   : > { %2559 = vperm.xlu0 %3669, %v5386_v61  }
 0x869   : > { %v5478_v31 = vpop.xlane.xlu2 %2887 }
 0x871   : > { %v2319_v36 = vpop.permute.xlu2 %2318 }
 0x872   : > { %v2321_v15 = vsel %vm1351_vm13, %v2319_v36, 0.0 }
 0x87b   : > { %2738 = vadd.xlane.f32.xlu0 %v2737_v41  ;;  %v3524_v41 = vld [vmem:[%s4227_s24 + $0x30] sm:$0xff] }
 0x87c   : > { %vm2750_vm10 = vcmp.ge.f32.partialorder %v3524_v41, %v2749_v33  ;;  %vm2743_vm11 = vcmp.ge.f32.partialorder %v3524_v41, %v5415_v48 }
 0x87d   : > { %v2751_v55 = vsel %vm2750_vm10, 1, %v5820_v40 }
 0x898   : > { %v5476_v0 = vpop.xlane.xlu0 %2918 }
 0x899   : > { %3804 = vrcp.f32 %v5476_v0  ;;  %vm2928_vm1 = vweird.f32 %v5476_v0  ;;  %v2932_v62 = vand.u32 2147483647, %v5476_v0 }
 0x89a   : > { %3806 = vlog2.f32 %v5476_v0 }
 0x89b   : > { %vm2933_vm7 = vcmp.eq.f32.partialorder %v2932_v62, 8.507059e+37 }
 0x89f   : > { %v3805_v25 = vpop.eup %3804 }
 0x8a0   : > { %v2924_v11 = vmul.f32 %v3805_v25, %v5476_v0  ;;  %vm2929_vm0 = vweird.f32 %v3805_v25 }
 0x8a1   : > { %vm2930_vm6 = vmor %vm2928_vm1, %vm2929_vm0 }
 0x8a2   : > { %v2925_v13 = vsub.f32 1.0, %v2924_v11 }
 0x8a4   : > { %v2926_v8 = vmul.f32 %v3805_v25, %v2925_v13 }
 0x8a6   : > { %v2927_v45 = vadd.f32 %v3805_v25, %v2926_v8 }
 0x8ab   : > { %v2061_v22 = vpop.permute.xlu0 %2060 }
 0x8ac   : > { %v2063_v44 = vsel %vm1235_vm3, %v2061_v22, 0.0  ;;  %v2934_v22 = vand.u32 2147483648, %v5476_v0 }
 0x8ad   : > { %v2066_v34 = vadd.f32 %v2065_v3, %v2063_v44  ;;  %v2744_v3 = vsel %vm2743_vm11, 1, %v5820_v40  ;;  %v2931_v44 = vsel %vm2930_vm6, %v3805_v25, %v2927_v45 }
 0x8ae   : > { %v2752_v52 = vadd.s32 %v2751_v55, %v2744_v3 }
 0x8af   : > { %v2068_v28 = vadd.f32 %v2067_v58, %v2066_v34  ;;  %v2935_v34 = vor.u32 1.1754944e-38, %v2934_v22 }
 0x8b0   : > { %v2780_v0 = vcvt.s32.f32 %v2752_v52 }
 0x8b1   : > { %v2075_v47 = vadd.f32 %v2074_v57, %v2068_v28  ;;  %v2936_v58 = vsel %vm2933_vm7, %v2935_v34, %v2931_v44 }
 0x8b2   : > { %v5535_v35 = vmul.f32 %v5457_v27, %v2936_v58 }
 0x8b3   : > { %v2081_v17 = vadd.f32 %v2080_v59, %v2075_v47  ;;  %v2313_v7 = vpop.permute.xlu0 %2312 }
 0x8b4   : > { %v2315_v60 = vsel %vm1343_vm12, %v2313_v7, 0.0 }
 0x8b5   : > { %v2087_v63 = vadd.f32 %v2086_v18, %v2081_v17  ;;  %v2316_v42 = vadd.f32 %v2315_v60, %v2309_v38  ;;  %v3533_v17 = vld [vmem:[%s4227_s24 + $0x38] sm:$0xff]  ;;  %s5575_s24 = sadd.s32 7, %s4592_s19 }
 0x8b6   : > { %vm2945_vm11 = vcmp.ge.f32.partialorder %v3533_v17, %v5535_v35  ;;  %p2968_p3 = scmp.lt.s32.totalorder %s5575_s24, 3 }
 0x8b7   : > { %v2093_v6 = vadd.f32 %v2092_v53, %v2087_v63  ;;  %v2322_v30 = vadd.f32 %v2321_v15, %v2316_v42  ;;  %v2946_v18 = vsel %vm2945_vm11, 1, %v5820_v40  ;;  %v2889_v63 = vadd.f32 %v5359_v43, %v5478_v31  ;;  %v3807_v42 = vpop.eup %3806 }
 0x8b8   : > { %v2921_v53 = vmul.f32 0.6931472, %v3807_v42  ;;  %v2687_v31 = vadd.f32 %v5359_v43, %v5400_v23  ;;  %s2969_s19 = scalar_select %p2968_p3, 1, 0 }
 0x8b9   : > { %3500 = vst [vmem:[%s5191_s21 + $0x18] sm:$0xff] %v2093_v6  ;;  %v2328_v12 = vadd.f32 %v2327_v1, %v2322_v30 }
 0x8ba   : > { %v2922_v15 = vsub.f32 %v5453_v50, %v2921_v53  ;;  %v2554_v50 = vpop.permute.xlu2 %2553 }
 0x8bb   : > { %v2334_v54 = vadd.f32 %v2333_v29, %v2328_v12  ;;  %v2506_v14 = vpop.permute.xlu0 %2505  ;;  %v2499_v29 = vsub.f32 0.0, %v5474_v16  ;;  %v2556_v25 = vsel %vm1343_vm12, %v2554_v50, 0.0 }
 0x8bc   : > { %v2508_v51 = vadd.f32 %v2506_v14, %v5386_v61  ;;  %v2938_v6 = vmul.f32 %v5535_v35, %v2922_v15 }
 0x8bd   : > { %3509 = vst [vmem:[%s5191_s21 + $0x20] sm:$0xff] %v2334_v54 }
 0x8be   : > { %vm2509_vm8 = vcmp.ge.f32.partialorder %v3515_v56, %v2508_v51  ;;  %v2939_v30 = vsel %vm1261_vm5, %v2938_v6, 0.0 }
 0x8bf   : > { %v2510_v39 = vsel %vm2509_vm8, 1, %v5820_v40 }
 0x8c0   : > { %v2511_v19 = vadd.s32 %v2510_v39, %v2503_v4 }
 0x8c2   : > { %2513 = vperm.xlu1 %3671, %v2511_v19   ;;  %v2539_v10 = vcvt.s32.f32 %v2511_v19 }
 0x8c3   : > { %v2560_v12 = vpop.permute.xlu0 %2559 }
 0x8ca   : > { %2542 = vperm.xlu1 %3671, %v2539_v10  }
 0x8d2   : > { %2754 = vperm.xlu1 %3671, %v2752_v52  }
 0x8da   : > { %2948 = vrot.lane.b32.xlu1 %v5535_v35, %s4011_s1  ;;  %s2970_s1 = scvt.s32.f32 %s2969_s19  ;;  %s3890_s19 = scalar_lea.hbm %s5742_s12, 128 }
 0x8db   : > { %p3892_p1 = scmp.lt.s32.totalorder %s3890_s19, %s3886_s10 }
 0x8dc   : > { %v2974_v11 = vstv %s2970_s1 }
 0x8dd   : > { %v2975_v33 = vmul.f32 %v2974_v11, %v5321_v26  ;;  %p3893_p0 = por %p3892_p1, %p3891_p10 }
 0x8df   : > { %p3894_p4 = pnand %p3893_p0, %p3889_p9 }
 0x8ee   : > { %v5570_v56 = vpop.xlane.xlu0 %2738 }
 0x934   : > { %v2514_v9 = vpop.permute.xlu1 %2513 }
 0x935   : > { %vm2515_vm8 = vcmp.eq.s32.totalorder %v4672_v46, %v2514_v9 }
 0x936   : > { %v3516_v37 = vsel %vm2515_vm8, 1.0, %v4013_v2 }
 0x937   : > { %v2518_v28 = vmul.f32 %v3516_v37, %v5389_v5 }
 0x939   : > { %v2519_v57 = vsel %vm1261_vm5, %v2518_v28, 0.0 }
 0x93a   : > { %2520 = vadd.xlane.f32.xlu0 %v2519_v57 }
 0x93c   : > { %v2543_v47 = vpop.permute.xlu1 %2542 }
 0x93d   : > { %v2545_v43 = vsel %vm1235_vm3, %v2543_v47, 0.0 }
 0x944   : > { %v2755_v59 = vpop.permute.xlu1 %2754 }
 0x945   : > { %vm2756_vm10 = vcmp.eq.s32.totalorder %v4672_v46, %v2755_v59 }
 0x946   : > { %v3525_v27 = vsel %vm2756_vm10, 1.0, %v4013_v2 }
 0x947   : > { %v2759_v32 = vmul.f32 %v3525_v27, %v5469_v20  ;;  %v5842_v20 = vld [vmem:[#allocation25_spill] sm:$0xff] }
 0x949   : > { %v2760_v36 = vsel %vm1261_vm5, %v2759_v32, 0.0 }
 0x94a   : > { %2761 = vadd.xlane.f32.xlu1 %v2760_v36 }
 0x94c   : > { %v2949_v38 = vpop.permute.xlu1 %2948 }
 0x94d   : > { %v2951_v5 = vadd.f32 %v2949_v38, %v5535_v35 }
 0x94e   : > { %2800 = vperm.xlu0 %3669, %v5415_v48  }
 0x94f   : > { %vm2952_vm0 = vcmp.ge.f32.partialorder %v3533_v17, %v2951_v5 }
 0x950   : > { %v2953_v7 = vsel %vm2952_vm0, 1, %v5820_v40 }
 0x951   : > { %v2954_v60 = vadd.s32 %v2953_v7, %v2946_v18 }
 0x953   : > { %2956 = vperm.xlu2 %3667, %v2954_v60   ;;  %v2982_v1 = vcvt.s32.f32 %v2954_v60 }
 0x956   : > { %3672 = vset.pattern.permute.xlu0 %v4012_v24 }
 0x957   : > { %1367 = vperm.xlu0 %3672, %v5842_v20  }
 0x95f   : > { %2812 = vperm.xlu0 %3672, %v5415_v48  }
 0x963   : > { %2996 = vperm.xlu1 %3671, %v2889_v63  }
 0x96b   : > { %3673 = vset.pattern.permute.xlu1 %v5832_v21 }
 0x96c   : > { %2565 = vperm.xlu1 %3673, %v5386_v61  }
 0x974   : > { %3008 = vperm.xlu1 %3673, %v5535_v35  }
 0x97c   : > { %3676 = vset.pattern.permute.xlu1 %v5820_v40  ;;  %2940 = vadd.xlane.f32.xlu2 %v2939_v30 }
 0x97d   : > { %2985 = vperm.xlu1 %3676, %v2982_v1  }
 0x985   : > { %3677 = vset.pattern.permute.xlu1 %v4012_v24 }
 0x994   : > { %2783 = vperm.xlu2 %3667, %v2780_v0  }
 0x99c   : > { %2794 = vperm.xlu2 %3667, %v2687_v31  }
 0x9a4   : > { %3002 = vperm.xlu2 %3667, %v5535_v35  }
 0x9ac   : > { %3674 = vset.pattern.permute.xlu2 %v5832_v21  ;;  %v2549_v21 = vsel %vm1252_vm4, %v2499_v29, 0.0 }
 0x9ad   : > { %2806 = vperm.xlu2 %3674, %v5415_v48   ;;  %v2957_v40 = vpop.permute.xlu2 %2956  ;;  %v2521_v54 = vpop.xlane.xlu0 %2520 }
 0x9ae   : > { %vm2958_vm1 = vcmp.eq.s32.totalorder %v4672_v46, %v2957_v40  ;;  %v2547_v23 = vsel %vm1243_vm2, %v2521_v54, 0.0 }
 0x9af   : > { %v3534_v16 = vsel %vm2958_vm1, 1.0, %v4013_v2  ;;  %v2548_v14 = vadd.f32 %v2547_v23, %v2545_v43  ;;  %v2562_v2 = vsel %vm1351_vm13, %v2560_v12, 0.0 }
 0x9b0   : > { %v2961_v51 = vmul.f32 %v3534_v16, %v2922_v15 }
 0x9b1   : > { %v2550_v48 = vadd.f32 %v2549_v21, %v2548_v14 }
 0x9b2   : > { %v2962_v39 = vsel %vm1261_vm5, %v2961_v51, 0.0 }
 0x9b3   : > { %2963 = vadd.xlane.f32.xlu1 %v2962_v39  ;;  %v2557_v4 = vadd.f32 %v2556_v25, %v2550_v48 }
 0x9b5   : > { %3675 = vset.pattern.permute.xlu2 %v4012_v24  ;;  %v5593_v19 = vadd.f32 %v2562_v2, %v2557_v4 }
 0x9b6   : > { %2571 = vperm.xlu2 %3675, %v5386_v61  }
 0x9be   : > { %2977 = vrot.lane.b32.xlu2 %v2975_v33, %s4008_s11 }
 0x9c0   : > { %v2801_v13 = vpop.permute.xlu0 %2800 }
 0x9c1   : > { %3897 = shalt.err (!%p3894_p4)
}
 0x9c2   : > { %s4014_s0 = smov 128   ;;  %s4015_s14 = smov 256   ;;  %v2762_v8 = vpop.xlane.xlu1 %2761  ;;  %v2740_v3 = vsub.f32 0.0, %v5570_v56  ;;  %v2803_v37 = vsel %vm1351_vm13, %v2801_v13, 0.0 }
 0x9c3   : > { %s4016_s18 = smov 8   ;;  %v2788_v62 = vsel %vm1243_vm2, %v2762_v8, 0.0  ;;  %p2966_p5 = scmp.lt.s32.totalorder %s5575_s24, 2 }
 0x9c4   : > { %3591 = dma.vmem_to_hbm [thread:$0]  (%p4147_p11), %s3060_s29, 1024, %s3062_s26, %s5607_s16, %s4014_s0, %s4015_s14, %s4016_s18   ;;  %v2790_v44 = vsel %vm1252_vm4, %v2740_v3, 0.0 }
 0x9c5   : > { %s5866_s24 = smov (!%p2966_p5, %s5575_s24), 2  ;;  %s5843_s26 = sld [smem:[#allocation51_spill]] }
 0x9c6   : > { %s3535_s23 = sshll.u32 %s5866_s24, 3  ;;  %s3075_s17 = sshll.u32 %s4576_s13, 4  ;;  %s3076_s17 = int_to_ptr.vmem [resolvable:$true] %s3075_s17 }
 0x9c7   : > { %s2972_s10 = scalar_lea.vmem %s4576_s13, %s3535_s23 [#allocation15] }
 0x9c8   : > { %v2973_v20 = vld [vmem:[%s2972_s10] sm:$0xff] }
 0x9c9   : > { %v1368_v24 = vpop.permute.xlu0 %1367 }
 0x9ca   : > { %v1370_v26 = vsel %vm1365_vm15, %v1368_v24, 0.0 }
 0x9cb   : > { %v1371_v61 = vadd.f32 %v1370_v26, %v5427_v49  ;;  %s3074_s28 = scalar_lea.hbm %s5843_s26, %s5599_s7  ;;  %s3918_s23 = scalar_lea.hbm %s5843_s26, 48 }
 0x9cc   : > { %3014 = vperm.xlu1 %3677, %v5535_v35   ;;  %s3077_s11 = sshll.u32 %s3074_s28, 4  ;;  %s3078_s11 = int_to_ptr.hbm [resolvable:$true] %s3077_s11 }
 0x9cd   : > { %1372 = vst [vmem:[%s5191_s21] sm:$0xff] %v1371_v61  ;;  %s3912_s19 = sshra.s32 %s3078_s11, 4  ;;  %s3913_s19 = int_to_ptr.hbm [resolvable:$true] %s3912_s19 }
 0x9ce   : > { %s3914_s24 = scalar_lea.hbm %s3913_s19, 24  ;;  %p3919_p7 = scmp.lt.s32.totalorder %s3913_s19, %s5843_s26 }
 0x9cf   : > { %p3915_p6 = scmp.ne.s32.totalorder %s3913_s19, %s3914_s24  ;;  %p3920_p8 = scmp.lt.s32.totalorder %s3918_s23, %s3914_s24 }
 0x9d1   : > { %v2813_v28 = vpop.permute.xlu0 %2812  ;;  %p3916_p13 = pnand %p3915_p6, %p4147_p11  ;;  %p3921_p9 = por %p3920_p8, %p3919_p7 }
 0x9d2   : > { %v2815_v32 = vsel %vm1365_vm15, %v2813_v28, 0.0 }
 0x9d3   : > { %p3917_p3 = pneg %p3916_p13 }
 0x9d5   : > { %v2997_v45 = vpop.permute.xlu1 %2996  ;;  %p3922_p10 = pnand %p3921_p9, %p3917_p3 }
 0x9de   : > { %v2566_v9 = vpop.permute.xlu1 %2565 }
 0x9df   : > { %v2568_v17 = vsel %vm1358_vm14, %v2566_v9, 0.0 }
 0x9e0   : > { %v2569_v5 = vadd.f32 %v2568_v17, %v5593_v19 }
 0x9e6   : > { %v3009_v38 = vpop.permute.xlu1 %3008 }
 0x9ef   : > { %v5628_v10 = vpop.xlane.xlu2 %2940  ;;  %v2986_v42 = vpop.permute.xlu1 %2985 }
 0x9f7   : > { %v2784_v41 = vpop.permute.xlu2 %2783 }
 0x9f8   : > { %v2786_v22 = vsel %vm1235_vm3, %v2784_v41, 0.0 }
 0x9f9   : > { %v2789_v52 = vadd.f32 %v2788_v62, %v2786_v22 }
 0x9fb   : > { %v2791_v58 = vadd.f32 %v2790_v44, %v2789_v52 }
 0x9ff   : > { %v2795_v55 = vpop.permute.xlu2 %2794 }
 0xa00   : > { %v2797_v34 = vsel %vm1343_vm12, %v2795_v55, 0.0 }
 0xa01   : > { %v2798_v35 = vadd.f32 %v2797_v34, %v2791_v58 }
 0xa03   : > { %v2804_v47 = vadd.f32 %v2803_v37, %v2798_v35 }
 0xa07   : > { %v3003_v49 = vpop.permute.xlu2 %3002 }
 0xa0f   : > { %v2807_v57 = vpop.permute.xlu2 %2806 }
 0xa10   : > { %v2809_v59 = vsel %vm1358_vm14, %v2807_v57, 0.0 }
 0xa11   : > { %v2810_v27 = vadd.f32 %v2809_v59, %v2804_v47 }
 0xa13   : > { %v2816_v36 = vadd.f32 %v2815_v32, %v2810_v27 }
 0xa15   : > { %3527 = vst [vmem:[%s5191_s21 + $0x30] sm:$0xff] %v2816_v36 }
 0xa17   : > { %v2572_v7 = vpop.permute.xlu2 %2571 }
 0xa18   : > { %v2574_v18 = vsel %vm1365_vm15, %v2572_v7, 0.0 }
 0xa19   : > { %v2575_v60 = vadd.f32 %v2574_v18, %v2569_v5 }
 0xa1b   : > { %3518 = vst [vmem:[%s5191_s21 + $0x28] sm:$0xff] %v2575_v60 }
 0xa1f   : > { %v2978_v63 = vpop.permute.xlu2 %2977 }
 0xa20   : > { %v2980_v53 = vadd.f32 %v2978_v63, %v2973_v20 }
 0xa22   : > { %2981 = vst.msk [vmem:[%s2972_s10] sm:$0xff] %vm685_vm9, %v2980_v53 }
 0xa23   : > { %3925 = shalt.err (!%p3922_p10)
}
 0xa24   : > { %3592 = dma.vmem_to_hbm [thread:$0]  (%p4147_p11), %s3076_s17, 384, %s3078_s11, %s5607_s16, %s4014_s0, %s4015_s14, %s4016_s18   ;;  %v2942_v30 = vsub.f32 0.0, %v5628_v10  ;;  %v2988_v1 = vsel %vm1235_vm3, %v2986_v42, 0.0  ;;  %v2999_v50 = vsel %vm1343_vm12, %v2997_v45, 0.0  ;;  %v3005_v29 = vsel %vm1351_vm13, %v3003_v49, 0.0 }
 0xa25   : > { %s5844_s28 = sld [smem:[#allocation50_spill]]  ;;  %v3011_v54 = vsel %vm1358_vm14, %v3009_v38, 0.0  ;;  %s3043_s11 = sshll.u32 %s5191_s21, 4  ;;  %s3044_s11 = int_to_ptr.vmem [resolvable:$true] %s3043_s11 }
 0xa26   : > { %v2964_v15 = vpop.xlane.xlu1 %2963  ;;  %v2992_v31 = vsel %vm1252_vm4, %v2942_v30, 0.0  ;;  %s3022_s19 = scalar_lea.sflag [#allocation8], %s4208_s20 }
 0xa27   : > { %v2990_v6 = vsel %vm1243_vm2, %v2964_v15, 0.0 }
 0xa28   : > { %v2991_v0 = vadd.f32 %v2990_v6, %v2988_v1 }
 0xa2a   : > { %v2993_v12 = vadd.f32 %v2992_v31, %v2991_v0 }
 0xa2b   : > { %s3042_s10 = scalar_lea.hbm %s5844_s28, %s5599_s7  ;;  %s3946_s23 = scalar_lea.hbm %s5844_s28, 128 }
 0xa2c   : > { %v3000_v56 = vadd.f32 %v2999_v50, %v2993_v12  ;;  %s3045_s17 = sshll.u32 %s3042_s10, 4  ;;  %s3046_s17 = int_to_ptr.hbm [resolvable:$true] %s3045_s17 }
 0xa2d   : > { %s3940_s24 = sshra.s32 %s3046_s17, 4  ;;  %s3941_s24 = int_to_ptr.hbm [resolvable:$true] %s3940_s24 }
 0xa2e   : > { %v3006_v40 = vadd.f32 %v3005_v29, %v3000_v56  ;;  %s3942_s1 = scalar_lea.hbm %s3941_s24, 64  ;;  %p3947_p5 = scmp.lt.s32.totalorder %s3941_s24, %s5844_s28 }
 0xa2f   : > { %p3943_p1 = scmp.ne.s32.totalorder %s3941_s24, %s3942_s1  ;;  %p3948_p6 = scmp.lt.s32.totalorder %s3946_s23, %s3942_s1 }
 0xa30   : > { %v3012_v43 = vadd.f32 %v3011_v54, %v3006_v40 }
 0xa31   : > { %p3944_p0 = pnand %p3943_p1, %p4147_p11  ;;  %p3949_p13 = por %p3948_p6, %p3947_p5 }
 0xa33   : > { %p3945_p4 = pneg %p3944_p0 }
 0xa35   : > { %p3950_p3 = pnand %p3949_p13, %p3945_p4 }
 0xa3e   : > { %v3015_v23 = vpop.permute.xlu1 %3014 }
 0xa3f   : > { %v3017_v16 = vsel %vm1365_vm15, %v3015_v23, 0.0 }
 0xa40   : > { %v3018_v14 = vadd.f32 %v3017_v16, %v3012_v43 }
 0xa42   : > { %3536 = vst [vmem:[%s5191_s21 + $0x38] sm:$0xff] %v3018_v14 }
 0xa43   : > { %3953 = shalt.err (!%p3950_p3)
}
 0xa44   : > { %3590 = dma.vmem_to_hbm [thread:$0]  (%p4147_p11), %s3044_s11, 1024, %s3046_s17, %s3022_s19, %s4014_s0, %s4015_s14, %s4016_s18  }
 0xa45 PF: > { %s5845_s20 = sld [smem:[#allocation20_spill]]  ;;  %p3601_p7 = pnand %p3291_p2, %p4151_p12 }
 0xa47   : > { %p3602_p8 = pneg %p3601_p7 }
 0xa4b   : > { %s3092_s16 = sand.u32 1, %s5845_s20  }
 0xa4c   : > { %s3093_s29 = scalar_lea.sflag [#allocation8], %s3092_s16 }
 0xa4d   : > { %3979 = dma.done.wait (%p3602_p8), %s3093_s29, 1024  }
 0xa4e   : > { %3981 = vsyncadd (%p3602_p8), %s3093_s29, 4294966272  ;;  %s5847_s10 = sadd.s32 4294967294, %s4000_s15  }
 0xa4f   : > { %s3102_s24 = sand.u32 1, %s5847_s10  }
 0xa50   : > { %s3103_s22 = scalar_lea.sflag [#allocation14], %s3102_s24 }
 0xa51   : > { %3983 = dma.done.wait (%p3602_p8), %s3103_s22, 1408  }
 0xa52   : > { %3985 = vsyncadd (%p3602_p8), %s3103_s22, 4294965888  ;;  %s5848_s15 = sld [smem:[#allocation22_spill]]  ;;  %s5851_s29 = smov %s3992_s30 }
 0xa53   : > { %s5849_s0 = sld [smem:[#allocation21_spill]] }
 0xa54   : > { %s5850_s14 = sld [smem:[#allocation23_spill]] }
 0xa58   : > { %p34_p11 = scmp.ge.s32.totalorder %s5848_s15, 4  }
 0xa59   : > { %s5852_s30 = smov %s5849_s0 }
 0xa5a   :  { %36 = sbr.rel (!%p34_p11) target bundleno = 14 (0xe), region = 278 }
 0xa5f   :  { %3119 = vsyncpa [#allocation7], 1 }
 0xa60   :  { %3121 = vsyncpa [#allocation7 + $0x1], 1 }
 0xa61   :  { %3122 = vsyncpa [#allocation11], 1 }
 0xa62   :  { %3123 = vsyncpa [#allocation8], 1 }
 0xa63   :  { %3125 = vsyncpa [#allocation8 + $0x1], 1 }
 0xa64   :  { %3126 = vsyncpa [#allocation14], 1 }
 0xa65   :  { %3128 = vsyncpa [#allocation14 + $0x1], 1 }

</bundles_post_ra>
